<compile_context>
chip_gen: v6e
topology: v6e:2x2x1
jax: 0.10.0
libtpu: 0.0.40
codegen_flags: <defaults>
</compile_context>

<pallas_src>
import functools

import jax
import jax.numpy as jnp
from jax.experimental import pallas as pl
from jax.experimental.pallas import tpu as pltpu


def round_up(x, m):
    return (x + m - 1) // m * m


# ----------------------------------------------------------------------------
# Pallas kernels
# ----------------------------------------------------------------------------
def mm_bias_kernel(a_ref, b_ref, shift_ref, o_ref, acc_ref, *, relu):
    """out = act(A @ B + shift); BN scale is pre-folded into B columns."""
    @pl.when(pl.program_id(2) == 0)
    def _():
        acc_ref[...] = jnp.zeros_like(acc_ref)

    acc_ref[...] += jnp.dot(a_ref[...], b_ref[...],
                            preferred_element_type=jnp.float32)

    @pl.when(pl.program_id(2) == pl.num_programs(2) - 1)
    def _():
        y = acc_ref[...] + shift_ref[...]
        if relu:
            y = jnp.maximum(y, 0.0)
        o_ref[...] = y.astype(o_ref.dtype)


def conv3x3_kernel(*refs, relu, add_res, th, Wo):
    """3x3 / stride 1 / pad 1 conv on one haloed row block (NHWC).

    The 9 tap-shifted MXU dots accumulate back-to-back into a f32 VMEM scratch
    tile; bias/BN-shift, optional residual add and ReLU are fused into the
    epilogue.
    """
    if add_res:
        x_ref, w_ref, shift_ref, res_ref, o_ref, acc_ref = refs
    else:
        x_ref, w_ref, shift_ref, o_ref, acc_ref = refs
        res_ref = None
    cin = x_ref.shape[-1]

    for t, (di, dj) in enumerate((i, j) for i in range(3) for j in range(3)):
        a = x_ref[0, 0, di:di + th, dj:dj + Wo, :].reshape(th * Wo, cin)
        contrib = jnp.dot(a, w_ref[t], preferred_element_type=jnp.float32)
        if t == 0:
            acc_ref[...] = contrib
        else:
            acc_ref[...] += contrib

    y = acc_ref[...] + shift_ref[...]
    if add_res:
        y = y + res_ref[0].astype(jnp.float32)
    if relu:
        y = jnp.maximum(y, 0.0)
    o_ref[0] = y.astype(o_ref.dtype)


# ----------------------------------------------------------------------------
# Pallas wrappers
# ----------------------------------------------------------------------------
def matmul_bias(a, b_p, shift_p, *, relu, out_dtype=jnp.bfloat16):
    """(M, K) @ (Kp, Np) + shift, optional ReLU.

    b_p / shift_p are prepped (BN scale folded, bf16, N optionally padded to
    128).  K is left unpadded whenever the full-extent block exception applies.
    """
    M, K = a.shape
    Kp, Np = b_p.shape

    Mp = round_up(M, 8)
    if Mp <= 512:
        tm = Mp
    else:
        tm = 0
        for cand in (512, 448, 384, 320, 256, 192, 128):
            if Mp % cand == 0:
                tm = cand
                break
        if tm == 0:
            tm = 256
            Mp = round_up(Mp, tm)
    if (Mp, Kp) != (M, K):
        a = jnp.pad(a, ((0, Mp - M), (0, Kp - K)))

    # K tile: largest multiple-of-128 divisor of Kp up to 3584 (FC: 7 steps
    # instead of 49); otherwise one full-extent K block (e.g. the K=64 shortcut).
    if Kp % 128 == 0:
        tk = 128
        for cand in range(min(Kp, 3584), 127, -128):
            if Kp % cand == 0:
                tk = cand
                break
    else:
        tk = Kp

    if Np % 256 == 0:
        tn = 256
    elif Np % 128 == 0:
        tn = 128
    else:
        tn = Np

    grid = (Mp // tm, Np // tn, Kp // tk)
    kernel = functools.partial(mm_bias_kernel, relu=relu)
    bytes_accessed = int(Mp * Kp * a.dtype.itemsize
                         + Kp * Np * b_p.dtype.itemsize
                         + Mp * Np * jnp.dtype(out_dtype).itemsize)
    out = pl.pallas_call(
        kernel,
        out_shape=jax.ShapeDtypeStruct((Mp, Np), out_dtype),
        grid_spec=pltpu.PrefetchScalarGridSpec(
            num_scalar_prefetch=0,
            grid=grid,
            in_specs=[
                pl.BlockSpec((tm, tk), lambda i, j, k: (i, k)),
                pl.BlockSpec((tk, tn), lambda i, j, k: (k, j)),
                pl.BlockSpec((1, tn), lambda i, j, k: (0, j)),
            ],
            out_specs=pl.BlockSpec((tm, tn), lambda i, j, k: (i, j)),
            scratch_shapes=[pltpu.VMEM((tm, tn), jnp.float32)],
        ),
        compiler_params=pltpu.CompilerParams(
            dimension_semantics=("parallel", "parallel", "arbitrary")),
        cost_estimate=pl.CostEstimate(flops=2 * Mp * Kp * Np,
                                      transcendentals=0,
                                      bytes_accessed=bytes_accessed),
    )(a, b_p, shift_p)
    if Mp != M:
        out = out[:M]
    return out


def conv3x3_bn(x, w9, shift, *, relu, residual=None):
    """3x3 s1 p1 conv + BN(+bias) + optional residual + optional ReLU.

    x: (N, H, W, Cin) bf16; w9: (9, Cin, Cout) bf16 with BN scale folded;
    shift: (1, Cout) f32; residual: (N, H, W, Cout) bf16 or None.
    """
    N, H, W, Cin = x.shape
    Cout = w9.shape[2]

    # Row-block size: largest divisor of H giving <= 512 output rows per grid
    # step, so the f32 accumulator tile stays small and the spatial grid axis
    # is parallel (keeps both v7x TensorCores busy at small batch).
    th = 1
    for cand in range(H, 0, -1):
        if H % cand == 0 and cand * W <= 512:
            th = cand
            break
    n_rb = H // th

    xp = jnp.pad(x, ((0, 0), (1, 1), (1, 1), (0, 0)))
    if n_rb == 1:
        xb = xp[:, None]
    else:
        # Haloed row-block layout (N, n_rb, th+2, W+2, Cin); XLA fuses this
        # with the pad above into a single pass over the activation.
        # TODO(synk): could be removed by keeping activations stored pre-padded
        # between convs or by in-kernel manual halo DMA.
        xb = jnp.stack([xp[:, r * th:r * th + th + 2] for r in range(n_rb)],
                       axis=1)

    Hb, Wp = th + 2, W + 2
    tco = 256 if (Cout % 256 == 0 and Cout > 256) else Cout
    n_co = Cout // tco
    add_res = residual is not None
    rows = th * W

    kernel = functools.partial(conv3x3_kernel, relu=relu, add_res=add_res,
                               th=th, Wo=W)
    in_specs = [
        pl.BlockSpec((1, 1, Hb, Wp, Cin), lambda co, n, rb: (n, rb, 0, 0, 0)),
        pl.BlockSpec((9, Cin, tco), lambda co, n, rb: (0, 0, co)),
        pl.BlockSpec((1, tco), lambda co, n, rb: (0, co)),
    ]
    args = [xb, w9, shift]
    if add_res:
        in_specs.append(pl.BlockSpec((1, rows, tco),
                                     lambda co, n, rb: (n, rb, co)))
        args.append(residual.reshape(N, H * W, Cout))

    flops = 2 * N * H * W * 9 * Cin * Cout
    bytes_accessed = int(n_co * xb.size * xb.dtype.itemsize
                         + w9.size * w9.dtype.itemsize
                         + (2 if add_res else 1) * N * H * W * Cout * 2)
    out = pl.pallas_call(
        kernel,
        out_shape=jax.ShapeDtypeStruct((N, H * W, Cout), jnp.bfloat16),
        grid_spec=pltpu.PrefetchScalarGridSpec(
            num_scalar_prefetch=0,
            # co outermost so the (9, Cin, tco) weight block stays resident
            # across the (image, row-block) axes.
            grid=(n_co, N, n_rb),
            in_specs=in_specs,
            out_specs=pl.BlockSpec((1, rows, tco),
                                   lambda co, n, rb: (n, rb, co)),
            scratch_shapes=[pltpu.VMEM((rows, tco), jnp.float32)],
        ),
        compiler_params=pltpu.CompilerParams(
            dimension_semantics=("parallel", "parallel", "parallel"),
            vmem_limit_bytes=32 * 1024 * 1024),
        cost_estimate=pl.CostEstimate(flops=flops, transcendentals=0,
                                      bytes_accessed=bytes_accessed),
    )(*args)
    return out.reshape(N, H, W, Cout)


# ----------------------------------------------------------------------------
# Non-conv glue (XLA): init-conv patch extraction, pooling
# ----------------------------------------------------------------------------
def im2col_nhwc(x, kh, kw, stride, pad):
    """Patch extraction for the 7x7 s2 stem only (tiny Cin)."""
    N, H, W, C = x.shape
    xp = jnp.pad(x, ((0, 0), (pad, pad), (pad, pad), (0, 0)))
    Ho = (H + 2 * pad - kh) // stride + 1
    Wo = (W + 2 * pad - kw) // stride + 1
    cols = []
    for i in range(kh):
        for j in range(kw):
            cols.append(xp[:, i:i + stride * (Ho - 1) + 1:stride,
                            j:j + stride * (Wo - 1) + 1:stride, :])
    col = jnp.stack(cols, axis=3)                       # (N, Ho, Wo, kh*kw, C)
    return col.reshape(N * Ho * Wo, kh * kw * C), Ho, Wo


def maxpool_3x3_s2_p1_nhwc(x):
    return jax.lax.reduce_window(
        x, jnp.array(-jnp.inf, x.dtype), jax.lax.max,
        (1, 3, 3, 1), (1, 2, 2, 1), ((0, 0), (1, 1), (1, 1), (0, 0)))


def _adaptive_windows(in_size, out_size):
    starts = [(i * in_size) // out_size for i in range(out_size)]
    ends = [-((-(i + 1) * in_size) // out_size) for i in range(out_size)]
    return starts, [e - s for s, e in zip(starts, ends)]


def adaptive_avg_pool_nhwc(x, out_h, out_w):
    N, H, W, C = x.shape
    hs, hsz = _adaptive_windows(H, out_h)
    ws, wsz = _adaptive_windows(W, out_w)
    xf = x.astype(jnp.float32)

    def uniform(starts, sizes, out):
        if len(set(sizes)) != 1:
            return None
        if out == 1:
            return sizes[0], 1
        strides = {starts[i + 1] - starts[i] for i in range(out - 1)}
        if len(strides) != 1:
            return None
        return sizes[0], strides.pop()

    uh = uniform(hs, hsz, out_h)
    uw = uniform(ws, wsz, out_w)
    if uh is not None and uw is not None:
        (kh, sh), (kw, sw) = uh, uw
        s = jax.lax.reduce_window(xf, jnp.array(0.0, jnp.float32), jax.lax.add,
                                  (1, kh, kw, 1), (1, sh, sw, 1), "VALID")
        return s * (1.0 / (kh * kw))
    rows = []
    for i in range(out_h):
        cols = []
        for j in range(out_w):
            cols.append(jnp.mean(
                xf[:, hs[i]:hs[i] + hsz[i], ws[j]:ws[j] + wsz[j], :],
                axis=(1, 2)))
        rows.append(jnp.stack(cols, axis=1))
    return jnp.stack(rows, axis=1)


# ----------------------------------------------------------------------------
# Parameters (PyTorch-like) and one-time prep (outside the forward path)
# ----------------------------------------------------------------------------
def bn_params(c):
    return dict(gamma=jnp.ones((c,), jnp.float32),
                beta=jnp.zeros((c,), jnp.float32),
                mean=jnp.zeros((c,), jnp.float32),
                var=jnp.ones((c,), jnp.float32))


def conv_params(key, cout, cin, kh, kw):
    w = jax.random.normal(key, (cout, cin, kh, kw), jnp.float32) * 0.05
    b = jnp.zeros((cout,), jnp.float32)
    return w, b


def resblock_params(key, cin, cout):
    keys = jax.random.split(key, 3)
    p = {}
    p["conv1_w"], p["conv1_b"] = conv_params(keys[0], cout, cin, 3, 3)
    p["bn1"] = bn_params(cout)
    p["conv2_w"], p["conv2_b"] = conv_params(keys[1], cout, cout, 3, 3)
    p["bn2"] = bn_params(cout)
    if cin != cout:
        p["sc_w"], p["sc_b"] = conv_params(keys[2], cout, cin, 1, 1)
        p["bn_sc"] = bn_params(cout)
    return p


def init_params(key, in_channels, num_classes):
    keys = jax.random.split(key, 6)
    params = {}
    params["init_w"], params["init_b"] = conv_params(keys[0], 64, in_channels,
                                                     7, 7)
    params["init_bn"] = bn_params(64)
    params["layer1"] = resblock_params(keys[1], 64, 64)
    params["layer2"] = resblock_params(keys[2], 64, 128)
    params["layer3"] = resblock_params(keys[3], 128, 256)
    params["layer4"] = resblock_params(keys[4], 256, 512)
    params["fc_w"] = jax.random.normal(keys[5], (num_classes, 512 * 7 * 7),
                                       jnp.float32) * 0.01
    params["fc_b"] = jnp.zeros((num_classes,), jnp.float32)
    return params


def fold_bn(bias, bn, eps=1e-5):
    scale = bn["gamma"] / jnp.sqrt(bn["var"] + eps)
    shift = bn["beta"] + (bias - bn["mean"]) * scale
    return scale, shift


def prep_gemm_weight(w_mat, scale, shift, pad_n=True):
    """(K, N) -> bf16 weight with BN scale folded + (1, Np) f32 shift.

    K is left unpadded when the full-extent block exception applies (so the
    activation side needs no runtime pad pass, e.g. the K=64 shortcut).
    """
    K, N = w_mat.shape
    Kp = K if K % 16 == 0 else round_up(K, 128)
    Np = round_up(N, 128) if pad_n else N
    w_mat = w_mat * scale[None, :]
    w_mat = jnp.pad(w_mat, ((0, Kp - K), (0, Np - N)))
    shift_p = jnp.pad(shift.reshape(1, N), ((0, 0), (0, Np - N)))
    return w_mat.astype(jnp.bfloat16), shift_p.astype(jnp.float32)


def prep_conv3x3(w, b, bn):
    scale, shift = fold_bn(b, bn)
    cout, cin = w.shape[0], w.shape[1]
    w9 = jnp.transpose(w, (2, 3, 1, 0)).reshape(9, cin, cout) * scale[None, None, :]
    return w9.astype(jnp.bfloat16), shift.reshape(1, cout).astype(jnp.float32)


def prepare_params(params):
    pp = {}
    cin = params["init_w"].shape[1]
    w0 = jnp.transpose(params["init_w"], (2, 3, 1, 0)).reshape(49 * cin, 64)
    s0, sh0 = fold_bn(params["init_b"], params["init_bn"])
    # Stem keeps Np=64 (no 64->128 output pad + slice over the stem activation).
    w0p, sh0p = prep_gemm_weight(w0, s0, sh0, pad_n=False)
    pp["init"] = {"w": w0p, "shift": sh0p}
    for name in ("layer1", "layer2", "layer3", "layer4"):
        p = params[name]
        q = {}
        q["w1"], q["shift1"] = prep_conv3x3(p["conv1_w"], p["conv1_b"], p["bn1"])
        q["w2"], q["shift2"] = prep_conv3x3(p["conv2_w"], p["conv2_b"], p["bn2"])
        if "sc_w" in p:
            cout, c_in = p["sc_w"].shape[0], p["sc_w"].shape[1]
            w_sc = p["sc_w"].reshape(cout, c_in).T
            s, sh = fold_bn(p["sc_b"], p["bn_sc"])
            q["w_sc"], q["shift_sc"] = prep_gemm_weight(w_sc, s, sh)
        pp[name] = q
    s_fc = jnp.ones((params["fc_w"].shape[0],), jnp.float32)
    wf, shf = prep_gemm_weight(params["fc_w"].T, s_fc, params["fc_b"])
    pp["fc"] = {"w": wf, "shift": shf}
    return pp


# ----------------------------------------------------------------------------
# Forward pass
# ----------------------------------------------------------------------------
def resblock_forward(x, p):
    N, H, W, Cin = x.shape
    Cout = p["w1"].shape[2]
    out = conv3x3_bn(x, p["w1"], p["shift1"], relu=True)
    if "w_sc" in p:
        a = x.reshape(N * H * W, Cin)
        identity = matmul_bias(a, p["w_sc"], p["shift_sc"], relu=False)
        identity = identity.reshape(N, H, W, Cout)     # Np == Cout here
    else:
        identity = x
    # Residual add + final ReLU fused into conv2's epilogue.
    return conv3x3_bn(out, p["w2"], p["shift2"], relu=True, residual=identity)


def resnet_forward(x, pp, num_classes):
    N = x.shape[0]
    # NCHW -> NHWC once at the module boundary; bf16 activations internally.
    x = jnp.transpose(x, (0, 2, 3, 1)).astype(jnp.bfloat16)

    # Stem: Conv 7x7 s2 p3 + BN + ReLU (Pallas GEMM), then MaxPool 3x3 s2 p1.
    a, Ho, Wo = im2col_nhwc(x, 7, 7, stride=2, pad=3)
    c0 = pp["init"]["w"].shape[1]                      # stem output channels (64)
    out = matmul_bias(a, pp["init"]["w"], pp["init"]["shift"], relu=True)
    out = out.reshape(N, Ho, Wo, c0)
    out = maxpool_3x3_s2_p1_nhwc(out)

    out = resblock_forward(out, pp["layer1"])
    out = resblock_forward(out, pp["layer2"])
    out = resblock_forward(out, pp["layer3"])
    out = resblock_forward(out, pp["layer4"])

    out = adaptive_avg_pool_nhwc(out, 7, 7)            # (N, 7, 7, C) f32
    # Match PyTorch .view(N, -1) which flattens in NCHW order.
    feat = jnp.transpose(out, (0, 3, 1, 2)).reshape(N, -1)
    logits = matmul_bias(feat.astype(jnp.bfloat16), pp["fc"]["w"],
                         pp["fc"]["shift"], relu=False, out_dtype=jnp.float32)
    return logits[:, :num_classes]


# ----------------------------------------------------------------------------
# Self-checks / demo
# ----------------------------------------------------------------------------
def _check_conv3x3():
    """Exercises the spatially-tiled (n_rb > 1) conv path vs. an XLA reference."""
    k1, k2, k3 = jax.random.split(jax.random.PRNGKey(1), 3)
    cin = cout = 64
    x = jax.random.normal(k1, (1, 32, 32, cin), jnp.float32)
    w_hwio = jax.random.normal(k2, (3, 3, cin, cout), jnp.float32) * 0.05
    b = jax.random.normal(k3, (cout,), jnp.float32) * 0.1

    xb = x.astype(jnp.bfloat16)
    wb = w_hwio.astype(jnp.bfloat16)
    out = conv3x3_bn(xb, wb.reshape(9, cin, cout),
                     b.reshape(1, cout), relu=True)

    ref = jax.lax.conv_general_dilated(
        xb.astype(jnp.float32), wb.astype(jnp.float32), (1, 1), "SAME",
        dimension_numbers=("NHWC", "HWIO", "NHWC"))
    ref = jnp.maximum(ref + b, 0.0)
    err = float(jnp.max(jnp.abs(out.astype(jnp.float32) - ref)))
    assert err < 0.15, f"conv3x3 mismatch: max abs err = {err}"


if __name__ == "__main__":
    _check_conv3x3()

    in_channels = 3
    num_classes = 10
    x = jax.random.normal(jax.random.PRNGKey(0), (2, in_channels, 32, 32),
                          jnp.float32)
    params = init_params(jax.random.PRNGKey(42), in_channels, num_classes)
    pp = prepare_params(params)     # one-time weight prep, outside the fwd path

    fwd = jax.jit(functools.partial(resnet_forward, num_classes=num_classes))
    out = jax.block_until_ready(fwd(x, pp))
    assert out.shape == (2, num_classes), out.shape
    assert bool(jnp.all(jnp.isfinite(out)))
    print("KERNEL_OK")
</pallas_src>

<mosaic_0001>
module attributes {stable_mosaic.version = 11 : i64} {
  func.func @conv3x3_kernel(%arg0: i32, %arg1: i32, %arg2: i32, %arg3: memref<1x1x18x34x64xbf16, #tpu.memory_space<vmem>>, %arg4: memref<9x64x64xbf16, #tpu.memory_space<vmem>>, %arg5: memref<1x64xf32, #tpu.memory_space<vmem>>, %arg6: memref<1x512x64xbf16, #tpu.memory_space<vmem>>, %arg7: memref<512x64xf32, #tpu.memory_space<vmem>>) attributes {dimension_semantics = [#tpu.dimension_semantics<parallel>, #tpu.dimension_semantics<parallel>, #tpu.dimension_semantics<parallel>], iteration_bounds = array<i64: 1, 1, 2>, scalar_prefetch = 0 : i64, scratch_operands = 1 : i64, tpu.core_type = #tpu.core_type<tc>, window_params = [{transform_indices = @transform_0, window_bounds = array<i64: 1, 1, 18, 34, 64>}, {transform_indices = @transform_1, window_bounds = array<i64: 9, 64, 64>}, {transform_indices = @transform_2, window_bounds = array<i64: 1, 64>}, {transform_indices = @transform_3, window_bounds = array<i64: 1, 512, 64>}]} {
    %c0 = arith.constant 0 : index
    %c0_0 = arith.constant 0 : index
    %c0_1 = arith.constant 0 : index
    %c0_2 = arith.constant 0 : index
    %c0_3 = arith.constant 0 : index
    %0 = vector.load %arg3[%c0, %c0_0, %c0_1, %c0_2, %c0_3] : memref<1x1x18x34x64xbf16, #tpu.memory_space<vmem>>, vector<1x1x16x32x64xbf16>
    %1 = vector.shape_cast %0 : vector<1x1x16x32x64xbf16> to vector<16x32x64xbf16>
    %2 = vector.shape_cast %1 : vector<16x32x64xbf16> to vector<512x64xbf16>
    %c0_4 = arith.constant 0 : index
    %c0_5 = arith.constant 0 : index
    %c0_6 = arith.constant 0 : index
    %3 = vector.load %arg4[%c0_4, %c0_5, %c0_6] : memref<9x64x64xbf16, #tpu.memory_space<vmem>>, vector<1x64x64xbf16>
    %4 = vector.shape_cast %3 : vector<1x64x64xbf16> to vector<64x64xbf16>
    %cst = arith.constant dense<0.000000e+00> : vector<512x64xf32>
    %5 = tpu.matmul %2, %4, %cst {dimension_numbers = #tpu.dot_dimension_numbers<[1], [0], [0], [1], [0, 0, 1, 1], [], []>} : vector<512x64xbf16>, vector<64x64xbf16>, vector<512x64xf32> -> vector<512x64xf32>
    %c0_7 = arith.constant 0 : index
    %c0_8 = arith.constant 0 : index
    %6 = vector.load %arg7[%c0_7, %c0_8] : memref<512x64xf32, #tpu.memory_space<vmem>>, vector<512x64xf32>
    tpu.vector_store %arg7[%c0_7, %c0_8], %5 {strides = array<i32>} : memref<512x64xf32, #tpu.memory_space<vmem>>, vector<512x64xf32>,
    %c0_9 = arith.constant 0 : index
    %c0_10 = arith.constant 0 : index
    %c0_11 = arith.constant 0 : index
    %c1 = arith.constant 1 : index
    %c0_12 = arith.constant 0 : index
    %7 = vector.load %arg3[%c0_9, %c0_10, %c0_11, %c1, %c0_12] : memref<1x1x18x34x64xbf16, #tpu.memory_space<vmem>>, vector<1x1x16x32x64xbf16>
    %8 = vector.shape_cast %7 : vector<1x1x16x32x64xbf16> to vector<16x32x64xbf16>
    %9 = vector.shape_cast %8 : vector<16x32x64xbf16> to vector<512x64xbf16>
    %c1_13 = arith.constant 1 : index
    %c0_14 = arith.constant 0 : index
    %c0_15 = arith.constant 0 : index
    %10 = vector.load %arg4[%c1_13, %c0_14, %c0_15] : memref<9x64x64xbf16, #tpu.memory_space<vmem>>, vector<1x64x64xbf16>
    %11 = vector.shape_cast %10 : vector<1x64x64xbf16> to vector<64x64xbf16>
    %cst_16 = arith.constant dense<0.000000e+00> : vector<512x64xf32>
    %12 = tpu.matmul %9, %11, %cst_16 {dimension_numbers = #tpu.dot_dimension_numbers<[1], [0], [0], [1], [0, 0, 1, 1], [], []>} : vector<512x64xbf16>, vector<64x64xbf16>, vector<512x64xf32> -> vector<512x64xf32>
    %c0_17 = arith.constant 0 : index
    %c0_18 = arith.constant 0 : index
    %13 = vector.load %arg7[%c0_17, %c0_18] : memref<512x64xf32, #tpu.memory_space<vmem>>, vector<512x64xf32>
    %14 = arith.addf %13, %12 : vector<512x64xf32>
    %c0_19 = arith.constant 0 : index
    %c0_20 = arith.constant 0 : index
    %15 = vector.load %arg7[%c0_19, %c0_20] : memref<512x64xf32, #tpu.memory_space<vmem>>, vector<512x64xf32>
    tpu.vector_store %arg7[%c0_19, %c0_20], %14 {strides = array<i32>} : memref<512x64xf32, #tpu.memory_space<vmem>>, vector<512x64xf32>,
    %c0_21 = arith.constant 0 : index
    %c0_22 = arith.constant 0 : index
    %c0_23 = arith.constant 0 : index
    %c2 = arith.constant 2 : index
    %c0_24 = arith.constant 0 : index
    %16 = vector.load %arg3[%c0_21, %c0_22, %c0_23, %c2, %c0_24] : memref<1x1x18x34x64xbf16, #tpu.memory_space<vmem>>, vector<1x1x16x32x64xbf16>
    %17 = vector.shape_cast %16 : vector<1x1x16x32x64xbf16> to vector<16x32x64xbf16>
    %18 = vector.shape_cast %17 : vector<16x32x64xbf16> to vector<512x64xbf16>
    %c2_25 = arith.constant 2 : index
    %c0_26 = arith.constant 0 : index
    %c0_27 = arith.constant 0 : index
    %19 = vector.load %arg4[%c2_25, %c0_26, %c0_27] : memref<9x64x64xbf16, #tpu.memory_space<vmem>>, vector<1x64x64xbf16>
    %20 = vector.shape_cast %19 : vector<1x64x64xbf16> to vector<64x64xbf16>
    %cst_28 = arith.constant dense<0.000000e+00> : vector<512x64xf32>
    %21 = tpu.matmul %18, %20, %cst_28 {dimension_numbers = #tpu.dot_dimension_numbers<[1], [0], [0], [1], [0, 0, 1, 1], [], []>} : vector<512x64xbf16>, vector<64x64xbf16>, vector<512x64xf32> -> vector<512x64xf32>
    %c0_29 = arith.constant 0 : index
    %c0_30 = arith.constant 0 : index
    %22 = vector.load %arg7[%c0_29, %c0_30] : memref<512x64xf32, #tpu.memory_space<vmem>>, vector<512x64xf32>
    %23 = arith.addf %22, %21 : vector<512x64xf32>
    %c0_31 = arith.constant 0 : index
    %c0_32 = arith.constant 0 : index
    %24 = vector.load %arg7[%c0_31, %c0_32] : memref<512x64xf32, #tpu.memory_space<vmem>>, vector<512x64xf32>
    tpu.vector_store %arg7[%c0_31, %c0_32], %23 {strides = array<i32>} : memref<512x64xf32, #tpu.memory_space<vmem>>, vector<512x64xf32>,
    %c0_33 = arith.constant 0 : index
    %c0_34 = arith.constant 0 : index
    %c1_35 = arith.constant 1 : index
    %c0_36 = arith.constant 0 : index
    %c0_37 = arith.constant 0 : index
    %25 = vector.load %arg3[%c0_33, %c0_34, %c1_35, %c0_36, %c0_37] : memref<1x1x18x34x64xbf16, #tpu.memory_space<vmem>>, vector<1x1x16x32x64xbf16>
    %26 = vector.shape_cast %25 : vector<1x1x16x32x64xbf16> to vector<16x32x64xbf16>
    %27 = vector.shape_cast %26 : vector<16x32x64xbf16> to vector<512x64xbf16>
    %c3 = arith.constant 3 : index
    %c0_38 = arith.constant 0 : index
    %c0_39 = arith.constant 0 : index
    %28 = vector.load %arg4[%c3, %c0_38, %c0_39] : memref<9x64x64xbf16, #tpu.memory_space<vmem>>, vector<1x64x64xbf16>
    %29 = vector.shape_cast %28 : vector<1x64x64xbf16> to vector<64x64xbf16>
    %cst_40 = arith.constant dense<0.000000e+00> : vector<512x64xf32>
    %30 = tpu.matmul %27, %29, %cst_40 {dimension_numbers = #tpu.dot_dimension_numbers<[1], [0], [0], [1], [0, 0, 1, 1], [], []>} : vector<512x64xbf16>, vector<64x64xbf16>, vector<512x64xf32> -> vector<512x64xf32>
    %c0_41 = arith.constant 0 : index
    %c0_42 = arith.constant 0 : index
    %31 = vector.load %arg7[%c0_41, %c0_42] : memref<512x64xf32, #tpu.memory_space<vmem>>, vector<512x64xf32>
    %32 = arith.addf %31, %30 : vector<512x64xf32>
    %c0_43 = arith.constant 0 : index
    %c0_44 = arith.constant 0 : index
    %33 = vector.load %arg7[%c0_43, %c0_44] : memref<512x64xf32, #tpu.memory_space<vmem>>, vector<512x64xf32>
    tpu.vector_store %arg7[%c0_43, %c0_44], %32 {strides = array<i32>} : memref<512x64xf32, #tpu.memory_space<vmem>>, vector<512x64xf32>,
    %c0_45 = arith.constant 0 : index
    %c0_46 = arith.constant 0 : index
    %c1_47 = arith.constant 1 : index
    %c1_48 = arith.constant 1 : index
    %c0_49 = arith.constant 0 : index
    %34 = vector.load %arg3[%c0_45, %c0_46, %c1_47, %c1_48, %c0_49] : memref<1x1x18x34x64xbf16, #tpu.memory_space<vmem>>, vector<1x1x16x32x64xbf16>
    %35 = vector.shape_cast %34 : vector<1x1x16x32x64xbf16> to vector<16x32x64xbf16>
    %36 = vector.shape_cast %35 : vector<16x32x64xbf16> to vector<512x64xbf16>
    %c4 = arith.constant 4 : index
    %c0_50 = arith.constant 0 : index
    %c0_51 = arith.constant 0 : index
    %37 = vector.load %arg4[%c4, %c0_50, %c0_51] : memref<9x64x64xbf16, #tpu.memory_space<vmem>>, vector<1x64x64xbf16>
    %38 = vector.shape_cast %37 : vector<1x64x64xbf16> to vector<64x64xbf16>
    %cst_52 = arith.constant dense<0.000000e+00> : vector<512x64xf32>
    %39 = tpu.matmul %36, %38, %cst_52 {dimension_numbers = #tpu.dot_dimension_numbers<[1], [0], [0], [1], [0, 0, 1, 1], [], []>} : vector<512x64xbf16>, vector<64x64xbf16>, vector<512x64xf32> -> vector<512x64xf32>
    %c0_53 = arith.constant 0 : index
    %c0_54 = arith.constant 0 : index
    %40 = vector.load %arg7[%c0_53, %c0_54] : memref<512x64xf32, #tpu.memory_space<vmem>>, vector<512x64xf32>
    %41 = arith.addf %40, %39 : vector<512x64xf32>
    %c0_55 = arith.constant 0 : index
    %c0_56 = arith.constant 0 : index
    %42 = vector.load %arg7[%c0_55, %c0_56] : memref<512x64xf32, #tpu.memory_space<vmem>>, vector<512x64xf32>
    tpu.vector_store %arg7[%c0_55, %c0_56], %41 {strides = array<i32>} : memref<512x64xf32, #tpu.memory_space<vmem>>, vector<512x64xf32>,
    %c0_57 = arith.constant 0 : index
    %c0_58 = arith.constant 0 : index
    %c1_59 = arith.constant 1 : index
    %c2_60 = arith.constant 2 : index
    %c0_61 = arith.constant 0 : index
    %43 = vector.load %arg3[%c0_57, %c0_58, %c1_59, %c2_60, %c0_61] : memref<1x1x18x34x64xbf16, #tpu.memory_space<vmem>>, vector<1x1x16x32x64xbf16>
    %44 = vector.shape_cast %43 : vector<1x1x16x32x64xbf16> to vector<16x32x64xbf16>
    %45 = vector.shape_cast %44 : vector<16x32x64xbf16> to vector<512x64xbf16>
    %c5 = arith.constant 5 : index
    %c0_62 = arith.constant 0 : index
    %c0_63 = arith.constant 0 : index
    %46 = vector.load %arg4[%c5, %c0_62, %c0_63] : memref<9x64x64xbf16, #tpu.memory_space<vmem>>, vector<1x64x64xbf16>
    %47 = vector.shape_cast %46 : vector<1x64x64xbf16> to vector<64x64xbf16>
    %cst_64 = arith.constant dense<0.000000e+00> : vector<512x64xf32>
    %48 = tpu.matmul %45, %47, %cst_64 {dimension_numbers = #tpu.dot_dimension_numbers<[1], [0], [0], [1], [0, 0, 1, 1], [], []>} : vector<512x64xbf16>, vector<64x64xbf16>, vector<512x64xf32> -> vector<512x64xf32>
    %c0_65 = arith.constant 0 : index
    %c0_66 = arith.constant 0 : index
    %49 = vector.load %arg7[%c0_65, %c0_66] : memref<512x64xf32, #tpu.memory_space<vmem>>, vector<512x64xf32>
    %50 = arith.addf %49, %48 : vector<512x64xf32>
    %c0_67 = arith.constant 0 : index
    %c0_68 = arith.constant 0 : index
    %51 = vector.load %arg7[%c0_67, %c0_68] : memref<512x64xf32, #tpu.memory_space<vmem>>, vector<512x64xf32>
    tpu.vector_store %arg7[%c0_67, %c0_68], %50 {strides = array<i32>} : memref<512x64xf32, #tpu.memory_space<vmem>>, vector<512x64xf32>,
    %c0_69 = arith.constant 0 : index
    %c0_70 = arith.constant 0 : index
    %c2_71 = arith.constant 2 : index
    %c0_72 = arith.constant 0 : index
    %c0_73 = arith.constant 0 : index
    %52 = vector.load %arg3[%c0_69, %c0_70, %c2_71, %c0_72, %c0_73] : memref<1x1x18x34x64xbf16, #tpu.memory_space<vmem>>, vector<1x1x16x32x64xbf16>
    %53 = vector.shape_cast %52 : vector<1x1x16x32x64xbf16> to vector<16x32x64xbf16>
    %54 = vector.shape_cast %53 : vector<16x32x64xbf16> to vector<512x64xbf16>
    %c6 = arith.constant 6 : index
    %c0_74 = arith.constant 0 : index
    %c0_75 = arith.constant 0 : index
    %55 = vector.load %arg4[%c6, %c0_74, %c0_75] : memref<9x64x64xbf16, #tpu.memory_space<vmem>>, vector<1x64x64xbf16>
    %56 = vector.shape_cast %55 : vector<1x64x64xbf16> to vector<64x64xbf16>
    %cst_76 = arith.constant dense<0.000000e+00> : vector<512x64xf32>
    %57 = tpu.matmul %54, %56, %cst_76 {dimension_numbers = #tpu.dot_dimension_numbers<[1], [0], [0], [1], [0, 0, 1, 1], [], []>} : vector<512x64xbf16>, vector<64x64xbf16>, vector<512x64xf32> -> vector<512x64xf32>
    %c0_77 = arith.constant 0 : index
    %c0_78 = arith.constant 0 : index
    %58 = vector.load %arg7[%c0_77, %c0_78] : memref<512x64xf32, #tpu.memory_space<vmem>>, vector<512x64xf32>
    %59 = arith.addf %58, %57 : vector<512x64xf32>
    %c0_79 = arith.constant 0 : index
    %c0_80 = arith.constant 0 : index
    %60 = vector.load %arg7[%c0_79, %c0_80] : memref<512x64xf32, #tpu.memory_space<vmem>>, vector<512x64xf32>
    tpu.vector_store %arg7[%c0_79, %c0_80], %59 {strides = array<i32>} : memref<512x64xf32, #tpu.memory_space<vmem>>, vector<512x64xf32>,
    %c0_81 = arith.constant 0 : index
    %c0_82 = arith.constant 0 : index
    %c2_83 = arith.constant 2 : index
    %c1_84 = arith.constant 1 : index
    %c0_85 = arith.constant 0 : index
    %61 = vector.load %arg3[%c0_81, %c0_82, %c2_83, %c1_84, %c0_85] : memref<1x1x18x34x64xbf16, #tpu.memory_space<vmem>>, vector<1x1x16x32x64xbf16>
    %62 = vector.shape_cast %61 : vector<1x1x16x32x64xbf16> to vector<16x32x64xbf16>
    %63 = vector.shape_cast %62 : vector<16x32x64xbf16> to vector<512x64xbf16>
    %c7 = arith.constant 7 : index
    %c0_86 = arith.constant 0 : index
    %c0_87 = arith.constant 0 : index
    %64 = vector.load %arg4[%c7, %c0_86, %c0_87] : memref<9x64x64xbf16, #tpu.memory_space<vmem>>, vector<1x64x64xbf16>
    %65 = vector.shape_cast %64 : vector<1x64x64xbf16> to vector<64x64xbf16>
    %cst_88 = arith.constant dense<0.000000e+00> : vector<512x64xf32>
    %66 = tpu.matmul %63, %65, %cst_88 {dimension_numbers = #tpu.dot_dimension_numbers<[1], [0], [0], [1], [0, 0, 1, 1], [], []>} : vector<512x64xbf16>, vector<64x64xbf16>, vector<512x64xf32> -> vector<512x64xf32>
    %c0_89 = arith.constant 0 : index
    %c0_90 = arith.constant 0 : index
    %67 = vector.load %arg7[%c0_89, %c0_90] : memref<512x64xf32, #tpu.memory_space<vmem>>, vector<512x64xf32>
    %68 = arith.addf %67, %66 : vector<512x64xf32>
    %c0_91 = arith.constant 0 : index
    %c0_92 = arith.constant 0 : index
    %69 = vector.load %arg7[%c0_91, %c0_92] : memref<512x64xf32, #tpu.memory_space<vmem>>, vector<512x64xf32>
    tpu.vector_store %arg7[%c0_91, %c0_92], %68 {strides = array<i32>} : memref<512x64xf32, #tpu.memory_space<vmem>>, vector<512x64xf32>,
    %c0_93 = arith.constant 0 : index
    %c0_94 = arith.constant 0 : index
    %c2_95 = arith.constant 2 : index
    %c2_96 = arith.constant 2 : index
    %c0_97 = arith.constant 0 : index
    %70 = vector.load %arg3[%c0_93, %c0_94, %c2_95, %c2_96, %c0_97] : memref<1x1x18x34x64xbf16, #tpu.memory_space<vmem>>, vector<1x1x16x32x64xbf16>
    %71 = vector.shape_cast %70 : vector<1x1x16x32x64xbf16> to vector<16x32x64xbf16>
    %72 = vector.shape_cast %71 : vector<16x32x64xbf16> to vector<512x64xbf16>
    %c8 = arith.constant 8 : index
    %c0_98 = arith.constant 0 : index
    %c0_99 = arith.constant 0 : index
    %73 = vector.load %arg4[%c8, %c0_98, %c0_99] : memref<9x64x64xbf16, #tpu.memory_space<vmem>>, vector<1x64x64xbf16>
    %74 = vector.shape_cast %73 : vector<1x64x64xbf16> to vector<64x64xbf16>
    %cst_100 = arith.constant dense<0.000000e+00> : vector<512x64xf32>
    %75 = tpu.matmul %72, %74, %cst_100 {dimension_numbers = #tpu.dot_dimension_numbers<[1], [0], [0], [1], [0, 0, 1, 1], [], []>} : vector<512x64xbf16>, vector<64x64xbf16>, vector<512x64xf32> -> vector<512x64xf32>
    %c0_101 = arith.constant 0 : index
    %c0_102 = arith.constant 0 : index
    %76 = vector.load %arg7[%c0_101, %c0_102] : memref<512x64xf32, #tpu.memory_space<vmem>>, vector<512x64xf32>
    %77 = arith.addf %76, %75 : vector<512x64xf32>
    %c0_103 = arith.constant 0 : index
    %c0_104 = arith.constant 0 : index
    %78 = vector.load %arg7[%c0_103, %c0_104] : memref<512x64xf32, #tpu.memory_space<vmem>>, vector<512x64xf32>
    tpu.vector_store %arg7[%c0_103, %c0_104], %77 {strides = array<i32>} : memref<512x64xf32, #tpu.memory_space<vmem>>, vector<512x64xf32>,
    %c0_105 = arith.constant 0 : index
    %c0_106 = arith.constant 0 : index
    %79 = vector.load %arg7[%c0_105, %c0_106] : memref<512x64xf32, #tpu.memory_space<vmem>>, vector<512x64xf32>
    %c0_107 = arith.constant 0 : index
    %c0_108 = arith.constant 0 : index
    %80 = vector.load %arg5[%c0_107, %c0_108] : memref<1x64xf32, #tpu.memory_space<vmem>>, vector<1x64xf32>
    %81 = vector.broadcast %80 : vector<1x64xf32> to vector<512x64xf32>
    %82 = arith.addf %79, %81 : vector<512x64xf32>
    %cst_109 = arith.constant 0.000000e+00 : f32
    %83 = vector.broadcast %cst_109 : f32 to vector<512x64xf32>
    %84 = arith.maximumf %82, %83 : vector<512x64xf32>
    %85 = arith.truncf %84 : vector<512x64xf32> to vector<512x64xbf16>
    %c0_110 = arith.constant 0 : index
    %c0_111 = arith.constant 0 : index
    %c0_112 = arith.constant 0 : index
    %86 = vector.load %arg6[%c0_110, %c0_111, %c0_112] : memref<1x512x64xbf16, #tpu.memory_space<vmem>>, vector<1x512x64xbf16>
    %87 = vector.shape_cast %86 : vector<1x512x64xbf16> to vector<512x64xbf16>
    %88 = vector.shape_cast %85 : vector<512x64xbf16> to vector<1x512x64xbf16>
    tpu.vector_store %arg6[%c0_110, %c0_111, %c0_112], %88 {strides = array<i32>} : memref<1x512x64xbf16, #tpu.memory_space<vmem>>, vector<1x512x64xbf16>,
    return
  }
  func.func @transform_0(%arg0: i32, %arg1: i32, %arg2: i32) -> (i32, i32, i32, i32, i32) {
    %c0_i32 = arith.constant 0 : i32
    %c0_i32_0 = arith.constant 0 : i32
    %c0_i32_1 = arith.constant 0 : i32
    %c0_i32_2 = arith.constant 0 : i32
    return %arg1, %arg2, %c0_i32, %c0_i32_0, %c0_i32_1 : i32, i32, i32, i32, i32
  }
  func.func @transform_1(%arg0: i32, %arg1: i32, %arg2: i32) -> (i32, i32, i32) {
    %c0_i32 = arith.constant 0 : i32
    %c0_i32_0 = arith.constant 0 : i32
    %c0_i32_1 = arith.constant 0 : i32
    return %c0_i32, %c0_i32_0, %arg0 : i32, i32, i32
  }
  func.func @transform_2(%arg0: i32, %arg1: i32, %arg2: i32) -> (i32, i32) {
    %c0_i32 = arith.constant 0 : i32
    %c0_i32_0 = arith.constant 0 : i32
    return %c0_i32, %arg0 : i32, i32
  }
  func.func @transform_3(%arg0: i32, %arg1: i32, %arg2: i32) -> (i32, i32, i32) {
    %c0_i32 = arith.constant 0 : i32
    return %arg1, %arg2, %arg0 : i32, i32, i32
  }
}

</mosaic_0001>

<bundles_post_ra>
// kernel: tpu_custom_call.1
= control target key start
LH: loop header
LB: loop body
LE: loop exit
PB: predicated region body
PF: predicated region fallthrough
CT: control target
= control target key end

     0   :  { %s13478_s12 = smov 0   ;;  %s13480_s13 = smov 0   ;;  %s17386_s0 = inlined_call_operand.vmem [shape: bf16[1,2,18,34,64], index: 0, kind: input, shape index: {}]   ;;  %s17387_s1 = inlined_call_operand.vmem [shape: bf16[9,64,64], index: 1, kind: input, shape index: {}]   ;;  %s17388_s2 = inlined_call_operand.vmem [shape: f32[1,64], index: 2, kind: input, shape index: {}]   ;;  %s17389_s3 = inlined_call_operand.vmem [shape: bf16[1,1024,64], index: 3, kind: output, shape index: {}]  }
   0x1   :  { %s13482_s14 = smov 0  }
   0x2 LB: > { %s25_s15 = sadd.s32 1, %s13452_s13  ;;  %p10985_p0 = scmp.ge.s32.totalorder %s13456_s14, 1  ;;  %s13456_s14 = sphi %s13482_s14, %s13_s14   ;;  %s13452_s13 = sphi %s13480_s13, %s17406_s13   ;;  %s13448_s12 = sphi %s13478_s12, %s17405_s12  }
   0x3   : > { %p26_p1 = scmp.ge.s32.totalorder %s25_s15, 2  ;;  %p183_p2 = scmp.lt.s32.totalorder %s13456_s14, 3 }
   0x5   : > { %s17408_s15 = smov (%p26_p1, %s25_s15), 0  ;;  %p184_p3 = pnand %p10985_p0, %p183_p2 }
   0x7   : > { %187 = sbr.rel (%p184_p3) target bundleno = 916 (0x394), region = 32 }
   0xc   : > { %v13297_v0 = vld [vmem:[%s17387_s1 + $0x18] sm:$0xff]   ;;  %p227_p4 = scmp.lt.s32.totalorder %s13448_s12, 1  ;;  %v13298_v1 = vld [vmem:[%s17387_s1 + $0x10] sm:$0xff]   ;;  %v13299_v2 = vld [vmem:[%s17387_s1 + $0x8] sm:$0xff]   ;;  %vm511_vm0 = vcmask 523264   ;;  %vm2614_vm1 = vcmask 1042432  }
   0xd   : > { %13264 = vmatprep.subr.bf16.mxu1 %v13297_v0  ;;  %12616 = vmatprep.subr.bf16.mxu0 %v13297_v0  ;;  %v13300_v4 = vld [vmem:[%s17387_s1] sm:$0xff]   ;;  %v13303_v6 = vld [vmem:[%s17387_s1 + $0x38] sm:$0xff]   ;;  %v13313_v12 = vld [vmem:[%s17387_s1 + $0x30] sm:$0xff]   ;;  %vm2615_vm2 = vcmask 1046532   ;;  %vm1041_vm3 = vsmask.f32 3328 }
   0xe   : > { %s228_s20 = scalar_select %p227_p4, %s13448_s12, 1  ;;  %13268 = vmatpush3.bf16.msra.mxu1 %v13297_v0  ;;  %12617 = vmatpush3.bf16.msra.mxu0 %v13297_v0  ;;  %v13308_v7 = vld [vmem:[%s17387_s1 + $0x58] sm:$0xff]   ;;  %v13318_v15 = vld [vmem:[%s17387_s1 + $0x50] sm:$0xff]   ;;  %v13323_v18 = vld [vmem:[%s17387_s1 + $0x28] sm:$0xff]   ;;  %vm1042_vm4 = vsmask.f32 7440 }
   0xf   : > { %13265 = vmatprep.subr.bf16.mxu1 %v13298_v1  ;;  %12618 = vmatprep.subr.bf16.mxu0 %v13298_v1  ;;  %v13328_v23 = vld [vmem:[%s17387_s1 + $0x48] sm:$0xff]   ;;  %v13333_v25 = vld [vmem:[%s17387_s1 + $0x20] sm:$0xff]   ;;  %vm13588_vm5 = vmor %vm1041_vm3, %vm1042_vm4  ;;  %vm10784_vm7 = vcmask 519168  }
  0x10   : > { %s13272_s23 = smul.u32 360, %s228_s20  ;;  %v13338_v29 = vld [vmem:[%s17387_s1 + $0x40] sm:$0xff]   ;;  %v13595_v58 = vld [vmem:[%s17387_s1 + $0x78] sm:$0xff]   ;;  %vm13606_vm6 = vmor %vm2614_vm1, %vm2615_vm2 }
  0x12   : > { %s13512_s26 = scalar_lea.vmem %s17386_s0, %s13272_s23  ;;  %13269 = vmatpush3.bf16.msra.mxu1 %v13298_v1  ;;  %12619 = vmatpush3.bf16.msra.mxu0 %v13298_v1 }
  0x13   : > { %v13301_v3 = vld [vmem:[%s13512_s26 + $0xa0] sm:$0xff]   ;;  %13266 = vmatprep.subr.bf16.mxu1 %v13299_v2  ;;  %12620 = vmatprep.subr.bf16.mxu0 %v13299_v2  ;;  %v13302_v8 = vld [vmem:[%s13512_s26 + $0xa8] sm:$0xff]   ;;  %v13306_v10 = vld [vmem:[%s13512_s26 + $0xb4] sm:$0xff]  }
  0x14   : > { %12656 = vmatprep.mubr.msk.bf16.mxu1 %vm511_vm0, %v13301_v3  ;;  %v13304_v5 = vld [vmem:[%s13512_s26] sm:$0xff]   ;;  %v13305_v9 = vld [vmem:[%s13512_s26 + $0x8] sm:$0xff]   ;;  %v13309_v11 = vld [vmem:[%s13512_s26 + $0x14] sm:$0xff]  }
  0x15   : > { %12624 = vmatprep.mubr.msk.bf16.mxu0 %vm511_vm0, %v13304_v5  ;;  %v13307_v13 = vld [vmem:[%s13512_s26 + $0xbc] sm:$0xff]   ;;  %v13311_v16 = vld [vmem:[%s13512_s26 + $0xc8] sm:$0xff]   ;;  %v13312_v19 = vld [vmem:[%s13512_s26 + $0xd0] sm:$0xff]  }
  0x16   : > { %13270 = vmatpush3.bf16.msra.mxu1 %v13299_v2  ;;  %12621 = vmatpush3.bf16.msra.mxu0 %v13299_v2  ;;  %v13310_v14 = vld [vmem:[%s13512_s26 + $0x1c] sm:$0xff]   ;;  %v13314_v17 = vld [vmem:[%s13512_s26 + $0x28] sm:$0xff]   ;;  %v13315_v20 = vld [vmem:[%s13512_s26 + $0x30] sm:$0xff]  }
  0x17   : > { %13267 = vmatprep.subr.bf16.mxu1 %v13300_v4  ;;  %12622 = vmatprep.subr.bf16.mxu0 %v13300_v4  ;;  %v13316_v21 = vld [vmem:[%s13512_s26 + $0xdc] sm:$0xff]   ;;  %v13317_v24 = vld [vmem:[%s13512_s26 + $0xe4] sm:$0xff]   ;;  %v13321_v27 = vld [vmem:[%s13512_s26 + $0xf0] sm:$0xff]  }
  0x18   : > { %v13319_v22 = vld [vmem:[%s13512_s26 + $0x3c] sm:$0xff]   ;;  %v13320_v26 = vld [vmem:[%s13512_s26 + $0x44] sm:$0xff]   ;;  %v13324_v28 = vld [vmem:[%s13512_s26 + $0x50] sm:$0xff]  }
  0x19   : > { %v13322_v30 = vld [vmem:[%s13512_s26 + $0xf8] sm:$0xff]   ;;  %v961_v32 = vld [vmem:[%s13512_s26] sm:$0xf]  ;;  %v962_v33 = vld [vmem:[%s13512_s26 + $0x4] sm:$0xf] }
  0x1a   : > { %13271 = vmatpush3.bf16.msra.mxu1 %v13300_v4  ;;  %12623 = vmatpush3.bf16.msra.mxu0 %v13300_v4  ;;  %v13325_v31 = vld [vmem:[%s13512_s26 + $0x58] sm:$0xff]   ;;  %v963_v34 = vld [vmem:[%s13512_s26 + $0x8] sm:$0xf]  ;;  %v1045_v37 = vshrl.u32 %v961_v32, 16  ;;  %v1048_v38 = vshll.u32 %v961_v32, 16  ;;  %v1054_v39 = vshll.u32 %v962_v33, 16 }
  0x1b   : > { %12688 = vmatprep.subr.bf16.mxu1 %v13303_v6  ;;  %12760 = vmatprep.subr.bf16.mxu0 %v13308_v7  ;;  %v13326_v35 = vld [vmem:[%s13512_s26 + $0x104] sm:$0xff]   ;;  %v1058_v40 = vshrl.u32 %v962_v33, 16  ;;  %v1064_v41 = vshll.u32 %v963_v34, 16  ;;  %v1068_v42 = vshrl.u32 %v963_v34, 16  ;;  %v964_v43 = vld [vmem:[%s13512_s26 + $0xc] sm:$0xf] }
  0x1c   : > { %v13329_v36 = vld [vmem:[%s13512_s26 + $0x64] sm:$0xff]   ;;  %v1047_v44 = vrot.slane %v1045_v37, 4  ;;  %v1050_v45 = vrot.slane %v1048_v38, 5  ;;  %v965_v46 = vld [vmem:[%s13512_s26 + $0x10] sm:$0x1]  ;;  %v1074_v47 = vshll.u32 %v964_v43, 16 }
  0x1d   : > { %12657 = vmatmul.mubr.msk.bf16.vlgmr.msra.gmra.mxu1 %vm511_vm0, %v13302_v8  ;;  %12625 = vmatmul.mubr.msk.bf16.vlgmr.msra.gmra.mxu0 %vm511_vm0, %v13305_v9  ;;  %v1078_v48 = vshrl.u32 %v964_v43, 16  ;;  %v1056_v49 = vrot.slane %v1054_v39, 5  ;;  %v1060_v50 = vrot.slane %v1058_v40, 4  ;;  %v1066_v51 = vrot.slane %v1064_v41, 5  ;;  %v2454_v61 = vld [vmem:[%s13512_s26] sm:$0xe] }
  0x1e   : > { %12689 = vmatpush3.bf16.msra.mxu1 %v13303_v6  ;;  %12660 = vmatprep.mubr.msk.bf16.mxu1 %vm511_vm0, %v13306_v10  ;;  %v1070_v52 = vrot.slane %v1068_v42, 4  ;;  %v1051_v54 = vor.u32 %v1050_v45, %v1047_v44  ;;  %v1076_v55 = vrot.slane %v1074_v47, 5  ;;  %v1084_v57 = vshll.u32 %v965_v46, 16  ;;  %v2455_v62 = vld [vmem:[%s13512_s26 + $0x4] sm:$0xf]  ;;  %v13614_v6 = vld [vmem:[%s17387_s1 + $0x98] sm:$0xff]  }
  0x1f   : > { %12761 = vmatpush3.bf16.msra.mxu0 %v13308_v7  ;;  %12628 = vmatprep.mubr.msk.bf16.mxu0 %vm511_vm0, %v13309_v11  ;;  %v1080_v56 = vrot.slane %v1078_v48, 4  ;;  %v1061_v59 = vor.u32 %v1060_v50, %v1056_v49  ;;  %v2456_v63 = vld [vmem:[%s13512_s26 + $0x8] sm:$0xf]  ;;  %v11133_v4 = vrot.slane %v2454_v61, 9  ;;  %v2457_v5 = vld [vmem:[%s13512_s26 + $0xc] sm:$0xf] }
  0x20   : > { %12690 = vmatprep.subr.bf16.mxu1 %v13313_v12  ;;  %12762 = vmatprep.subr.bf16.mxu0 %v13318_v15  ;;  %v1071_v60 = vor.u32 %v1070_v52, %v1066_v51  ;;  %v1052_v0 = vrot.slane %v1051_v54, 4  ;;  %v1086_v2 = vrot.slane %v1084_v57, 5  ;;  %v13327_v7 = vld [vmem:[%s13512_s26 + $0x10c] sm:$0xff]   ;;  %v2619_v10 = vrot.slane %v2455_v62, 5  ;;  %v970_v40 = vld [vmem:[%s13512_s26 + $0x24] sm:$0x1] }
  0x21   : > { %v1081_v1 = vor.u32 %v1080_v56, %v1076_v55  ;;  %v1062_v8 = vrot.slane %v1061_v59, 4  ;;  %v2622_v11 = vrot.slane %v2456_v63, 5  ;;  %v2459_v41 = vld [vmem:[%s13512_s26 + $0x14] sm:$0xe]  ;;  %v2460_v46 = vld [vmem:[%s13512_s26 + $0x18] sm:$0xf] }
  0x22   : > { %12691 = vmatpush3.bf16.msra.mxu1 %v13313_v12  ;;  %v1072_v9 = vrot.slane %v1071_v60, 4  ;;  %v2458_v12 = vld [vmem:[%s13512_s26 + $0x10] sm:$0x1]  ;;  %v1128_v56 = vshll.u32 %v970_v40, 16  ;;  %v2462_v57 = vld [vmem:[%s13512_s26 + $0x20] sm:$0xf] }
  0x23   : > { %12763 = vmatpush3.bf16.msra.mxu0 %v13318_v15  ;;  %12692 = vmatprep.subr.bf16.mxu1 %v13323_v18  ;;  %v1082_v15 = vrot.slane %v1081_v1, 4  ;;  %v11134_v62 = vrot.slane %v2459_v41, 9  ;;  %v2463_v63 = vld [vmem:[%s13512_s26 + $0x24] sm:$0x1] }
  0x24   : > { %12764 = vmatprep.subr.bf16.mxu0 %v13328_v23  ;;  %v13335_v1 = vld [vmem:[%s13512_s26 + $0x80] sm:$0xff]  }
  0x25   : > { %12661 = vmatmul.mubr.msk.bf16.gmra.mxu1 %vm511_vm0, %v13307_v13  ;;  %12629 = vmatmul.mubr.msk.bf16.gmra.mxu0 %vm511_vm0, %v13310_v14  ;;  %v13330_v13 = vld [vmem:[%s13512_s26 + $0x6c] sm:$0xff]   ;;  %v1057_v14 = vsel %vm13588_vm5, %v1052_v0, %v1056_v49  ;;  %v13332_v0 = vld [vmem:[%s13512_s26 + $0x120] sm:$0xff]  }
  0x26   : > { %12664 = vmatprep.mubr.msk.bf16.mxu1 %vm511_vm0, %v13311_v16  ;;  %12632 = vmatprep.mubr.msk.bf16.mxu0 %vm511_vm0, %v13314_v17  ;;  %v2625_v16 = vrot.slane %v2457_v5, 5  ;;  %v2628_v17 = vrot.slane %v2458_v12, 5 }
  0x27   : > { %12693 = vmatpush3.bf16.msra.mxu1 %v13323_v18  ;;  %12765 = vmatpush3.bf16.msra.mxu0 %v13328_v23  ;;  %v966_v18 = vld [vmem:[%s13512_s26 + $0x14] sm:$0xf]  ;;  %v13632_v23 = vsel %vm13606_vm6, %v11133_v4, %v2619_v10 }
  0x28   : > { %12694 = vmatprep.subr.bf16.mxu1 %v13333_v25  ;;  %12766 = vmatprep.subr.bf16.mxu0 %v13338_v29  ;;  %v1089_v34 = vshrl.u32 %v966_v18, 16 }
  0x2a   : > { %v1091_v43 = vrot.slane %v1089_v34, 4  ;;  %v972_v34 = vld [vmem:[%s13512_s26 + $0x2c] sm:$0xf] }
  0x2b   : > { %12695 = vmatpush3.bf16.msra.mxu1 %v13333_v25  ;;  %12767 = vmatpush3.bf16.msra.mxu0 %v13338_v29  ;;  %v967_v25 = vld [vmem:[%s13512_s26 + $0x18] sm:$0xf]  ;;  %v2627_v29 = vrot.slane %v2625_v16, 4 }
  0x2c   : > { %12832 = vmatprep.subr.bf16.mxu1 %v13595_v58  ;;  %12904 = vmatprep.subr.bf16.mxu0 %v13614_v6  ;;  %v1098_v39 = vshll.u32 %v967_v25, 16  ;;  %v1102_v45 = vshrl.u32 %v967_v25, 16 }
  0x2d   : > { %12665 = vmatmul.mubr.msk.bf16.gmra.mxu1 %vm511_vm0, %v13312_v19  ;;  %12633 = vmatmul.mubr.msk.bf16.gmra.mxu0 %vm511_vm0, %v13315_v20  ;;  %v13331_v19 = vld [vmem:[%s13512_s26 + $0x118] sm:$0xff]   ;;  %v13655_v38 = vsel %vm13606_vm6, %v2627_v29, %v2628_v17 }
  0x2e   : > { %12668 = vmatprep.mubr.msk.bf16.mxu1 %vm511_vm0, %v13316_v21  ;;  %12636 = vmatprep.mubr.msk.bf16.mxu0 %vm511_vm0, %v13319_v22  ;;  %v13334_v20 = vld [vmem:[%s13512_s26 + $0x78] sm:$0xff]   ;;  %v1067_v21 = vsel %vm13588_vm5, %v1062_v8, %v1066_v51  ;;  %v1077_v22 = vsel %vm13588_vm5, %v1072_v9, %v1076_v55  ;;  %v1100_v47 = vrot.slane %v1098_v39, 5  ;;  %v1104_v54 = vrot.slane %v1102_v45, 4  ;;  %v13339_v9 = vld [vmem:[%s13512_s26 + $0x8c] sm:$0xff]   ;;  %v974_v45 = vld [vmem:[%s13512_s26 + $0x34] sm:$0xf] }
  0x2f   : > { %v2461_v51 = vld [vmem:[%s13512_s26 + $0x1c] sm:$0xf]  ;;  %v1130_v8 = vrot.slane %v1128_v56, 5  ;;  %v1146_v56 = vshrl.u32 %v972_v34, 16 }
  0x30   : > { %v1105_v5 = vor.u32 %v1104_v54, %v1100_v47  ;;  %v2635_v12 = vrot.slane %v2461_v51, 5  ;;  %v2464_v54 = vld [vmem:[%s13512_s26 + $0x28] sm:$0xe] }
  0x35   : > { %12669 = vmatmul.mubr.msk.bf16.gmra.mxu1 %vm511_vm0, %v13317_v24  ;;  %12637 = vmatmul.mubr.msk.bf16.gmra.mxu0 %vm511_vm0, %v13320_v26  ;;  %v2621_v24 = vrot.slane %v2619_v10, 4  ;;  %v13635_v26 = vcombine.low %v1057_v14, %v1067_v21  ;;  %v971_v14 = vld [vmem:[%s13512_s26 + $0x28] sm:$0xf] }
  0x36   : > { %12672 = vmatprep.mubr.msk.bf16.mxu1 %vm511_vm0, %v13321_v27  ;;  %12640 = vmatprep.mubr.msk.bf16.mxu0 %vm511_vm0, %v13324_v28  ;;  %v1087_v27 = vsel %vm13588_vm5, %v1082_v15, %v1086_v2  ;;  %v2624_v28 = vrot.slane %v2622_v11, 4  ;;  %v13336_v2 = vld [vmem:[%s13512_s26 + $0x12c] sm:$0xff]   ;;  %v1136_v39 = vshll.u32 %v971_v14, 16 }
  0x37   : > { %v13641_v32 = vcombine.low %v1077_v22, %v1087_v27  ;;  %v13645_v33 = vsel %vm13606_vm6, %v2621_v24, %v2622_v11  ;;  %v2632_v11 = vrot.slane %v2460_v46, 5  ;;  %v2637_v22 = vrot.slane %v2635_v12, 4  ;;  %v975_v46 = vld [vmem:[%s13512_s26 + $0x38] sm:$0x1] }
  0x38   : > { %v13651_v37 = vsel %vm13606_vm6, %v2624_v28, %v2625_v16  ;;  %v1106_v16 = vrot.slane %v1105_v5, 4  ;;  %v1133_v28 = vshrl.u32 %v971_v14, 16 }
  0x39   : > { %v11158_v42 = vcombine.low %v13651_v37, %v13655_v38  ;;  %v2634_v21 = vrot.slane %v2632_v11, 4 }
  0x3a   : > { %v1135_v51 = vrot.slane %v1133_v28, 4 }
  0x3d   : > { %12673 = vmatmul.mubr.msk.bf16.gmra.mxu1 %vm511_vm0, %v13322_v30  ;;  %12641 = vmatmul.mubr.msk.bf16.gmra.mxu0 %vm511_vm0, %v13325_v31  ;;  %v968_v30 = vld [vmem:[%s13512_s26 + $0x1c] sm:$0xf]  ;;  %v969_v31 = vld [vmem:[%s13512_s26 + $0x20] sm:$0xf] }
  0x3e   : > { %12676 = vmatprep.mubr.msk.bf16.mxu1 %vm511_vm0, %v13326_v35  ;;  %12644 = vmatprep.mubr.msk.bf16.mxu0 %vm511_vm0, %v13329_v36  ;;  %v1092_v35 = vshll.u32 %v966_v18, 16  ;;  %v11157_v36 = vcombine.low %v13632_v23, %v13645_v33  ;;  %v1108_v48 = vshll.u32 %v968_v30, 16  ;;  %v1112_v49 = vshrl.u32 %v968_v30, 16 }
  0x3f   : > { %v1118_v50 = vshll.u32 %v969_v31, 16  ;;  %v1122_v55 = vshrl.u32 %v969_v31, 16  ;;  %v2641_v18 = vrot.slane %v2463_v63, 5  ;;  %v13692_v31 = vsel %vm13606_vm6, %v2634_v21, %v2635_v12 }
  0x40   : > { %v1094_v44 = vrot.slane %v1092_v35, 5  ;;  %v1110_v59 = vrot.slane %v1108_v48, 5  ;;  %v1114_v60 = vrot.slane %v1112_v49, 4  ;;  %v973_v35 = vld [vmem:[%s13512_s26 + $0x30] sm:$0xf]  ;;  %v13340_v48 = vld [vmem:[%s13512_s26 + $0x94] sm:$0xff]  }
  0x41   : > { %v1120_v61 = vrot.slane %v1118_v50, 5  ;;  %v1166_v63 = vshrl.u32 %v974_v45, 16 }
  0x42   : > { %v1095_v52 = vor.u32 %v1094_v44, %v1091_v43  ;;  %v1115_v10 = vor.u32 %v1114_v60, %v1110_v59  ;;  %v1111_v24 = vsel %vm13588_vm5, %v1106_v16, %v1110_v59  ;;  %v1156_v59 = vshrl.u32 %v973_v35, 16  ;;  %v2465_v60 = vld [vmem:[%s13512_s26 + $0x2c] sm:$0xf] }
  0x43   : > { %v2645_v16 = vrot.slane %v2465_v60, 5  ;;  %v980_v60 = vld [vmem:[%s13512_s26 + $0x4c] sm:$0x1] }
  0x44   : > { %v1096_v4 = vrot.slane %v1095_v52, 4  ;;  %v1138_v52 = vrot.slane %v1136_v39, 5 }
  0x45   : > { %12677 = vmatmul.mubr.msk.bf16.gmra.mxu1 %vm511_vm0, %v13327_v7  ;;  %12645 = vmatmul.mubr.msk.bf16.gmra.mxu0 %vm511_vm0, %v13330_v13  ;;  %v1124_v7 = vrot.slane %v1122_v55, 4  ;;  %v2638_v13 = vrot.slane %v2462_v57, 5  ;;  %v1142_v55 = vshll.u32 %v972_v34, 16  ;;  %v1152_v57 = vshll.u32 %v973_v35, 16  ;;  %v977_v34 = vld [vmem:[%s13512_s26 + $0x40] sm:$0xf] }
  0x46   : > { %12680 = vmatprep.mubr.msk.bf16.mxu1 %vm511_vm0, %v13331_v19  ;;  %12648 = vmatprep.mubr.msk.bf16.mxu0 %vm511_vm0, %v13334_v20  ;;  %v1101_v15 = vsel %vm13588_vm5, %v1096_v4, %v1100_v47  ;;  %v1116_v19 = vrot.slane %v1115_v10, 4  ;;  %v13678_v20 = vsel %vm13606_vm6, %v11134_v62, %v2632_v11  ;;  %v13337_v47 = vld [vmem:[%s13512_s26 + $0x134] sm:$0xff]   ;;  %v1162_v62 = vshll.u32 %v974_v45, 16  ;;  %v978_v45 = vld [vmem:[%s13512_s26 + $0x44] sm:$0xf] }
  0x47   : > { %v1125_v17 = vor.u32 %v1124_v7, %v1120_v61  ;;  %v2640_v27 = vrot.slane %v2638_v13, 4  ;;  %v13686_v29 = vcombine.low %v1101_v15, %v1111_v24  ;;  %v11159_v41 = vcombine.low %v13678_v20, %v13692_v31  ;;  %v976_v24 = vld [vmem:[%s13512_s26 + $0x3c] sm:$0xf]  ;;  %v13346_v20 = vld [vmem:[%s17387_s1 + $0x88] sm:$0xff]  }
  0x48   : > { %v1121_v30 = vsel %vm13588_vm5, %v1116_v19, %v1120_v61  ;;  %v13702_v43 = vsel %vm13606_vm6, %v2637_v22, %v2638_v13  ;;  %v1139_v61 = vor.u32 %v1138_v52, %v1135_v51  ;;  %v1148_v4 = vrot.slane %v1146_v56, 4 }
  0x49   : > { %v1126_v25 = vrot.slane %v1125_v17, 4  ;;  %v13706_v44 = vsel %vm13606_vm6, %v2640_v27, %v2641_v18  ;;  %v1154_v5 = vrot.slane %v1152_v57, 5  ;;  %v1158_v7 = vrot.slane %v1156_v59, 4  ;;  %v2468_v17 = vld [vmem:[%s13512_s26 + $0x38] sm:$0x1] }
  0x4a   : > { %v11160_v50 = vcombine.low %v13702_v43, %v13706_v44  ;;  %v1164_v10 = vrot.slane %v1162_v62, 5  ;;  %v1168_v11 = vrot.slane %v1166_v63, 4  ;;  %v11135_v15 = vrot.slane %v2464_v54, 9  ;;  %v979_v54 = vld [vmem:[%s13512_s26 + $0x48] sm:$0xf] }
  0x4b   : > { %v1131_v40 = vsel %vm13588_vm5, %v1126_v25, %v1130_v8  ;;  %v2467_v8 = vld [vmem:[%s13512_s26 + $0x34] sm:$0xf]  ;;  %v1159_v14 = vor.u32 %v1158_v7, %v1154_v5  ;;  %v1180_v59 = vshll.u32 %v976_v24, 16  ;;  %v1186_v63 = vshll.u32 %v977_v34, 16 }
  0x4c   : > { %v13712_v49 = vcombine.low %v1121_v30, %v1131_v40  ;;  %v1169_v19 = vor.u32 %v1168_v11, %v1164_v10  ;;  %v2651_v22 = vrot.slane %v2467_v8, 5  ;;  %v13734_v28 = vsel %vm13606_vm6, %v11135_v15, %v2645_v16  ;;  %v2472_v15 = vld [vmem:[%s13512_s26 + $0x48] sm:$0xf] }
  0x4d   : > { %12681 = vmatmul.mubr.msk.bf16.gmra.mxu1 %vm511_vm0, %v13332_v0  ;;  %12649 = vmatmul.mubr.msk.bf16.gmra.mxu0 %vm511_vm0, %v13335_v1  ;;  %v1172_v0 = vshll.u32 %v975_v46, 16  ;;  %v2466_v1 = vld [vmem:[%s13512_s26 + $0x30] sm:$0xf]  ;;  %v1160_v27 = vrot.slane %v1159_v14, 4  ;;  %v1177_v46 = vshrl.u32 %v976_v24, 16  ;;  %v1200_v7 = vshrl.u32 %v978_v45, 16 }
  0x4e   : > { %12684 = vmatprep.mubr.msk.bf16.mxu1 %vm511_vm0, %v13336_v2  ;;  %12652 = vmatprep.mubr.msk.bf16.mxu0 %vm511_vm0, %v13339_v9  ;;  %v1144_v2 = vrot.slane %v1142_v55, 5  ;;  %v1140_v9 = vrot.slane %v1139_v61, 4  ;;  %v2648_v21 = vrot.slane %v2466_v1, 5  ;;  %v1170_v30 = vrot.slane %v1169_v19, 4  ;;  %v13343_v61 = vld [vmem:[%s17387_s1 + $0x70] sm:$0xff]  }
  0x4f   : > { %v1174_v12 = vrot.slane %v1172_v0, 5  ;;  %v2653_v33 = vrot.slane %v2651_v22, 4  ;;  %v1165_v39 = vsel %vm13588_vm5, %v1160_v27, %v1164_v10  ;;  %v1179_v57 = vrot.slane %v1177_v46, 4  ;;  %v2470_v10 = vld [vmem:[%s13512_s26 + $0x40] sm:$0xf] }
  0x50   : > { %v1149_v13 = vor.u32 %v1148_v4, %v1144_v2  ;;  %v1145_v18 = vsel %vm13588_vm5, %v1140_v9, %v1144_v2  ;;  %v2650_v23 = vrot.slane %v2648_v21, 4  ;;  %v1190_v0 = vshrl.u32 %v977_v34, 16  ;;  %v2469_v2 = vld [vmem:[%s13512_s26 + $0x3c] sm:$0xe]  ;;  %v13344_v4 = vld [vmem:[%s17387_s1 + $0x90] sm:$0xff]  }
  0x51   : > { %v1196_v1 = vshll.u32 %v978_v45, 16  ;;  %v1206_v8 = vshll.u32 %v979_v54, 16  ;;  %v1210_v9 = vshrl.u32 %v979_v54, 16  ;;  %v1188_v11 = vrot.slane %v1186_v63, 5  ;;  %v2471_v14 = vld [vmem:[%s13512_s26 + $0x44] sm:$0xf] }
  0x52   : > { %v1150_v25 = vrot.slane %v1149_v13, 4  ;;  %v13754_v52 = vsel %vm13606_vm6, %v2650_v23, %v2651_v22  ;;  %v1216_v13 = vshll.u32 %v980_v60, 16  ;;  %v1202_v38 = vrot.slane %v1200_v7, 4  ;;  %v981_v24 = vld [vmem:[%s13512_s26 + $0x50] sm:$0xf]  ;;  %v13347_v54 = vld [vmem:[%s17387_s1 + $0x60] sm:$0xff]  }
  0x53   : > { %v2658_v19 = vrot.slane %v2470_v10, 5  ;;  %v2661_v22 = vrot.slane %v2471_v14, 5  ;;  %v983_v63 = vld [vmem:[%s13512_s26 + $0x58] sm:$0xf]  ;;  %v2475_v10 = vld [vmem:[%s13512_s26 + $0x54] sm:$0xf] }
  0x54   : > { %v1155_v35 = vsel %vm13588_vm5, %v1150_v25, %v1154_v5  ;;  %v1182_v5 = vrot.slane %v1180_v59, 5  ;;  %v2476_v14 = vld [vmem:[%s13512_s26 + $0x58] sm:$0xf] }
  0x55   : > { %12685 = vmatmul.mubr.msk.bf16.gmra.mxu1 %vm511_vm0, %v13337_v47  ;;  %12653 = vmatmul.mubr.msk.bf16.gmra.mxu0 %vm511_vm0, %v13340_v48  ;;  %v13746_v47 = vcombine.low %v1145_v18, %v1155_v35  ;;  %v1175_v48 = vsel %vm13588_vm5, %v1170_v30, %v1174_v12  ;;  %v1192_v12 = vrot.slane %v1190_v0, 4  ;;  %v11136_v18 = vrot.slane %v2469_v2, 9  ;;  %v985_v2 = vld [vmem:[%s13512_s26 + $0x60] sm:$0x1] }
  0x56   : > { %12696 = vmatprep.mubr.msk.bf16.mxu1 %vm511_vm0, %v13635_v26  ;;  %12768 = vmatprep.mubr.msk.bf16.mxu0 %vm511_vm0, %v11157_v36  ;;  %v2647_v26 = vrot.slane %v2645_v16, 4  ;;  %v2654_v36 = vrot.slane %v2468_v17, 5  ;;  %v13757_v55 = vcombine.low %v1165_v39, %v1175_v48  ;;  %v1183_v37 = vor.u32 %v1182_v5, %v1179_v57  ;;  %v982_v48 = vld [vmem:[%s13512_s26 + $0x54] sm:$0xf]  ;;  %v13348_v57 = vld [vmem:[%s17387_s1 + $0x80] sm:$0xff]  }
  0x57   : > { %v1193_v16 = vor.u32 %v1192_v12, %v1188_v11  ;;  %v1218_v17 = vrot.slane %v1216_v13, 5  ;;  %v13800_v27 = vsel %vm13606_vm6, %v11136_v18, %v2658_v19  ;;  %v2664_v30 = vrot.slane %v2472_v15, 5  ;;  %v2477_v15 = vld [vmem:[%s13512_s26 + $0x5c] sm:$0xf] }
  0x58   : > { %v13743_v40 = vsel %vm13606_vm6, %v2647_v26, %v2648_v21  ;;  %v13761_v56 = vsel %vm13606_vm6, %v2653_v33, %v2654_v36  ;;  %v1184_v31 = vrot.slane %v1183_v37, 4  ;;  %v2660_v26 = vrot.slane %v2658_v19, 4 }
  0x59   : > { %v11161_v51 = vcombine.low %v13734_v28, %v13743_v40  ;;  %v11162_v62 = vcombine.low %v13754_v52, %v13761_v56  ;;  %v1194_v25 = vrot.slane %v1193_v16, 4  ;;  %v2663_v34 = vrot.slane %v2661_v22, 4 }
  0x5a   : > { %v1189_v23 = vsel %vm13588_vm5, %v1184_v31, %v1188_v11  ;;  %v13808_v39 = vsel %vm13606_vm6, %v2660_v26, %v2661_v22  ;;  %v2666_v45 = vrot.slane %v2664_v30, 4  ;;  %v1221_v0 = vshrl.u32 %v981_v24, 16 }
  0x5b   : > { %v11163_v44 = vcombine.low %v13800_v27, %v13808_v39  ;;  %v1230_v40 = vshll.u32 %v982_v48, 16  ;;  %v2671_v31 = vrot.slane %v2475_v10, 5  ;;  %v2674_v22 = vrot.slane %v2476_v14, 5 }
  0x5c   : > { %v1223_v28 = vrot.slane %v1221_v0, 4 }
  0x5d   : > { %12697 = vmatmul.mubr.msk.bf16.vlgmr.msra.gmra.mxu1 %vm511_vm0, %v13641_v32  ;;  %12769 = vmatmul.mubr.msk.bf16.vlgmr.msra.gmra.mxu0 %vm511_vm0, %v11158_v42  ;;  %v1198_v32 = vrot.slane %v1196_v1, 5  ;;  %v1208_v42 = vrot.slane %v1206_v8, 5  ;;  %v984_v1 = vld [vmem:[%s13512_s26 + $0x5c] sm:$0xf]  ;;  %v1240_v8 = vshll.u32 %v983_v63, 16  ;;  %v1232_v11 = vrot.slane %v1230_v40, 5 }
  0x5e   : > { %12833 = vmatpush3.bf16.msra.mxu1 %v13595_v58  ;;  %12700 = vmatprep.mubr.msk.bf16.mxu1 %vm511_vm0, %v13686_v29  ;;  %v1212_v58 = vrot.slane %v1210_v9, 4  ;;  %v13345_v29 = vld [vmem:[%s17387_s1 + $0x68] sm:$0xff]   ;;  %v1244_v9 = vshrl.u32 %v983_v63, 16  ;;  %v1254_v13 = vshrl.u32 %v984_v1, 16  ;;  %v2673_v56 = vrot.slane %v2671_v31, 4 }
  0x5f   : > { %12905 = vmatpush3.bf16.msra.mxu0 %v13614_v6  ;;  %12772 = vmatprep.mubr.msk.bf16.mxu0 %vm511_vm0, %v11159_v41  ;;  %v2473_v6 = vld [vmem:[%s13512_s26 + $0x4c] sm:$0x1]  ;;  %v1203_v41 = vor.u32 %v1202_v38, %v1198_v32  ;;  %v1199_v35 = vsel %vm13588_vm5, %v1194_v25, %v1198_v32  ;;  %v1250_v32 = vshll.u32 %v984_v1, 16  ;;  %v1242_v38 = vrot.slane %v1240_v8, 5  ;;  %v2479_v1 = vld [vmem:[%s13512_s26 + $0x64] sm:$0xe] }
  0x60   : > { %12834 = vmatprep.subr.bf16.mxu1 %v13343_v61  ;;  %12906 = vmatprep.subr.bf16.mxu0 %v13344_v4  ;;  %v1213_v21 = vor.u32 %v1212_v58, %v1208_v42  ;;  %v2667_v46 = vrot.slane %v2473_v6, 5  ;;  %v11071_v59 = vcombine.low %v1189_v23, %v1199_v35  ;;  %v1260_v58 = vshll.u32 %v985_v2, 16 }
  0x61   : > { %v1204_v33 = vrot.slane %v1203_v41, 4  ;;  %v1252_v16 = vrot.slane %v1250_v32, 5  ;;  %v2677_v25 = vrot.slane %v2477_v15, 5  ;;  %v2676_v23 = vrot.slane %v2674_v22, 4 }
  0x62   : > { %12835 = vmatpush3.bf16.msra.mxu1 %v13343_v61  ;;  %v1214_v36 = vrot.slane %v1213_v21, 4  ;;  %v2675_v39 = vsel %vm13606_vm6, %v2673_v56, %v2674_v22 }
  0x63   : > { %12907 = vmatpush3.bf16.msra.mxu0 %v13344_v4  ;;  %12836 = vmatprep.subr.bf16.mxu1 %v13345_v29  ;;  %v1209_v60 = vsel %vm13588_vm5, %v1204_v33, %v1208_v42  ;;  %v2474_v4 = vld [vmem:[%s13512_s26 + $0x50] sm:$0xe]  ;;  %v1246_v42 = vrot.slane %v1244_v9, 4  ;;  %v2679_v33 = vrot.slane %v2677_v25, 4 }
  0x64   : > { %12908 = vmatprep.subr.bf16.mxu0 %v13346_v20  ;;  %v1219_v61 = vsel %vm13588_vm5, %v1214_v36, %v1218_v17  ;;  %v1256_v17 = vrot.slane %v1254_v13, 4  ;;  %v11137_v18 = vrot.slane %v2474_v4, 9  ;;  %v987_v36 = vld [vmem:[%s13512_s26 + $0x68] sm:$0xf] }
  0x65   : > { %12701 = vmatmul.mubr.msk.bf16.gmra.mxu1 %vm511_vm0, %v13712_v49  ;;  %12773 = vmatmul.mubr.msk.bf16.gmra.mxu0 %vm511_vm0, %v11160_v50  ;;  %v13834_v43 = vcombine.low %v1209_v60, %v1219_v61  ;;  %v13840_v49 = vsel %vm13606_vm6, %v2663_v34, %v2664_v30  ;;  %v1224_v50 = vshll.u32 %v981_v24, 16  ;;  %v1247_v6 = vor.u32 %v1246_v42, %v1242_v38  ;;  %v2478_v24 = vld [vmem:[%s13512_s26 + $0x60] sm:$0x1]  ;;  %v989_v60 = vld [vmem:[%s13512_s26 + $0x70] sm:$0xf] }
  0x66   : > { %12704 = vmatprep.mubr.msk.bf16.mxu1 %vm511_vm0, %v13746_v47  ;;  %12776 = vmatprep.mubr.msk.bf16.mxu0 %vm511_vm0, %v11161_v51  ;;  %v13846_v47 = vsel %vm13606_vm6, %v2666_v45, %v2667_v46  ;;  %v1234_v51 = vshrl.u32 %v982_v48, 16  ;;  %v1257_v21 = vor.u32 %v1256_v17, %v1252_v16  ;;  %v2672_v52 = vsel %vm13606_vm6, %v11137_v18, %v2671_v31  ;;  %v988_v46 = vld [vmem:[%s13512_s26 + $0x6c] sm:$0xf]  ;;  %v2480_v4 = vld [vmem:[%s13512_s26 + $0x68] sm:$0xf] }
  0x67   : > { %12837 = vmatpush3.bf16.msra.mxu1 %v13345_v29  ;;  %12909 = vmatpush3.bf16.msra.mxu0 %v13346_v20  ;;  %v11164_v5 = vcombine.low %v13840_v49, %v13846_v47  ;;  %v1226_v7 = vrot.slane %v1224_v50, 5  ;;  %v1262_v20 = vrot.slane %v1260_v58, 5  ;;  %v2680_v45 = vrot.slane %v2478_v24, 5  ;;  %v990_v50 = vld [vmem:[%s13512_s26 + $0x74] sm:$0x1] }
  0x68   : > { %12838 = vmatprep.subr.bf16.mxu1 %v13347_v54  ;;  %12910 = vmatprep.subr.bf16.mxu0 %v13348_v57  ;;  %v1236_v12 = vrot.slane %v1234_v51, 4  ;;  %v1258_v30 = vrot.slane %v1257_v21, 4  ;;  %v1278_v40 = vshrl.u32 %v987_v36, 16  ;;  %v1284_v51 = vshll.u32 %v988_v46, 16  ;;  %v2483_v18 = vld [vmem:[%s13512_s26 + $0x74] sm:$0x1] }
  0x69   : > { %v1227_v37 = vor.u32 %v1226_v7, %v1223_v28  ;;  %v2681_v63 = vsel %vm13606_vm6, %v2679_v33, %v2680_v45  ;;  %v1288_v9 = vshrl.u32 %v988_v46, 16  ;;  %v1294_v10 = vshll.u32 %v989_v60, 16  ;;  %v991_v21 = vld [vmem:[%s13512_s26 + $0x78] sm:$0xf] }
  0x6a   : > { %v1237_v29 = vor.u32 %v1236_v12, %v1232_v11  ;;  %v1263_v48 = vsel %vm13588_vm5, %v1258_v30, %v1262_v20  ;;  %v1280_v12 = vrot.slane %v1278_v40, 4  ;;  %v1286_v32 = vrot.slane %v1284_v51, 5  ;;  %v2487_v40 = vld [vmem:[%s13512_s26 + $0x84] sm:$0xf] }
  0x6b   : > { %12839 = vmatpush3.bf16.msra.mxu1 %v13347_v54  ;;  %12911 = vmatpush3.bf16.msra.mxu0 %v13348_v57  ;;  %v1228_v19 = vrot.slane %v1227_v37, 4  ;;  %v11165_v54 = vcombine.low %v2672_v52, %v2675_v39  ;;  %v2678_v57 = vsel %vm13606_vm6, %v2676_v23, %v2677_v25  ;;  %v1298_v13 = vshrl.u32 %v989_v60, 16  ;;  %v2482_v37 = vld [vmem:[%s13512_s26 + $0x70] sm:$0xf] }
  0x6c   : > { %v1238_v41 = vrot.slane %v1237_v29, 4  ;;  %v11166_v2 = vcombine.low %v2678_v57, %v2681_v63  ;;  %v1304_v14 = vshll.u32 %v990_v50, 16  ;;  %v1290_v42 = vrot.slane %v1288_v9, 4  ;;  %v2484_v63 = vld [vmem:[%s13512_s26 + $0x78] sm:$0xe] }
  0x6d   : > { %12705 = vmatmul.mubr.msk.bf16.gmra.mxu1 %vm511_vm0, %v13757_v55  ;;  %12777 = vmatmul.mubr.msk.bf16.gmra.mxu0 %vm511_vm0, %v11162_v62  ;;  %v1233_v27 = vsel %vm13588_vm5, %v1228_v19, %v1232_v11  ;;  %v1248_v55 = vrot.slane %v1247_v6, 4  ;;  %v986_v62 = vld [vmem:[%s13512_s26 + $0x64] sm:$0xf]  ;;  %v2481_v11 = vld [vmem:[%s13512_s26 + $0x6c] sm:$0xf]  ;;  %v1296_v58 = vrot.slane %v1294_v10, 5 }
  0x6e   : > { %12708 = vmatprep.mubr.msk.bf16.mxu1 %vm511_vm0, %v11071_v59  ;;  %12780 = vmatprep.mubr.msk.bf16.mxu0 %vm511_vm0, %v11163_v44  ;;  %v1243_v26 = vsel %vm13588_vm5, %v1238_v41, %v1242_v38  ;;  %v1265_v59 = vshrl.u32 %v986_v62, 16  ;;  %v1268_v0 = vshll.u32 %v986_v62, 16  ;;  %v1274_v44 = vshll.u32 %v987_v36, 16 }
  0x6f   : > { %v11073_v34 = vcombine.low %v1233_v27, %v1243_v26  ;;  %v1253_v35 = vsel %vm13588_vm5, %v1248_v55, %v1252_v16  ;;  %v1300_v29 = vrot.slane %v1298_v13, 4  ;;  %v1306_v49 = vrot.slane %v1304_v14, 5  ;;  %v992_v26 = vld [vmem:[%s13512_s26 + $0x7c] sm:$0xf] }
  0x70   : > { %v11074_v61 = vcombine.low %v1253_v35, %v1263_v48  ;;  %v1267_v28 = vrot.slane %v1265_v59, 4  ;;  %v1270_v7 = vrot.slane %v1268_v0, 5  ;;  %v1276_v8 = vrot.slane %v1274_v44, 5  ;;  %v994_v48 = vld [vmem:[%s13512_s26 + $0x84] sm:$0xf] }
  0x71   : > { %v2684_v47 = vrot.slane %v2480_v4, 5  ;;  %v1291_v16 = vor.u32 %v1290_v42, %v1286_v32  ;;  %v2687_v17 = vrot.slane %v2481_v11, 5  ;;  %v2690_v19 = vrot.slane %v2482_v37, 5  ;;  %v2485_v0 = vld [vmem:[%s13512_s26 + $0x7c] sm:$0xf] }
  0x72   : > { %v1271_v38 = vor.u32 %v1270_v7, %v1267_v28  ;;  %v1281_v15 = vor.u32 %v1280_v12, %v1276_v8  ;;  %v1301_v20 = vor.u32 %v1300_v29, %v1296_v58  ;;  %v2693_v62 = vrot.slane %v2483_v18, 5  ;;  %v2486_v28 = vld [vmem:[%s13512_s26 + $0x80] sm:$0xf] }
  0x73   : > { %v2686_v41 = vrot.slane %v2684_v47, 4  ;;  %v1292_v24 = vrot.slane %v1291_v16, 4  ;;  %v2689_v25 = vrot.slane %v2687_v17, 4  ;;  %v2692_v27 = vrot.slane %v2690_v19, 4 }
  0x74   : > { %v1282_v6 = vrot.slane %v1281_v15, 4  ;;  %v1302_v52 = vrot.slane %v1301_v20, 4  ;;  %v1309_v45 = vshrl.u32 %v991_v21, 16  ;;  %v1312_v46 = vshll.u32 %v991_v21, 16 }
  0x75   : > { %12709 = vmatmul.mubr.msk.bf16.gmra.mxu1 %vm511_vm0, %v13834_v43  ;;  %12781 = vmatmul.mubr.msk.bf16.gmra.mxu0 %vm511_vm0, %v11164_v5  ;;  %v11138_v43 = vrot.slane %v2479_v1, 9  ;;  %v1272_v5 = vrot.slane %v1271_v38, 4  ;;  %v2688_v56 = vsel %vm13606_vm6, %v2686_v41, %v2687_v17  ;;  %v1297_v23 = vsel %vm13588_vm5, %v1292_v24, %v1296_v58  ;;  %v13354_v17 = vld [vmem:[%s17387_s1 + $0xd8] sm:$0xff]  }
  0x76   : > { %12712 = vmatprep.mubr.msk.bf16.mxu1 %vm511_vm0, %v11073_v34  ;;  %12784 = vmatprep.mubr.msk.bf16.mxu0 %vm511_vm0, %v11165_v54  ;;  %v1287_v55 = vsel %vm13588_vm5, %v1282_v6, %v1286_v32  ;;  %v2691_v36 = vsel %vm13606_vm6, %v2689_v25, %v2690_v19  ;;  %v993_v34 = vld [vmem:[%s13512_s26 + $0x80] sm:$0xf]  ;;  %v1307_v35 = vsel %vm13588_vm5, %v1302_v52, %v1306_v49  ;;  %v995_v54 = vld [vmem:[%s13512_s26 + $0x88] sm:$0x1]  ;;  %v1318_v60 = vshll.u32 %v992_v26, 16  ;;  %v13351_v32 = vld [vmem:[%s17387_s1 + $0xb8] sm:$0xff]  }
  0x77   : > { %v2685_v31 = vsel %vm13606_vm6, %v11138_v43, %v2684_v47  ;;  %v1277_v22 = vsel %vm13588_vm5, %v1272_v5, %v1276_v8  ;;  %v2694_v39 = vsel %vm13606_vm6, %v2692_v27, %v2693_v62  ;;  %v11076_v57 = vcombine.low %v1297_v23, %v1307_v35  ;;  %12976 = vmatprep.subr.bf16.mxu1 %v13351_v32  ;;  %v2488_v5 = vld [vmem:[%s13512_s26 + $0x88] sm:$0x1]  ;;  %v997_v25 = vld [vmem:[%s13512_s26 + $0x90] sm:$0xf]  ;;  %v998_v62 = vld [vmem:[%s13512_s26 + $0x94] sm:$0xf] }
  0x78   : > { %v11075_v30 = vcombine.low %v1277_v22, %v1287_v55  ;;  %v11167_v33 = vcombine.low %v2685_v31, %v2688_v56  ;;  %v11168_v59 = vcombine.low %v2691_v36, %v2694_v39  ;;  %v1311_v44 = vrot.slane %v1309_v45, 4  ;;  %v996_v31 = vld [vmem:[%s13512_s26 + $0x8c] sm:$0xf]  ;;  %13048 = vmatprep.subr.bf16.mxu0 %v13354_v17  ;;  %v999_v36 = vld [vmem:[%s13512_s26 + $0x98] sm:$0xf] }
  0x79   : > { %v1314_v50 = vrot.slane %v1312_v46, 5  ;;  %v1328_v1 = vshll.u32 %v993_v34, 16  ;;  %v1320_v51 = vrot.slane %v1318_v60, 5  ;;  %v1338_v7 = vshll.u32 %v994_v48, 16  ;;  %v1000_v46 = vld [vmem:[%s13512_s26 + $0x9c] sm:$0x1] }
  0x7a   : > { %v1342_v8 = vshrl.u32 %v994_v48, 16  ;;  %v1348_v12 = vshll.u32 %v995_v54, 16  ;;  %v11139_v38 = vrot.slane %v2484_v63, 9  ;;  %v2697_v15 = vrot.slane %v2485_v0, 5  ;;  %v2489_v48 = vld [vmem:[%s13512_s26 + $0x8c] sm:$0xe] }
  0x7b   : > { %v1315_v9 = vor.u32 %v1314_v50, %v1311_v44  ;;  %v1330_v10 = vrot.slane %v1328_v1, 5  ;;  %v1340_v14 = vrot.slane %v1338_v7, 5  ;;  %v2700_v47 = vrot.slane %v2486_v28, 5  ;;  %v2491_v1 = vld [vmem:[%s13512_s26 + $0x94] sm:$0xf] }
  0x7c   : > { %v1344_v37 = vrot.slane %v1342_v8, 4  ;;  %v1350_v43 = vrot.slane %v1348_v12, 5  ;;  %v2703_v16 = vrot.slane %v2487_v40, 5  ;;  %v2698_v6 = vsel %vm13606_vm6, %v11139_v38, %v2697_v15 }
  0x7d   : > { %12713 = vmatmul.mubr.msk.bf16.gmra.mxu1 %vm511_vm0, %v11074_v61  ;;  %12785 = vmatmul.mubr.msk.bf16.gmra.mxu0 %vm511_vm0, %v11166_v2  ;;  %v1322_v61 = vshrl.u32 %v992_v26, 16  ;;  %v1332_v2 = vshrl.u32 %v993_v34, 16  ;;  %v1316_v42 = vrot.slane %v1315_v9, 4  ;;  %v2699_v20 = vrot.slane %v2697_v15, 4 }
  0x7e   : > { %12716 = vmatprep.mubr.msk.bf16.mxu1 %vm511_vm0, %v11075_v30  ;;  %12788 = vmatprep.mubr.msk.bf16.mxu0 %vm511_vm0, %v11167_v33  ;;  %v1345_v49 = vor.u32 %v1344_v37, %v1340_v14  ;;  %v2702_v22 = vrot.slane %v2700_v47, 4  ;;  %v2705_v24 = vrot.slane %v2703_v16, 4  ;;  %v2706_v56 = vrot.slane %v2488_v5, 5 }
  0x7f   : > { %v1324_v4 = vrot.slane %v1322_v61, 4  ;;  %v1334_v11 = vrot.slane %v1332_v2, 4  ;;  %v1321_v18 = vsel %vm13588_vm5, %v1316_v42, %v1320_v51  ;;  %v2701_v52 = vsel %vm13606_vm6, %v2699_v20, %v2700_v47  ;;  %v2490_v61 = vld [vmem:[%s13512_s26 + $0x90] sm:$0xf]  ;;  %v2493_v42 = vld [vmem:[%s13512_s26 + $0x9c] sm:$0x1] }
  0x80   : > { %v1346_v21 = vrot.slane %v1345_v49, 4  ;;  %v11169_v30 = vcombine.low %v2698_v6, %v2701_v52  ;;  %v2704_v23 = vsel %vm13606_vm6, %v2702_v22, %v2703_v16  ;;  %v1353_v33 = vshrl.u32 %v996_v31, 16 }
  0x81   : > { %v1325_v13 = vor.u32 %v1324_v4, %v1320_v51  ;;  %v1335_v58 = vor.u32 %v1334_v11, %v1330_v10  ;;  %v2707_v35 = vsel %vm13606_vm6, %v2705_v24, %v2706_v56  ;;  %v1356_v39 = vshll.u32 %v996_v31, 16  ;;  %v2492_v4 = vld [vmem:[%s13512_s26 + $0x98] sm:$0xf] }
  0x82   : > { %v1351_v26 = vsel %vm13588_vm5, %v1346_v21, %v1350_v43  ;;  %v1362_v45 = vshll.u32 %v997_v25, 16  ;;  %v11170_v54 = vcombine.low %v2704_v23, %v2707_v35  ;;  %v1372_v60 = vshll.u32 %v998_v62, 16  ;;  %v2494_v35 = vld [vmem:[%s13512_s26 + $0xa0] sm:$0xe] }
  0x83   : > { %v1326_v29 = vrot.slane %v1325_v13, 4  ;;  %v1336_v19 = vrot.slane %v1335_v58, 4  ;;  %v1358_v63 = vrot.slane %v1356_v39, 5  ;;  %v1376_v44 = vshrl.u32 %v998_v62, 16  ;;  %v2495_v39 = vld [vmem:[%s13512_s26 + $0xa4] sm:$0xf] }
  0x84   : > { %v1364_v0 = vrot.slane %v1362_v45, 5  ;;  %v1382_v50 = vshll.u32 %v999_v36, 16  ;;  %v1374_v28 = vrot.slane %v1372_v60, 5  ;;  %v1386_v40 = vshrl.u32 %v999_v36, 16 }
  0x85   : > { %12717 = vmatmul.mubr.msk.bf16.gmra.mxu1 %vm511_vm0, %v11076_v57  ;;  %12789 = vmatmul.mubr.msk.bf16.gmra.mxu0 %vm511_vm0, %v11168_v59  ;;  %v1331_v41 = vsel %vm13588_vm5, %v1326_v29, %v1330_v10  ;;  %v1341_v55 = vsel %vm13588_vm5, %v1336_v19, %v1340_v14  ;;  %v1355_v57 = vrot.slane %v1353_v33, 4  ;;  %v1366_v59 = vshrl.u32 %v997_v25, 16 }
  0x86   : > { %v11077_v27 = vcombine.low %v1321_v18, %v1331_v41  ;;  %v11078_v34 = vcombine.low %v1341_v55, %v1351_v26  ;;  %12792 = vmatprep.mubr.msk.bf16.mxu0 %vm511_vm0, %v11169_v30  ;;  %v1392_v51 = vshll.u32 %v1000_v46, 16  ;;  %v1378_v8 = vrot.slane %v1376_v44, 4  ;;  %v1001_v18 = vld [vmem:[%s13512_s26 + $0xa0] sm:$0xf]  ;;  %v1002_v41 = vld [vmem:[%s13512_s26 + $0xa4] sm:$0xf] }
  0x87   : > { %v1368_v2 = vrot.slane %v1366_v59, 4  ;;  %v1359_v7 = vor.u32 %v1358_v63, %v1355_v57  ;;  %v1384_v9 = vrot.slane %v1382_v50, 5  ;;  %v11140_v10 = vrot.slane %v2489_v48, 9  ;;  %v1004_v26 = vld [vmem:[%s13512_s26 + $0xac] sm:$0xf] }
  0x88   : > { %12720 = vmatprep.mubr.msk.bf16.mxu1 %vm511_vm0, %v11077_v27  ;;  %v1388_v12 = vrot.slane %v1386_v40, 4  ;;  %v1394_v32 = vrot.slane %v1392_v51, 5  ;;  %v2710_v13 = vrot.slane %v2490_v61, 5  ;;  %v1379_v37 = vor.u32 %v1378_v8, %v1374_v28  ;;  %v1003_v27 = vld [vmem:[%s13512_s26 + $0xa8] sm:$0xf] }
  0x89   : > { %v1369_v11 = vor.u32 %v1368_v2, %v1364_v0  ;;  %v1360_v14 = vrot.slane %v1359_v7, 4  ;;  %v2713_v38 = vrot.slane %v2491_v1, 5  ;;  %v2716_v58 = vrot.slane %v2492_v4, 5  ;;  %v1005_v30 = vld [vmem:[%s13512_s26 + $0xb0] sm:$0x1] }
  0x8a   : > { %v1389_v15 = vor.u32 %v1388_v12, %v1384_v9  ;;  %v2711_v29 = vsel %vm13606_vm6, %v11140_v10, %v2710_v13  ;;  %v2712_v49 = vrot.slane %v2710_v13, 4  ;;  %v1380_v5 = vrot.slane %v1379_v37, 4  ;;  %v2496_v57 = vld [vmem:[%s13512_s26 + $0xa8] sm:$0xf]  ;;  %v2497_v2 = vld [vmem:[%s13512_s26 + $0xac] sm:$0xf] }
  0x8b   : > { %v1370_v43 = vrot.slane %v1369_v11, 4  ;;  %v1365_v47 = vsel %vm13588_vm5, %v1360_v14, %v1364_v0  ;;  %v2715_v16 = vrot.slane %v2713_v38, 4  ;;  %v2718_v17 = vrot.slane %v2716_v58, 4  ;;  %v2498_v13 = vld [vmem:[%s13512_s26 + $0xb0] sm:$0x1] }
  0x8c   : > { %v1390_v6 = vrot.slane %v1389_v15, 4  ;;  %v2714_v20 = vsel %vm13606_vm6, %v2712_v49, %v2713_v38  ;;  %v2719_v31 = vrot.slane %v2493_v42, 5  ;;  %v1385_v22 = vsel %vm13588_vm5, %v1380_v5, %v1384_v9  ;;  %v1007_v5 = vld [vmem:[%s13512_s26 + $0xb8] sm:$0xf] }
  0x8d   : > { %12721 = vmatmul.mubr.msk.bf16.gmra.mxu1 %vm511_vm0, %v11078_v34  ;;  %12793 = vmatmul.mubr.msk.bf16.gmra.mxu0 %vm511_vm0, %v11170_v54  ;;  %v1375_v19 = vsel %vm13588_vm5, %v1370_v43, %v1374_v28  ;;  %v11171_v24 = vcombine.low %v2711_v29, %v2714_v20  ;;  %v2717_v25 = vsel %vm13606_vm6, %v2715_v16, %v2716_v58  ;;  %v1397_v56 = vshrl.u32 %v1001_v18, 16  ;;  %v1006_v43 = vld [vmem:[%s13512_s26 + $0xb4] sm:$0xf]  ;;  %v1009_v20 = vld [vmem:[%s13512_s26 + $0xc0] sm:$0xf] }
  0x8e   : > { %v11079_v21 = vcombine.low %v1365_v47, %v1375_v19  ;;  %v1395_v55 = vsel %vm13588_vm5, %v1390_v6, %v1394_v32  ;;  %v2720_v52 = vsel %vm13606_vm6, %v2718_v17, %v2719_v31  ;;  %v1400_v62 = vshll.u32 %v1001_v18, 16  ;;  %v1008_v6 = vld [vmem:[%s13512_s26 + $0xbc] sm:$0xf] }
  0x8f   : > { %v11080_v23 = vcombine.low %v1385_v22, %v1395_v55  ;;  %12796 = vmatprep.mubr.msk.bf16.mxu0 %vm511_vm0, %v11171_v24  ;;  %v11172_v33 = vcombine.low %v2717_v25, %v2720_v52  ;;  %v1406_v36 = vshll.u32 %v1002_v41, 16  ;;  %v1410_v34 = vshrl.u32 %v1002_v41, 16  ;;  %v1010_v24 = vld [vmem:[%s13512_s26 + $0xc4] sm:$0x1] }
  0x90   : > { %12724 = vmatprep.mubr.msk.bf16.mxu1 %vm511_vm0, %v11079_v21  ;;  %v1399_v45 = vrot.slane %v1397_v56, 4  ;;  %v1402_v46 = vrot.slane %v1400_v62, 5  ;;  %v1416_v48 = vshll.u32 %v1003_v27, 16  ;;  %v1420_v54 = vshrl.u32 %v1003_v27, 16  ;;  %v2499_v56 = vld [vmem:[%s13512_s26 + $0xb4] sm:$0xe] }
  0x91   : > { %v1408_v59 = vrot.slane %v1406_v36, 5  ;;  %v1412_v60 = vrot.slane %v1410_v34, 4  ;;  %v1426_v61 = vshll.u32 %v1004_v26, 16  ;;  %v1430_v63 = vshrl.u32 %v1004_v26, 16 }
  0x92   : > { %v1403_v0 = vor.u32 %v1402_v46, %v1399_v45  ;;  %v1418_v44 = vrot.slane %v1416_v48, 5  ;;  %v1422_v50 = vrot.slane %v1420_v54, 4  ;;  %v1436_v1 = vshll.u32 %v1005_v30, 16  ;;  %v2501_v45 = vld [vmem:[%s13512_s26 + $0xbc] sm:$0xf] }
  0x93   : > { %v1413_v28 = vor.u32 %v1412_v60, %v1408_v59  ;;  %v1428_v40 = vrot.slane %v1426_v61, 5  ;;  %v1432_v51 = vrot.slane %v1430_v63, 4  ;;  %v11141_v4 = vrot.slane %v2494_v35, 9 }
  0x94   : > { %v1404_v7 = vrot.slane %v1403_v0, 4  ;;  %v1423_v8 = vor.u32 %v1422_v50, %v1418_v44  ;;  %v1438_v9 = vrot.slane %v1436_v1, 5  ;;  %v2723_v10 = vrot.slane %v2495_v39, 5 }
  0x95   : > { %12725 = vmatmul.mubr.msk.bf16.gmra.mxu1 %vm511_vm0, %v11080_v23  ;;  %12797 = vmatmul.mubr.msk.bf16.gmra.mxu0 %vm511_vm0, %v11172_v33  ;;  %v1414_v11 = vrot.slane %v1413_v28, 4  ;;  %v1433_v12 = vor.u32 %v1432_v51, %v1428_v40  ;;  %v2726_v32 = vrot.slane %v2496_v57, 5  ;;  %v2729_v14 = vrot.slane %v2497_v2, 5  ;;  %v2500_v33 = vld [vmem:[%s13512_s26 + $0xb8] sm:$0xf] }
  0x96   : > { %v1409_v37 = vsel %vm13588_vm5, %v1404_v7, %v1408_v59  ;;  %v1424_v38 = vrot.slane %v1423_v8, 4  ;;  %v2724_v42 = vsel %vm13606_vm6, %v11141_v4, %v2723_v10  ;;  %v2725_v58 = vrot.slane %v2723_v10, 4  ;;  %v2502_v59 = vld [vmem:[%s13512_s26 + $0xc0] sm:$0xf]  ;;  %v2503_v4 = vld [vmem:[%s13512_s26 + $0xc4] sm:$0x1] }
  0x97   : > { %v1419_v15 = vsel %vm13588_vm5, %v1414_v11, %v1418_v44  ;;  %v1434_v29 = vrot.slane %v1433_v12, 4  ;;  %v2728_v49 = vrot.slane %v2726_v32, 4  ;;  %v2731_v47 = vrot.slane %v2729_v14, 4 }
  0x98   : > { %v11081_v16 = vcombine.low %v1409_v37, %v1419_v15  ;;  %v1429_v17 = vsel %vm13588_vm5, %v1424_v38, %v1428_v40  ;;  %v2727_v18 = vsel %vm13606_vm6, %v2725_v58, %v2726_v32  ;;  %v2732_v19 = vrot.slane %v2498_v13, 5  ;;  %v1011_v37 = vld [vmem:[%s13512_s26 + $0xc8] sm:$0xf]  ;;  %v1012_v15 = vld [vmem:[%s13512_s26 + $0xcc] sm:$0xf] }
  0x99   : > { %v1439_v31 = vsel %vm13588_vm5, %v1434_v29, %v1438_v9  ;;  %v11173_v41 = vcombine.low %v2724_v42, %v2727_v18  ;;  %v2730_v21 = vsel %vm13606_vm6, %v2728_v49, %v2729_v14  ;;  %v1441_v22 = vshrl.u32 %v1006_v43, 16 }
  0x9a   : > { %12728 = vmatprep.mubr.msk.bf16.mxu1 %vm511_vm0, %v11081_v16  ;;  %v11082_v25 = vcombine.low %v1429_v17, %v1439_v31  ;;  %v2733_v27 = vsel %vm13606_vm6, %v2731_v47, %v2732_v19  ;;  %v1444_v55 = vshll.u32 %v1006_v43, 16  ;;  %v1450_v52 = vshll.u32 %v1007_v5, 16  ;;  %v1013_v16 = vld [vmem:[%s13512_s26 + $0xd0] sm:$0xf] }
  0x9b   : > { %12800 = vmatprep.mubr.msk.bf16.mxu0 %vm511_vm0, %v11173_v41  ;;  %v11174_v62 = vcombine.low %v2730_v21, %v2733_v27  ;;  %v1443_v26 = vrot.slane %v1441_v22, 4  ;;  %v1454_v30 = vshrl.u32 %v1007_v5, 16  ;;  %v1460_v23 = vshll.u32 %v1008_v6, 16 }
  0x9c   : > { %v1446_v36 = vrot.slane %v1444_v55, 5  ;;  %v1452_v34 = vrot.slane %v1450_v52, 5  ;;  %v1464_v35 = vshrl.u32 %v1008_v6, 16  ;;  %v1470_v39 = vshll.u32 %v1009_v20, 16 }
  0x9d   : > { %12729 = vmatmul.mubr.msk.bf16.gmra.mxu1 %vm511_vm0, %v11082_v25  ;;  %12801 = vmatmul.mubr.msk.bf16.gmra.mxu0 %vm511_vm0, %v11174_v62  ;;  %v1456_v46 = vrot.slane %v1454_v30, 4  ;;  %v1462_v48 = vrot.slane %v1460_v23, 5  ;;  %v1474_v54 = vshrl.u32 %v1009_v20, 16  ;;  %v1480_v57 = vshll.u32 %v1010_v24, 16  ;;  %v1014_v20 = vld [vmem:[%s13512_s26 + $0xd4] sm:$0xf] }
  0x9e   : > { %v1447_v60 = vor.u32 %v1446_v36, %v1443_v26  ;;  %v1466_v61 = vrot.slane %v1464_v35, 4  ;;  %v1472_v63 = vrot.slane %v1470_v39, 5  ;;  %v11142_v0 = vrot.slane %v2499_v56, 9  ;;  %v1015_v24 = vld [vmem:[%s13512_s26 + $0xd8] sm:$0x1] }
  0x9f   : > { %v1457_v44 = vor.u32 %v1456_v46, %v1452_v34  ;;  %v1476_v50 = vrot.slane %v1474_v54, 4  ;;  %v1482_v1 = vrot.slane %v1480_v57, 5  ;;  %v2736_v2 = vrot.slane %v2500_v33, 5  ;;  %v2504_v25 = vld [vmem:[%s13512_s26 + $0xc8] sm:$0xe] }
  0xa0   : > { %v1448_v28 = vrot.slane %v1447_v60, 4  ;;  %v1467_v40 = vor.u32 %v1466_v61, %v1462_v48  ;;  %v2739_v51 = vrot.slane %v2501_v45, 5  ;;  %v2742_v7 = vrot.slane %v2502_v59, 5  ;;  %v2505_v62 = vld [vmem:[%s13512_s26 + $0xcc] sm:$0xf] }
  0xa1   : > { %v1458_v8 = vrot.slane %v1457_v44, 4  ;;  %v1477_v9 = vor.u32 %v1476_v50, %v1472_v63  ;;  %v2737_v10 = vsel %vm13606_vm6, %v11142_v0, %v2736_v2  ;;  %v2738_v11 = vrot.slane %v2736_v2, 4  ;;  %v2506_v36 = vld [vmem:[%s13512_s26 + $0xd0] sm:$0xf]  ;;  %v2507_v46 = vld [vmem:[%s13512_s26 + $0xd4] sm:$0xf] }
  0xa2   : > { %v1453_v12 = vsel %vm13588_vm5, %v1448_v28, %v1452_v34  ;;  %v1468_v32 = vrot.slane %v1467_v40, 4  ;;  %v2741_v13 = vrot.slane %v2739_v51, 4  ;;  %v2744_v14 = vrot.slane %v2742_v7, 4  ;;  %v2508_v60 = vld [vmem:[%s13512_s26 + $0xd8] sm:$0x1] }
  0xa3   : > { %v1463_v38 = vsel %vm13588_vm5, %v1458_v8, %v1462_v48  ;;  %v1478_v42 = vrot.slane %v1477_v9, 4  ;;  %v2740_v58 = vsel %vm13606_vm6, %v2738_v11, %v2739_v51  ;;  %v2745_v43 = vrot.slane %v2503_v4, 5  ;;  %v1016_v50 = vld [vmem:[%s13512_s26 + $0xdc] sm:$0xf]  ;;  %v1017_v51 = vld [vmem:[%s13512_s26 + $0xe0] sm:$0xf] }
  0xa4   : > { %v11083_v29 = vcombine.low %v1453_v12, %v1463_v38  ;;  %v1473_v49 = vsel %vm13588_vm5, %v1468_v32, %v1472_v63  ;;  %v11175_v47 = vcombine.low %v2737_v10, %v2740_v58  ;;  %v2743_v5 = vsel %vm13606_vm6, %v2741_v13, %v2742_v7  ;;  %v1018_v10 = vld [vmem:[%s13512_s26 + $0xe4] sm:$0xf] }
  0xa5   : > { %v1483_v17 = vsel %vm13588_vm5, %v1478_v42, %v1482_v1  ;;  %v2746_v18 = vsel %vm13606_vm6, %v2744_v14, %v2745_v43  ;;  %v1485_v19 = vshrl.u32 %v1011_v37, 16  ;;  %v1488_v6 = vshll.u32 %v1011_v37, 16  ;;  %v1019_v14 = vld [vmem:[%s13512_s26 + $0xe8] sm:$0xf] }
  0xa6   : > { %12732 = vmatprep.mubr.msk.bf16.mxu1 %vm511_vm0, %v11083_v29  ;;  %v11084_v31 = vcombine.low %v1473_v49, %v1483_v17  ;;  %12804 = vmatprep.mubr.msk.bf16.mxu0 %vm511_vm0, %v11175_v47  ;;  %v11176_v41 = vcombine.low %v2743_v5, %v2746_v18  ;;  %v1494_v21 = vshll.u32 %v1012_v15, 16  ;;  %v1498_v22 = vshrl.u32 %v1012_v15, 16  ;;  %v1020_v47 = vld [vmem:[%s13512_s26 + $0xec] sm:$0x1] }
  0xa7   : > { %v1487_v27 = vrot.slane %v1485_v19, 4  ;;  %v1490_v55 = vrot.slane %v1488_v6, 5  ;;  %v1504_v52 = vshll.u32 %v1013_v16, 16  ;;  %v1508_v56 = vshrl.u32 %v1013_v16, 16  ;;  %v2509_v19 = vld [vmem:[%s13512_s26 + $0xdc] sm:$0xe] }
  0xa8   : > { %12733 = vmatmul.mubr.msk.bf16.gmra.mxu1 %vm511_vm0, %v11084_v31  ;;  %12805 = vmatmul.mubr.msk.bf16.gmra.mxu0 %vm511_vm0, %v11176_v41  ;;  %v1496_v26 = vrot.slane %v1494_v21, 5  ;;  %v1500_v30 = vrot.slane %v1498_v22, 4  ;;  %v1514_v23 = vshll.u32 %v1014_v20, 16  ;;  %v1518_v33 = vshrl.u32 %v1014_v20, 16  ;;  %v2510_v6 = vld [vmem:[%s13512_s26 + $0xe0] sm:$0xf] }
  0xa9   : > { %v1491_v34 = vor.u32 %v1490_v55, %v1487_v27  ;;  %v1506_v35 = vrot.slane %v1504_v52, 5  ;;  %v1510_v39 = vrot.slane %v1508_v56, 4  ;;  %v1524_v45 = vshll.u32 %v1015_v24, 16  ;;  %v2511_v22 = vld [vmem:[%s13512_s26 + $0xe4] sm:$0xf] }
  0xaa   : > { %v1501_v48 = vor.u32 %v1500_v30, %v1496_v26  ;;  %v1516_v54 = vrot.slane %v1514_v23, 5  ;;  %v1520_v57 = vrot.slane %v1518_v33, 4  ;;  %v11143_v59 = vrot.slane %v2504_v25, 9  ;;  %v2512_v52 = vld [vmem:[%s13512_s26 + $0xe8] sm:$0xf] }
  0xab   : > { %v1492_v61 = vrot.slane %v1491_v34, 4  ;;  %v1511_v63 = vor.u32 %v1510_v39, %v1506_v35  ;;  %v1526_v0 = vrot.slane %v1524_v45, 5  ;;  %v2749_v44 = vrot.slane %v2505_v62, 5 }
  0xac   : > { %v1502_v1 = vrot.slane %v1501_v48, 4  ;;  %v1521_v2 = vor.u32 %v1520_v57, %v1516_v54  ;;  %v2752_v28 = vrot.slane %v2506_v36, 5  ;;  %v2755_v40 = vrot.slane %v2507_v46, 5 }
  0xad   : > { %v1497_v4 = vsel %vm13588_vm5, %v1492_v61, %v1496_v26  ;;  %v1512_v7 = vrot.slane %v1511_v63, 4  ;;  %v2750_v8 = vsel %vm13606_vm6, %v11143_v59, %v2749_v44  ;;  %v2751_v9 = vrot.slane %v2749_v44, 4 }
  0xae   : > { %v1507_v11 = vsel %vm13588_vm5, %v1502_v1, %v1506_v35  ;;  %v1522_v12 = vrot.slane %v1521_v2, 4  ;;  %v2754_v32 = vrot.slane %v2752_v28, 4  ;;  %v2757_v13 = vrot.slane %v2755_v40, 4  ;;  %v2513_v35 = vld [vmem:[%s13512_s26 + $0xec] sm:$0x1] }
  0xaf   : > { %v11085_v37 = vcombine.low %v1497_v4, %v1507_v11  ;;  %v1517_v38 = vsel %vm13588_vm5, %v1512_v7, %v1516_v54  ;;  %v2753_v42 = vsel %vm13606_vm6, %v2751_v9, %v2752_v28  ;;  %v2758_v58 = vrot.slane %v2508_v60, 5  ;;  %v1022_v9 = vld [vmem:[%s13512_s26 + $0xf4] sm:$0xf] }
  0xb0   : > { %v1527_v43 = vsel %vm13588_vm5, %v1522_v12, %v1526_v0  ;;  %v11177_v15 = vcombine.low %v2750_v8, %v2753_v42  ;;  %v2756_v29 = vsel %vm13606_vm6, %v2754_v32, %v2755_v40  ;;  %v1529_v49 = vshrl.u32 %v1016_v50, 16  ;;  %v1021_v40 = vld [vmem:[%s13512_s26 + $0xf0] sm:$0xf] }
  0xb1   : > { %12736 = vmatprep.mubr.msk.bf16.mxu1 %vm511_vm0, %v11085_v37  ;;  %v11086_v5 = vcombine.low %v1517_v38, %v1527_v43  ;;  %v2759_v16 = vsel %vm13606_vm6, %v2757_v13, %v2758_v58  ;;  %v1532_v17 = vshll.u32 %v1016_v50, 16  ;;  %v1538_v18 = vshll.u32 %v1017_v51, 16  ;;  %v1025_v37 = vld [vmem:[%s13512_s26 + $0x100] sm:$0x1] }
  0xb2   : > { %12808 = vmatprep.mubr.msk.bf16.mxu0 %vm511_vm0, %v11177_v15  ;;  %v11178_v20 = vcombine.low %v2756_v29, %v2759_v16  ;;  %v1531_v31 = vrot.slane %v1529_v49, 4  ;;  %v1542_v41 = vshrl.u32 %v1017_v51, 16  ;;  %v1548_v21 = vshll.u32 %v1018_v10, 16 }
  0xb3   : > { %12737 = vmatmul.mubr.msk.bf16.gmra.mxu1 %vm511_vm0, %v11086_v5  ;;  %v1534_v24 = vrot.slane %v1532_v17, 5  ;;  %v1540_v25 = vrot.slane %v1538_v18, 5  ;;  %v1552_v27 = vshrl.u32 %v1018_v10, 16  ;;  %v1558_v55 = vshll.u32 %v1019_v14, 16  ;;  %v1023_v10 = vld [vmem:[%s13512_s26 + $0xf8] sm:$0xf] }
  0xb4   : > { %12809 = vmatmul.mubr.msk.bf16.gmra.mxu0 %vm511_vm0, %v11178_v20  ;;  %v1544_v56 = vrot.slane %v1542_v41, 4  ;;  %v1550_v62 = vrot.slane %v1548_v21, 5  ;;  %v1562_v26 = vshrl.u32 %v1019_v14, 16  ;;  %v1568_v30 = vshll.u32 %v1020_v47, 16  ;;  %v1024_v14 = vld [vmem:[%s13512_s26 + $0xfc] sm:$0xf] }
  0xb5   : > { %v1535_v23 = vor.u32 %v1534_v24, %v1531_v31  ;;  %v1554_v33 = vrot.slane %v1552_v27, 4  ;;  %v1560_v36 = vrot.slane %v1558_v55, 5  ;;  %v11144_v34 = vrot.slane %v2509_v19, 9  ;;  %v2514_v5 = vld [vmem:[%s13512_s26 + $0xf0] sm:$0xe] }
  0xb6   : > { %v1545_v39 = vor.u32 %v1544_v56, %v1540_v25  ;;  %v1564_v45 = vrot.slane %v1562_v26, 4  ;;  %v1570_v46 = vrot.slane %v1568_v30, 5  ;;  %v2762_v48 = vrot.slane %v2510_v6, 5  ;;  %v2515_v6 = vld [vmem:[%s13512_s26 + $0xf4] sm:$0xf] }
  0xb7   : > { %v1536_v54 = vrot.slane %v1535_v23, 4  ;;  %v1555_v57 = vor.u32 %v1554_v33, %v1550_v62  ;;  %v2765_v59 = vrot.slane %v2511_v22, 5  ;;  %v2768_v60 = vrot.slane %v2512_v52, 5  ;;  %v2516_v22 = vld [vmem:[%s13512_s26 + $0xf8] sm:$0xf] }
  0xb8   : > { %v1546_v61 = vrot.slane %v1545_v39, 4  ;;  %v1565_v63 = vor.u32 %v1564_v45, %v1560_v36  ;;  %v2763_v0 = vsel %vm13606_vm6, %v11144_v34, %v2762_v48  ;;  %v2764_v44 = vrot.slane %v2762_v48, 4  ;;  %v2517_v52 = vld [vmem:[%s13512_s26 + $0xfc] sm:$0xf]  ;;  %v2518_v23 = vld [vmem:[%s13512_s26 + $0x100] sm:$0x1] }
  0xb9   : > { %v1541_v50 = vsel %vm13588_vm5, %v1536_v54, %v1540_v25  ;;  %v1556_v1 = vrot.slane %v1555_v57, 4  ;;  %v2767_v2 = vrot.slane %v2765_v59, 4  ;;  %v2770_v28 = vrot.slane %v2768_v60, 4  ;;  %v1026_v39 = vld [vmem:[%s13512_s26 + $0x104] sm:$0xf] }
  0xba   : > { %v1551_v51 = vsel %vm13588_vm5, %v1546_v61, %v1550_v62  ;;  %v1566_v4 = vrot.slane %v1565_v63, 4  ;;  %v2766_v7 = vsel %vm13606_vm6, %v2764_v44, %v2765_v59  ;;  %v2771_v8 = vrot.slane %v2513_v35, 5 }
  0xbb   : > { %v11087_v11 = vcombine.low %v1541_v50, %v1551_v51  ;;  %v1561_v12 = vsel %vm13588_vm5, %v1556_v1, %v1560_v36  ;;  %v11179_v32 = vcombine.low %v2763_v0, %v2766_v7  ;;  %v2769_v13 = vsel %vm13606_vm6, %v2767_v2, %v2768_v60  ;;  %v1027_v1 = vld [vmem:[%s13512_s26 + $0x108] sm:$0xf]  ;;  %v1029_v7 = vld [vmem:[%s13512_s26 + $0x110] sm:$0xf] }
  0xbc   : > { %v1571_v38 = vsel %vm13588_vm5, %v1566_v4, %v1570_v46  ;;  %v2772_v42 = vsel %vm13606_vm6, %v2770_v28, %v2771_v8  ;;  %v1573_v58 = vshrl.u32 %v1021_v40, 16  ;;  %v1576_v43 = vshll.u32 %v1021_v40, 16  ;;  %v1028_v4 = vld [vmem:[%s13512_s26 + $0x10c] sm:$0xf] }
  0xbd   : > { %12740 = vmatprep.mubr.msk.bf16.mxu1 %vm511_vm0, %v11087_v11  ;;  %v11088_v15 = vcombine.low %v1561_v12, %v1571_v38  ;;  %12812 = vmatprep.mubr.msk.bf16.mxu0 %vm511_vm0, %v11179_v32  ;;  %v11180_v29 = vcombine.low %v2769_v13, %v2772_v42  ;;  %v1582_v49 = vshll.u32 %v1022_v9, 16  ;;  %v1586_v47 = vshrl.u32 %v1022_v9, 16  ;;  %v1030_v12 = vld [vmem:[%s13512_s26 + $0x114] sm:$0x1]  ;;  %v2519_v32 = vld [vmem:[%s13512_s26 + $0x104] sm:$0xe] }
  0xbe   : > { %v1575_v16 = vrot.slane %v1573_v58, 4  ;;  %v1578_v17 = vrot.slane %v1576_v43, 5  ;;  %v1592_v18 = vshll.u32 %v1023_v10, 16  ;;  %v1596_v19 = vshrl.u32 %v1023_v10, 16  ;;  %v2520_v42 = vld [vmem:[%s13512_s26 + $0x108] sm:$0xf] }
  0xbf   : > { %12741 = vmatmul.mubr.msk.bf16.gmra.mxu1 %vm511_vm0, %v11088_v15  ;;  %12813 = vmatmul.mubr.msk.bf16.gmra.mxu0 %vm511_vm0, %v11180_v29  ;;  %v1584_v20 = vrot.slane %v1582_v49, 5  ;;  %v1588_v31 = vrot.slane %v1586_v47, 4  ;;  %v1602_v41 = vshll.u32 %v1024_v14, 16  ;;  %v1606_v21 = vshrl.u32 %v1024_v14, 16  ;;  %v2521_v49 = vld [vmem:[%s13512_s26 + $0x10c] sm:$0xf] }
  0xc0   : > { %v1579_v24 = vor.u32 %v1578_v17, %v1575_v16  ;;  %v1594_v25 = vrot.slane %v1592_v18, 5  ;;  %v1598_v27 = vrot.slane %v1596_v19, 4  ;;  %v1612_v55 = vshll.u32 %v1025_v37, 16  ;;  %v2522_v47 = vld [vmem:[%s13512_s26 + $0x110] sm:$0xf] }
  0xc1   : > { %v1589_v56 = vor.u32 %v1588_v31, %v1584_v20  ;;  %v1604_v62 = vrot.slane %v1602_v41, 5  ;;  %v1608_v26 = vrot.slane %v1606_v21, 4  ;;  %v11145_v30 = vrot.slane %v2514_v5, 9 }
  0xc2   : > { %v1580_v33 = vrot.slane %v1579_v24, 4  ;;  %v1599_v36 = vor.u32 %v1598_v27, %v1594_v25  ;;  %v1614_v34 = vrot.slane %v1612_v55, 5  ;;  %v2775_v35 = vrot.slane %v2515_v6, 5 }
  0xc3   : > { %v1590_v45 = vrot.slane %v1589_v56, 4  ;;  %v1609_v46 = vor.u32 %v1608_v26, %v1604_v62  ;;  %v2778_v48 = vrot.slane %v2516_v22, 5  ;;  %v2781_v54 = vrot.slane %v2517_v52, 5 }
  0xc4   : > { %v1585_v57 = vsel %vm13588_vm5, %v1580_v33, %v1584_v20  ;;  %v1600_v59 = vrot.slane %v1599_v36, 4  ;;  %v2776_v60 = vsel %vm13606_vm6, %v11145_v30, %v2775_v35  ;;  %v2777_v61 = vrot.slane %v2775_v35, 4  ;;  %v2523_v30 = vld [vmem:[%s13512_s26 + $0x114] sm:$0x1] }
  0xc5   : > { %v1595_v63 = vsel %vm13588_vm5, %v1590_v45, %v1594_v25  ;;  %v1610_v0 = vrot.slane %v1609_v46, 4  ;;  %v2780_v44 = vrot.slane %v2778_v48, 4  ;;  %v2783_v50 = vrot.slane %v2781_v54, 4  ;;  %v1032_v45 = vld [vmem:[%s13512_s26 + $0x11c] sm:$0xf] }
  0xc6   : > { %v11089_v2 = vcombine.low %v1585_v57, %v1595_v63  ;;  %v1605_v28 = vsel %vm13588_vm5, %v1600_v59, %v1604_v62  ;;  %v2779_v40 = vsel %vm13606_vm6, %v2777_v61, %v2778_v48  ;;  %v2784_v51 = vrot.slane %v2518_v23, 5  ;;  %v1033_v59 = vld [vmem:[%s13512_s26 + $0x120] sm:$0xf] }
  0xc7   : > { %v1615_v8 = vsel %vm13588_vm5, %v1610_v0, %v1614_v34  ;;  %v11181_v9 = vcombine.low %v2776_v60, %v2779_v40  ;;  %v2782_v10 = vsel %vm13606_vm6, %v2780_v44, %v2781_v54  ;;  %v1617_v11 = vshrl.u32 %v1026_v39, 16  ;;  %v1034_v44 = vld [vmem:[%s13512_s26 + $0x124] sm:$0xf] }
  0xc8   : > { %12744 = vmatprep.mubr.msk.bf16.mxu1 %vm511_vm0, %v11089_v2  ;;  %v11090_v13 = vcombine.low %v1605_v28, %v1615_v8  ;;  %v2785_v14 = vsel %vm13606_vm6, %v2783_v50, %v2784_v51  ;;  %v1620_v37 = vshll.u32 %v1026_v39, 16  ;;  %v1626_v38 = vshll.u32 %v1027_v1, 16  ;;  %v1031_v39 = vld [vmem:[%s13512_s26 + $0x118] sm:$0xf]  ;;  %v1035_v8 = vld [vmem:[%s13512_s26 + $0x128] sm:$0x1] }
  0xc9   : > { %12816 = vmatprep.mubr.msk.bf16.mxu0 %vm511_vm0, %v11181_v9  ;;  %v11182_v58 = vcombine.low %v2782_v10, %v2785_v14  ;;  %v1619_v43 = vrot.slane %v1617_v11, 4  ;;  %v1630_v15 = vshrl.u32 %v1027_v1, 16  ;;  %v1636_v29 = vshll.u32 %v1028_v4, 16 }
  0xca   : > { %12745 = vmatmul.mubr.msk.bf16.gmra.mxu1 %vm511_vm0, %v11090_v13  ;;  %v1622_v5 = vrot.slane %v1620_v37, 5  ;;  %v1628_v16 = vrot.slane %v1626_v38, 5  ;;  %v1640_v17 = vshrl.u32 %v1028_v4, 16  ;;  %v1646_v18 = vshll.u32 %v1029_v7, 16  ;;  %v2525_v13 = vld [vmem:[%s13512_s26 + $0x11c] sm:$0xf] }
  0xcb   : > { %12817 = vmatmul.mubr.msk.bf16.gmra.mxu0 %vm511_vm0, %v11182_v58  ;;  %v1632_v19 = vrot.slane %v1630_v15, 4  ;;  %v1638_v6 = vrot.slane %v1636_v29, 5  ;;  %v1650_v20 = vshrl.u32 %v1029_v7, 16  ;;  %v1656_v31 = vshll.u32 %v1030_v12, 16  ;;  %v2526_v58 = vld [vmem:[%s13512_s26 + $0x120] sm:$0xf] }
  0xcc   : > { %v1623_v41 = vor.u32 %v1622_v5, %v1619_v43  ;;  %v1642_v21 = vrot.slane %v1640_v17, 4  ;;  %v1648_v22 = vrot.slane %v1646_v18, 5  ;;  %v11146_v24 = vrot.slane %v2519_v32, 9  ;;  %v2524_v32 = vld [vmem:[%s13512_s26 + $0x118] sm:$0xe] }
  0xcd   : > { %v1633_v25 = vor.u32 %v1632_v19, %v1628_v16  ;;  %v1652_v27 = vrot.slane %v1650_v20, 4  ;;  %v1658_v55 = vrot.slane %v1656_v31, 5  ;;  %v2788_v52 = vrot.slane %v2520_v42, 5 }
  0xce   : > { %v1624_v56 = vrot.slane %v1623_v41, 4  ;;  %v1643_v62 = vor.u32 %v1642_v21, %v1638_v6  ;;  %v2791_v26 = vrot.slane %v2521_v49, 5  ;;  %v2794_v23 = vrot.slane %v2522_v47, 5  ;;  %v2527_v47 = vld [vmem:[%s13512_s26 + $0x124] sm:$0xf] }
  0xcf   : > { %v1634_v33 = vrot.slane %v1633_v25, 4  ;;  %v1653_v36 = vor.u32 %v1652_v27, %v1648_v22  ;;  %v2789_v34 = vsel %vm13606_vm6, %v11146_v24, %v2788_v52  ;;  %v2790_v35 = vrot.slane %v2788_v52, 4 }
  0xd0   : > { %v1629_v46 = vsel %vm13588_vm5, %v1624_v56, %v1628_v16  ;;  %v1644_v48 = vrot.slane %v1643_v62, 4  ;;  %v2793_v54 = vrot.slane %v2791_v26, 4  ;;  %v2796_v57 = vrot.slane %v2794_v23, 4 }
  0xd1   : > { %v1639_v60 = vsel %vm13588_vm5, %v1634_v33, %v1638_v6  ;;  %v1654_v61 = vrot.slane %v1653_v36, 4  ;;  %v2792_v63 = vsel %vm13606_vm6, %v2790_v35, %v2791_v26  ;;  %v2797_v0 = vrot.slane %v2523_v30, 5 }
  0xd2   : > { %v11091_v50 = vcombine.low %v1629_v46, %v1639_v60  ;;  %v1649_v1 = vsel %vm13588_vm5, %v1644_v48, %v1648_v22  ;;  %v11183_v2 = vcombine.low %v2789_v34, %v2792_v63  ;;  %v2795_v28 = vsel %vm13606_vm6, %v2793_v54, %v2794_v23  ;;  %v2528_v22 = vld [vmem:[%s13512_s26 + $0x128] sm:$0x1] }
  0xd3   : > { %v1659_v40 = vsel %vm13588_vm5, %v1654_v61, %v1658_v55  ;;  %v2798_v51 = vsel %vm13606_vm6, %v2796_v57, %v2797_v0  ;;  %v1661_v4 = vshrl.u32 %v1031_v39, 16  ;;  %v1664_v7 = vshll.u32 %v1031_v39, 16  ;;  %v1036_v39 = vld [vmem:[%s13512_s26 + $0x12c] sm:$0xf]  ;;  %v1038_v61 = vld [vmem:[%s13512_s26 + $0x134] sm:$0xf] }
  0xd4   : > { %12748 = vmatprep.mubr.msk.bf16.mxu1 %vm511_vm0, %v11091_v50  ;;  %v11092_v9 = vcombine.low %v1649_v1, %v1659_v40  ;;  %12820 = vmatprep.mubr.msk.bf16.mxu0 %vm511_vm0, %v11183_v2  ;;  %v11184_v10 = vcombine.low %v2795_v28, %v2798_v51  ;;  %v1670_v11 = vshll.u32 %v1032_v45, 16  ;;  %v1674_v12 = vshrl.u32 %v1032_v45, 16  ;;  %v1037_v45 = vld [vmem:[%s13512_s26 + $0x130] sm:$0xf]  ;;  %v1039_v1 = vld [vmem:[%s13512_s26 + $0x138] sm:$0xf] }
  0xd5   : > { %v1663_v14 = vrot.slane %v1661_v4, 4  ;;  %v1666_v37 = vrot.slane %v1664_v7, 5  ;;  %v1680_v38 = vshll.u32 %v1033_v59, 16  ;;  %v1684_v42 = vshrl.u32 %v1033_v59, 16  ;;  %v1040_v2 = vld [vmem:[%s13512_s26 + $0x13c] sm:$0x1] }
  0xd6   : > { %12749 = vmatmul.mubr.msk.bf16.gmra.mxu1 %vm511_vm0, %v11092_v9  ;;  %12821 = vmatmul.mubr.msk.bf16.gmra.mxu0 %vm511_vm0, %v11184_v10  ;;  %v1672_v43 = vrot.slane %v1670_v11, 5  ;;  %v1676_v15 = vrot.slane %v1674_v12, 4  ;;  %v1690_v29 = vshll.u32 %v1034_v44, 16  ;;  %v1694_v49 = vshrl.u32 %v1034_v44, 16  ;;  %v2529_v9 = vld [vmem:[%s13512_s26 + $0x12c] sm:$0xe] }
  0xd7   : > { %v1667_v5 = vor.u32 %v1666_v37, %v1663_v14  ;;  %v1682_v16 = vrot.slane %v1680_v38, 5  ;;  %v1686_v17 = vrot.slane %v1684_v42, 4  ;;  %v1700_v18 = vshll.u32 %v1035_v8, 16 }
  0xd8   : > { %v1677_v20 = vor.u32 %v1676_v15, %v1672_v43  ;;  %v1692_v31 = vrot.slane %v1690_v29, 5  ;;  %v1696_v41 = vrot.slane %v1694_v49, 4  ;;  %v11147_v21 = vrot.slane %v2524_v32, 9 }
  0xd9   : > { %v1668_v24 = vrot.slane %v1667_v5, 4  ;;  %v1687_v25 = vor.u32 %v1686_v17, %v1682_v16  ;;  %v1702_v27 = vrot.slane %v1700_v18, 5  ;;  %v2801_v55 = vrot.slane %v2525_v13, 5  ;;  %v2531_v5 = vld [vmem:[%s13512_s26 + $0x134] sm:$0xf] }
  0xda   : > { %v1678_v62 = vrot.slane %v1677_v20, 4  ;;  %v1697_v26 = vor.u32 %v1696_v41, %v1692_v31  ;;  %v2804_v30 = vrot.slane %v2526_v58, 5  ;;  %v2807_v23 = vrot.slane %v2527_v47, 5 }
  0xdb   : > { %v1673_v33 = vsel %vm13588_vm5, %v1668_v24, %v1672_v43  ;;  %v1688_v36 = vrot.slane %v1687_v25, 4  ;;  %v2802_v34 = vsel %vm13606_vm6, %v11147_v21, %v2801_v55  ;;  %v2803_v35 = vrot.slane %v2801_v55, 4  ;;  %v2530_v43 = vld [vmem:[%s13512_s26 + $0x130] sm:$0xf] }
  0xdc   : > { %v1683_v54 = vsel %vm13588_vm5, %v1678_v62, %v1682_v16  ;;  %v1698_v57 = vrot.slane %v1697_v26, 4  ;;  %v2806_v59 = vrot.slane %v2804_v30, 4  ;;  %v2809_v60 = vrot.slane %v2807_v23, 4  ;;  %v2533_v26 = vld [vmem:[%s13512_s26 + $0x13c] sm:$0x1] }
  0xdd   : > { %v12658_v19 = vpop.f32.mrf.mxu1  ;;  %v12626_v6 = vpop.f32.mrf.mxu0  ;;  %v11093_v63 = vcombine.low %v1673_v33, %v1683_v54  ;;  %v1693_v0 = vsel %vm13588_vm5, %v1688_v36, %v1692_v31  ;;  %v2805_v44 = vsel %vm13606_vm6, %v2803_v35, %v2804_v30  ;;  %v2810_v50 = vrot.slane %v2528_v22, 5  ;;  %v2532_v31 = vld [vmem:[%s13512_s26 + $0x138] sm:$0xf] }
  0xde   : > { %931 = vst.msk [vmem:[#allocation2 + $0x110] sm:$0xff] %vm511_vm0, %v12658_v19  ;;  %899 = vst.msk [vmem:[#allocation2 + $0x10] sm:$0xff] %vm511_vm0, %v12626_v6  ;;  %v1703_v51 = vsel %vm13588_vm5, %v1698_v57, %v1702_v27  ;;  %v11185_v4 = vcombine.low %v2802_v34, %v2805_v44  ;;  %v2808_v7 = vsel %vm13606_vm6, %v2806_v59, %v2807_v23  ;;  %v1705_v8 = vshrl.u32 %v1036_v39, 16  ;;  %v11365_v34 = vld [vmem:[%s13512_s26 + $0x14] sm:$0xf] }
  0xdf   : > { %v770_v52 = vpop.f32.mrf.mxu1  ;;  %v642_v56 = vpop.f32.mrf.mxu0  ;;  %12752 = vmatprep.mubr.msk.bf16.mxu1 %vm511_vm0, %v11093_v63  ;;  %v11094_v10 = vcombine.low %v1693_v0, %v1703_v51  ;;  %v2811_v11 = vsel %vm13606_vm6, %v2809_v60, %v2810_v50  ;;  %v1708_v12 = vshll.u32 %v1036_v39, 16  ;;  %v1714_v32 = vshll.u32 %v1037_v45, 16  ;;  %v11366_v57 = vld [vmem:[%s13512_s26 + $0x18] sm:$0xf] }
  0xe0   : > { %929 = vst.msk [vmem:[#allocation2 + $0x100] sm:$0xff] %vm511_vm0, %v770_v52  ;;  %897 = vst.msk [vmem:[#allocation2] sm:$0xff] %vm511_vm0, %v642_v56  ;;  %12824 = vmatprep.mubr.msk.bf16.mxu0 %vm511_vm0, %v11185_v4  ;;  %v11186_v37 = vcombine.low %v2808_v7, %v2811_v11  ;;  %v1707_v38 = vrot.slane %v1705_v8, 4  ;;  %v1718_v42 = vshrl.u32 %v1037_v45, 16  ;;  %v1724_v58 = vshll.u32 %v1038_v61, 16  ;;  %v13349_v8 = vld [vmem:[%s13512_s26 + $0x14] sm:$0xff]  }
  0xe1   : > { %v12659_v46 = vpop.f32.mrf.mxu1  ;;  %v12627_v48 = vpop.f32.mrf.mxu0  ;;  %12753 = vmatmul.mubr.msk.bf16.gmra.mxu1 %vm511_vm0, %v11094_v10  ;;  %v1710_v15 = vrot.slane %v1708_v12, 5  ;;  %v1716_v29 = vrot.slane %v1714_v32, 5  ;;  %v1728_v49 = vshrl.u32 %v1038_v61, 16  ;;  %v1734_v47 = vshll.u32 %v1039_v1, 16  ;;  %v11368_v10 = vld [vmem:[%s13512_s26 + $0x20] sm:$0xf] }
  0xe2   : > { %932 = vst.msk [vmem:[#allocation2 + $0x118] sm:$0xff] %vm511_vm0, %v12659_v46  ;;  %900 = vst.msk [vmem:[#allocation2 + $0x18] sm:$0xff] %vm511_vm0, %v12627_v48  ;;  %12825 = vmatmul.mubr.msk.bf16.gmra.mxu0 %vm511_vm0, %v11186_v37  ;;  %v1720_v18 = vrot.slane %v1718_v42, 4  ;;  %v1726_v19 = vrot.slane %v1724_v58, 5  ;;  %v1738_v6 = vshrl.u32 %v1039_v1, 16  ;;  %v1744_v20 = vshll.u32 %v1040_v2, 16 }
  0xe3   : > { %v773_v28 = vpop.f32.mrf.mxu1  ;;  %v645_v40 = vpop.f32.mrf.mxu0  ;;  %v1711_v41 = vor.u32 %v1710_v15, %v1707_v38  ;;  %v1730_v21 = vrot.slane %v1728_v49, 4  ;;  %v1736_v22 = vrot.slane %v1734_v47, 5  ;;  %v11148_v24 = vrot.slane %v2529_v9, 9  ;;  %v11367_v9 = vld [vmem:[%s13512_s26 + $0x1c] sm:$0xf] }
  0xe4   : > { %930 = vst.msk [vmem:[#allocation2 + $0x108] sm:$0xff] %vm511_vm0, %v773_v28  ;;  %898 = vst.msk [vmem:[#allocation2 + $0x8] sm:$0xff] %vm511_vm0, %v645_v40  ;;  %v1721_v55 = vor.u32 %v1720_v18, %v1716_v29  ;;  %v1740_v52 = vrot.slane %v1738_v6, 4  ;;  %v1746_v56 = vrot.slane %v1744_v20, 5  ;;  %v2814_v62 = vrot.slane %v2530_v43, 5 }
  0xe5   : > { %v12662_v13 = vpop.f32.mrf.mxu1  ;;  %v12630_v14 = vpop.f32.mrf.mxu0  ;;  %v1712_v30 = vrot.slane %v1711_v41, 4  ;;  %v1731_v23 = vor.u32 %v1730_v21, %v1726_v19  ;;  %v2817_v33 = vrot.slane %v2531_v5, 5  ;;  %v2820_v36 = vrot.slane %v2532_v31, 5  ;;  %v11369_v38 = vld [vmem:[%s13512_s26 + $0x24] sm:$0x1] }
  0xe6   : > { %935 = vst.msk [vmem:[#allocation2 + $0x130] sm:$0xff] %vm511_vm0, %v12662_v13  ;;  %903 = vst.msk [vmem:[#allocation2 + $0x30] sm:$0xff] %vm511_vm0, %v12630_v14  ;;  %v1722_v45 = vrot.slane %v1721_v55, 4  ;;  %v1741_v46 = vor.u32 %v1740_v52, %v1736_v22  ;;  %v2815_v48 = vsel %vm13606_vm6, %v11148_v24, %v2814_v62  ;;  %v2816_v54 = vrot.slane %v2814_v62, 4  ;;  %v11370_v42 = vld [vmem:[%s13512_s26 + $0x28] sm:$0xf] }
  0xe7   : > { %v786_v16 = vpop.f32.mrf.mxu1  ;;  %v658_v17 = vpop.f32.mrf.mxu0  ;;  %v1717_v59 = vsel %vm13588_vm5, %v1712_v30, %v1716_v29  ;;  %v1732_v60 = vrot.slane %v1731_v23, 4  ;;  %v2819_v61 = vrot.slane %v2817_v33, 4  ;;  %v2822_v63 = vrot.slane %v2820_v36, 4 }
  0xe8   : > { %933 = vst.msk [vmem:[#allocation2 + $0x120] sm:$0xff] %vm511_vm0, %v786_v16  ;;  %901 = vst.msk [vmem:[#allocation2 + $0x20] sm:$0xff] %vm511_vm0, %v658_v17  ;;  %v1727_v50 = vsel %vm13588_vm5, %v1722_v45, %v1726_v19  ;;  %v1742_v1 = vrot.slane %v1741_v46, 4  ;;  %v2818_v2 = vsel %vm13606_vm6, %v2816_v54, %v2817_v33  ;;  %v2823_v28 = vrot.slane %v2533_v26, 5  ;;  %v11371_v19 = vld [vmem:[%s13512_s26 + $0x2c] sm:$0xf] }
  0xe9   : > { %v12663_v25 = vpop.f32.mrf.mxu1  ;;  %v12631_v27 = vpop.f32.mrf.mxu0  ;;  %v11095_v40 = vcombine.low %v1717_v59, %v1727_v50  ;;  %v1737_v51 = vsel %vm13588_vm5, %v1732_v60, %v1736_v22  ;;  %v11187_v4 = vcombine.low %v2815_v48, %v2818_v2  ;;  %v2821_v7 = vsel %vm13606_vm6, %v2819_v61, %v2820_v36  ;;  %v13350_v45 = vld [vmem:[%s13512_s26 + $0x1c] sm:$0xff]   ;;  %v11373_v59 = vld [vmem:[%s13512_s26 + $0x34] sm:$0xf]  ;;  %v11374_v2 = vld [vmem:[%s13512_s26 + $0x38] sm:$0x1] }
  0xea   : > { %936 = vst.msk [vmem:[#allocation2 + $0x138] sm:$0xff] %vm511_vm0, %v12663_v25  ;;  %904 = vst.msk [vmem:[#allocation2 + $0x38] sm:$0xff] %vm511_vm0, %v12631_v27  ;;  %v1747_v32 = vsel %vm13588_vm5, %v1742_v1, %v1746_v56  ;;  %v2824_v13 = vsel %vm13606_vm6, %v2822_v63, %v2823_v28  ;;  %v4447_v14 = vshrl.u32 %v11365_v34, 16  ;;  %v4450_v37 = vshll.u32 %v11365_v34, 16 }
  0xeb   : > { %v789_v35 = vpop.f32.mrf.mxu1  ;;  %v661_v39 = vpop.f32.mrf.mxu0  ;;  %12756 = vmatprep.mubr.msk.bf16.mxu1 %vm511_vm0, %v11095_v40  ;;  %v11096_v58 = vcombine.low %v1737_v51, %v1747_v32  ;;  %12828 = vmatprep.mubr.msk.bf16.mxu0 %vm511_vm0, %v11187_v4  ;;  %v11188_v43 = vcombine.low %v2821_v7, %v2824_v13  ;;  %v4456_v15 = vshll.u32 %v11366_v57, 16  ;;  %v4460_v29 = vshrl.u32 %v11366_v57, 16  ;;  %v11375_v7 = vld [vmem:[%s13512_s26 + $0x3c] sm:$0xf] }
  0xec   : > { %934 = vst.msk [vmem:[#allocation2 + $0x128] sm:$0xff] %vm511_vm0, %v789_v35  ;;  %902 = vst.msk [vmem:[#allocation2 + $0x28] sm:$0xff] %vm511_vm0, %v661_v39  ;;  %v4449_v5 = vrot.slane %v4447_v14, 4  ;;  %v4452_v16 = vrot.slane %v4450_v37, 5  ;;  %v4466_v17 = vshll.u32 %v11367_v9, 16  ;;  %v4470_v18 = vshrl.u32 %v11367_v9, 16 }
  0xed   : > { %v12666_v0 = vpop.f32.mrf.mxu1  ;;  %v12634_v44 = vpop.f32.mrf.mxu0  ;;  %12757 = vmatmul.mubr.msk.bf16.gmra.mxu1 %vm511_vm0, %v11096_v58  ;;  %12829 = vmatmul.mubr.msk.bf16.gmra.mxu0 %vm511_vm0, %v11188_v43  ;;  %v4458_v6 = vrot.slane %v4456_v15, 5  ;;  %v4462_v20 = vrot.slane %v4460_v29, 4  ;;  %v4476_v31 = vshll.u32 %v11368_v10, 16  ;;  %v4480_v41 = vshrl.u32 %v11368_v10, 16  ;;  %v11372_v35 = vld [vmem:[%s13512_s26 + $0x30] sm:$0xf] }
  0xee   : > { %939 = vst.msk [vmem:[#allocation2 + $0x150] sm:$0xff] %vm511_vm0, %v12666_v0  ;;  %907 = vst.msk [vmem:[#allocation2 + $0x50] sm:$0xff] %vm511_vm0, %v12634_v44  ;;  %12840 = vmatprep.mubr.msk.bf16.mxu1 %vm511_vm0, %v13349_v8  ;;  %v4453_v24 = vor.u32 %v4452_v16, %v4449_v5  ;;  %v4468_v25 = vrot.slane %v4466_v17, 5  ;;  %v4472_v27 = vrot.slane %v4470_v18, 4  ;;  %v4486_v55 = vshll.u32 %v11369_v38, 16  ;;  %v13352_v44 = vld [vmem:[%s13512_s26 + $0x28] sm:$0xff]  }
  0xef   : > { %v802_v11 = vpop.f32.mrf.mxu1  ;;  %v674_v12 = vpop.f32.mrf.mxu0  ;;  %v4463_v52 = vor.u32 %v4462_v20, %v4458_v6  ;;  %v4478_v56 = vrot.slane %v4476_v31, 5  ;;  %v4482_v62 = vrot.slane %v4480_v41, 4  ;;  %v4491_v26 = vshrl.u32 %v11370_v42, 16  ;;  %v13361_v9 = vld [vmem:[%s17387_s1 + $0xb0] sm:$0xff]   ;;  %v14280_v14 = vld [vmem:[%s13512_s26 + $0x40] sm:$0xf] }
  0xf0   : > { %937 = vst.msk [vmem:[#allocation2 + $0x140] sm:$0xff] %vm511_vm0, %v802_v11  ;;  %905 = vst.msk [vmem:[#allocation2 + $0x40] sm:$0xff] %vm511_vm0, %v674_v12  ;;  %v4454_v33 = vrot.slane %v4453_v24, 4  ;;  %v4473_v36 = vor.u32 %v4472_v27, %v4468_v25  ;;  %v4488_v34 = vrot.slane %v4486_v55, 5  ;;  %v4494_v39 = vshll.u32 %v11370_v42, 16  ;;  %v14290_v29 = vld [vmem:[%s17387_s1 + $0xd0] sm:$0xff]  }
  0xf1   : > { %v12667_v49 = vpop.f32.mrf.mxu1  ;;  %v12635_v47 = vpop.f32.mrf.mxu0  ;;  %v4464_v46 = vrot.slane %v4463_v52, 4  ;;  %v4483_v48 = vor.u32 %v4482_v62, %v4478_v56  ;;  %v4493_v54 = vrot.slane %v4491_v26, 4  ;;  %v4500_v57 = vshll.u32 %v11371_v19, 16  ;;  %v11377_v27 = vld [vmem:[%s13512_s26 + $0x44] sm:$0xf]  ;;  %v13353_v52 = vld [vmem:[%s13512_s26 + $0x30] sm:$0xff]  }
  0xf2   : > { %940 = vst.msk [vmem:[#allocation2 + $0x158] sm:$0xff] %vm511_vm0, %v12667_v49  ;;  %908 = vst.msk [vmem:[#allocation2 + $0x58] sm:$0xff] %vm511_vm0, %v12635_v47  ;;  %v4459_v63 = vsel %vm13588_vm5, %v4454_v33, %v4458_v6  ;;  %v4474_v0 = vrot.slane %v4473_v36, 4  ;;  %v4496_v50 = vrot.slane %v4494_v39, 5  ;;  %v4504_v1 = vshrl.u32 %v11371_v19, 16  ;;  %v13429_v49 = vld [vmem:[%s17387_s1 + $0xb8] sm:$0xff]  }
  0xf3   : > { %v805_v21 = vpop.f32.mrf.mxu1  ;;  %v677_v22 = vpop.f32.mrf.mxu0  ;;  %v4469_v28 = vsel %vm13588_vm5, %v4464_v46, %v4468_v25  ;;  %v4484_v40 = vrot.slane %v4483_v48, 4  ;;  %v14271_v51 = vrot.slane %v4500_v57, 5  ;;  %v4510_v4 = vshll.u32 %v11372_v35, 16  ;;  %v11378_v48 = vld [vmem:[%s13512_s26 + $0x48] sm:$0xf] }
  0xf4   : > { %938 = vst.msk [vmem:[#allocation2 + $0x148] sm:$0xff] %vm511_vm0, %v805_v21  ;;  %906 = vst.msk [vmem:[#allocation2 + $0x48] sm:$0xff] %vm511_vm0, %v677_v22  ;;  %v11453_v11 = vcombine.low %v4459_v63, %v4469_v28  ;;  %v4479_v12 = vsel %vm13588_vm5, %v4474_v0, %v4478_v56  ;;  %v4497_v32 = vor.u32 %v4496_v50, %v4493_v54  ;;  %v4506_v13 = vrot.slane %v4504_v1, 4  ;;  %v14305_v21 = vld [vmem:[%s17387_s1 + $0xa8] sm:$0xff]   ;;  %v13430_v56 = vld [vmem:[%s17387_s1 + $0xd8] sm:$0xff]  }
  0xf5   : > { %v12670_v30 = vpop.f32.mrf.mxu1  ;;  %v12638_v23 = vpop.f32.mrf.mxu0  ;;  %12841 = vmatmul.mubr.msk.bf16.vlgmr.msra.gmra.mxu1 %vm511_vm0, %v13350_v45  ;;  %v4489_v37 = vsel %vm13588_vm5, %v4484_v40, %v4488_v34  ;;  %v4512_v38 = vrot.slane %v4510_v4, 5  ;;  %v4514_v42 = vshrl.u32 %v11372_v35, 16  ;;  %v4520_v58 = vshll.u32 %v11373_v59, 16  ;;  %v11379_v54 = vld [vmem:[%s13512_s26 + $0x4c] sm:$0x1] }
  0xf6   : > { %943 = vst.msk [vmem:[#allocation2 + $0x170] sm:$0xff] %vm511_vm0, %v12670_v30  ;;  %911 = vst.msk [vmem:[#allocation2 + $0x70] sm:$0xff] %vm511_vm0, %v12638_v23  ;;  %12977 = vmatpush3.bf16.msra.mxu1 %v13429_v49  ;;  %12912 = vmatprep.mubr.msk.bf16.mxu0 %vm511_vm0, %v11453_v11  ;;  %v11454_v47 = vcombine.low %v4479_v12, %v4489_v37  ;;  %v4498_v5 = vrot.slane %v4497_v32, 4  ;;  %v4507_v16 = vor.u32 %v4506_v13, %v14271_v51  ;;  %v13355_v30 = vld [vmem:[%s13512_s26 + $0x3c] sm:$0xff]   ;;  %v14332_v63 = vld [vmem:[%s13512_s26 + $0x50] sm:$0xf] }
  0xf7   : > { %v818_v60 = vpop.f32.mrf.mxu1  ;;  %v690_v61 = vpop.f32.mrf.mxu0  ;;  %v4524_v17 = vshrl.u32 %v11373_v59, 16  ;;  %12844 = vmatprep.mubr.msk.bf16.mxu1 %vm511_vm0, %v13352_v44  ;;  %v4516_v18 = vrot.slane %v4514_v42, 4  ;;  %v14300_v19 = vrot.slane %v4520_v58, 5  ;;  %v4530_v6 = vshll.u32 %v11374_v2, 16  ;;  %12978 = vmatprep.subr.bf16.mxu1 %v13361_v9  ;;  %v13374_v50 = vld [vmem:[%s17387_s1 + $0xc8] sm:$0xff]  }
  0xf8   : > { %941 = vst.msk [vmem:[#allocation2 + $0x160] sm:$0xff] %vm511_vm0, %v818_v60  ;;  %909 = vst.msk [vmem:[#allocation2 + $0x60] sm:$0xff] %vm511_vm0, %v690_v61  ;;  %v4535_v20 = vshrl.u32 %v11375_v7, 16  ;;  %12913 = vmatmul.mubr.msk.bf16.vlgmr.msra.gmra.mxu0 %vm511_vm0, %v11454_v47  ;;  %v4503_v22 = vsel %vm13588_vm5, %v4498_v5, %v14271_v51  ;;  %v4508_v24 = vrot.slane %v4507_v16, 4  ;;  %v4538_v55 = vshll.u32 %v11375_v7, 16  ;;  %v13381_v51 = vld [vmem:[%s17387_s1 + $0xa0] sm:$0xff]  }
  0xf9   : > { %v12671_v8 = vpop.f32.mrf.mxu1  ;;  %v12639_v10 = vpop.f32.mrf.mxu0  ;;  %v4526_v25 = vrot.slane %v4524_v17, 4  ;;  %13049 = vmatpush3.bf16.msra.mxu0 %v13430_v56  ;;  %v4517_v62 = vor.u32 %v4516_v18, %v4512_v38  ;;  %v4532_v26 = vrot.slane %v4530_v6, 5  ;;  %v4544_v33 = vshll.u32 %v14280_v14, 16  ;;  %v11381_v37 = vld [vmem:[%s13512_s26 + $0x54] sm:$0xf]  ;;  %v13356_v47 = vld [vmem:[%s13512_s26 + $0x44] sm:$0xff]  }
  0xfa   : > { %944 = vst.msk [vmem:[#allocation2 + $0x178] sm:$0xff] %vm511_vm0, %v12671_v8  ;;  %912 = vst.msk [vmem:[#allocation2 + $0x78] sm:$0xff] %vm511_vm0, %v12639_v10  ;;  %v4537_v23 = vrot.slane %v4535_v20, 4  ;;  %v4513_v35 = vsel %vm13588_vm5, %v4508_v24, %v4512_v38  ;;  %v4540_v45 = vrot.slane %v4538_v55, 5  ;;  %v4548_v46 = vshrl.u32 %v14280_v14, 16  ;;  %12979 = vmatpush3.bf16.msra.mxu1 %v13361_v9  ;;  %13050 = vmatprep.subr.bf16.mxu0 %v14290_v29  ;;  %v13357_v20 = vld [vmem:[%s13512_s26 + $0x50] sm:$0xff]  }
  0xfb   : > { %v821_v43 = vpop.f32.mrf.mxu1  ;;  %v693_v15 = vpop.f32.mrf.mxu0  ;;  %v4527_v39 = vor.u32 %v4526_v25, %v14300_v19  ;;  %v11455_v57 = vcombine.low %v4503_v22, %v4513_v35  ;;  %v4518_v59 = vrot.slane %v4517_v62, 4  ;;  %v14329_v60 = vrot.slane %v4544_v33, 5  ;;  %12980 = vmatprep.subr.bf16.mxu1 %v14305_v21  ;;  %v11382_v18 = vld [vmem:[%s13512_s26 + $0x58] sm:$0xf]  ;;  %v11384_v56 = vld [vmem:[%s13512_s26 + $0x60] sm:$0x1] }
  0xfc   : > { %942 = vst.msk [vmem:[#allocation2 + $0x168] sm:$0xff] %vm511_vm0, %v821_v43  ;;  %910 = vst.msk [vmem:[#allocation2 + $0x68] sm:$0xff] %vm511_vm0, %v693_v15  ;;  %v4554_v61 = vshll.u32 %v11377_v27, 16  ;;  %v4541_v2 = vor.u32 %v4540_v45, %v4537_v23  ;;  %v4550_v28 = vrot.slane %v4548_v46, 4  ;;  %v4558_v40 = vshrl.u32 %v11377_v27, 16  ;;  %v13384_v62 = vld [vmem:[%s17387_s1 + $0xc0] sm:$0xff]  }
  0xfd   : > { %v12674_v31 = vpop.f32.mrf.mxu1  ;;  %v12642_v41 = vpop.f32.mrf.mxu0  ;;  %v4528_v1 = vrot.slane %v4527_v39, 4  ;;  %12845 = vmatmul.mubr.msk.bf16.gmra.mxu1 %vm511_vm0, %v13353_v52  ;;  %12916 = vmatprep.mubr.msk.bf16.mxu0 %vm511_vm0, %v11455_v57  ;;  %v4523_v4 = vsel %vm13588_vm5, %v4518_v59, %v14300_v19  ;;  %v4564_v8 = vshll.u32 %v11378_v48, 16  ;;  %v4568_v9 = vshrl.u32 %v11378_v48, 16 }
  0xfe   : > { %947 = vst.msk [vmem:[#allocation2 + $0x190] sm:$0xff] %vm511_vm0, %v12674_v31  ;;  %915 = vst.msk [vmem:[#allocation2 + $0x90] sm:$0xff] %vm511_vm0, %v12642_v41  ;;  %v4556_v7 = vrot.slane %v4554_v61, 5  ;;  %12848 = vmatprep.mubr.msk.bf16.mxu1 %vm511_vm0, %v13355_v30  ;;  %v4542_v32 = vrot.slane %v4541_v2, 4  ;;  %v4551_v13 = vor.u32 %v4550_v28, %v14329_v60  ;;  %v4560_v14 = vrot.slane %v4558_v40, 4  ;;  %13051 = vmatpush3.bf16.msra.mxu0 %v14290_v29 }
  0xff   : > { %v834_v36 = vpop.f32.mrf.mxu1  ;;  %v706_v34 = vpop.f32.mrf.mxu0  ;;  %v4533_v12 = vsel %vm13588_vm5, %v4528_v1, %v4532_v26  ;;  %v4566_v42 = vrot.slane %v4564_v8, 5  ;;  %v4570_v58 = vrot.slane %v4568_v9, 4  ;;  %v4574_v43 = vshll.u32 %v11379_v54, 16  ;;  %12981 = vmatpush3.bf16.msra.mxu1 %v14305_v21  ;;  %13052 = vmatprep.subr.bf16.mxu0 %v13374_v50  ;;  %v11383_v21 = vld [vmem:[%s13512_s26 + $0x5c] sm:$0xf] }
 0x100   : > { %945 = vst.msk [vmem:[#allocation2 + $0x180] sm:$0xff] %vm511_vm0, %v834_v36  ;;  %913 = vst.msk [vmem:[#allocation2 + $0x80] sm:$0xff] %vm511_vm0, %v706_v34  ;;  %v11456_v38 = vcombine.low %v4523_v4, %v4533_v12  ;;  %v4547_v5 = vsel %vm13588_vm5, %v4542_v32, %v14329_v60  ;;  %v4552_v16 = vrot.slane %v4551_v13, 4  ;;  %v4561_v17 = vor.u32 %v4560_v14, %v4556_v7  ;;  %v11385_v36 = vld [vmem:[%s13512_s26 + $0x64] sm:$0xf]  ;;  %v13358_v9 = vld [vmem:[%s13512_s26 + $0x58] sm:$0xff]  }
 0x101   : > { %v12675_v0 = vpop.f32.mrf.mxu1  ;;  %v12643_v44 = vpop.f32.mrf.mxu0  ;;  %v4579_v29 = vshrl.u32 %v14332_v63, 16  ;;  %12982 = vmatprep.subr.bf16.mxu1 %v13381_v51  ;;  %v4571_v19 = vor.u32 %v4570_v58, %v4566_v42  ;;  %v4576_v6 = vrot.slane %v4574_v43, 5  ;;  %v4582_v31 = vshll.u32 %v14332_v63, 16  ;;  %v11386_v2 = vld [vmem:[%s13512_s26 + $0x68] sm:$0xf] }
 0x102   : > { %948 = vst.msk [vmem:[#allocation2 + $0x198] sm:$0xff] %vm511_vm0, %v12675_v0  ;;  %916 = vst.msk [vmem:[#allocation2 + $0x98] sm:$0xff] %vm511_vm0, %v12643_v44  ;;  %12917 = vmatmul.mubr.msk.bf16.gmra.mxu0 %vm511_vm0, %v11456_v38  ;;  %v4588_v41 = vshll.u32 %v11381_v37, 16  ;;  %v4557_v25 = vsel %vm13588_vm5, %v4552_v16, %v4556_v7  ;;  %v4562_v27 = vrot.slane %v4561_v17, 4  ;;  %v4592_v52 = vshrl.u32 %v11381_v37, 16 }
 0x103   : > { %v837_v10 = vpop.f32.mrf.mxu1  ;;  %v709_v11 = vpop.f32.mrf.mxu0  ;;  %v4581_v55 = vrot.slane %v4579_v29, 4  ;;  %13053 = vmatpush3.bf16.msra.mxu0 %v13374_v50  ;;  %v11457_v26 = vcombine.low %v4547_v5, %v4557_v25  ;;  %v4572_v30 = vrot.slane %v4571_v19, 4  ;;  %v4584_v23 = vrot.slane %v4582_v31, 5  ;;  %12983 = vmatpush3.bf16.msra.mxu1 %v13381_v51  ;;  %v11387_v38 = vld [vmem:[%s13512_s26 + $0x6c] sm:$0xf]  ;;  %v13359_v5 = vld [vmem:[%s13512_s26 + $0x64] sm:$0xff]  }
 0x104   : > { %946 = vst.msk [vmem:[#allocation2 + $0x188] sm:$0xff] %vm511_vm0, %v837_v10  ;;  %914 = vst.msk [vmem:[#allocation2 + $0x88] sm:$0xff] %vm511_vm0, %v709_v11  ;;  %v4590_v33 = vrot.slane %v4588_v41, 5  ;;  %v4567_v39 = vsel %vm13588_vm5, %v4562_v27, %v4566_v42  ;;  %v4594_v45 = vrot.slane %v4592_v52, 4  ;;  %v4598_v46 = vshll.u32 %v11382_v18, 16  ;;  %13054 = vmatprep.subr.bf16.mxu0 %v13384_v62 }
 0x105   : > { %v12678_v15 = vpop.f32.mrf.mxu1  ;;  %v12646_v49 = vpop.f32.mrf.mxu0  ;;  %v4602_v48 = vshrl.u32 %v11382_v18, 16  ;;  %12849 = vmatmul.mubr.msk.bf16.gmra.mxu1 %vm511_vm0, %v13356_v47  ;;  %12920 = vmatprep.mubr.msk.bf16.mxu0 %vm511_vm0, %v11457_v26  ;;  %v4577_v54 = vsel %vm13588_vm5, %v4572_v30, %v4576_v6  ;;  %v4585_v57 = vor.u32 %v4584_v23, %v4581_v55  ;;  %v4608_v59 = vshll.u32 %v11383_v21, 16  ;;  %v11388_v58 = vld [vmem:[%s13512_s26 + $0x70] sm:$0xf]  ;;  %v11389_v18 = vld [vmem:[%s13512_s26 + $0x74] sm:$0x1] }
 0x106   : > { %951 = vst.msk [vmem:[#allocation2 + $0x1b0] sm:$0xff] %vm511_vm0, %v12678_v15  ;;  %919 = vst.msk [vmem:[#allocation2 + $0xb0] sm:$0xff] %vm511_vm0, %v12646_v49  ;;  %v4612_v60 = vshrl.u32 %v11383_v21, 16  ;;  %v11458_v0 = vcombine.low %v4567_v39, %v4577_v54  ;;  %12852 = vmatprep.mubr.msk.bf16.mxu1 %vm511_vm0, %v13357_v20  ;;  %v4595_v44 = vor.u32 %v4594_v45, %v4590_v33  ;;  %v4600_v50 = vrot.slane %v4598_v46, 5  ;;  %v11390_v31 = vld [vmem:[%s13512_s26 + $0x78] sm:$0xf] }
 0x107   : > { %v850_v22 = vpop.f32.mrf.mxu1  ;;  %v722_v24 = vpop.f32.mrf.mxu0  ;;  %v4604_v1 = vrot.slane %v4602_v48, 4  ;;  %13055 = vmatpush3.bf16.msra.mxu0 %v13384_v62  ;;  %v4586_v28 = vrot.slane %v4585_v57, 4  ;;  %v4610_v40 = vrot.slane %v4608_v59, 5  ;;  %v4618_v4 = vshll.u32 %v11384_v56, 16  ;;  %v11391_v55 = vld [vmem:[%s13512_s26 + $0x7c] sm:$0xf] }
 0x108   : > { %949 = vst.msk [vmem:[#allocation2 + $0x1a0] sm:$0xff] %vm511_vm0, %v850_v22  ;;  %917 = vst.msk [vmem:[#allocation2 + $0xa0] sm:$0xff] %vm511_vm0, %v722_v24  ;;  %v4614_v51 = vrot.slane %v4612_v60, 4  ;;  %v4596_v10 = vrot.slane %v4595_v44, 4  ;;  %v4623_v12 = vshrl.u32 %v11385_v36, 16  ;;  %v4626_v32 = vshll.u32 %v11385_v36, 16 }
 0x109   : > { %v12679_v34 = vpop.f32.mrf.mxu1  ;;  %v12647_v35 = vpop.f32.mrf.mxu0  ;;  %v4605_v11 = vor.u32 %v4604_v1, %v4600_v50  ;;  %v4591_v13 = vsel %vm13588_vm5, %v4586_v28, %v4590_v33  ;;  %v4620_v37 = vrot.slane %v4618_v4, 5  ;;  %v4632_v42 = vshll.u32 %v11386_v2, 16  ;;  %v13360_v59 = vld [vmem:[%s13512_s26 + $0x6c] sm:$0xff]   ;;  %v13362_v28 = vld [vmem:[%s13512_s26 + $0x78] sm:$0xff]  }
 0x10a   : > { %952 = vst.msk [vmem:[#allocation2 + $0x1b8] sm:$0xff] %vm511_vm0, %v12679_v34  ;;  %920 = vst.msk [vmem:[#allocation2 + $0xb8] sm:$0xff] %vm511_vm0, %v12647_v35  ;;  %12921 = vmatmul.mubr.msk.bf16.gmra.mxu0 %vm511_vm0, %v11458_v0  ;;  %v4615_v14 = vor.u32 %v4614_v51, %v4610_v40  ;;  %v4601_v49 = vsel %vm13588_vm5, %v4596_v10, %v4600_v50  ;;  %v4625_v16 = vrot.slane %v4623_v12, 4  ;;  %v4628_v17 = vrot.slane %v4626_v32, 5  ;;  %v11393_v51 = vld [vmem:[%s13512_s26 + $0x84] sm:$0xf] }
 0x10b   : > { %v853_v61 = vpop.f32.mrf.mxu1  ;;  %v725_v63 = vpop.f32.mrf.mxu0  ;;  %v4606_v47 = vrot.slane %v4605_v11, 4  ;;  %v11459_v29 = vcombine.low %v4591_v13, %v4601_v49  ;;  %v14404_v6 = vrot.slane %v4632_v42, 5  ;;  %v4636_v20 = vshrl.u32 %v11386_v2, 16  ;;  %v11394_v12 = vld [vmem:[%s13512_s26 + $0x88] sm:$0x1] }
 0x10c   : > { %950 = vst.msk [vmem:[#allocation2 + $0x1a8] sm:$0xff] %vm511_vm0, %v853_v61  ;;  %918 = vst.msk [vmem:[#allocation2 + $0xa8] sm:$0xff] %vm511_vm0, %v725_v63  ;;  %v4616_v19 = vrot.slane %v4615_v14, 4  ;;  %v4629_v24 = vor.u32 %v4628_v17, %v4625_v16  ;;  %v4642_v25 = vshll.u32 %v11387_v38, 16  ;;  %v4646_v27 = vshrl.u32 %v11387_v38, 16 }
 0x10d   : > { %v12682_v7 = vpop.f32.mrf.mxu1  ;;  %v12650_v8 = vpop.f32.mrf.mxu0  ;;  %v4611_v22 = vsel %vm13588_vm5, %v4606_v47, %v4610_v40  ;;  %12853 = vmatmul.mubr.msk.bf16.gmra.mxu1 %vm511_vm0, %v13358_v9  ;;  %12924 = vmatprep.mubr.msk.bf16.mxu0 %vm511_vm0, %v11459_v29  ;;  %v4638_v56 = vrot.slane %v4636_v20, 4  ;;  %v4652_v62 = vshll.u32 %v11388_v58, 16  ;;  %v4656_v26 = vshrl.u32 %v11388_v58, 16  ;;  %v11392_v63 = vld [vmem:[%s13512_s26 + $0x80] sm:$0xf] }
 0x10e   : > { %955 = vst.msk [vmem:[#allocation2 + $0x1d0] sm:$0xff] %vm511_vm0, %v12682_v7  ;;  %923 = vst.msk [vmem:[#allocation2 + $0xd0] sm:$0xff] %vm511_vm0, %v12650_v8  ;;  %v4621_v52 = vsel %vm13588_vm5, %v4616_v19, %v4620_v37  ;;  %12856 = vmatprep.mubr.msk.bf16.mxu1 %vm511_vm0, %v13359_v5  ;;  %v4630_v36 = vrot.slane %v4629_v24, 4  ;;  %v4644_v34 = vrot.slane %v4642_v25, 5  ;;  %v4648_v35 = vrot.slane %v4646_v27, 4 }
 0x10f   : > { %v866_v43 = vpop.f32.mrf.mxu1  ;;  %v738_v15 = vpop.f32.mrf.mxu0  ;;  %v11460_v33 = vcombine.low %v4611_v22, %v4621_v52  ;;  %v4639_v39 = vor.u32 %v4638_v56, %v14404_v6  ;;  %v4654_v45 = vrot.slane %v4652_v62, 5  ;;  %v4658_v46 = vrot.slane %v4656_v26, 4  ;;  %v11395_v32 = vld [vmem:[%s13512_s26 + $0x8c] sm:$0xf]  ;;  %v13363_v56 = vld [vmem:[%s13512_s26 + $0x80] sm:$0xff]  }
 0x110   : > { %953 = vst.msk [vmem:[#allocation2 + $0x1c0] sm:$0xff] %vm511_vm0, %v866_v43  ;;  %921 = vst.msk [vmem:[#allocation2 + $0xc0] sm:$0xff] %vm511_vm0, %v738_v15  ;;  %v4662_v48 = vshll.u32 %v11389_v18, 16  ;;  %v4635_v60 = vsel %vm13588_vm5, %v4630_v36, %v14404_v6  ;;  %v4649_v61 = vor.u32 %v4648_v35, %v4644_v34  ;;  %v4667_v0 = vshrl.u32 %v11390_v31, 16  ;;  %v13365_v35 = vld [vmem:[%s13512_s26 + $0x8c] sm:$0xff]  }
 0x111   : > { %v12683_v41 = vpop.f32.mrf.mxu1  ;;  %v12651_v21 = vpop.f32.mrf.mxu0  ;;  %v4670_v44 = vshll.u32 %v11390_v31, 16  ;;  %v4640_v50 = vrot.slane %v4639_v39, 4  ;;  %v4659_v1 = vor.u32 %v4658_v46, %v4654_v45  ;;  %v4676_v40 = vshll.u32 %v11391_v55, 16  ;;  %v11398_v46 = vld [vmem:[%s13512_s26 + $0x98] sm:$0xf] }
 0x112   : > { %956 = vst.msk [vmem:[#allocation2 + $0x1d8] sm:$0xff] %vm511_vm0, %v12683_v41  ;;  %924 = vst.msk [vmem:[#allocation2 + $0xd8] sm:$0xff] %vm511_vm0, %v12651_v21  ;;  %12925 = vmatmul.mubr.msk.bf16.gmra.mxu0 %vm511_vm0, %v11460_v33  ;;  %v4664_v2 = vrot.slane %v4662_v48, 5  ;;  %v4650_v8 = vrot.slane %v4649_v61, 4  ;;  %v4669_v9 = vrot.slane %v4667_v0, 4  ;;  %v4680_v11 = vshrl.u32 %v11391_v55, 16 }
 0x113   : > { %v869_v30 = vpop.f32.mrf.mxu1  ;;  %v741_v23 = vpop.f32.mrf.mxu0  ;;  %v4672_v10 = vrot.slane %v4670_v44, 5  ;;  %v4645_v13 = vsel %vm13588_vm5, %v4640_v50, %v4644_v34  ;;  %v4660_v14 = vrot.slane %v4659_v1, 4  ;;  %v4678_v37 = vrot.slane %v4676_v40, 5  ;;  %v11396_v21 = vld [vmem:[%s13512_s26 + $0x90] sm:$0xf] }
 0x114   : > { %954 = vst.msk [vmem:[#allocation2 + $0x1c8] sm:$0xff] %vm511_vm0, %v869_v30  ;;  %922 = vst.msk [vmem:[#allocation2 + $0xc8] sm:$0xff] %vm511_vm0, %v741_v23  ;;  %v4686_v38 = vshll.u32 %v11392_v63, 16  ;;  %v11461_v43 = vcombine.low %v4635_v60, %v4645_v13  ;;  %v4655_v15 = vsel %vm13588_vm5, %v4650_v8, %v4654_v45  ;;  %v4682_v47 = vrot.slane %v4680_v11, 4  ;;  %v11397_v23 = vld [vmem:[%s13512_s26 + $0x94] sm:$0xf] }
 0x115   : > { %v12686_v54 = vpop.f32.mrf.mxu1  ;;  %v12654_v57 = vpop.f32.mrf.mxu0  ;;  %v4673_v49 = vor.u32 %v4672_v10, %v4669_v9  ;;  %12857 = vmatmul.mubr.msk.bf16.gmra.mxu1 %vm511_vm0, %v13360_v59  ;;  %v4665_v5 = vsel %vm13588_vm5, %v4660_v14, %v4664_v2  ;;  %v4690_v17 = vshrl.u32 %v11392_v63, 16  ;;  %v4696_v18 = vshll.u32 %v11393_v51, 16  ;;  %v11399_v63 = vld [vmem:[%s13512_s26 + $0x9c] sm:$0x1] }
 0x116   : > { %959 = vst.msk [vmem:[#allocation2 + $0x1f0] sm:$0xff] %vm511_vm0, %v12686_v54  ;;  %927 = vst.msk [vmem:[#allocation2 + $0xf0] sm:$0xff] %vm511_vm0, %v12654_v57  ;;  %v4688_v16 = vrot.slane %v4686_v38, 5  ;;  %12928 = vmatprep.mubr.msk.bf16.mxu0 %vm511_vm0, %v11461_v43  ;;  %v11462_v6 = vcombine.low %v4655_v15, %v4665_v5  ;;  %12860 = vmatprep.mubr.msk.bf16.mxu1 %vm511_vm0, %v13362_v28  ;;  %v4683_v31 = vor.u32 %v4682_v47, %v4678_v37 }
 0x117   : > { %v882_v4 = vpop.f32.mrf.mxu1  ;;  %v754_v7 = vpop.f32.mrf.mxu0  ;;  %v4674_v20 = vrot.slane %v4673_v49, 4  ;;  %v4700_v41 = vshrl.u32 %v11393_v51, 16  ;;  %v4692_v22 = vrot.slane %v4690_v17, 4  ;;  %v4698_v24 = vrot.slane %v4696_v18, 5  ;;  %v13366_v17 = vld [vmem:[%s13512_s26 + $0x94] sm:$0xff]  }
 0x118   : > { %957 = vst.msk [vmem:[#allocation2 + $0x1e0] sm:$0xff] %vm511_vm0, %v882_v4  ;;  %925 = vst.msk [vmem:[#allocation2 + $0xe0] sm:$0xff] %vm511_vm0, %v754_v7  ;;  %v4706_v25 = vshll.u32 %v11394_v12, 16  ;;  %v4711_v27 = vshrl.u32 %v11395_v32, 16  ;;  %v4684_v26 = vrot.slane %v4683_v31, 4  ;;  %v4714_v33 = vshll.u32 %v11395_v32, 16 }
 0x119   : > { %v12687_v42 = vpop.f32.mrf.mxu1  ;;  %v12655_v58 = vpop.f32.mrf.mxu0  ;;  %v4679_v62 = vsel %vm13588_vm5, %v4674_v20, %v4678_v37  ;;  %v4702_v30 = vrot.slane %v4700_v41, 4  ;;  %v4693_v36 = vor.u32 %v4692_v22, %v4688_v16  ;;  %v4720_v45 = vshll.u32 %v11396_v21, 16  ;;  %v11400_v12 = vld [vmem:[%s13512_s26 + $0xa0] sm:$0xf] }
 0x11a   : > { %960 = vst.msk [vmem:[#allocation2 + $0x1f8] sm:$0xff] %vm511_vm0, %v12687_v42  ;;  %928 = vst.msk [vmem:[#allocation2 + $0xf8] sm:$0xff] %vm511_vm0, %v12655_v58  ;;  %12929 = vmatmul.mubr.msk.bf16.gmra.mxu0 %vm511_vm0, %v11462_v6  ;;  %v4708_v34 = vrot.slane %v4706_v25, 5  ;;  %v4713_v39 = vrot.slane %v4711_v27, 4  ;;  %v4689_v57 = vsel %vm13588_vm5, %v4684_v26, %v4688_v16  ;;  %v4716_v60 = vrot.slane %v4714_v33, 5  ;;  %v13367_v41 = vld [vmem:[%s13512_s26 + $0xa0] sm:$0xff]  }
 0x11b   : > { %v885_v29 = vpop.f32.mrf.mxu1  ;;  %v757_v19 = vpop.f32.mrf.mxu0  ;;  %v4703_v59 = vor.u32 %v4702_v30, %v4698_v24  ;;  %v4724_v61 = vshrl.u32 %v11396_v21, 16  ;;  %v4694_v0 = vrot.slane %v4693_v36, 4  ;;  %v11463_v44 = vcombine.low %v4679_v62, %v4689_v57  ;;  %v11401_v58 = vld [vmem:[%s13512_s26 + $0xa4] sm:$0xf]  ;;  %v11402_v21 = vld [vmem:[%s13512_s26 + $0xa8] sm:$0xf] }
 0x11c   : > { %958 = vst.msk [vmem:[#allocation2 + $0x1e8] sm:$0xff] %vm511_vm0, %v885_v29  ;;  %926 = vst.msk [vmem:[#allocation2 + $0xe8] sm:$0xff] %vm511_vm0, %v757_v19  ;;  %v4722_v50 = vrot.slane %v4720_v45, 5  ;;  %v4730_v1 = vshll.u32 %v11397_v23, 16  ;;  %v4717_v51 = vor.u32 %v4716_v60, %v4713_v39  ;;  %v4734_v7 = vshrl.u32 %v11397_v23, 16  ;;  %v13389_v33 = vld [vmem:[%s17387_s1 + $0xf8] sm:$0xff]  }
 0x11d   : > { %v14448_v55 = vpop.f32.mrf.mxu1  ;;  %v14450_v52 = vpop.f32.mrf.mxu0  ;;  %v4704_v40 = vrot.slane %v4703_v59, 4  ;;  %v4726_v4 = vrot.slane %v4724_v61, 4  ;;  %12861 = vmatmul.mubr.msk.bf16.gmra.mxu1 %vm511_vm0, %v13363_v56  ;;  %12932 = vmatprep.mubr.msk.bf16.mxu0 %vm511_vm0, %v11463_v44  ;;  %v4699_v8 = vsel %vm13588_vm5, %v4694_v0, %v4698_v24  ;;  %v4740_v10 = vshll.u32 %v11398_v46, 16  ;;  %v11403_v23 = vld [vmem:[%s13512_s26 + $0xac] sm:$0xf] }
 0x11e   : > { %v4732_v9 = vrot.slane %v4730_v1, 5  ;;  %v4744_v11 = vshrl.u32 %v11398_v46, 16  ;;  %12864 = vmatprep.mubr.msk.bf16.mxu1 %vm511_vm0, %v13365_v35  ;;  %v4718_v37 = vrot.slane %v4717_v51, 4  ;;  %v4736_v42 = vrot.slane %v4734_v7, 4  ;;  %13120 = vmatprep.subr.bf16.mxu1 %v13389_v33  ;;  %v2262_v51 = vld [vmem:[#allocation2] sm:$0xff] }
 0x11f   : > { %v14459_v48 = vpop.f32.mrf.mxu1  ;;  %v14461_v54 = vpop.f32.mrf.mxu0  ;;  %v4709_v14 = vsel %vm13588_vm5, %v4704_v40, %v4708_v34  ;;  %v4727_v38 = vor.u32 %v4726_v4, %v4722_v50  ;;  %v4742_v15 = vrot.slane %v4740_v10, 5  ;;  %v4750_v47 = vshll.u32 %v11399_v63, 16  ;;  %v11404_v63 = vld [vmem:[%s13512_s26 + $0xb0] sm:$0x1]  ;;  %v11405_v4 = vld [vmem:[%s13512_s26 + $0xb4] sm:$0xf] }
 0x120   : > { %v11464_v43 = vcombine.low %v4699_v8, %v4709_v14  ;;  %v4746_v49 = vrot.slane %v4744_v11, 4  ;;  %v4723_v18 = vsel %vm13588_vm5, %v4718_v37, %v4722_v50  ;;  %v4737_v19 = vor.u32 %v4736_v42, %v4732_v9  ;;  %v2264_v40 = vld [vmem:[#allocation2 + $0x10] sm:$0xff] }
 0x121   : > { %v14466_v2 = vpop.f32.mrf.mxu1  ;;  %v14468_v28 = vpop.f32.mrf.mxu0  ;;  %v4728_v29 = vrot.slane %v4727_v38, 4  ;;  %v4755_v6 = vshrl.u32 %v11400_v12, 16  ;;  %v4752_v31 = vrot.slane %v4750_v47, 5  ;;  %v4758_v22 = vshll.u32 %v11400_v12, 16 }
 0x122   : > { %12933 = vmatmul.mubr.msk.bf16.gmra.mxu0 %vm511_vm0, %v11464_v43  ;;  %v4747_v20 = vor.u32 %v4746_v49, %v4742_v15  ;;  %v4764_v24 = vshll.u32 %v11401_v58, 16  ;;  %v4738_v62 = vrot.slane %v4737_v19, 4  ;;  %v4768_v30 = vshrl.u32 %v11401_v58, 16  ;;  %v11406_v58 = vld [vmem:[%s13512_s26 + $0xb8] sm:$0xf]  ;;  %v13368_v19 = vld [vmem:[%s13512_s26 + $0xa8] sm:$0xff]  }
 0x123   : > { %v14475_v32 = vpop.f32.mrf.mxu1  ;;  %v14477_v13 = vpop.f32.mrf.mxu0  ;;  %v4733_v56 = vsel %vm13588_vm5, %v4728_v29, %v4732_v9  ;;  %v4757_v26 = vrot.slane %v4755_v6, 4  ;;  %v4760_v35 = vrot.slane %v4758_v22, 5  ;;  %v4774_v60 = vshll.u32 %v11402_v21, 16  ;;  %v2265_v29 = vld [vmem:[#allocation2 + $0x18] sm:$0xff] }
 0x124   : > { %v11465_v36 = vcombine.low %v4723_v18, %v4733_v56  ;;  %v4748_v34 = vrot.slane %v4747_v20, 4  ;;  %v4766_v39 = vrot.slane %v4764_v24, 5  ;;  %v4743_v57 = vsel %vm13588_vm5, %v4738_v62, %v4742_v15  ;;  %v13369_v56 = vld [vmem:[%s13512_s26 + $0xb4] sm:$0xff]  }
 0x125   : > { %v14483_v5 = vpop.f32.mrf.mxu1  ;;  %v14485_v16 = vpop.f32.mrf.mxu0  ;;  %v4770_v59 = vrot.slane %v4768_v30, 4  ;;  %v4778_v61 = vshrl.u32 %v11402_v21, 16  ;;  %12865 = vmatmul.mubr.msk.bf16.gmra.mxu1 %vm511_vm0, %v13366_v17  ;;  %v4761_v44 = vor.u32 %v4760_v35, %v4757_v26  ;;  %v4784_v50 = vshll.u32 %v11403_v23, 16  ;;  %v11407_v21 = vld [vmem:[%s13512_s26 + $0xbc] sm:$0xf] }
 0x126   : > { %12936 = vmatprep.mubr.msk.bf16.mxu0 %vm511_vm0, %v11465_v36  ;;  %v4753_v0 = vsel %vm13588_vm5, %v4748_v34, %v4752_v31  ;;  %v4788_v1 = vshrl.u32 %v11403_v23, 16  ;;  %12868 = vmatprep.mubr.msk.bf16.mxu1 %vm511_vm0, %v13367_v41  ;;  %v4776_v11 = vrot.slane %v4774_v60, 5  ;;  %v4794_v42 = vshll.u32 %v11404_v63, 16  ;;  %v11408_v36 = vld [vmem:[%s13512_s26 + $0xc0] sm:$0xf] }
 0x127   : > { %v14493_v25 = vpop.f32.mrf.mxu1  ;;  %v14495_v27 = vpop.f32.mrf.mxu0  ;;  %v11466_v9 = vcombine.low %v4743_v57, %v4753_v0  ;;  %v4771_v10 = vor.u32 %v4770_v59, %v4766_v39  ;;  %v4780_v12 = vrot.slane %v4778_v61, 4  ;;  %v4762_v14 = vrot.slane %v4761_v44, 4  ;;  %v11409_v63 = vld [vmem:[%s13512_s26 + $0xc4] sm:$0x1] }
 0x128   : > { %v4786_v37 = vrot.slane %v4784_v50, 5  ;;  %v4790_v38 = vrot.slane %v4788_v1, 4  ;;  %v2328_v17 = vadd.f32 %v14448_v55, %v2264_v40  ;;  %v2326_v18 = vadd.f32 %v2262_v51, %v14459_v48  ;;  %v2263_v40 = vld [vmem:[#allocation2 + $0x8] sm:$0xff] }
 0x129   : > { %v14503_v45 = vpop.f32.mrf.mxu1  ;;  %v14505_v46 = vpop.f32.mrf.mxu0  ;;  %v4772_v49 = vrot.slane %v4771_v10, 4  ;;  %v4781_v47 = vor.u32 %v4780_v12, %v4776_v11  ;;  %v4767_v6 = vsel %vm13588_vm5, %v4762_v14, %v4766_v39  ;;  %v4796_v31 = vrot.slane %v4794_v42, 5  ;;  %v13392_v39 = vld [vmem:[%s17387_s1 + $0x118] sm:$0xff]  }
 0x12a   : > { %12937 = vmatmul.mubr.msk.bf16.gmra.mxu0 %vm511_vm0, %v11466_v9  ;;  %v4791_v20 = vor.u32 %v4790_v38, %v4786_v37  ;;  %v2329_v41 = vadd.f32 %v14466_v2, %v2265_v29  ;;  %2392 = vst.msk [vmem:[#allocation2 + $0x10] sm:$0xff] %vm511_vm0, %v2328_v17  ;;  %2390 = vst.msk [vmem:[#allocation2] sm:$0xff] %vm511_vm0, %v2326_v18  ;;  %v4799_v62 = vshrl.u32 %v11405_v4, 16  ;;  %v4802_v26 = vshll.u32 %v11405_v4, 16  ;;  %v13370_v14 = vld [vmem:[%s13512_s26 + $0xbc] sm:$0xff]  }
 0x12b   : > { %v14515_v7 = vpop.f32.mrf.mxu1  ;;  %v14517_v8 = vpop.f32.mrf.mxu0  ;;  %v4777_v55 = vsel %vm13588_vm5, %v4772_v49, %v4776_v11  ;;  %v4782_v48 = vrot.slane %v4781_v47, 4  ;;  %v4808_v23 = vshll.u32 %v11406_v58, 16  ;;  %v4812_v33 = vshrl.u32 %v11406_v58, 16  ;;  %13192 = vmatprep.subr.bf16.mxu0 %v13392_v39  ;;  %v2268_v49 = vld [vmem:[#allocation2 + $0x30] sm:$0xff]  ;;  %v11410_v47 = vld [vmem:[%s13512_s26 + $0xc8] sm:$0xf] }
 0x12c   : > { %v11467_v30 = vcombine.low %v4767_v6, %v4777_v55  ;;  %v4792_v2 = vrot.slane %v4791_v20, 4  ;;  %2393 = vst.msk [vmem:[#allocation2 + $0x18] sm:$0xff] %vm511_vm0, %v2329_v41  ;;  %v4801_v59 = vrot.slane %v4799_v62, 4  ;;  %v4804_v60 = vrot.slane %v4802_v26, 5  ;;  %v2266_v62 = vld [vmem:[#allocation2 + $0x20] sm:$0xff] }
 0x12d   : > { %v14521_v43 = vpop.f32.mrf.mxu1  ;;  %v14523_v15 = vpop.f32.mrf.mxu0  ;;  %v4787_v57 = vsel %vm13588_vm5, %v4782_v48, %v4786_v37  ;;  %v4818_v61 = vshll.u32 %v11407_v21, 16  ;;  %12869 = vmatmul.mubr.msk.bf16.gmra.mxu1 %vm511_vm0, %v13368_v19  ;;  %v4810_v44 = vrot.slane %v4808_v23, 5  ;;  %v4814_v50 = vrot.slane %v4812_v33, 4  ;;  %v13372_v23 = vld [vmem:[%s13512_s26 + $0xc8] sm:$0xff]  }
 0x12e   : > { %12940 = vmatprep.mubr.msk.bf16.mxu0 %vm511_vm0, %v11467_v30  ;;  %v4797_v0 = vsel %vm13588_vm5, %v4792_v2, %v4796_v31  ;;  %v4822_v1 = vshrl.u32 %v11407_v21, 16  ;;  %12872 = vmatprep.mubr.msk.bf16.mxu1 %vm511_vm0, %v13369_v56  ;;  %v4805_v10 = vor.u32 %v4804_v60, %v4801_v59  ;;  %v4828_v12 = vshll.u32 %v11408_v36, 16  ;;  %v11411_v39 = vld [vmem:[%s13512_s26 + $0xcc] sm:$0xf] }
 0x12f   : > { %v14533_v22 = vpop.f32.mrf.mxu1  ;;  %v14535_v24 = vpop.f32.mrf.mxu0  ;;  %v11468_v9 = vcombine.low %v4787_v57, %v4797_v0  ;;  %v4820_v11 = vrot.slane %v4818_v61, 5  ;;  %v4815_v37 = vor.u32 %v4814_v50, %v4810_v44  ;;  %v4832_v42 = vshrl.u32 %v11408_v36, 16  ;;  %v2269_v61 = vld [vmem:[#allocation2 + $0x38] sm:$0xff] }
 0x130   : > { %v4824_v38 = vrot.slane %v4822_v1, 4  ;;  %v4838_v58 = vshll.u32 %v11409_v63, 16  ;;  %v4806_v29 = vrot.slane %v4805_v10, 4  ;;  %v4830_v19 = vrot.slane %v4828_v12, 5  ;;  %v11412_v63 = vld [vmem:[%s13512_s26 + $0xd0] sm:$0xf] }
 0x131   : > { %v14544_v34 = vpop.f32.mrf.mxu1  ;;  %v14546_v35 = vpop.f32.mrf.mxu0  ;;  %v2327_v6 = vadd.f32 %v2263_v40, %v14475_v32  ;;  %v2332_v20 = vadd.f32 %v14483_v5, %v2268_v49  ;;  %v4816_v31 = vrot.slane %v4815_v37, 4  ;;  %v3341_v21 = vld [vmem:[#allocation2 + $0x10] sm:$0xff]  ;;  %v4834_v55 = vrot.slane %v4832_v42, 4  ;;  %v3339_v56 = vld [vmem:[#allocation2] sm:$0xff] }
 0x132   : > { %12941 = vmatmul.mubr.msk.bf16.gmra.mxu0 %vm511_vm0, %v11468_v9  ;;  %v4825_v41 = vor.u32 %v4824_v38, %v4820_v11  ;;  %v4840_v48 = vrot.slane %v4838_v58, 5  ;;  %v4811_v32 = vsel %vm13588_vm5, %v4806_v29, %v4810_v44  ;;  %v3405_v5 = vadd.f32 %v14450_v52, %v3341_v21  ;;  %v11413_v40 = vld [vmem:[%s13512_s26 + $0xd4] sm:$0xf]  ;;  %v11414_v9 = vld [vmem:[%s13512_s26 + $0xd8] sm:$0x1] }
 0x133   : > { %v14558_v51 = vpop.f32.mrf.mxu1  ;;  %v14560_v4 = vpop.f32.mrf.mxu0  ;;  %2391 = vst.msk [vmem:[#allocation2 + $0x8] sm:$0xff] %vm511_vm0, %v2327_v6  ;;  %v3403_v2 = vadd.f32 %v3339_v56, %v14461_v54  ;;  %2396 = vst.msk [vmem:[#allocation2 + $0x30] sm:$0xff] %vm511_vm0, %v2332_v20  ;;  %v3342_v33 = vld [vmem:[#allocation2 + $0x18] sm:$0xff]  ;;  %v2330_v36 = vadd.f32 %v2266_v62, %v14493_v25  ;;  %v4821_v57 = vsel %vm13588_vm5, %v4816_v31, %v4820_v11  ;;  %v4843_v50 = vshrl.u32 %v11410_v47, 16 }
 0x134   : > { %v4826_v59 = vrot.slane %v4825_v41, 4  ;;  %v4835_v60 = vor.u32 %v4834_v55, %v4830_v19  ;;  %v3406_v52 = vadd.f32 %v14468_v28, %v3342_v33  ;;  %v11469_v44 = vcombine.low %v4811_v32, %v4821_v57  ;;  %3469 = vst.msk [vmem:[#allocation2 + $0x10] sm:$0xff] %vm511_vm0, %v3405_v5  ;;  %v13373_v41 = vld [vmem:[%s13512_s26 + $0xd0] sm:$0xff]   ;;  %v13375_v62 = vld [vmem:[%s13512_s26 + $0xdc] sm:$0xff]  }
 0x135   : > { %v14565_v17 = vpop.f32.mrf.mxu1  ;;  %v14567_v18 = vpop.f32.mrf.mxu0  ;;  %3467 = vst.msk [vmem:[#allocation2] sm:$0xff] %vm511_vm0, %v3403_v2  ;;  %2394 = vst.msk [vmem:[#allocation2 + $0x20] sm:$0xff] %vm511_vm0, %v2330_v36  ;;  %v2333_v25 = vadd.f32 %v14503_v45, %v2269_v61  ;;  %v4846_v1 = vshll.u32 %v11410_v47, 16  ;;  %12873 = vmatmul.mubr.msk.bf16.gmra.mxu1 %vm511_vm0, %v13370_v14  ;;  %v4852_v11 = vshll.u32 %v11411_v39, 16  ;;  %v4856_v12 = vshrl.u32 %v11411_v39, 16  ;;  %v2267_v36 = vld [vmem:[#allocation2 + $0x28] sm:$0xff] }
 0x136   : > { %v4831_v28 = vsel %vm13588_vm5, %v4826_v59, %v4830_v19  ;;  %v4836_v10 = vrot.slane %v4835_v60, 4  ;;  %3470 = vst.msk [vmem:[#allocation2 + $0x18] sm:$0xff] %vm511_vm0, %v3406_v52  ;;  %12944 = vmatprep.mubr.msk.bf16.mxu0 %vm511_vm0, %v11469_v44  ;;  %12876 = vmatprep.mubr.msk.bf16.mxu1 %vm511_vm0, %v13372_v23  ;;  %v4845_v45 = vrot.slane %v4843_v50, 4  ;;  %v4862_v42 = vshll.u32 %v11412_v63, 16  ;;  %v2270_v44 = vld [vmem:[#allocation2 + $0x40] sm:$0xff] }
 0x137   : > { %v14572_v26 = vpop.f32.mrf.mxu1  ;;  %v14574_v30 = vpop.f32.mrf.mxu0  ;;  %2397 = vst.msk [vmem:[#allocation2 + $0x38] sm:$0xff] %vm511_vm0, %v2333_v25  ;;  %v4848_v14 = vrot.slane %v4846_v1, 5  ;;  %v4866_v58 = vshrl.u32 %v11412_v63, 16  ;;  %v4854_v47 = vrot.slane %v4852_v11, 5  ;;  %v4858_v29 = vrot.slane %v4856_v12, 4  ;;  %v2272_v63 = vld [vmem:[#allocation2 + $0x50] sm:$0xff] }
 0x138   : > { %v4841_v49 = vsel %vm13588_vm5, %v4836_v10, %v4840_v48  ;;  %v4872_v19 = vshll.u32 %v11413_v40, 16  ;;  %v4864_v55 = vrot.slane %v4862_v42, 5  ;;  %v4876_v48 = vshrl.u32 %v11413_v40, 16  ;;  %v11415_v25 = vld [vmem:[%s13512_s26 + $0xdc] sm:$0xf] }
 0x139   : > { %v14589_v0 = vpop.f32.mrf.mxu1  ;;  %v14591_v54 = vpop.f32.mrf.mxu0  ;;  %v11470_v31 = vcombine.low %v4831_v28, %v4841_v49  ;;  %v4849_v21 = vor.u32 %v4848_v14, %v4845_v45  ;;  %v4868_v56 = vrot.slane %v4866_v58, 4  ;;  %v4859_v5 = vor.u32 %v4858_v29, %v4854_v47  ;;  %v11416_v10 = vld [vmem:[%s13512_s26 + $0xe0] sm:$0xf]  ;;  %v2273_v42 = vld [vmem:[#allocation2 + $0x58] sm:$0xff]  ;;  %v14642_v58 = vld [vmem:[%s13512_s26 + $0xe8] sm:$0xf] }
 0x13a   : > { %v3340_v32 = vld [vmem:[#allocation2 + $0x8] sm:$0xff]  ;;  %v3345_v2 = vld [vmem:[#allocation2 + $0x30] sm:$0xff]  ;;  %v14618_v23 = vrot.slane %v4872_v19, 5  ;;  %v4882_v33 = vshll.u32 %v11414_v9, 16  ;;  %v4878_v1 = vrot.slane %v4876_v48, 4  ;;  %v2331_v9 = vadd.f32 %v2267_v36, %v14515_v7 }
 0x13b   : > { %v14603_v37 = vpop.f32.mrf.mxu1  ;;  %v14605_v38 = vpop.f32.mrf.mxu0  ;;  %12945 = vmatmul.mubr.msk.bf16.gmra.mxu0 %vm511_vm0, %v11470_v31  ;;  %v3404_v59 = vadd.f32 %v3340_v32, %v14477_v13  ;;  %v4850_v60 = vrot.slane %v4849_v21, 4  ;;  %v4869_v52 = vor.u32 %v4868_v56, %v4864_v55  ;;  %v3409_v61 = vadd.f32 %v14485_v16, %v3345_v2  ;;  %v11417_v7 = vld [vmem:[%s13512_s26 + $0xe4] sm:$0xf] }
 0x13c   : > { %v4860_v50 = vrot.slane %v4859_v5, 4  ;;  %v4884_v40 = vrot.slane %v4882_v33, 5  ;;  %v3343_v28 = vld [vmem:[#allocation2 + $0x20] sm:$0xff]  ;;  %v2336_v14 = vadd.f32 %v14521_v43, %v2272_v63  ;;  %v4879_v29 = vor.u32 %v4878_v1, %v14618_v23  ;;  %2395 = vst.msk [vmem:[#allocation2 + $0x28] sm:$0xff] %vm511_vm0, %v2331_v9  ;;  %v11419_v33 = vld [vmem:[%s13512_s26 + $0xec] sm:$0x1] }
 0x13d   : > { %v14612_v6 = vpop.f32.mrf.mxu1  ;;  %v14614_v20 = vpop.f32.mrf.mxu0  ;;  %3468 = vst.msk [vmem:[#allocation2 + $0x8] sm:$0xff] %vm511_vm0, %v3404_v59  ;;  %v4855_v13 = vsel %vm13588_vm5, %v4850_v60, %v4854_v47  ;;  %v4870_v16 = vrot.slane %v4869_v52, 4  ;;  %3473 = vst.msk [vmem:[#allocation2 + $0x30] sm:$0xff] %vm511_vm0, %v3409_v61  ;;  %v3407_v45 = vadd.f32 %v3343_v28, %v14495_v27  ;;  %12877 = vmatmul.mubr.msk.bf16.gmra.mxu1 %vm511_vm0, %v13373_v41  ;;  %v4890_v56 = vshll.u32 %v11415_v25, 16  ;;  %v13376_v60 = vld [vmem:[%s13512_s26 + $0xe4] sm:$0xff]  }
 0x13e   : > { %v4865_v49 = vsel %vm13588_vm5, %v4860_v50, %v4864_v55  ;;  %v3346_v47 = vld [vmem:[#allocation2 + $0x38] sm:$0xff]  ;;  %v2334_v19 = vadd.f32 %v2270_v44, %v14533_v22  ;;  %v2337_v27 = vadd.f32 %v14544_v34, %v2273_v42  ;;  %12880 = vmatprep.mubr.msk.bf16.mxu1 %vm511_vm0, %v13375_v62  ;;  %2400 = vst.msk [vmem:[#allocation2 + $0x50] sm:$0xff] %vm511_vm0, %v2336_v14  ;;  %v4887_v55 = vshrl.u32 %v11415_v25, 16 }
 0x13f   : > { %v14620_v39 = vpop.f32.mrf.mxu1  ;;  %v14622_v57 = vpop.f32.mrf.mxu0  ;;  %v11471_v21 = vcombine.low %v4855_v13, %v4865_v49  ;;  %v4875_v41 = vsel %vm13588_vm5, %v4870_v16, %v14618_v23  ;;  %3471 = vst.msk [vmem:[#allocation2 + $0x20] sm:$0xff] %vm511_vm0, %v3407_v45  ;;  %v3410_v22 = vadd.f32 %v14505_v46, %v3346_v47  ;;  %v4880_v34 = vrot.slane %v4879_v29, 4  ;;  %v13377_v13 = vld [vmem:[%s13512_s26 + $0xf0] sm:$0xff]   ;;  %v2277_v49 = vld [vmem:[#allocation2 + $0x78] sm:$0xff] }
 0x140   : > { %2398 = vst.msk [vmem:[#allocation2 + $0x40] sm:$0xff] %vm511_vm0, %v2334_v19  ;;  %2401 = vst.msk [vmem:[#allocation2 + $0x58] sm:$0xff] %vm511_vm0, %v2337_v27  ;;  %v4896_v32 = vshll.u32 %v11416_v10, 16  ;;  %v4900_v5 = vshrl.u32 %v11416_v10, 16  ;;  %v4889_v62 = vrot.slane %v4887_v55, 4  ;;  %v4906_v46 = vshll.u32 %v11417_v7, 16 }
 0x141   : > { %v14630_v11 = vpop.f32.mrf.mxu1  ;;  %v14632_v12 = vpop.f32.mrf.mxu0  ;;  %12948 = vmatprep.mubr.msk.bf16.mxu0 %vm511_vm0, %v11471_v21  ;;  %3474 = vst.msk [vmem:[#allocation2 + $0x38] sm:$0xff] %vm511_vm0, %v3410_v22  ;;  %v4910_v48 = vshrl.u32 %v11417_v7, 16  ;;  %v4916_v36 = vshll.u32 %v14642_v58, 16  ;;  %v4885_v59 = vsel %vm13588_vm5, %v4880_v34, %v4884_v40  ;;  %v4892_v52 = vrot.slane %v4890_v56, 5  ;;  %v2271_v10 = vld [vmem:[#allocation2 + $0x48] sm:$0xff]  ;;  %v2276_v16 = vld [vmem:[#allocation2 + $0x70] sm:$0xff] }
 0x142   : > { %v4898_v61 = vrot.slane %v4896_v32, 5  ;;  %v4902_v63 = vrot.slane %v4900_v5, 4  ;;  %v11472_v50 = vcombine.low %v4875_v41, %v4885_v59  ;;  %v4908_v1 = vrot.slane %v4906_v46, 5  ;;  %v2274_v7 = vld [vmem:[#allocation2 + $0x60] sm:$0xff]  ;;  %v11420_v29 = vld [vmem:[%s13512_s26 + $0xf0] sm:$0xf] }
 0x143   : > { %v14651_v31 = vpop.f32.mrf.mxu1  ;;  %v14653_v43 = vpop.f32.mrf.mxu0  ;;  %v4912_v9 = vrot.slane %v4910_v48, 4  ;;  %v14679_v28 = vrot.slane %v4916_v36, 5  ;;  %v4893_v45 = vor.u32 %v4892_v52, %v4889_v62  ;;  %v4920_v14 = vshrl.u32 %v14642_v58, 16  ;;  %v3344_v27 = vld [vmem:[#allocation2 + $0x28] sm:$0xff]  ;;  %v11421_v55 = vld [vmem:[%s13512_s26 + $0xf4] sm:$0xf] }
 0x144   : > { %v4903_v40 = vor.u32 %v4902_v63, %v4898_v61  ;;  %v4926_v42 = vshll.u32 %v11419_v33, 16  ;;  %12949 = vmatmul.mubr.msk.bf16.gmra.mxu0 %vm511_vm0, %v11472_v50  ;;  %v2335_v41 = vadd.f32 %v2271_v10, %v14558_v51  ;;  %v2340_v22 = vadd.f32 %v14565_v17, %v2276_v16  ;;  %v11422_v46 = vld [vmem:[%s13512_s26 + $0xf8] sm:$0xf]  ;;  %v14697_v48 = vld [vmem:[%s13512_s26 + $0xfc] sm:$0xf] }
 0x145   : > { %v14664_v2 = vpop.f32.mrf.mxu1  ;;  %v14666_v23 = vpop.f32.mrf.mxu0  ;;  %v4913_v21 = vor.u32 %v4912_v9, %v4908_v1  ;;  %v2338_v58 = vadd.f32 %v2274_v7, %v14572_v26  ;;  %12881 = vmatmul.mubr.msk.bf16.gmra.mxu1 %vm511_vm0, %v13376_v60  ;;  %v3408_v34 = vadd.f32 %v3344_v27, %v14517_v8  ;;  %v4894_v56 = vrot.slane %v4893_v45, 4  ;;  %v3349_v5 = vld [vmem:[#allocation2 + $0x50] sm:$0xff]  ;;  %v11424_v27 = vld [vmem:[%s13512_s26 + $0x100] sm:$0x1] }
 0x146   : > { %v4904_v32 = vrot.slane %v4903_v40, 4  ;;  %v4922_v62 = vrot.slane %v4920_v14, 4  ;;  %v3413_v17 = vadd.f32 %v14523_v15, %v3349_v5  ;;  %v4928_v26 = vrot.slane %v4926_v42, 5  ;;  %2399 = vst.msk [vmem:[#allocation2 + $0x48] sm:$0xff] %vm511_vm0, %v2335_v41  ;;  %12884 = vmatprep.mubr.msk.bf16.mxu1 %vm511_vm0, %v13377_v13  ;;  %2404 = vst.msk [vmem:[#allocation2 + $0x70] sm:$0xff] %vm511_vm0, %v2340_v22 }
 0x147   : > { %v14675_v44 = vpop.f32.mrf.mxu1  ;;  %v14677_v25 = vpop.f32.mrf.mxu0  ;;  %v4914_v51 = vrot.slane %v4913_v21, 4  ;;  %v3347_v59 = vld [vmem:[#allocation2 + $0x40] sm:$0xff]  ;;  %v3350_v8 = vld [vmem:[#allocation2 + $0x58] sm:$0xff]  ;;  %2402 = vst.msk [vmem:[#allocation2 + $0x60] sm:$0xff] %vm511_vm0, %v2338_v58  ;;  %v2341_v60 = vadd.f32 %v14589_v0, %v2277_v49  ;;  %3472 = vst.msk [vmem:[#allocation2 + $0x28] sm:$0xff] %vm511_vm0, %v3408_v34  ;;  %v4899_v52 = vsel %vm13588_vm5, %v4894_v56, %v4898_v61  ;;  %v4934_v45 = vshll.u32 %v11420_v29, 16 }
 0x148   : > { %v4909_v15 = vsel %vm13588_vm5, %v4904_v32, %v4908_v1  ;;  %v4923_v63 = vor.u32 %v4922_v62, %v14679_v28  ;;  %v3411_v50 = vadd.f32 %v3347_v59, %v14535_v24  ;;  %3477 = vst.msk [vmem:[#allocation2 + $0x50] sm:$0xff] %vm511_vm0, %v3413_v17  ;;  %v3414_v61 = vadd.f32 %v14546_v35, %v3350_v8  ;;  %v13378_v24 = vld [vmem:[%s13512_s26 + $0xf8] sm:$0xff]  }
 0x149   : > { %v14684_v47 = vpop.f32.mrf.mxu1  ;;  %v14686_v19 = vpop.f32.mrf.mxu0  ;;  %v11473_v13 = vcombine.low %v4899_v52, %v4909_v15  ;;  %v4919_v0 = vsel %vm13588_vm5, %v4914_v51, %v14679_v28  ;;  %2405 = vst.msk [vmem:[#allocation2 + $0x78] sm:$0xff] %vm511_vm0, %v2341_v60  ;;  %v4931_v1 = vshrl.u32 %v11420_v29, 16  ;;  %v4940_v40 = vshll.u32 %v11421_v55, 16 }
 0x14a   : > { %v4924_v16 = vrot.slane %v4923_v63, 4  ;;  %3475 = vst.msk [vmem:[#allocation2 + $0x40] sm:$0xff] %vm511_vm0, %v3411_v50  ;;  %v4944_v14 = vshrl.u32 %v11421_v55, 16  ;;  %3478 = vst.msk [vmem:[#allocation2 + $0x58] sm:$0xff] %vm511_vm0, %v3414_v61  ;;  %v4950_v28 = vshll.u32 %v11422_v46, 16  ;;  %v4954_v49 = vshrl.u32 %v11422_v46, 16 }
 0x14b   : > { %v14699_v33 = vpop.f32.mrf.mxu1  ;;  %v14701_v36 = vpop.f32.mrf.mxu0  ;;  %12952 = vmatprep.mubr.msk.bf16.mxu0 %vm511_vm0, %v11473_v13  ;;  %v4933_v35 = vrot.slane %v4931_v1, 4  ;;  %v4960_v21 = vshll.u32 %v14697_v48, 16  ;;  %v4936_v41 = vrot.slane %v4934_v45, 5  ;;  %v4942_v22 = vrot.slane %v4940_v40, 5  ;;  %v13379_v55 = vld [vmem:[%s13512_s26 + $0x104] sm:$0xff]   ;;  %v2280_v63 = vld [vmem:[#allocation2 + $0x90] sm:$0xff] }
 0x14c   : > { %v4929_v29 = vsel %vm13588_vm5, %v4924_v16, %v4928_v26  ;;  %v4946_v58 = vrot.slane %v4944_v14, 4  ;;  %v4952_v5 = vrot.slane %v4950_v28, 5  ;;  %v4956_v62 = vrot.slane %v4954_v49, 4  ;;  %v2275_v46 = vld [vmem:[#allocation2 + $0x68] sm:$0xff]  ;;  %v11425_v50 = vld [vmem:[%s13512_s26 + $0x104] sm:$0xf] }
 0x14d   : > { %v14716_v9 = vpop.f32.mrf.mxu1  ;;  %v14718_v10 = vpop.f32.mrf.mxu0  ;;  %v11474_v32 = vcombine.low %v4919_v0, %v4929_v29  ;;  %v14743_v51 = vrot.slane %v4960_v21, 5  ;;  %12885 = vmatmul.mubr.msk.bf16.gmra.mxu1 %vm511_vm0, %v13378_v24  ;;  %v3348_v17 = vld [vmem:[#allocation2 + $0x48] sm:$0xff]  ;;  %v4937_v26 = vor.u32 %v4936_v41, %v4933_v35  ;;  %v3353_v8 = vld [vmem:[#allocation2 + $0x70] sm:$0xff]  ;;  %v4964_v60 = vshrl.u32 %v14697_v48, 16  ;;  %v2281_v41 = vld [vmem:[#allocation2 + $0x98] sm:$0xff] }
 0x14e   : > { %v4947_v59 = vor.u32 %v4946_v58, %v4942_v22  ;;  %v4970_v52 = vshll.u32 %v11424_v27, 16  ;;  %v3351_v15 = vld [vmem:[#allocation2 + $0x60] sm:$0xff]  ;;  %v3412_v61 = vadd.f32 %v3348_v17, %v14560_v4  ;;  %v4957_v1 = vor.u32 %v4956_v62, %v4952_v5  ;;  %v11426_v48 = vld [vmem:[%s13512_s26 + $0x108] sm:$0xf]  ;;  %12888 = vmatprep.mubr.msk.bf16.mxu1 %vm511_vm0, %v13379_v55  ;;  %v13380_v28 = vld [vmem:[%s13512_s26 + $0x10c] sm:$0xff]  }
 0x14f   : > { %v14728_v42 = vpop.f32.mrf.mxu1  ;;  %v14730_v7 = vpop.f32.mrf.mxu0  ;;  %12953 = vmatmul.mubr.msk.bf16.gmra.mxu0 %vm511_vm0, %v11474_v32  ;;  %v3417_v16 = vadd.f32 %v14567_v18, %v3353_v8  ;;  %v2339_v24 = vadd.f32 %v2275_v46, %v14603_v37  ;;  %v4938_v45 = vrot.slane %v4937_v26, 4  ;;  %v4966_v14 = vrot.slane %v4964_v60, 4  ;;  %v2278_v27 = vld [vmem:[#allocation2 + $0x80] sm:$0xff]  ;;  %v11427_v21 = vld [vmem:[%s13512_s26 + $0x10c] sm:$0xf] }
 0x150   : > { %v4948_v40 = vrot.slane %v4947_v59, 4  ;;  %v4972_v35 = vrot.slane %v4970_v52, 5  ;;  %v3354_v49 = vld [vmem:[#allocation2 + $0x78] sm:$0xff]  ;;  %3476 = vst.msk [vmem:[#allocation2 + $0x48] sm:$0xff] %vm511_vm0, %v3412_v61  ;;  %v4958_v4 = vrot.slane %v4957_v1, 4  ;;  %v3415_v18 = vadd.f32 %v3351_v15, %v14574_v30 }
 0x151   : > { %v14739_v34 = vpop.f32.mrf.mxu1  ;;  %v14741_v56 = vpop.f32.mrf.mxu0  ;;  %3481 = vst.msk [vmem:[#allocation2 + $0x70] sm:$0xff] %vm511_vm0, %v3417_v16  ;;  %2403 = vst.msk [vmem:[#allocation2 + $0x68] sm:$0xff] %vm511_vm0, %v2339_v24  ;;  %v2344_v37 = vadd.f32 %v14612_v6, %v2280_v63  ;;  %v3418_v29 = vadd.f32 %v14591_v54, %v3354_v49  ;;  %v4943_v58 = vsel %vm13588_vm5, %v4938_v45, %v4942_v22  ;;  %v11428_v46 = vld [vmem:[%s13512_s26 + $0x110] sm:$0xf]  ;;  %v4978_v59 = vshll.u32 %v11425_v50, 16 }
 0x152   : > { %v4953_v55 = vsel %vm13588_vm5, %v4948_v40, %v4952_v5  ;;  %v4967_v32 = vor.u32 %v4966_v14, %v14743_v51  ;;  %v2342_v62 = vadd.f32 %v2278_v27, %v14620_v39  ;;  %v4963_v54 = vsel %vm13588_vm5, %v4958_v4, %v14743_v51  ;;  %3479 = vst.msk [vmem:[#allocation2 + $0x60] sm:$0xff] %vm511_vm0, %v3415_v18  ;;  %v13382_v5 = vld [vmem:[%s13512_s26 + $0x118] sm:$0xff]   ;;  %v2279_v4 = vld [vmem:[#allocation2 + $0x88] sm:$0xff] }
 0x153   : > { %v14748_v13 = vpop.f32.mrf.mxu1  ;;  %v14750_v0 = vpop.f32.mrf.mxu0  ;;  %v11475_v6 = vcombine.low %v4943_v58, %v4953_v55  ;;  %2408 = vst.msk [vmem:[#allocation2 + $0x90] sm:$0xff] %vm511_vm0, %v2344_v37  ;;  %3482 = vst.msk [vmem:[#allocation2 + $0x78] sm:$0xff] %vm511_vm0, %v3418_v29  ;;  %v2345_v22 = vadd.f32 %v14630_v11, %v2281_v41  ;;  %v4975_v39 = vshrl.u32 %v11425_v50, 16  ;;  %v4984_v8 = vshll.u32 %v11426_v48, 16  ;;  %v11429_v11 = vld [vmem:[%s13512_s26 + $0x114] sm:$0x1] }
 0x154   : > { %v4968_v26 = vrot.slane %v4967_v32, 4  ;;  %2406 = vst.msk [vmem:[#allocation2 + $0x80] sm:$0xff] %vm511_vm0, %v2342_v62  ;;  %v4988_v60 = vshrl.u32 %v11426_v48, 16  ;;  %v4994_v63 = vshll.u32 %v11427_v21, 16  ;;  %v4998_v61 = vshrl.u32 %v11427_v21, 16  ;;  %v13383_v58 = vld [vmem:[%s13512_s26 + $0x120] sm:$0xff]  }
 0x155   : > { %v14773_v17 = vpop.f32.mrf.mxu1  ;;  %v14775_v30 = vpop.f32.mrf.mxu0  ;;  %12956 = vmatprep.mubr.msk.bf16.mxu0 %vm511_vm0, %v11475_v6  ;;  %2409 = vst.msk [vmem:[#allocation2 + $0x98] sm:$0xff] %vm511_vm0, %v2345_v22  ;;  %v4977_v15 = vrot.slane %v4975_v39, 4  ;;  %v5004_v1 = vshll.u32 %v11428_v46, 16  ;;  %12889 = vmatmul.mubr.msk.bf16.gmra.mxu1 %vm511_vm0, %v13380_v28  ;;  %v4980_v50 = vrot.slane %v4978_v59, 5  ;;  %v4986_v24 = vrot.slane %v4984_v8, 5  ;;  %v2282_v55 = vld [vmem:[#allocation2 + $0xa0] sm:$0xff] }
 0x156   : > { %v4973_v16 = vsel %vm13588_vm5, %v4968_v26, %v4972_v35  ;;  %v4990_v48 = vrot.slane %v4988_v60, 4  ;;  %v4996_v49 = vrot.slane %v4994_v63, 5  ;;  %v5000_v27 = vrot.slane %v4998_v61, 4  ;;  %12892 = vmatprep.mubr.msk.bf16.mxu1 %vm511_vm0, %v13382_v5  ;;  %v2284_v35 = vld [vmem:[#allocation2 + $0xb0] sm:$0xff]  ;;  %v11430_v32 = vld [vmem:[%s13512_s26 + $0x118] sm:$0xf] }
 0x157   : > { %v14786_v52 = vpop.f32.mrf.mxu1  ;;  %v14788_v51 = vpop.f32.mrf.mxu0  ;;  %v11476_v14 = vcombine.low %v4963_v54, %v4973_v16  ;;  %v14800_v21 = vrot.slane %v5004_v1, 5  ;;  %v4981_v28 = vor.u32 %v4980_v50, %v4977_v15  ;;  %v5008_v29 = vshrl.u32 %v11428_v46, 16  ;;  %v2285_v60 = vld [vmem:[#allocation2 + $0xb8] sm:$0xff]  ;;  %v13385_v1 = vld [vmem:[%s13512_s26 + $0x12c] sm:$0xff]  }
 0x158   : > { %v3352_v18 = vld [vmem:[#allocation2 + $0x68] sm:$0xff]  ;;  %v4991_v37 = vor.u32 %v4990_v48, %v4986_v24  ;;  %v5014_v41 = vshll.u32 %v11429_v11, 16  ;;  %v5001_v6 = vor.u32 %v5000_v27, %v4996_v49  ;;  %v2343_v54 = vadd.f32 %v2279_v4, %v14651_v31  ;;  %v11431_v11 = vld [vmem:[%s13512_s26 + $0x11c] sm:$0xf]  ;;  %v11432_v27 = vld [vmem:[%s13512_s26 + $0x120] sm:$0xf] }
 0x159   : > { %v14796_v45 = vpop.f32.mrf.mxu1  ;;  %v14798_v40 = vpop.f32.mrf.mxu0  ;;  %12957 = vmatmul.mubr.msk.bf16.gmra.mxu0 %vm511_vm0, %v11476_v14  ;;  %v3416_v62 = vadd.f32 %v3352_v18, %v14605_v38  ;;  %v2348_v22 = vadd.f32 %v14664_v2, %v2284_v35  ;;  %v4982_v5 = vrot.slane %v4981_v28, 4  ;;  %v5010_v59 = vrot.slane %v5008_v29, 4  ;;  %v11433_v4 = vld [vmem:[%s13512_s26 + $0x124] sm:$0xf]  ;;  %v11434_v29 = vld [vmem:[%s13512_s26 + $0x128] sm:$0x1] }
 0x15a   : > { %v4992_v26 = vrot.slane %v4991_v37, 4  ;;  %v3357_v46 = vld [vmem:[#allocation2 + $0x90] sm:$0xff]  ;;  %v5016_v8 = vrot.slane %v5014_v41, 5  ;;  %v5002_v38 = vrot.slane %v5001_v6, 4  ;;  %2407 = vst.msk [vmem:[#allocation2 + $0x88] sm:$0xff] %vm511_vm0, %v2343_v54  ;;  %v2346_v63 = vadd.f32 %v2282_v55, %v14675_v44 }
 0x15b   : > { %v14809_v39 = vpop.f32.mrf.mxu1  ;;  %v14811_v15 = vpop.f32.mrf.mxu0  ;;  %3480 = vst.msk [vmem:[#allocation2 + $0x68] sm:$0xff] %vm511_vm0, %v3416_v62  ;;  %v3421_v31 = vadd.f32 %v14614_v20, %v3357_v46  ;;  %v3355_v2 = vld [vmem:[#allocation2 + $0x80] sm:$0xff]  ;;  %2412 = vst.msk [vmem:[#allocation2 + $0xb0] sm:$0xff] %vm511_vm0, %v2348_v22  ;;  %v2349_v61 = vadd.f32 %v14684_v47, %v2285_v60  ;;  %v4987_v16 = vsel %vm13588_vm5, %v4982_v5, %v4986_v24  ;;  %v5019_v24 = vshrl.u32 %v11430_v32, 16  ;;  %v2283_v5 = vld [vmem:[#allocation2 + $0xa8] sm:$0xff] }
 0x15c   : > { %v4997_v50 = vsel %vm13588_vm5, %v4992_v26, %v4996_v49  ;;  %v5011_v48 = vor.u32 %v5010_v59, %v14800_v21  ;;  %v3419_v20 = vadd.f32 %v3355_v2, %v14622_v57  ;;  %v3358_v14 = vld [vmem:[#allocation2 + $0x98] sm:$0xff]  ;;  %v5007_v44 = vsel %vm13588_vm5, %v5002_v38, %v14800_v21  ;;  %2410 = vst.msk [vmem:[#allocation2 + $0xa0] sm:$0xff] %vm511_vm0, %v2346_v63 }
 0x15d   : > { %v11477_v35 = vcombine.low %v4987_v16, %v4997_v50  ;;  %3485 = vst.msk [vmem:[#allocation2 + $0x90] sm:$0xff] %vm511_vm0, %v3421_v31  ;;  %v3422_v47 = vadd.f32 %v14632_v12, %v3358_v14  ;;  %2413 = vst.msk [vmem:[#allocation2 + $0xb8] sm:$0xff] %vm511_vm0, %v2349_v61  ;;  %v14836_v49 = vpop.f32.mrf.mxu1  ;;  %12893 = vmatmul.mubr.msk.bf16.gmra.mxu1 %vm511_vm0, %v13383_v58  ;;  %v5022_v18 = vshll.u32 %v11430_v32, 16  ;;  %v5028_v28 = vshll.u32 %v11431_v11, 16  ;;  %v14841_v41 = vpop.f32.mrf.mxu0  ;;  %v13386_v31 = vld [vmem:[%s13512_s26 + $0x134] sm:$0xff]  }
 0x15e   : > { %v5012_v57 = vrot.slane %v5011_v48, 4  ;;  %3483 = vst.msk [vmem:[#allocation2 + $0x80] sm:$0xff] %vm511_vm0, %v3419_v20  ;;  %v5032_v37 = vshrl.u32 %v11431_v11, 16  ;;  %v5021_v12 = vrot.slane %v5019_v24, 4  ;;  %v5038_v21 = vshll.u32 %v11432_v27, 16  ;;  %12896 = vmatprep.mubr.msk.bf16.mxu1 %vm511_vm0, %v13385_v1  ;;  %v2288_v50 = vld [vmem:[#allocation2 + $0xd0] sm:$0xff] }
 0x15f   : > { %12960 = vmatprep.mubr.msk.bf16.mxu0 %vm511_vm0, %v11477_v35  ;;  %3486 = vst.msk [vmem:[#allocation2 + $0x98] sm:$0xff] %vm511_vm0, %v3422_v47  ;;  %v5042_v55 = vshrl.u32 %v11432_v27, 16  ;;  %v5048_v62 = vshll.u32 %v11433_v4, 16  ;;  %v14846_v6 = vpop.f32.mrf.mxu1  ;;  %v5024_v32 = vrot.slane %v5022_v18, 5  ;;  %v5030_v54 = vrot.slane %v5028_v28, 5  ;;  %v14850_v26 = vpop.f32.mrf.mxu0  ;;  %v13387_v24 = vld [vmem:[%s13512_s26 + $0x140] sm:$0xff]  }
 0x160   : > { %v5017_v58 = vsel %vm13588_vm5, %v5012_v57, %v5016_v8  ;;  %v5034_v22 = vrot.slane %v5032_v37, 4  ;;  %v5040_v59 = vrot.slane %v5038_v21, 5  ;;  %v5052_v1 = vshrl.u32 %v11433_v4, 16  ;;  %v11435_v47 = vld [vmem:[%s13512_s26 + $0x12c] sm:$0xf]  ;;  %v2289_v21 = vld [vmem:[#allocation2 + $0xd8] sm:$0xff] }
 0x161   : > { %v11478_v46 = vcombine.low %v5007_v44, %v5017_v58  ;;  %v5044_v60 = vrot.slane %v5042_v55, 4  ;;  %v14852_v38 = vrot.slane %v5048_v62, 5  ;;  %v14855_v2 = vpop.f32.mrf.mxu1  ;;  %v3356_v63 = vld [vmem:[#allocation2 + $0x88] sm:$0xff]  ;;  %v5025_v61 = vor.u32 %v5024_v32, %v5021_v12  ;;  %v14857_v48 = vpop.f32.mrf.mxu0  ;;  %v2286_v44 = vld [vmem:[#allocation2 + $0xc0] sm:$0xff]  ;;  %v11436_v55 = vld [vmem:[%s13512_s26 + $0x130] sm:$0xf] }
 0x162   : > { %v5035_v11 = vor.u32 %v5034_v22, %v5030_v54  ;;  %v3361_v8 = vld [vmem:[#allocation2 + $0xb0] sm:$0xff]  ;;  %v5058_v16 = vshll.u32 %v11434_v29, 16  ;;  %v3420_v20 = vadd.f32 %v3356_v63, %v14653_v43  ;;  %v2347_v35 = vadd.f32 %v2283_v5, %v14699_v33 }
 0x163   : > { %12961 = vmatmul.mubr.msk.bf16.gmra.mxu0 %vm511_vm0, %v11478_v46  ;;  %v5045_v14 = vor.u32 %v5044_v60, %v5040_v59  ;;  %v3425_v27 = vadd.f32 %v14666_v23, %v3361_v8  ;;  %v5026_v57 = vrot.slane %v5025_v61, 4  ;;  %v5054_v18 = vrot.slane %v5052_v1, 4  ;;  %v3359_v37 = vld [vmem:[#allocation2 + $0xa0] sm:$0xff]  ;;  %v11437_v62 = vld [vmem:[%s13512_s26 + $0x134] sm:$0xf]  ;;  %v14873_v58 = vpop.f32.mrf.mxu1  ;;  %v14875_v32 = vpop.f32.mrf.mxu0 }
 0x164   : > { %v5036_v4 = vrot.slane %v5035_v11, 4  ;;  %v5060_v28 = vrot.slane %v5058_v16, 5  ;;  %v3362_v29 = vld [vmem:[#allocation2 + $0xb8] sm:$0xff]  ;;  %3484 = vst.msk [vmem:[#allocation2 + $0x88] sm:$0xff] %vm511_vm0, %v3420_v20  ;;  %2411 = vst.msk [vmem:[#allocation2 + $0xa8] sm:$0xff] %vm511_vm0, %v2347_v35  ;;  %v3423_v43 = vadd.f32 %v3359_v37, %v14677_v25  ;;  %v2352_v23 = vadd.f32 %v14716_v9, %v2288_v50 }
 0x165   : > { %v5046_v12 = vrot.slane %v5045_v14, 4  ;;  %3489 = vst.msk [vmem:[#allocation2 + $0xb0] sm:$0xff] %vm511_vm0, %v3425_v27  ;;  %v3426_v33 = vadd.f32 %v14686_v19, %v3362_v29  ;;  %v5031_v22 = vsel %vm13588_vm5, %v5026_v57, %v5030_v54  ;;  %v5055_v46 = vor.u32 %v5054_v18, %v14852_v38  ;;  %12897 = vmatmul.mubr.msk.bf16.gmra.mxu1 %vm511_vm0, %v13386_v31  ;;  %v11438_v19 = vld [vmem:[%s13512_s26 + $0x138] sm:$0xf]  ;;  %v11439_v1 = vld [vmem:[%s13512_s26 + $0x13c] sm:$0x1] }
 0x166   : > { %v5041_v5 = vsel %vm13588_vm5, %v5036_v4, %v5040_v59  ;;  %v2350_v25 = vadd.f32 %v2286_v44, %v14728_v42  ;;  %3487 = vst.msk [vmem:[#allocation2 + $0xa0] sm:$0xff] %vm511_vm0, %v3423_v43  ;;  %2416 = vst.msk [vmem:[#allocation2 + $0xd0] sm:$0xff] %vm511_vm0, %v2352_v23  ;;  %v2353_v54 = vadd.f32 %v14739_v34, %v2289_v21  ;;  %v5063_v59 = vshrl.u32 %v11435_v47, 16  ;;  %v13388_v44 = vld [vmem:[%s13512_s26 + $0x148] sm:$0xff]   ;;  %v2292_v21 = vld [vmem:[#allocation2 + $0xf0] sm:$0xff] }
 0x167   : > { %v11479_v9 = vcombine.low %v5031_v22, %v5041_v5  ;;  %v5051_v60 = vsel %vm13588_vm5, %v5046_v12, %v14852_v38  ;;  %3490 = vst.msk [vmem:[#allocation2 + $0xb8] sm:$0xff] %vm511_vm0, %v3426_v33  ;;  %12900 = vmatprep.mubr.msk.bf16.mxu1 %vm511_vm0, %v13387_v24  ;;  %v5056_v31 = vrot.slane %v5055_v46, 4  ;;  %v5066_v42 = vshll.u32 %v11435_v47, 16  ;;  %v2287_v33 = vld [vmem:[#allocation2 + $0xc8] sm:$0xff]  ;;  %v2290_v46 = vld [vmem:[#allocation2 + $0xe0] sm:$0xff] }
 0x168   : > { %2414 = vst.msk [vmem:[#allocation2 + $0xc0] sm:$0xff] %vm511_vm0, %v2350_v25  ;;  %v5072_v63 = vshll.u32 %v11436_v55, 16  ;;  %v5076_v61 = vshrl.u32 %v11436_v55, 16  ;;  %2417 = vst.msk [vmem:[#allocation2 + $0xd8] sm:$0xff] %vm511_vm0, %v2353_v54  ;;  %v5065_v38 = vrot.slane %v5063_v59, 4  ;;  %v5082_v11 = vshll.u32 %v11437_v62, 16  ;;  %v14897_v34 = vpop.f32.mrf.mxu1  ;;  %v14899_v50 = vpop.f32.mrf.mxu0 }
 0x169   : > { %12964 = vmatprep.mubr.msk.bf16.mxu0 %vm511_vm0, %v11479_v9  ;;  %v5086_v8 = vshrl.u32 %v11437_v62, 16  ;;  %v5092_v16 = vshll.u32 %v11438_v19, 16  ;;  %v5061_v20 = vsel %vm13588_vm5, %v5056_v31, %v5060_v28  ;;  %v5068_v14 = vrot.slane %v5066_v42, 5  ;;  %v11440_v25 = vld [vmem:[%s13512_s26 + $0x140] sm:$0xf] }
 0x16a   : > { %v5074_v27 = vrot.slane %v5072_v63, 5  ;;  %v5078_v35 = vrot.slane %v5076_v61, 4  ;;  %v11480_v47 = vcombine.low %v5051_v60, %v5061_v20  ;;  %v5084_v24 = vrot.slane %v5082_v11, 5  ;;  %v14906_v18 = vpop.f32.mrf.mxu1  ;;  %v14908_v37 = vpop.f32.mrf.mxu0  ;;  %v11441_v9 = vld [vmem:[%s13512_s26 + $0x144] sm:$0xf] }
 0x16b   : > { %v5088_v57 = vrot.slane %v5086_v8, 4  ;;  %v14904_v4 = vrot.slane %v5092_v16, 5  ;;  %v3360_v29 = vld [vmem:[#allocation2 + $0xa8] sm:$0xff]  ;;  %v5069_v12 = vor.u32 %v5068_v14, %v5065_v38  ;;  %v5096_v23 = vshrl.u32 %v11438_v19, 16 }
 0x16c   : > { %v5079_v43 = vor.u32 %v5078_v35, %v5074_v27  ;;  %v5102_v28 = vshll.u32 %v11439_v1, 16  ;;  %12965 = vmatmul.mubr.msk.bf16.gmra.mxu0 %vm511_vm0, %v11480_v47  ;;  %v3424_v55 = vadd.f32 %v3360_v29, %v14701_v36  ;;  %v2351_v22 = vadd.f32 %v2287_v33, %v14748_v13  ;;  %v14916_v60 = vpop.f32.mrf.mxu1  ;;  %v14918_v54 = vpop.f32.mrf.mxu0  ;;  %v2293_v36 = vld [vmem:[#allocation2 + $0xf8] sm:$0xff]  ;;  %v11442_v8 = vld [vmem:[%s13512_s26 + $0x148] sm:$0xf]  ;;  %v11443_v35 = vld [vmem:[%s13512_s26 + $0x14c] sm:$0xf] }
 0x16d   : > { %v5089_v62 = vor.u32 %v5088_v57, %v5084_v24  ;;  %v2356_v5 = vadd.f32 %v14773_v17, %v2292_v21  ;;  %v5070_v19 = vrot.slane %v5069_v12, 4  ;;  %v3365_v31 = vld [vmem:[#allocation2 + $0xd0] sm:$0xff]  ;;  %v5098_v42 = vrot.slane %v5096_v23, 4  ;;  %12901 = vmatmul.mubr.msk.bf16.gmra.mxu1 %vm511_vm0, %v13388_v44 }
 0x16e   : > { %v5080_v59 = vrot.slane %v5079_v43, 4  ;;  %v5104_v63 = vrot.slane %v5102_v28, 5  ;;  %3488 = vst.msk [vmem:[#allocation2 + $0xa8] sm:$0xff] %vm511_vm0, %v3424_v55  ;;  %v3429_v17 = vadd.f32 %v14718_v10, %v3365_v31  ;;  %2415 = vst.msk [vmem:[#allocation2 + $0xc8] sm:$0xff] %vm511_vm0, %v2351_v22  ;;  %v2354_v38 = vadd.f32 %v2290_v46, %v14786_v52  ;;  %v14935_v44 = vpop.f32.mrf.mxu1 }
 0x16f   : > { %v5090_v13 = vrot.slane %v5089_v62, 4  ;;  %v3363_v61 = vld [vmem:[#allocation2 + $0xc0] sm:$0xff]  ;;  %2420 = vst.msk [vmem:[#allocation2 + $0xf0] sm:$0xff] %vm511_vm0, %v2356_v5  ;;  %v2357_v11 = vadd.f32 %v14796_v45, %v2293_v36  ;;  %v5075_v1 = vsel %vm13588_vm5, %v5070_v19, %v5074_v27  ;;  %v5099_v20 = vor.u32 %v5098_v42, %v14904_v4  ;;  %v3366_v14 = vld [vmem:[#allocation2 + $0xd8] sm:$0xff]  ;;  %v2291_v19 = vld [vmem:[#allocation2 + $0xe8] sm:$0xff] }
 0x170   : > { %v5085_v16 = vsel %vm13588_vm5, %v5080_v59, %v5084_v24  ;;  %v3427_v10 = vadd.f32 %v3363_v61, %v14730_v7  ;;  %3493 = vst.msk [vmem:[#allocation2 + $0xd0] sm:$0xff] %vm511_vm0, %v3429_v17  ;;  %v3430_v45 = vadd.f32 %v14741_v56, %v3366_v14  ;;  %2418 = vst.msk [vmem:[#allocation2 + $0xe0] sm:$0xff] %vm511_vm0, %v2354_v38  ;;  %v5107_v27 = vshrl.u32 %v11440_v25, 16  ;;  %v11444_v24 = vld [vmem:[%s13512_s26 + $0x150] sm:$0x1]  ;;  %v14945_v7 = vpop.f32.mrf.mxu0 }
 0x171   : > { %v11481_v47 = vcombine.low %v5075_v1, %v5085_v16  ;;  %v5095_v52 = vsel %vm13588_vm5, %v5090_v13, %v14904_v4  ;;  %2421 = vst.msk [vmem:[#allocation2 + $0xf8] sm:$0xff] %vm511_vm0, %v2357_v11  ;;  %v5100_v57 = vrot.slane %v5099_v20, 4  ;;  %v5110_v29 = vshll.u32 %v11440_v25, 16  ;;  %v11521_v59 = vld [vmem:[%s13512_s26 + $0x14] sm:$0xe] }
 0x172   : > { %3491 = vst.msk [vmem:[#allocation2 + $0xc0] sm:$0xff] %vm511_vm0, %v3427_v10  ;;  %v5116_v12 = vshll.u32 %v11441_v9, 16  ;;  %v5120_v43 = vshrl.u32 %v11441_v9, 16  ;;  %3494 = vst.msk [vmem:[#allocation2 + $0xd8] sm:$0xff] %vm511_vm0, %v3430_v45  ;;  %v5109_v56 = vrot.slane %v5107_v27, 4  ;;  %v5126_v4 = vshll.u32 %v11442_v8, 16 }
 0x173   : > { %12968 = vmatprep.mubr.msk.bf16.mxu0 %vm511_vm0, %v11481_v47  ;;  %v5130_v23 = vshrl.u32 %v11442_v8, 16  ;;  %v5136_v28 = vshll.u32 %v11443_v35, 16  ;;  %v5105_v33 = vsel %vm13588_vm5, %v5100_v57, %v5104_v63  ;;  %v5112_v21 = vrot.slane %v5110_v29, 5  ;;  %v14952_v22 = vpop.f32.mrf.mxu1  ;;  %v11522_v38 = vld [vmem:[%s13512_s26 + $0x18] sm:$0xf] }
 0x174   : > { %v5118_v55 = vrot.slane %v5116_v12, 5  ;;  %v5122_v62 = vrot.slane %v5120_v43, 4  ;;  %v11482_v5 = vcombine.low %v5095_v52, %v5105_v33  ;;  %v5128_v46 = vrot.slane %v5126_v4, 5  ;;  %v14957_v31 = vpop.f32.mrf.mxu0  ;;  %v11523_v10 = vld [vmem:[%s13512_s26 + $0x1c] sm:$0xf] }
 0x175   : > { %v5132_v25 = vrot.slane %v5130_v23, 4  ;;  %v14954_v9 = vrot.slane %v5136_v28, 5  ;;  %v3364_v42 = vld [vmem:[#allocation2 + $0xc8] sm:$0xff]  ;;  %v5113_v63 = vor.u32 %v5112_v21, %v5109_v56  ;;  %v5140_v17 = vshrl.u32 %v11443_v35, 16  ;;  %v14960_v11 = vpop.f32.mrf.mxu1  ;;  %v11524_v14 = vld [vmem:[%s13512_s26 + $0x20] sm:$0xf] }
 0x176   : > { %v5123_v36 = vor.u32 %v5122_v62, %v5118_v55  ;;  %v3369_v13 = vld [vmem:[#allocation2 + $0xf0] sm:$0xff]  ;;  %v5146_v61 = vshll.u32 %v11444_v24, 16  ;;  %12969 = vmatmul.mubr.msk.bf16.gmra.mxu0 %vm511_vm0, %v11482_v5  ;;  %v3428_v8 = vadd.f32 %v3364_v42, %v14750_v0  ;;  %v2355_v20 = vadd.f32 %v2291_v19, %v14809_v39  ;;  %v14969_v47 = vld [vmem:[%s13512_s26 + $0x24] sm:$0x1]  ;;  %v14971_v52 = vpop.f32.mrf.mxu0 }
 0x177   : > { %v5133_v1 = vor.u32 %v5132_v25, %v5128_v46  ;;  %v3433_v16 = vadd.f32 %v14775_v30, %v3369_v13  ;;  %v5114_v35 = vrot.slane %v5113_v63, 4  ;;  %v5142_v27 = vrot.slane %v5140_v17, 4  ;;  %v3367_v57 = vld [vmem:[#allocation2 + $0xe0] sm:$0xff]  ;;  %v14973_v29 = vpop.f32.mrf.mxu1  ;;  %v2296_v5 = vld [vmem:[#allocation2 + $0x110] sm:$0xff]  ;;  %v2297_v63 = vld [vmem:[#allocation2 + $0x118] sm:$0xff] }
 0x178   : > { %v5124_v45 = vrot.slane %v5123_v36, 4  ;;  %v5148_v24 = vrot.slane %v5146_v61, 5  ;;  %3492 = vst.msk [vmem:[#allocation2 + $0xc8] sm:$0xff] %vm511_vm0, %v3428_v8  ;;  %2419 = vst.msk [vmem:[#allocation2 + $0xe8] sm:$0xff] %vm511_vm0, %v2355_v20  ;;  %v3431_v30 = vadd.f32 %v3367_v57, %v14788_v51  ;;  %v11601_v39 = vrot.slane %v11521_v59, 9  ;;  %v14979_v43 = vpop.f32.mrf.mxu0  ;;  %v3370_v33 = vld [vmem:[#allocation2 + $0xf8] sm:$0xff] }
 0x179   : > { %v5134_v0 = vrot.slane %v5133_v1, 4  ;;  %3497 = vst.msk [vmem:[#allocation2 + $0xf0] sm:$0xff] %vm511_vm0, %v3433_v16  ;;  %v6018_v12 = vrot.slane %v11522_v38, 5  ;;  %v5119_v56 = vsel %vm13588_vm5, %v5114_v35, %v5118_v55  ;;  %v5143_v23 = vor.u32 %v5142_v27, %v14954_v9  ;;  %v13390_v36 = vld [vmem:[%s13512_s26 + $0x28] sm:$0xff]   ;;  %v11528_v20 = vld [vmem:[%s13512_s26 + $0x30] sm:$0xf] }
 0x17a   : > { %v5129_v4 = vsel %vm13588_vm5, %v5124_v45, %v5128_v46  ;;  %v6021_v28 = vrot.slane %v11523_v10, 5  ;;  %3495 = vst.msk [vmem:[#allocation2 + $0xe0] sm:$0xff] %vm511_vm0, %v3431_v30  ;;  %v2294_v46 = vld [vmem:[#allocation2 + $0x100] sm:$0xff]  ;;  %v6024_v59 = vrot.slane %v11524_v14, 5  ;;  %v6027_v42 = vrot.slane %v14969_v47, 5  ;;  %v14997_v17 = vpop.f32.mrf.mxu0  ;;  %v2295_v27 = vld [vmem:[#allocation2 + $0x108] sm:$0xff] }
 0x17b   : > { %v11483_v21 = vcombine.low %v5119_v56, %v5129_v4  ;;  %v5139_v51 = vsel %vm13588_vm5, %v5134_v0, %v14954_v9  ;;  %v6019_v62 = vsel %vm13606_vm6, %v11601_v39, %v6018_v12  ;;  %v6020_v55 = vrot.slane %v6018_v12, 4  ;;  %v11526_v13 = vld [vmem:[%s13512_s26 + $0x28] sm:$0xe]  ;;  %v14995_v9 = vpop.f32.mrf.mxu1  ;;  %v11527_v16 = vld [vmem:[%s13512_s26 + $0x2c] sm:$0xf]  ;;  %v2300_v30 = vld [vmem:[#allocation2 + $0x130] sm:$0xff] }
 0x17c   : > { %v5144_v25 = vrot.slane %v5143_v23, 4  ;;  %v6023_v19 = vrot.slane %v6021_v28, 4  ;;  %v2360_v38 = vadd.f32 %v14836_v49, %v2296_v5  ;;  %v3434_v8 = vadd.f32 %v14798_v40, %v3370_v33  ;;  %v11529_v10 = vld [vmem:[%s13512_s26 + $0x34] sm:$0xf]  ;;  %v11530_v57 = vld [vmem:[%s13512_s26 + $0x38] sm:$0x1] }
 0x17d   : > { %12972 = vmatprep.mubr.msk.bf16.mxu0 %vm511_vm0, %v11483_v21  ;;  %v6022_v61 = vsel %vm13606_vm6, %v6020_v55, %v6021_v28  ;;  %v2358_v1 = vadd.f32 %v2294_v46, %v14846_v6  ;;  %v6026_v35 = vrot.slane %v6024_v59, 4  ;;  %v15014_v49 = vld [vmem:[%s13512_s26 + $0x3c] sm:$0xe]  ;;  %v2361_v6 = vadd.f32 %v14855_v2, %v2297_v63  ;;  %v15022_v39 = vld [vmem:[%s13512_s26 + $0x40] sm:$0xf] }
 0x17e   : > { %v5149_v14 = vsel %vm13588_vm5, %v5144_v25, %v5148_v24  ;;  %v6025_v47 = vsel %vm13606_vm6, %v6023_v19, %v6024_v59  ;;  %v11625_v45 = vcombine.low %v6019_v62, %v6022_v61  ;;  %2424 = vst.msk [vmem:[#allocation2 + $0x110] sm:$0xff] %vm511_vm0, %v2360_v38  ;;  %3498 = vst.msk [vmem:[#allocation2 + $0xf8] sm:$0xff] %vm511_vm0, %v3434_v8  ;;  %v11602_v0 = vrot.slane %v11526_v13, 9  ;;  %v15025_v12 = vld [vmem:[%s13512_s26 + $0x44] sm:$0xf]  ;;  %v2301_v59 = vld [vmem:[#allocation2 + $0x138] sm:$0xff] }
 0x17f   : > { %v11484_v40 = vcombine.low %v5139_v51, %v5149_v14  ;;  %2422 = vst.msk [vmem:[#allocation2 + $0x100] sm:$0xff] %vm511_vm0, %v2358_v1  ;;  %v2359_v24 = vadd.f32 %v2295_v27, %v14873_v58  ;;  %v6028_v56 = vsel %vm13606_vm6, %v6026_v35, %v6027_v42  ;;  %v3368_v4 = vld [vmem:[#allocation2 + $0xe8] sm:$0xff]  ;;  %v6031_v23 = vrot.slane %v11527_v16, 5  ;;  %v15031_v21 = vpop.f32.mrf.mxu1  ;;  %v15033_v2 = vpop.f32.mrf.mxu0  ;;  %2425 = vst.msk [vmem:[#allocation2 + $0x118] sm:$0xff] %vm511_vm0, %v2361_v6  ;;  %v2298_v5 = vld [vmem:[#allocation2 + $0x120] sm:$0xff] }
 0x180   : > { %12984 = vmatprep.mubr.msk.bf16.mxu1 %vm511_vm0, %v11625_v45  ;;  %v6034_v28 = vrot.slane %v11528_v20, 5  ;;  %v2364_v33 = vadd.f32 %v14897_v34, %v2300_v30  ;;  %v11626_v58 = vcombine.low %v6025_v47, %v6028_v56  ;;  %v3432_v51 = vadd.f32 %v3368_v4, %v14811_v15  ;;  %v15042_v34 = vld [vmem:[%s17387_s1 + $0xf0] sm:$0xff]   ;;  %v2299_v42 = vld [vmem:[#allocation2 + $0x128] sm:$0xff]  ;;  %v13431_v16 = vld [vmem:[%s17387_s1 + $0xf8] sm:$0xff]  }
 0x181   : > { %12973 = vmatmul.mubr.msk.bf16.gmra.mxu0 %vm511_vm0, %v11484_v40  ;;  %2423 = vst.msk [vmem:[#allocation2 + $0x108] sm:$0xff] %vm511_vm0, %v2359_v24  ;;  %v6037_v62 = vrot.slane %v11529_v10, 5  ;;  %v6040_v55 = vrot.slane %v11530_v57, 5  ;;  %v6032_v46 = vsel %vm13606_vm6, %v11602_v0, %v6031_v23  ;;  %v6033_v25 = vrot.slane %v6031_v23, 4  ;;  %v11534_v63 = vld [vmem:[%s13512_s26 + $0x48] sm:$0xf]  ;;  %v15050_v13 = vpop.f32.mrf.mxu1  ;;  %v15052_v61 = vpop.f32.mrf.mxu0 }
 0x182   : > { %13056 = vmatprep.mubr.msk.bf16.mxu0 %vm511_vm0, %v13390_v36  ;;  %v6036_v15 = vrot.slane %v6034_v28, 4  ;;  %2428 = vst.msk [vmem:[#allocation2 + $0x130] sm:$0xff] %vm511_vm0, %v2364_v33  ;;  %v2362_v19 = vadd.f32 %v2298_v5, %v14906_v18  ;;  %12985 = vmatmul.mubr.msk.bf16.vlgmr.msra.gmra.mxu1 %vm511_vm0, %v11626_v58  ;;  %3496 = vst.msk [vmem:[#allocation2 + $0xe8] sm:$0xff] %vm511_vm0, %v3432_v51  ;;  %v13391_v36 = vld [vmem:[%s13512_s26 + $0x30] sm:$0xff]   ;;  %v2365_v8 = vadd.f32 %v14916_v60, %v2301_v59  ;;  %v13393_v60 = vld [vmem:[%s13512_s26 + $0x3c] sm:$0xff]  }
 0x183   : > { %v6039_v38 = vrot.slane %v6037_v62, 4  ;;  %v2363_v1 = vadd.f32 %v2299_v42, %v14935_v44  ;;  %v11603_v18 = vrot.slane %v15014_v49, 9  ;;  %13121 = vmatpush3.bf16.msra.mxu1 %v13431_v16  ;;  %v6035_v20 = vsel %vm13606_vm6, %v6033_v25, %v6034_v28  ;;  %v2304_v47 = vld [vmem:[#allocation2 + $0x150] sm:$0xff]  ;;  %v11535_v35 = vld [vmem:[%s13512_s26 + $0x4c] sm:$0x1]  ;;  %v15074_v45 = vpop.f32.mrf.mxu1  ;;  %v15076_v27 = vpop.f32.mrf.mxu0  ;;  %v2302_v24 = vld [vmem:[#allocation2 + $0x140] sm:$0xff] }
 0x184   : > { %v15067_v10 = vsel %vm13606_vm6, %v6036_v15, %v6037_v62  ;;  %2426 = vst.msk [vmem:[#allocation2 + $0x120] sm:$0xff] %vm511_vm0, %v2362_v19  ;;  %v6044_v44 = vrot.slane %v15022_v39, 5  ;;  %v6047_v14 = vrot.slane %v15025_v12, 5  ;;  %v11627_v57 = vcombine.low %v6032_v46, %v6035_v20  ;;  %2429 = vst.msk [vmem:[#allocation2 + $0x138] sm:$0xff] %vm511_vm0, %v2365_v8  ;;  %v2305_v0 = vld [vmem:[#allocation2 + $0x158] sm:$0xff]  ;;  %13122 = vmatprep.subr.bf16.mxu1 %v15042_v34  ;;  %v15104_v51 = vld [vmem:[%s17387_s1 + $0x110] sm:$0xff]  }
 0x185   : > { %v6041_v49 = vsel %vm13606_vm6, %v6039_v38, %v6040_v55  ;;  %2427 = vst.msk [vmem:[#allocation2 + $0x128] sm:$0xff] %vm511_vm0, %v2363_v1  ;;  %v2368_v40 = vadd.f32 %v14952_v22, %v2304_v47  ;;  %v6050_v6 = vrot.slane %v11534_v63, 5  ;;  %v15084_v30 = vld [vmem:[%s13512_s26 + $0x50] sm:$0xe]  ;;  %v15093_v33 = vld [vmem:[%s13512_s26 + $0x54] sm:$0xf]  ;;  %v15113_v19 = vpop.f32.mrf.mxu1  ;;  %v2369_v38 = vadd.f32 %v14973_v29, %v2305_v0  ;;  %v15124_v1 = vpop.f32.mrf.mxu0 }
 0x186   : > { %v3373_v39 = vld [vmem:[#allocation2 + $0x110] sm:$0xff]  ;;  %v3371_v12 = vld [vmem:[#allocation2 + $0x100] sm:$0xff]  ;;  %v11628_v56 = vcombine.low %v15067_v10, %v6041_v49  ;;  %v15090_v4 = vsel %vm13606_vm6, %v11603_v18, %v6044_v44  ;;  %v6046_v23 = vrot.slane %v6044_v44, 4  ;;  %v6049_v28 = vrot.slane %v6047_v14, 4  ;;  %v15096_v22 = vld [vmem:[%s13512_s26 + $0x58] sm:$0xf]  ;;  %12988 = vmatprep.mubr.msk.bf16.mxu1 %vm511_vm0, %v11627_v57 }
 0x187   : > { %v15099_v58 = vld [vmem:[%s13512_s26 + $0x5c] sm:$0xf]  ;;  %v3437_v62 = vadd.f32 %v14841_v41, %v3373_v39  ;;  %v3435_v55 = vadd.f32 %v3371_v12, %v14850_v26  ;;  %2432 = vst.msk [vmem:[#allocation2 + $0x150] sm:$0xff] %vm511_vm0, %v2368_v40  ;;  %v6052_v5 = vrot.slane %v6050_v6, 4  ;;  %v6053_v46 = vrot.slane %v11535_v35, 5  ;;  %v2303_v25 = vld [vmem:[#allocation2 + $0x148] sm:$0xff]  ;;  %13123 = vmatpush3.bf16.msra.mxu1 %v15042_v34 }
 0x188   : > { %v15111_v15 = vld [vmem:[%s13512_s26 + $0x60] sm:$0x1]  ;;  %v3374_v59 = vld [vmem:[#allocation2 + $0x118] sm:$0xff]  ;;  %v3372_v42 = vld [vmem:[#allocation2 + $0x108] sm:$0xff]  ;;  %v6048_v63 = vsel %vm13606_vm6, %v6046_v23, %v6047_v14  ;;  %v15119_v41 = vsel %vm13606_vm6, %v6049_v28, %v6050_v6  ;;  %v2366_v26 = vadd.f32 %v2302_v24, %v14960_v11  ;;  %2433 = vst.msk [vmem:[#allocation2 + $0x158] sm:$0xff] %vm511_vm0, %v2369_v38  ;;  %v2367_v44 = vadd.f32 %v2303_v25, %v14995_v9 }
 0x189   : > { %v2308_v8 = vld [vmem:[#allocation2 + $0x170] sm:$0xff]  ;;  %v13409_v18 = vld [vmem:[%s17387_s1 + $0xe8] sm:$0xff]   ;;  %3501 = vst.msk [vmem:[#allocation2 + $0x110] sm:$0xff] %vm511_vm0, %v3437_v62  ;;  %13057 = vmatmul.mubr.msk.bf16.vlgmr.msra.gmra.mxu0 %vm511_vm0, %v13391_v36  ;;  %3499 = vst.msk [vmem:[#allocation2 + $0x100] sm:$0xff] %vm511_vm0, %v3435_v55  ;;  %v3438_v11 = vadd.f32 %v14857_v48, %v3374_v59  ;;  %v3436_v29 = vadd.f32 %v3372_v42, %v14875_v32  ;;  %v11629_v34 = vcombine.low %v15090_v4, %v6048_v63 }
 0x18a   : > { %v3377_v16 = vld [vmem:[#allocation2 + $0x130] sm:$0xff]  ;;  %v15137_v20 = vsel %vm13606_vm6, %v6052_v5, %v6053_v46  ;;  %v2306_v10 = vld [vmem:[#allocation2 + $0x160] sm:$0xff]  ;;  %v13432_v36 = vld [vmem:[%s17387_s1 + $0x118] sm:$0xff]   ;;  %13060 = vmatprep.mubr.msk.bf16.mxu0 %vm511_vm0, %v13393_v60  ;;  %2430 = vst.msk [vmem:[#allocation2 + $0x140] sm:$0xff] %vm511_vm0, %v2366_v26  ;;  %v11604_v14 = vrot.slane %v15084_v30, 9  ;;  %12989 = vmatmul.mubr.msk.bf16.gmra.mxu1 %vm511_vm0, %v11628_v56  ;;  %v6057_v57 = vrot.slane %v15093_v33, 5  ;;  %v2372_v40 = vadd.f32 %v15031_v21, %v2308_v8  ;;  %v12746_v0 = vpop.f32.mrf.mxu1 }
 0x18b   : > { %13193 = vmatpush3.bf16.msra.mxu0 %v13432_v36  ;;  %v3441_v48 = vadd.f32 %v14899_v50, %v3377_v16  ;;  %v11630_v32 = vcombine.low %v15119_v41, %v15137_v20  ;;  %v15151_v47 = vld [vmem:[%s13512_s26 + $0x64] sm:$0xe]  ;;  %v15154_v35 = vld [vmem:[%s13512_s26 + $0x68] sm:$0xf]  ;;  %3502 = vst.msk [vmem:[#allocation2 + $0x118] sm:$0xff] %vm511_vm0, %v3438_v11  ;;  %3500 = vst.msk [vmem:[#allocation2 + $0x108] sm:$0xff] %vm511_vm0, %v3436_v29  ;;  %12992 = vmatprep.mubr.msk.bf16.mxu1 %vm511_vm0, %v11629_v34 }
 0x18c   : > { %v15159_v60 = vld [vmem:[%s17387_s1 + $0xe0] sm:$0xff]   ;;  %v6060_v49 = vrot.slane %v15096_v22, 5  ;;  %v6063_v6 = vrot.slane %v15099_v58, 5  ;;  %v2309_v24 = vld [vmem:[#allocation2 + $0x178] sm:$0xff]  ;;  %13194 = vmatprep.subr.bf16.mxu0 %v15104_v51  ;;  %v15175_v30 = vld [vmem:[%s17387_s1 + $0x108] sm:$0xff]   ;;  %2431 = vst.msk [vmem:[#allocation2 + $0x148] sm:$0xff] %vm511_vm0, %v2367_v44  ;;  %v2370_v23 = vadd.f32 %v2306_v10, %v15050_v13  ;;  %v15188_v22 = vpop.f32.mrf.mxu0  ;;  %13124 = vmatprep.subr.bf16.mxu1 %v13409_v18  ;;  %v15194_v62 = vsel %vm13606_vm6, %v11604_v14, %v6057_v57  ;;  %v2199_v46 = vpop.f32.mrf.mxu1 }
 0x18d   : > { %v15165_v50 = vld [vmem:[%s13512_s26 + $0x44] sm:$0xff]   ;;  %3505 = vst.msk [vmem:[#allocation2 + $0x130] sm:$0xff] %vm511_vm0, %v3441_v48  ;;  %v3378_v12 = vld [vmem:[#allocation2 + $0x138] sm:$0xff]  ;;  %v13395_v56 = vld [vmem:[%s13512_s26 + $0x50] sm:$0xff]   ;;  %v6066_v4 = vrot.slane %v15111_v15, 5  ;;  %v2373_v28 = vadd.f32 %v15074_v45, %v2309_v24  ;;  %v6059_v55 = vrot.slane %v6057_v57, 4  ;;  %13125 = vmatpush3.bf16.msra.mxu1 %v13409_v18 }
 0x18e   : > { %v3375_v9 = vld [vmem:[#allocation2 + $0x120] sm:$0xff]  ;;  %v3376_v21 = vld [vmem:[#allocation2 + $0x128] sm:$0xff]  ;;  %2436 = vst.msk [vmem:[#allocation2 + $0x170] sm:$0xff] %vm511_vm0, %v2372_v40  ;;  %v2312_v5 = vld [vmem:[#allocation2 + $0x190] sm:$0xff]  ;;  %v6065_v15 = vrot.slane %v6063_v6, 4  ;;  %v11605_v59 = vrot.slane %v15151_v47, 9  ;;  %v15208_v63 = vpop.f32.mrf.mxu0  ;;  %13126 = vmatprep.subr.bf16.mxu1 %v15159_v60  ;;  %v12747_v18 = vpop.f32.mrf.mxu1 }
 0x18f   : > { %v3439_v39 = vadd.f32 %v3375_v9, %v14908_v37  ;;  %v15186_v33 = vld [vmem:[%s13512_s26 + $0x6c] sm:$0xf]  ;;  %v3442_v37 = vadd.f32 %v14918_v54, %v3378_v12  ;;  %v3440_v58 = vadd.f32 %v3376_v21, %v14945_v7  ;;  %v15198_v45 = vld [vmem:[%s13512_s26 + $0x70] sm:$0xf]  ;;  %v6062_v54 = vrot.slane %v6060_v49, 4  ;;  %2434 = vst.msk [vmem:[#allocation2 + $0x160] sm:$0xff] %vm511_vm0, %v2370_v23  ;;  %13195 = vmatpush3.bf16.msra.mxu0 %v15104_v51 }
 0x190   : > { %v2307_v13 = vld [vmem:[#allocation2 + $0x168] sm:$0xff]  ;;  %v3381_v25 = vld [vmem:[#allocation2 + $0x150] sm:$0xff]  ;;  %2437 = vst.msk [vmem:[#allocation2 + $0x178] sm:$0xff] %vm511_vm0, %v2373_v28  ;;  %v6070_v38 = vrot.slane %v15154_v35, 5  ;;  %v6073_v8 = vrot.slane %v15186_v33, 5  ;;  %13196 = vmatprep.subr.bf16.mxu0 %v15175_v30  ;;  %v15227_v29 = vsel %vm13606_vm6, %v6065_v15, %v6066_v4  ;;  %v2310_v16 = vld [vmem:[#allocation2 + $0x180] sm:$0xff]  ;;  %v15236_v44 = vpop.f32.mrf.mxu0 }
 0x191   : > { %3503 = vst.msk [vmem:[#allocation2 + $0x120] sm:$0xff] %vm511_vm0, %v3439_v39  ;;  %v2371_v7 = vadd.f32 %v2307_v13, %v15113_v19  ;;  %v15206_v42 = vld [vmem:[%s13512_s26 + $0x74] sm:$0x1]  ;;  %3506 = vst.msk [vmem:[#allocation2 + $0x138] sm:$0xff] %vm511_vm0, %v3442_v37  ;;  %v3445_v26 = vadd.f32 %v14957_v31, %v3381_v25  ;;  %v6061_v19 = vsel %vm13606_vm6, %v6059_v55, %v6060_v49  ;;  %v2313_v34 = vld [vmem:[#allocation2 + $0x198] sm:$0xff]  ;;  %13061 = vmatmul.mubr.msk.bf16.gmra.mxu0 %vm511_vm0, %v15165_v50 }
 0x192   : > { %3504 = vst.msk [vmem:[#allocation2 + $0x128] sm:$0xff] %vm511_vm0, %v3440_v58  ;;  %v11631_v51 = vcombine.low %v15194_v62, %v6061_v19  ;;  %v15223_v11 = vsel %vm13606_vm6, %v6062_v54, %v6063_v6  ;;  %v2376_v31 = vadd.f32 %v12746_v0, %v2312_v5  ;;  %v2311_v10 = vld [vmem:[#allocation2 + $0x188] sm:$0xff]  ;;  %v15231_v36 = vld [vmem:[%s13512_s26 + $0x78] sm:$0xe]  ;;  %v15234_v48 = vld [vmem:[%s13512_s26 + $0x7c] sm:$0xf]  ;;  %v15248_v57 = vsel %vm13606_vm6, %v11605_v59, %v6070_v38  ;;  %v2202_v6 = vpop.f32.mrf.mxu1  ;;  %v15271_v28 = vpop.f32.mrf.mxu0 }
 0x193   : > { %2435 = vst.msk [vmem:[#allocation2 + $0x168] sm:$0xff] %vm511_vm0, %v2371_v7  ;;  %v13422_v14 = vld [vmem:[%s17387_s1 + $0x100] sm:$0xff]   ;;  %3509 = vst.msk [vmem:[#allocation2 + $0x150] sm:$0xff] %vm511_vm0, %v3445_v26  ;;  %v11632_v35 = vcombine.low %v15223_v11, %v15227_v29  ;;  %v3382_v9 = vld [vmem:[#allocation2 + $0x158] sm:$0xff]  ;;  %v6072_v49 = vrot.slane %v6070_v38, 4  ;;  %v6075_v40 = vrot.slane %v6073_v8, 4  ;;  %13127 = vmatpush3.bf16.msra.mxu1 %v15159_v60  ;;  %13064 = vmatprep.mubr.msk.bf16.mxu0 %vm511_vm0, %v13395_v56 }
 0x194   : > { %v3379_v47 = vld [vmem:[#allocation2 + $0x140] sm:$0xff]  ;;  %v3446_v0 = vadd.f32 %v14979_v43, %v3382_v9  ;;  %2440 = vst.msk [vmem:[#allocation2 + $0x190] sm:$0xff] %vm511_vm0, %v2376_v31  ;;  %v6076_v39 = vrot.slane %v15198_v45, 5  ;;  %v6079_v12 = vrot.slane %v15206_v42, 5  ;;  %13197 = vmatpush3.bf16.msra.mxu0 %v15175_v30  ;;  %12993 = vmatmul.mubr.msk.bf16.gmra.mxu1 %vm511_vm0, %v11630_v32  ;;  %v13396_v60 = vld [vmem:[%s13512_s26 + $0x58] sm:$0xff]   ;;  %v3380_v21 = vld [vmem:[#allocation2 + $0x148] sm:$0xff]  ;;  %v2374_v43 = vadd.f32 %v2310_v16, %v2199_v46 }
 0x195   : > { %v15251_v24 = vld [vmem:[%s13512_s26 + $0x80] sm:$0xf]  ;;  %v3443_v50 = vadd.f32 %v3379_v47, %v14971_v52  ;;  %v15268_v52 = vsel %vm13606_vm6, %v6072_v49, %v6073_v8  ;;  %v2377_v56 = vadd.f32 %v12747_v18, %v2313_v34  ;;  %v2375_v4 = vadd.f32 %v2311_v10, %v2202_v6  ;;  %v11549_v23 = vld [vmem:[%s13512_s26 + $0x84] sm:$0xf]  ;;  %12996 = vmatprep.mubr.msk.bf16.mxu1 %vm511_vm0, %v11631_v51  ;;  %v3385_v20 = vld [vmem:[#allocation2 + $0x170] sm:$0xff] }
 0x196   : > { %3510 = vst.msk [vmem:[#allocation2 + $0x158] sm:$0xff] %vm511_vm0, %v3446_v0  ;;  %v3444_v41 = vadd.f32 %v3380_v21, %v14997_v17  ;;  %v11633_v32 = vcombine.low %v15248_v57, %v15268_v52  ;;  %v15281_v30 = vsel %vm13606_vm6, %v6075_v40, %v6076_v39  ;;  %v6078_v33 = vrot.slane %v6076_v39, 4  ;;  %v11550_v37 = vld [vmem:[%s13512_s26 + $0x88] sm:$0x1]  ;;  %v15285_v58 = vld [vmem:[%s13512_s26 + $0x8c] sm:$0xe]  ;;  %13198 = vmatprep.subr.bf16.mxu0 %v13422_v14  ;;  %v12750_v8 = vpop.f32.mrf.mxu1  ;;  %v15313_v51 = vpop.f32.mrf.mxu0 }
 0x197   : > { %3507 = vst.msk [vmem:[#allocation2 + $0x140] sm:$0xff] %vm511_vm0, %v3443_v50  ;;  %v13397_v62 = vld [vmem:[%s13512_s26 + $0x64] sm:$0xff]   ;;  %v3449_v55 = vadd.f32 %v15033_v2, %v3385_v20  ;;  %v3386_v17 = vld [vmem:[#allocation2 + $0x178] sm:$0xff]  ;;  %2438 = vst.msk [vmem:[#allocation2 + $0x180] sm:$0xff] %vm511_vm0, %v2374_v43  ;;  %v11606_v5 = vrot.slane %v15231_v36, 9  ;;  %v6083_v45 = vrot.slane %v15234_v48, 5 }
 0x198   : > { %v3383_v13 = vld [vmem:[#allocation2 + $0x160] sm:$0xff]  ;;  %2441 = vst.msk [vmem:[#allocation2 + $0x198] sm:$0xff] %vm511_vm0, %v2377_v56  ;;  %2439 = vst.msk [vmem:[#allocation2 + $0x188] sm:$0xff] %vm511_vm0, %v2375_v4  ;;  %v6086_v46 = vrot.slane %v15251_v24, 5  ;;  %v15299_v2 = vsel %vm13606_vm6, %v6078_v33, %v6079_v12  ;;  %v3450_v54 = vadd.f32 %v15076_v27, %v3386_v17  ;;  %v2316_v15 = vld [vmem:[#allocation2 + $0x1b0] sm:$0xff]  ;;  %v6089_v7 = vrot.slane %v11549_v23, 5  ;;  %13199 = vmatpush3.bf16.msra.mxu0 %v13422_v14  ;;  %v2215_v40 = vpop.f32.mrf.mxu1 }
 0x199   : > { %3508 = vst.msk [vmem:[#allocation2 + $0x148] sm:$0xff] %vm511_vm0, %v3444_v41  ;;  %v3447_v25 = vadd.f32 %v3383_v13, %v15052_v61  ;;  %v11552_v59 = vld [vmem:[%s13512_s26 + $0x90] sm:$0xf]  ;;  %v15304_v42 = vld [vmem:[%s13512_s26 + $0x94] sm:$0xf]  ;;  %3513 = vst.msk [vmem:[#allocation2 + $0x170] sm:$0xff] %vm511_vm0, %v3449_v55  ;;  %v11634_v61 = vcombine.low %v15281_v30, %v15299_v2  ;;  %v15311_v19 = vsel %vm13606_vm6, %v11606_v5, %v6083_v45  ;;  %13065 = vmatmul.mubr.msk.bf16.gmra.mxu0 %vm511_vm0, %v13396_v60 }
 0x19a   : > { %v3384_v26 = vld [vmem:[#allocation2 + $0x168] sm:$0xff]  ;;  %v6085_v38 = vrot.slane %v6083_v45, 4  ;;  %v6088_v27 = vrot.slane %v6086_v46, 4  ;;  %v2314_v18 = vld [vmem:[#allocation2 + $0x1a0] sm:$0xff]  ;;  %v15316_v31 = vld [vmem:[%s13512_s26 + $0x98] sm:$0xf]  ;;  %v2380_v36 = vadd.f32 %v12750_v8, %v2316_v15  ;;  %13068 = vmatprep.mubr.msk.bf16.mxu0 %vm511_vm0, %v13397_v62  ;;  %v12751_v4 = vpop.f32.mrf.mxu1 }
 0x19b   : > { %v15319_v16 = vld [vmem:[%s13512_s26 + $0x9c] sm:$0x1]  ;;  %v15322_v34 = vld [vmem:[%s13512_s26 + $0xa0] sm:$0xe]  ;;  %3511 = vst.msk [vmem:[#allocation2 + $0x160] sm:$0xff] %vm511_vm0, %v3447_v25  ;;  %3514 = vst.msk [vmem:[#allocation2 + $0x178] sm:$0xff] %vm511_vm0, %v3450_v54  ;;  %v3448_v10 = vadd.f32 %v3384_v26, %v15124_v1  ;;  %v15336_v1 = vpop.f32.mrf.mxu0  ;;  %v2378_v60 = vadd.f32 %v2314_v18, %v2215_v40 }
 0x19c   : > { %v6091_v48 = vrot.slane %v6089_v7, 4  ;;  %v6092_v14 = vrot.slane %v11550_v37, 5  ;;  %v3389_v47 = vld [vmem:[#allocation2 + $0x190] sm:$0xff]  ;;  %v15330_v9 = vsel %vm13606_vm6, %v6085_v38, %v6086_v46  ;;  %v15334_v49 = vsel %vm13606_vm6, %v6088_v27, %v6089_v7  ;;  %v2317_v6 = vld [vmem:[#allocation2 + $0x1b8] sm:$0xff]  ;;  %2444 = vst.msk [vmem:[#allocation2 + $0x1b0] sm:$0xff] %vm511_vm0, %v2380_v36  ;;  %12997 = vmatmul.mubr.msk.bf16.gmra.mxu1 %vm511_vm0, %v11632_v35  ;;  %v2218_v5 = vpop.f32.mrf.mxu1  ;;  %v2315_v45 = vld [vmem:[#allocation2 + $0x1a8] sm:$0xff] }
 0x19d   : > { %v11607_v24 = vrot.slane %v15285_v58, 9  ;;  %v6096_v50 = vrot.slane %v11552_v59, 5  ;;  %3512 = vst.msk [vmem:[#allocation2 + $0x168] sm:$0xff] %vm511_vm0, %v3448_v10  ;;  %v3453_v0 = vadd.f32 %v15188_v22, %v3389_v47  ;;  %v11635_v39 = vcombine.low %v15311_v19, %v15330_v9  ;;  %v11557_v21 = vld [vmem:[%s13512_s26 + $0xa4] sm:$0xf]  ;;  %v13398_v22 = vld [vmem:[%s13512_s26 + $0x6c] sm:$0xff]   ;;  %v15365_v33 = vpop.f32.mrf.mxu0  ;;  %13000 = vmatprep.mubr.msk.bf16.mxu1 %vm511_vm0, %v11633_v32 }
 0x19e   : > { %v15347_v12 = vsel %vm13606_vm6, %v6091_v48, %v6092_v14  ;;  %v15351_v43 = vld [vmem:[%s13512_s26 + $0xa8] sm:$0xf]  ;;  %v6099_v20 = vrot.slane %v15304_v42, 5  ;;  %v15368_v37 = vld [vmem:[%s13512_s26 + $0xac] sm:$0xf]  ;;  %v3387_v11 = vld [vmem:[#allocation2 + $0x180] sm:$0xff]  ;;  %v2381_v62 = vadd.f32 %v12751_v4, %v2317_v6  ;;  %v2379_v7 = vadd.f32 %v2315_v45, %v2218_v5 }
 0x19f   : > { %v11636_v56 = vcombine.low %v15334_v49, %v15347_v12  ;;  %v15362_v23 = vsel %vm13606_vm6, %v11607_v24, %v6096_v50  ;;  %v6098_v41 = vrot.slane %v6096_v50, 4  ;;  %v15371_v58 = vld [vmem:[%s13512_s26 + $0xb0] sm:$0x1]  ;;  %3517 = vst.msk [vmem:[#allocation2 + $0x190] sm:$0xff] %vm511_vm0, %v3453_v0  ;;  %v3390_v29 = vld [vmem:[#allocation2 + $0x198] sm:$0xff]  ;;  %2442 = vst.msk [vmem:[#allocation2 + $0x1a0] sm:$0xff] %vm511_vm0, %v2378_v60  ;;  %v3451_v52 = vadd.f32 %v3387_v11, %v15208_v63 }
 0x1a0   : > { %v3388_v35 = vld [vmem:[#allocation2 + $0x188] sm:$0xff]  ;;  %v6102_v55 = vrot.slane %v15316_v31, 5  ;;  %v6105_v13 = vrot.slane %v15319_v16, 5  ;;  %v11608_v57 = vrot.slane %v15322_v34, 9  ;;  %v3454_v32 = vadd.f32 %v15236_v44, %v3390_v29  ;;  %v11561_v25 = vld [vmem:[%s13512_s26 + $0xb4] sm:$0xe] }
 0x1a1   : > { %v3452_v17 = vadd.f32 %v3388_v35, %v15271_v28  ;;  %v15387_v46 = vsel %vm13606_vm6, %v6098_v41, %v6099_v20  ;;  %v11562_v54 = vld [vmem:[%s13512_s26 + $0xb8] sm:$0xf]  ;;  %2445 = vst.msk [vmem:[#allocation2 + $0x1b8] sm:$0xff] %vm511_vm0, %v2381_v62  ;;  %v6101_v59 = vrot.slane %v6099_v20, 4  ;;  %v11563_v42 = vld [vmem:[%s13512_s26 + $0xbc] sm:$0xf]  ;;  %v15399_v28 = vpop.f32.mrf.mxu0  ;;  %13069 = vmatmul.mubr.msk.bf16.gmra.mxu0 %vm511_vm0, %v13398_v22  ;;  %v12754_v24 = vpop.f32.mrf.mxu1 }
 0x1a2   : > { %v13400_v15 = vld [vmem:[%s13512_s26 + $0x78] sm:$0xff]   ;;  %v11637_v63 = vcombine.low %v15362_v23, %v15387_v46  ;;  %v6104_v44 = vrot.slane %v6102_v55, 4  ;;  %3515 = vst.msk [vmem:[#allocation2 + $0x180] sm:$0xff] %vm511_vm0, %v3451_v52  ;;  %3518 = vst.msk [vmem:[#allocation2 + $0x198] sm:$0xff] %vm511_vm0, %v3454_v32  ;;  %v6109_v26 = vrot.slane %v11557_v21, 5  ;;  %v6112_v38 = vrot.slane %v15351_v43, 5 }
 0x1a3   : > { %3516 = vst.msk [vmem:[#allocation2 + $0x188] sm:$0xff] %vm511_vm0, %v3452_v17  ;;  %v6115_v27 = vrot.slane %v15368_v37, 5  ;;  %v6118_v8 = vrot.slane %v15371_v58, 5  ;;  %2443 = vst.msk [vmem:[#allocation2 + $0x1a8] sm:$0xff] %vm511_vm0, %v2379_v7  ;;  %v15407_v18 = vsel %vm13606_vm6, %v6101_v59, %v6102_v55  ;;  %v11609_v16 = vrot.slane %v11561_v25, 9  ;;  %v3393_v36 = vld [vmem:[#allocation2 + $0x1b0] sm:$0xff]  ;;  %13072 = vmatprep.mubr.msk.bf16.mxu0 %vm511_vm0, %v13400_v15  ;;  %v2231_v11 = vpop.f32.mrf.mxu1 }
 0x1a4   : > { %v15411_v31 = vsel %vm13606_vm6, %v6104_v44, %v6105_v13  ;;  %v6122_v34 = vrot.slane %v11562_v54, 5  ;;  %v11564_v10 = vld [vmem:[%s13512_s26 + $0xc0] sm:$0xf]  ;;  %v15419_v14 = vsel %vm13606_vm6, %v11608_v57, %v6109_v26  ;;  %v6111_v47 = vrot.slane %v6109_v26, 4  ;;  %v2320_v50 = vld [vmem:[#allocation2 + $0x1d0] sm:$0xff]  ;;  %13001 = vmatmul.mubr.msk.bf16.gmra.mxu1 %vm511_vm0, %v11634_v61  ;;  %v2321_v29 = vld [vmem:[#allocation2 + $0x1d8] sm:$0xff] }
 0x1a5   : > { %v11638_v48 = vcombine.low %v15407_v18, %v15411_v31  ;;  %v6114_v40 = vrot.slane %v6112_v38, 4  ;;  %v3457_v6 = vadd.f32 %v15313_v51, %v3393_v36  ;;  %v6117_v0 = vrot.slane %v6115_v27, 4  ;;  %v13401_v43 = vld [vmem:[%s13512_s26 + $0x80] sm:$0xff]   ;;  %v15432_v51 = vpop.f32.mrf.mxu0  ;;  %13004 = vmatprep.mubr.msk.bf16.mxu1 %vm511_vm0, %v11635_v39  ;;  %v13403_v2 = vld [vmem:[%s13512_s26 + $0x8c] sm:$0xff]   ;;  %v11566_v19 = vld [vmem:[%s13512_s26 + $0xc8] sm:$0xe]  ;;  %v12755_v25 = vpop.f32.mrf.mxu1 }
 0x1a6   : > { %v15425_v60 = vsel %vm13606_vm6, %v11609_v16, %v6122_v34  ;;  %v6124_v21 = vrot.slane %v6122_v34, 4  ;;  %v3391_v22 = vld [vmem:[#allocation2 + $0x1a0] sm:$0xff]  ;;  %v2384_v4 = vadd.f32 %v12754_v24, %v2320_v50  ;;  %v15436_v20 = vsel %vm13606_vm6, %v6111_v47, %v6112_v38  ;;  %v11567_v9 = vld [vmem:[%s13512_s26 + $0xcc] sm:$0xf]  ;;  %v11568_v17 = vld [vmem:[%s13512_s26 + $0xd0] sm:$0xf] }
 0x1a7   : > { %v2318_v41 = vld [vmem:[#allocation2 + $0x1c0] sm:$0xff]  ;;  %v15440_v37 = vsel %vm13606_vm6, %v6114_v40, %v6115_v27  ;;  %v6125_v58 = vrot.slane %v11563_v42, 5  ;;  %3521 = vst.msk [vmem:[#allocation2 + $0x1b0] sm:$0xff] %vm511_vm0, %v3457_v6  ;;  %v3455_v61 = vadd.f32 %v3391_v22, %v15336_v1  ;;  %v11639_v35 = vcombine.low %v15419_v14, %v15436_v20  ;;  %v15459_v1 = vpop.f32.mrf.mxu0  ;;  %v11569_v5 = vld [vmem:[%s13512_s26 + $0xd4] sm:$0xf]  ;;  %v2319_v38 = vld [vmem:[#allocation2 + $0x1c8] sm:$0xff]  ;;  %v2234_v36 = vpop.f32.mrf.mxu1 }
 0x1a8   : > { %v11565_v30 = vld [vmem:[%s13512_s26 + $0xc4] sm:$0x1]  ;;  %v15454_v62 = vsel %vm13606_vm6, %v6117_v0, %v6118_v8  ;;  %v6128_v55 = vrot.slane %v11564_v10, 5  ;;  %2448 = vst.msk [vmem:[#allocation2 + $0x1d0] sm:$0xff] %vm511_vm0, %v2384_v4  ;;  %v3394_v39 = vld [vmem:[#allocation2 + $0x1b8] sm:$0xff]  ;;  %v2382_v13 = vadd.f32 %v2318_v41, %v2231_v11  ;;  %v2385_v26 = vadd.f32 %v12755_v25, %v2321_v29 }
 0x1a9   : > { %v11640_v57 = vcombine.low %v15440_v37, %v15454_v62  ;;  %v15465_v52 = vsel %vm13606_vm6, %v6124_v21, %v6125_v58  ;;  %v6127_v32 = vrot.slane %v6125_v58, 4  ;;  %3519 = vst.msk [vmem:[#allocation2 + $0x1a0] sm:$0xff] %vm511_vm0, %v3455_v61  ;;  %v3458_v45 = vadd.f32 %v15365_v33, %v3394_v39  ;;  %v11570_v59 = vld [vmem:[%s13512_s26 + $0xd8] sm:$0x1]  ;;  %v11571_v44 = vld [vmem:[%s13512_s26 + $0xdc] sm:$0xe]  ;;  %v15476_v27 = vpop.f32.mrf.mxu0  ;;  %13073 = vmatmul.mubr.msk.bf16.gmra.mxu0 %vm511_vm0, %v13401_v43 }
 0x1aa   : > { %v11641_v54 = vcombine.low %v15425_v60, %v15465_v52  ;;  %v6130_v15 = vrot.slane %v6128_v55, 4  ;;  %v6131_v7 = vrot.slane %v11565_v30, 5  ;;  %2446 = vst.msk [vmem:[#allocation2 + $0x1c0] sm:$0xff] %vm511_vm0, %v2382_v13  ;;  %v3392_v42 = vld [vmem:[#allocation2 + $0x1a8] sm:$0xff]  ;;  %v11610_v8 = vrot.slane %v11566_v19, 9  ;;  %2449 = vst.msk [vmem:[#allocation2 + $0x1d8] sm:$0xff] %vm511_vm0, %v2385_v26  ;;  %13076 = vmatprep.mubr.msk.bf16.mxu0 %vm511_vm0, %v13403_v2 }
 0x1ab   : > { %v15480_v33 = vsel %vm13606_vm6, %v6127_v32, %v6128_v55  ;;  %v6135_v16 = vrot.slane %v11567_v9, 5  ;;  %v11572_v34 = vld [vmem:[%s13512_s26 + $0xe0] sm:$0xf]  ;;  %3522 = vst.msk [vmem:[#allocation2 + $0x1b8] sm:$0xff] %vm511_vm0, %v3458_v45  ;;  %v3456_v10 = vadd.f32 %v3392_v42, %v15399_v28  ;;  %v6138_v40 = vrot.slane %v11568_v17, 5  ;;  %v15502_v41 = vpop.f32.mrf.mxu0  ;;  %v13404_v17 = vld [vmem:[%s13512_s26 + $0x94] sm:$0xff]  }
 0x1ac   : > { %v15487_v47 = vsel %vm13606_vm6, %v6130_v15, %v6131_v7  ;;  %v6141_v6 = vrot.slane %v11569_v5, 5  ;;  %v11573_v24 = vld [vmem:[%s13512_s26 + $0xe4] sm:$0xf]  ;;  %v11574_v50 = vld [vmem:[%s13512_s26 + $0xe8] sm:$0xf]  ;;  %v2383_v0 = vadd.f32 %v2319_v38, %v2234_v36  ;;  %v6144_v30 = vrot.slane %v11570_v59, 5  ;;  %13005 = vmatmul.mubr.msk.bf16.gmra.mxu1 %vm511_vm0, %v11636_v56 }
 0x1ad   : > { %v11642_v21 = vcombine.low %v15480_v33, %v15487_v47  ;;  %v15497_v28 = vsel %vm13606_vm6, %v11610_v8, %v6135_v16  ;;  %v6137_v22 = vrot.slane %v6135_v16, 4  ;;  %v11575_v4 = vld [vmem:[%s13512_s26 + $0xec] sm:$0x1]  ;;  %3520 = vst.msk [vmem:[#allocation2 + $0x1a8] sm:$0xff] %vm511_vm0, %v3456_v10  ;;  %v6140_v43 = vrot.slane %v6138_v40, 4  ;;  %13008 = vmatprep.mubr.msk.bf16.mxu1 %vm511_vm0, %v11637_v63  ;;  %v13405_v5 = vld [vmem:[%s13512_s26 + $0xa0] sm:$0xff]   ;;  %v12758_v7 = vpop.f32.mrf.mxu1 }
 0x1ae   : > { %v6143_v58 = vrot.slane %v6141_v6, 4  ;;  %v11611_v61 = vrot.slane %v11571_v44, 9  ;;  %v11576_v11 = vld [vmem:[%s13512_s26 + $0xf0] sm:$0xe]  ;;  %2447 = vst.msk [vmem:[#allocation2 + $0x1c8] sm:$0xff] %vm511_vm0, %v2383_v0  ;;  %v6148_v29 = vrot.slane %v11572_v34, 5  ;;  %v15540_v44 = vpop.f32.mrf.mxu0 }
 0x1af   : > { %v15512_v2 = vsel %vm13606_vm6, %v6137_v22, %v6138_v40  ;;  %v6151_v55 = vrot.slane %v11573_v24, 5  ;;  %v6154_v19 = vrot.slane %v11574_v50, 5  ;;  %v11577_v9 = vld [vmem:[%s13512_s26 + $0xf4] sm:$0xf]  ;;  %v15523_v56 = vsel %vm13606_vm6, %v6140_v43, %v6141_v6  ;;  %v11578_v32 = vld [vmem:[%s13512_s26 + $0xf8] sm:$0xf]  ;;  %v2247_v24 = vpop.f32.mrf.mxu1 }
 0x1b0   : > { %v3397_v49 = vld [vmem:[#allocation2 + $0x1d0] sm:$0xff]  ;;  %v11643_v12 = vcombine.low %v15497_v28, %v15512_v2  ;;  %v15527_v39 = vsel %vm13606_vm6, %v6143_v58, %v6144_v30  ;;  %v6157_v13 = vrot.slane %v11575_v4, 5  ;;  %v15537_v63 = vsel %vm13606_vm6, %v11611_v61, %v6148_v29  ;;  %v11579_v25 = vld [vmem:[%s13512_s26 + $0xfc] sm:$0xf]  ;;  %v11580_v36 = vld [vmem:[%s13512_s26 + $0x100] sm:$0x1]  ;;  %v15550_v0 = vpop.f32.mrf.mxu0 }
 0x1b1   : > { %v3461_v23 = vadd.f32 %v15432_v51, %v3397_v49  ;;  %v11644_v46 = vcombine.low %v15523_v56, %v15527_v39  ;;  %v6150_v45 = vrot.slane %v6148_v29, 4  ;;  %v3395_v15 = vld [vmem:[#allocation2 + $0x1c0] sm:$0xff]  ;;  %v2324_v59 = vld [vmem:[#allocation2 + $0x1f0] sm:$0xff]  ;;  %v6153_v42 = vrot.slane %v6151_v55, 4  ;;  %v3398_v6 = vld [vmem:[#allocation2 + $0x1d8] sm:$0xff]  ;;  %13077 = vmatmul.mubr.msk.bf16.gmra.mxu0 %vm511_vm0, %v13404_v17  ;;  %v12759_v49 = vpop.f32.mrf.mxu1 }
 0x1b2   : > { %v6156_v26 = vrot.slane %v6154_v19, 4  ;;  %v11612_v38 = vrot.slane %v11576_v11, 9  ;;  %v6161_v51 = vrot.slane %v11577_v9, 5  ;;  %v3459_v8 = vadd.f32 %v3395_v15, %v15459_v1  ;;  %v11581_v40 = vld [vmem:[%s13512_s26 + $0x104] sm:$0xe]  ;;  %13080 = vmatprep.mubr.msk.bf16.mxu0 %vm511_vm0, %v13405_v5  ;;  %v13407_v18 = vld [vmem:[%s13512_s26 + $0xb4] sm:$0xff]  }
 0x1b3   : > { %3525 = vst.msk [vmem:[#allocation2 + $0x1d0] sm:$0xff] %vm511_vm0, %v3461_v23  ;;  %v2388_v16 = vadd.f32 %v12758_v7, %v2324_v59  ;;  %v15546_v34 = vsel %vm13606_vm6, %v6150_v45, %v6151_v55  ;;  %v6164_v10 = vrot.slane %v11578_v32, 5  ;;  %v2322_v50 = vld [vmem:[#allocation2 + $0x1e0] sm:$0xff]  ;;  %v15556_v1 = vsel %vm13606_vm6, %v6153_v42, %v6154_v19  ;;  %v11582_v58 = vld [vmem:[%s13512_s26 + $0x108] sm:$0xf]  ;;  %v15576_v32 = vpop.f32.mrf.mxu0  ;;  %v2250_v31 = vpop.f32.mrf.mxu1 }
 0x1b4   : > { %v11645_v22 = vcombine.low %v15537_v63, %v15546_v34  ;;  %v15560_v4 = vsel %vm13606_vm6, %v6156_v26, %v6157_v13  ;;  %v15564_v43 = vsel %vm13606_vm6, %v11612_v38, %v6161_v51  ;;  %3523 = vst.msk [vmem:[#allocation2 + $0x1c0] sm:$0xff] %vm511_vm0, %v3459_v8  ;;  %v3462_v30 = vadd.f32 %v15476_v27, %v3398_v6  ;;  %v11583_v55 = vld [vmem:[%s13512_s26 + $0x10c] sm:$0xf]  ;;  %v11584_v19 = vld [vmem:[%s13512_s26 + $0x110] sm:$0xf]  ;;  %v2325_v13 = vld [vmem:[#allocation2 + $0x1f8] sm:$0xff] }
 0x1b5   : > { %2452 = vst.msk [vmem:[#allocation2 + $0x1f0] sm:$0xff] %vm511_vm0, %v2388_v16  ;;  %v2386_v61 = vadd.f32 %v2322_v50, %v2247_v24  ;;  %v11646_v11 = vcombine.low %v15556_v1, %v15560_v4  ;;  %v6163_v29 = vrot.slane %v6161_v51, 4  ;;  %v3396_v9 = vld [vmem:[#allocation2 + $0x1c8] sm:$0xff]  ;;  %v6166_v17 = vrot.slane %v6164_v10, 4  ;;  %13009 = vmatmul.mubr.msk.bf16.gmra.mxu1 %vm511_vm0, %v11638_v48  ;;  %v11586_v42 = vld [vmem:[%s13512_s26 + $0x118] sm:$0xe]  ;;  %v15605_v20 = vpop.f32.mrf.mxu0  ;;  %v12842_v6 = vpop.f32.mrf.mxu1 }
 0x1b6   : > { %v6167_v27 = vrot.slane %v11579_v25, 5  ;;  %v6170_v23 = vrot.slane %v11580_v36, 5  ;;  %v11613_v45 = vrot.slane %v11581_v40, 9  ;;  %3526 = vst.msk [vmem:[#allocation2 + $0x1d8] sm:$0xff] %vm511_vm0, %v3462_v30  ;;  %v3460_v5 = vadd.f32 %v3396_v9, %v15502_v41  ;;  %v11585_v25 = vld [vmem:[%s13512_s26 + $0x114] sm:$0x1]  ;;  %13012 = vmatprep.mubr.msk.bf16.mxu1 %vm511_vm0, %v11639_v35 }
 0x1b7   : > { %2450 = vst.msk [vmem:[#allocation2 + $0x1e0] sm:$0xff] %vm511_vm0, %v2386_v61  ;;  %v2389_v15 = vadd.f32 %v12759_v49, %v2325_v13  ;;  %v15587_v7 = vsel %vm13606_vm6, %v6163_v29, %v6164_v10  ;;  %v6174_v59 = vrot.slane %v11582_v58, 5  ;;  %v13406_v26 = vld [vmem:[%s13512_s26 + $0xa8] sm:$0xff]   ;;  %v6177_v8 = vrot.slane %v11583_v55, 5  ;;  %v11587_v36 = vld [vmem:[%s13512_s26 + $0x11c] sm:$0xf] }
 0x1b8   : > { %v2323_v48 = vld [vmem:[#allocation2 + $0x1e8] sm:$0xff]  ;;  %v11647_v41 = vcombine.low %v15564_v43, %v15587_v7  ;;  %v15601_v38 = vsel %vm13606_vm6, %v6166_v17, %v6167_v27  ;;  %v6169_v51 = vrot.slane %v6167_v27, 4  ;;  %3524 = vst.msk [vmem:[#allocation2 + $0x1c8] sm:$0xff] %vm511_vm0, %v3460_v5  ;;  %v6180_v10 = vrot.slane %v11584_v19, 5  ;;  %v11588_v40 = vld [vmem:[%s13512_s26 + $0x120] sm:$0xf]  ;;  %v3919_v17 = vpop.f32.mrf.mxu1 }
 0x1b9   : > { %2453 = vst.msk [vmem:[#allocation2 + $0x1f8] sm:$0xff] %vm511_vm0, %v2389_v15  ;;  %v2387_v14 = vadd.f32 %v2323_v48, %v2250_v31  ;;  %v15609_v35 = vsel %vm13606_vm6, %v11613_v45, %v6174_v59  ;;  %v6176_v16 = vrot.slane %v6174_v59, 4  ;;  %v4176_v24 = vld [vmem:[#allocation2 + $0x10] sm:$0xff]  ;;  %v6179_v58 = vrot.slane %v6177_v8, 4  ;;  %v11589_v29 = vld [vmem:[%s13512_s26 + $0x124] sm:$0xf]  ;;  %13081 = vmatmul.mubr.msk.bf16.gmra.mxu0 %vm511_vm0, %v13406_v26  ;;  %v15635_v31 = vpop.f32.mrf.mxu0 }
 0x1ba   : > { %v15615_v50 = vsel %vm13606_vm6, %v6169_v51, %v6170_v23  ;;  %v6183_v30 = vrot.slane %v11585_v25, 5  ;;  %v11614_v61 = vrot.slane %v11586_v42, 9  ;;  %v4240_v55 = vadd.f32 %v12842_v6, %v4176_v24  ;;  %v4174_v27 = vld [vmem:[#allocation2] sm:$0xff]  ;;  %v11590_v59 = vld [vmem:[%s13512_s26 + $0x128] sm:$0x1]  ;;  %13084 = vmatprep.mubr.msk.bf16.mxu0 %vm511_vm0, %v13407_v18  ;;  %v12843_v26 = vpop.f32.mrf.mxu1  ;;  %v4188_v34 = vld [vmem:[#allocation2 + $0x70] sm:$0xff] }
 0x1bb   : > { %2451 = vst.msk [vmem:[#allocation2 + $0x1e8] sm:$0xff] %vm511_vm0, %v2387_v14  ;;  %v11648_v9 = vcombine.low %v15601_v38, %v15615_v50  ;;  %v15623_v19 = vsel %vm13606_vm6, %v6176_v16, %v6177_v8  ;;  %v6182_v49 = vrot.slane %v6180_v10, 4  ;;  %v15629_v45 = vsel %vm13606_vm6, %v6179_v58, %v6180_v10  ;;  %v11591_v8 = vld [vmem:[%s13512_s26 + $0x12c] sm:$0xe]  ;;  %v11592_v14 = vld [vmem:[%s13512_s26 + $0x130] sm:$0xf]  ;;  %v15657_v58 = vpop.f32.mrf.mxu0 }
 0x1bc   : > { %v3401_v13 = vld [vmem:[#allocation2 + $0x1f0] sm:$0xff]  ;;  %v11649_v23 = vcombine.low %v15609_v35, %v15623_v19  ;;  %v6187_v5 = vrot.slane %v11587_v36, 5  ;;  %v6190_v15 = vrot.slane %v11588_v40, 5  ;;  %4304 = vst.msk [vmem:[#allocation2 + $0x10] sm:$0xff] %vm511_vm0, %v4240_v55  ;;  %v4238_v42 = vadd.f32 %v4174_v27, %v3919_v17  ;;  %v4177_v10 = vld [vmem:[#allocation2 + $0x18] sm:$0xff]  ;;  %v3922_v62 = vpop.f32.mrf.mxu1  ;;  %v13417_v43 = vld [vmem:[%s13512_s26 + $0x104] sm:$0xff]  }
 0x1bd   : > { %v3465_v25 = vadd.f32 %v15540_v44, %v3401_v13  ;;  %v15639_v48 = vsel %vm13606_vm6, %v6182_v49, %v6183_v30  ;;  %v6193_v51 = vrot.slane %v11589_v29, 5  ;;  %13013 = vmatmul.mubr.msk.bf16.gmra.mxu1 %vm511_vm0, %v11640_v57  ;;  %v4241_v24 = vadd.f32 %v12843_v26, %v4177_v10  ;;  %v11593_v29 = vld [vmem:[%s13512_s26 + $0x134] sm:$0xf]  ;;  %v11594_v55 = vld [vmem:[%s13512_s26 + $0x138] sm:$0xf]  ;;  %v4175_v57 = vld [vmem:[#allocation2 + $0x8] sm:$0xff] }
 0x1be   : > { %v3399_v16 = vld [vmem:[#allocation2 + $0x1e0] sm:$0xff]  ;;  %v11650_v44 = vcombine.low %v15629_v45, %v15639_v48  ;;  %v15648_v36 = vsel %vm13606_vm6, %v11614_v61, %v6187_v5  ;;  %v6189_v40 = vrot.slane %v6187_v5, 4  ;;  %v6192_v6 = vrot.slane %v6190_v15, 4  ;;  %4302 = vst.msk [vmem:[#allocation2] sm:$0xff] %vm511_vm0, %v4238_v42  ;;  %13016 = vmatprep.mubr.msk.bf16.mxu1 %vm511_vm0, %v11641_v54  ;;  %v11595_v27 = vld [vmem:[%s13512_s26 + $0x13c] sm:$0x1]  ;;  %v15678_v5 = vpop.f32.mrf.mxu0 }
 0x1bf   : > { %3529 = vst.msk [vmem:[#allocation2 + $0x1f0] sm:$0xff] %vm511_vm0, %v3465_v25  ;;  %v3463_v18 = vadd.f32 %v3399_v16, %v15550_v0  ;;  %v6195_v30 = vrot.slane %v6193_v51, 4  ;;  %v6196_v61 = vrot.slane %v11590_v59, 5  ;;  %v11615_v13 = vrot.slane %v11591_v8, 9  ;;  %v13408_v60 = vld [vmem:[%s13512_s26 + $0xbc] sm:$0xff]   ;;  %4305 = vst.msk [vmem:[#allocation2 + $0x18] sm:$0xff] %vm511_vm0, %v4241_v24 }
 0x1c0   : > { %v3402_v37 = vld [vmem:[#allocation2 + $0x1f8] sm:$0xff]  ;;  %v15667_v0 = vsel %vm13606_vm6, %v6189_v40, %v6190_v15  ;;  %v15671_v49 = vsel %vm13606_vm6, %v6192_v6, %v6193_v51  ;;  %v6200_v17 = vrot.slane %v11592_v14, 5  ;;  %v4239_v54 = vadd.f32 %v4175_v57, %v3922_v62  ;;  %v11596_v25 = vld [vmem:[%s13512_s26 + $0x140] sm:$0xe]  ;;  %v11597_v42 = vld [vmem:[%s13512_s26 + $0x144] sm:$0xf]  ;;  %v12846_v14 = vpop.f32.mrf.mxu1 }
 0x1c1   : > { %3527 = vst.msk [vmem:[#allocation2 + $0x1e0] sm:$0xff] %vm511_vm0, %v3463_v18  ;;  %v3466_v52 = vadd.f32 %v15576_v32, %v3402_v37  ;;  %v15684_v59 = vsel %vm13606_vm6, %v6195_v30, %v6196_v61  ;;  %v13410_v8 = vld [vmem:[%s13512_s26 + $0xc8] sm:$0xff]   ;;  %v4180_v16 = vld [vmem:[#allocation2 + $0x30] sm:$0xff]  ;;  %v6203_v40 = vrot.slane %v11593_v29, 5  ;;  %v4178_v24 = vld [vmem:[#allocation2 + $0x20] sm:$0xff]  ;;  %v15698_v30 = vpop.f32.mrf.mxu0  ;;  %v6206_v61 = vrot.slane %v11594_v55, 5  ;;  %13085 = vmatmul.mubr.msk.bf16.gmra.mxu0 %vm511_vm0, %v13408_v60 }
 0x1c2   : > { %v3400_v51 = vld [vmem:[#allocation2 + $0x1e8] sm:$0xff]  ;;  %v15693_v26 = vsel %vm13606_vm6, %v11615_v13, %v6200_v17  ;;  %v6202_v10 = vrot.slane %v6200_v17, 4  ;;  %4303 = vst.msk [vmem:[#allocation2 + $0x8] sm:$0xff] %vm511_vm0, %v4239_v54  ;;  %v4244_v18 = vadd.f32 %v12846_v14, %v4180_v16  ;;  %v6209_v37 = vrot.slane %v11595_v27, 5  ;;  %v3935_v13 = vpop.f32.mrf.mxu1  ;;  %v11600_v14 = vld [vmem:[%s13512_s26 + $0x150] sm:$0x1]  ;;  %13088 = vmatprep.mubr.msk.bf16.mxu0 %vm511_vm0, %v13410_v8 }
 0x1c3   : > { %3530 = vst.msk [vmem:[#allocation2 + $0x1f8] sm:$0xff] %vm511_vm0, %v3466_v52  ;;  %v3464_v6 = vadd.f32 %v3400_v51, %v15605_v20  ;;  %v11598_v62 = vld [vmem:[%s13512_s26 + $0x148] sm:$0xf]  ;;  %v5666_v57 = vld [vmem:[#allocation2 + $0x10] sm:$0xff]  ;;  %v6205_v17 = vrot.slane %v6203_v40, 4  ;;  %v11616_v52 = vrot.slane %v11596_v25, 9  ;;  %v4242_v55 = vadd.f32 %v4178_v24, %v3935_v13  ;;  %v12918_v60 = vpop.f32.mrf.mxu0 }
 0x1c4   : > { %v15703_v29 = vsel %vm13606_vm6, %v6202_v10, %v6203_v40  ;;  %v6213_v32 = vrot.slane %v11597_v42, 5  ;;  %v11599_v20 = vld [vmem:[%s13512_s26 + $0x14c] sm:$0xf]  ;;  %v5730_v54 = vadd.f32 %v15635_v31, %v5666_v57  ;;  %4308 = vst.msk [vmem:[#allocation2 + $0x30] sm:$0xff] %vm511_vm0, %v4244_v18  ;;  %v6208_v51 = vrot.slane %v6206_v61, 4  ;;  %v12847_v42 = vpop.f32.mrf.mxu1  ;;  %v4181_v16 = vld [vmem:[#allocation2 + $0x38] sm:$0xff] }
 0x1c5   : > { %3528 = vst.msk [vmem:[#allocation2 + $0x1e8] sm:$0xff] %vm511_vm0, %v3464_v6  ;;  %v5664_v25 = vld [vmem:[#allocation2] sm:$0xff]  ;;  %v15716_v10 = vsel %vm13606_vm6, %v6205_v17, %v6206_v61  ;;  %v6216_v6 = vrot.slane %v11598_v62, 5  ;;  %13017 = vmatmul.mubr.msk.bf16.gmra.mxu1 %vm511_vm0, %v11642_v21  ;;  %4306 = vst.msk [vmem:[#allocation2 + $0x20] sm:$0xff] %vm511_vm0, %v4242_v55  ;;  %v4245_v18 = vadd.f32 %v12847_v42, %v4181_v16  ;;  %v6219_v61 = vrot.slane %v11599_v20, 5  ;;  %v4179_v21 = vld [vmem:[#allocation2 + $0x28] sm:$0xff] }
 0x1c6   : > { %v15720_v31 = vsel %vm13606_vm6, %v11616_v52, %v6213_v32  ;;  %v6215_v40 = vrot.slane %v6213_v32, 4  ;;  %5794 = vst.msk [vmem:[#allocation2 + $0x10] sm:$0xff] %vm511_vm0, %v5730_v54  ;;  %v5728_v8 = vadd.f32 %v5664_v25, %v15657_v58  ;;  %v15731_v24 = vsel %vm13606_vm6, %v6208_v51, %v6209_v37  ;;  %v11833_v32 = vld [vmem:[%s13512_s26 + $0x28] sm:$0xf]  ;;  %v11834_v62 = vld [vmem:[%s13512_s26 + $0x2c] sm:$0xf]  ;;  %13020 = vmatprep.mubr.msk.bf16.mxu1 %vm511_vm0, %v11643_v12  ;;  %v3938_v47 = vpop.f32.mrf.mxu1  ;;  %v5425_v58 = vpop.f32.mrf.mxu0 }
 0x1c7   : > { %v5667_v33 = vld [vmem:[#allocation2 + $0x18] sm:$0xff]  ;;  %v6218_v13 = vrot.slane %v6216_v6, 4  ;;  %v6222_v17 = vrot.slane %v11600_v14, 5  ;;  %v13411_v52 = vld [vmem:[%s13512_s26 + $0xd0] sm:$0xff]   ;;  %4309 = vst.msk [vmem:[#allocation2 + $0x38] sm:$0xff] %vm511_vm0, %v4245_v18  ;;  %v4243_v12 = vadd.f32 %v4179_v21, %v3938_v47  ;;  %v6221_v55 = vrot.slane %v6219_v61, 4 }
 0x1c8   : > { %v15743_v37 = vsel %vm13606_vm6, %v6215_v40, %v6216_v6  ;;  %5792 = vst.msk [vmem:[#allocation2] sm:$0xff] %vm511_vm0, %v5728_v8  ;;  %v5731_v28 = vadd.f32 %v15678_v5, %v5667_v33  ;;  %v13413_v2 = vld [vmem:[%s13512_s26 + $0xdc] sm:$0xff]   ;;  %v4184_v20 = vld [vmem:[#allocation2 + $0x50] sm:$0xff]  ;;  %v12850_v25 = vpop.f32.mrf.mxu1  ;;  %v12919_v42 = vpop.f32.mrf.mxu0  ;;  %v7846_v40 = vshrl.u32 %v11833_v32, 16  ;;  %v7849_v5 = vshll.u32 %v11833_v32, 16 }
 0x1c9   : > { %v5665_v51 = vld [vmem:[#allocation2 + $0x8] sm:$0xff]  ;;  %v15754_v14 = vsel %vm13606_vm6, %v6218_v13, %v6219_v61  ;;  %v11835_v16 = vld [vmem:[%s13512_s26 + $0x30] sm:$0xf]  ;;  %v7855_v6 = vshll.u32 %v11834_v62, 16  ;;  %4307 = vst.msk [vmem:[#allocation2 + $0x28] sm:$0xff] %vm511_vm0, %v4243_v12  ;;  %v4248_v18 = vadd.f32 %v12850_v25, %v4184_v20  ;;  %v15762_v33 = vsel %vm13606_vm6, %v6221_v55, %v6222_v17  ;;  %v4182_v13 = vld [vmem:[#allocation2 + $0x40] sm:$0xff]  ;;  %13089 = vmatmul.mubr.msk.bf16.gmra.mxu0 %vm511_vm0, %v13411_v52 }
 0x1ca   : > { %5795 = vst.msk [vmem:[#allocation2 + $0x18] sm:$0xff] %vm511_vm0, %v5731_v28  ;;  %v5729_v8 = vadd.f32 %v5665_v51, %v15698_v30  ;;  %v11836_v47 = vld [vmem:[%s13512_s26 + $0x34] sm:$0xf]  ;;  %v7859_v21 = vshrl.u32 %v11834_v62, 16  ;;  %v3951_v61 = vpop.f32.mrf.mxu1  ;;  %v5428_v57 = vpop.f32.mrf.mxu0  ;;  %v7848_v28 = vrot.slane %v7846_v40, 4  ;;  %v7851_v27 = vrot.slane %v7849_v5, 5  ;;  %13092 = vmatprep.mubr.msk.bf16.mxu0 %vm511_vm0, %v13413_v2 }
 0x1cb   : > { %v5670_v54 = vld [vmem:[#allocation2 + $0x30] sm:$0xff]  ;;  %v15767_v30 = vrot.slane %v7855_v6, 5  ;;  %4312 = vst.msk [vmem:[#allocation2 + $0x50] sm:$0xff] %vm511_vm0, %v4248_v18  ;;  %v4246_v62 = vadd.f32 %v4182_v13, %v3951_v61  ;;  %v4185_v12 = vld [vmem:[#allocation2 + $0x58] sm:$0xff]  ;;  %v7865_v55 = vshll.u32 %v11835_v16, 16  ;;  %v7869_v32 = vshrl.u32 %v11835_v16, 16 }
 0x1cc   : > { %5793 = vst.msk [vmem:[#allocation2 + $0x8] sm:$0xff] %vm511_vm0, %v5729_v8  ;;  %v5734_v17 = vadd.f32 %v12918_v60, %v5670_v54  ;;  %v7861_v20 = vrot.slane %v7859_v21, 4  ;;  %v5668_v51 = vld [vmem:[#allocation2 + $0x20] sm:$0xff]  ;;  %v12851_v25 = vpop.f32.mrf.mxu1  ;;  %v12922_v40 = vpop.f32.mrf.mxu0  ;;  %v11837_v5 = vld [vmem:[%s13512_s26 + $0x38] sm:$0x1]  ;;  %v7852_v6 = vor.u32 %v7851_v27, %v7848_v28  ;;  %v7875_v52 = vshll.u32 %v11836_v47, 16 }
 0x1cd   : > { %v7879_v15 = vshrl.u32 %v11836_v47, 16  ;;  %13021 = vmatmul.mubr.msk.bf16.gmra.mxu1 %vm511_vm0, %v11644_v46  ;;  %v13414_v60 = vld [vmem:[%s13512_s26 + $0xe4] sm:$0xff]   ;;  %v5732_v54 = vadd.f32 %v5668_v51, %v5425_v58  ;;  %4310 = vst.msk [vmem:[#allocation2 + $0x40] sm:$0xff] %vm511_vm0, %v4246_v62  ;;  %v4249_v2 = vadd.f32 %v12851_v25, %v4185_v12  ;;  %v7867_v18 = vrot.slane %v7865_v55, 5  ;;  %v13415_v28 = vld [vmem:[%s13512_s26 + $0xf0] sm:$0xff]  }
 0x1ce   : > { %5798 = vst.msk [vmem:[#allocation2 + $0x30] sm:$0xff] %vm511_vm0, %v5734_v17  ;;  %v7862_v8 = vor.u32 %v7861_v20, %v15767_v30  ;;  %v11989_v27 = vld [vmem:[%s13512_s26 + $0x28] sm:$0xe]  ;;  %13024 = vmatprep.mubr.msk.bf16.mxu1 %vm511_vm0, %v11645_v22  ;;  %v5671_v56 = vld [vmem:[#allocation2 + $0x38] sm:$0xff]  ;;  %v3954_v39 = vpop.f32.mrf.mxu1  ;;  %v5441_v16 = vpop.f32.mrf.mxu0  ;;  %v7853_v47 = vrot.slane %v7852_v6, 4  ;;  %v7871_v58 = vrot.slane %v7869_v32, 4  ;;  %v17394_v45 = vcombine.low %v15648_v36, %v15667_v0 }
 0x1cf   : > { %v4183_v46 = vld [vmem:[#allocation2 + $0x48] sm:$0xff]  ;;  %v7877_v21 = vrot.slane %v7875_v52, 5  ;;  %v7881_v61 = vrot.slane %v7879_v15, 4  ;;  %5796 = vst.msk [vmem:[#allocation2 + $0x20] sm:$0xff] %vm511_vm0, %v5732_v54  ;;  %v5735_v13 = vadd.f32 %v12919_v42, %v5671_v56  ;;  %4313 = vst.msk [vmem:[#allocation2 + $0x58] sm:$0xff] %vm511_vm0, %v4249_v2  ;;  %v7885_v17 = vshll.u32 %v11837_v5, 16 }
 0x1d0   : > { %v4247_v63 = vadd.f32 %v4183_v46, %v3954_v39  ;;  %v7863_v22 = vrot.slane %v7862_v8, 4  ;;  %v11990_v62 = vld [vmem:[%s13512_s26 + $0x2c] sm:$0xf]  ;;  %v12854_v20 = vpop.f32.mrf.mxu1  ;;  %v12923_v55 = vpop.f32.mrf.mxu0  ;;  %v7858_v15 = vsel %vm13588_vm5, %v7853_v47, %v15767_v30  ;;  %v7872_v32 = vor.u32 %v7871_v58, %v7867_v18  ;;  %v11991_v25 = vld [vmem:[%s13512_s26 + $0x30] sm:$0xf]  ;;  %v4186_v30 = vld [vmem:[#allocation2 + $0x60] sm:$0xff] }
 0x1d1   : > { %v5669_v12 = vld [vmem:[#allocation2 + $0x28] sm:$0xff]  ;;  %v7882_v51 = vor.u32 %v7881_v61, %v7877_v21  ;;  %v11992_v6 = vld [vmem:[%s13512_s26 + $0x34] sm:$0xf]  ;;  %v12069_v42 = vrot.slane %v11989_v27, 9  ;;  %5799 = vst.msk [vmem:[#allocation2 + $0x38] sm:$0xff] %vm511_vm0, %v5735_v13  ;;  %v4252_v54 = vadd.f32 %v12854_v20, %v4188_v34  ;;  %v7887_v2 = vrot.slane %v7885_v17, 5  ;;  %13093 = vmatmul.mubr.msk.bf16.gmra.mxu0 %vm511_vm0, %v13414_v60 }
 0x1d2   : > { %v5733_v52 = vadd.f32 %v5669_v12, %v5428_v57  ;;  %4311 = vst.msk [vmem:[#allocation2 + $0x48] sm:$0xff] %vm511_vm0, %v4247_v63  ;;  %v7868_v5 = vsel %vm13588_vm5, %v7863_v22, %v7867_v18  ;;  %v5674_v8 = vld [vmem:[#allocation2 + $0x50] sm:$0xff]  ;;  %v3967_v56 = vpop.f32.mrf.mxu1  ;;  %v5444_v39 = vpop.f32.mrf.mxu0  ;;  %v7873_v46 = vrot.slane %v7872_v32, 4  ;;  %v9417_v27 = vrot.slane %v11990_v62, 5  ;;  %v11993_v18 = vld [vmem:[%s13512_s26 + $0x38] sm:$0x1]  ;;  %13096 = vmatprep.mubr.msk.bf16.mxu0 %vm511_vm0, %v13415_v28 }
 0x1d3   : > { %v7883_v47 = vrot.slane %v7882_v51, 4  ;;  %v15800_v58 = vcombine.low %v7858_v15, %v7868_v5  ;;  %v5738_v57 = vadd.f32 %v12922_v40, %v5674_v8  ;;  %4316 = vst.msk [vmem:[#allocation2 + $0x70] sm:$0xff] %vm511_vm0, %v4252_v54  ;;  %v4250_v61 = vadd.f32 %v4186_v30, %v3967_v56  ;;  %v11838_v34 = vld [vmem:[%s13512_s26 + $0x3c] sm:$0xf]  ;;  %v11840_v30 = vld [vmem:[%s13512_s26 + $0x44] sm:$0xf] }
 0x1d4   : > { %5797 = vst.msk [vmem:[#allocation2 + $0x28] sm:$0xff] %vm511_vm0, %v5733_v52  ;;  %v9420_v13 = vrot.slane %v11991_v25, 5  ;;  %v9423_v63 = vrot.slane %v11992_v6, 5  ;;  %v5672_v22 = vld [vmem:[#allocation2 + $0x40] sm:$0xff]  ;;  %v12855_v17 = vpop.f32.mrf.mxu1  ;;  %v4189_v12 = vld [vmem:[#allocation2 + $0x78] sm:$0xff]  ;;  %v12926_v62 = vpop.f32.mrf.mxu0  ;;  %v7878_v60 = vsel %vm13588_vm5, %v7873_v46, %v7877_v21  ;;  %v15814_v20 = vsel %vm13606_vm6, %v12069_v42, %v9417_v27  ;;  %v13423_v0 = vld [vmem:[%s13512_s26 + $0x12c] sm:$0xff]  }
 0x1d5   : > { %v7888_v40 = vsel %vm13588_vm5, %v7883_v47, %v7887_v2  ;;  %v9419_v15 = vrot.slane %v9417_v27, 4  ;;  %13025 = vmatmul.mubr.msk.bf16.gmra.mxu1 %vm511_vm0, %v11646_v11  ;;  %5802 = vst.msk [vmem:[#allocation2 + $0x50] sm:$0xff] %vm511_vm0, %v5738_v57  ;;  %v5736_v28 = vadd.f32 %v5672_v22, %v5441_v16  ;;  %4314 = vst.msk [vmem:[#allocation2 + $0x60] sm:$0xff] %vm511_vm0, %v4250_v61  ;;  %v11839_v25 = vld [vmem:[%s13512_s26 + $0x40] sm:$0xf]  ;;  %v13416_v6 = vld [vmem:[%s13512_s26 + $0xf8] sm:$0xff]  }
 0x1d6   : > { %v4253_v32 = vadd.f32 %v12855_v17, %v4189_v12  ;;  %v15822_v21 = vcombine.low %v7878_v60, %v7888_v40  ;;  %v9422_v51 = vrot.slane %v9420_v13, 4  ;;  %13028 = vmatprep.mubr.msk.bf16.mxu1 %vm511_vm0, %v11647_v41  ;;  %v5675_v1 = vld [vmem:[#allocation2 + $0x58] sm:$0xff]  ;;  %v3970_v4 = vpop.f32.mrf.mxu1  ;;  %v4187_v11 = vld [vmem:[#allocation2 + $0x68] sm:$0xff]  ;;  %v5457_v42 = vpop.f32.mrf.mxu0  ;;  %v9425_v52 = vrot.slane %v9423_v63, 4  ;;  %v4192_v41 = vld [vmem:[#allocation2 + $0x90] sm:$0xff] }
 0x1d7   : > { %v15832_v16 = vsel %vm13606_vm6, %v9419_v15, %v9420_v13  ;;  %v9426_v54 = vrot.slane %v11993_v18, 5  ;;  %v7890_v5 = vshrl.u32 %v11838_v34, 16  ;;  %5800 = vst.msk [vmem:[#allocation2 + $0x40] sm:$0xff] %vm511_vm0, %v5736_v28  ;;  %v5739_v2 = vadd.f32 %v12923_v55, %v5675_v1  ;;  %v11841_v13 = vld [vmem:[%s13512_s26 + $0x48] sm:$0xf]  ;;  %v4190_v15 = vld [vmem:[#allocation2 + $0x80] sm:$0xff] }
 0x1d8   : > { %4317 = vst.msk [vmem:[#allocation2 + $0x78] sm:$0xff] %vm511_vm0, %v4253_v32  ;;  %v4251_v7 = vadd.f32 %v4187_v11, %v3970_v4  ;;  %v15839_v8 = vsel %vm13606_vm6, %v9422_v51, %v9423_v63  ;;  %v12093_v56 = vcombine.low %v15814_v20, %v15832_v16  ;;  %v12858_v47 = vpop.f32.mrf.mxu1  ;;  %v12927_v27 = vpop.f32.mrf.mxu0  ;;  %v7893_v61 = vshll.u32 %v11838_v34, 16  ;;  %v11996_v19 = vld [vmem:[%s13512_s26 + $0x44] sm:$0xf] }
 0x1d9   : > { %v5673_v46 = vld [vmem:[#allocation2 + $0x48] sm:$0xff]  ;;  %v15846_v57 = vsel %vm13606_vm6, %v9425_v52, %v9426_v54  ;;  %v7892_v55 = vrot.slane %v7890_v5, 4  ;;  %v7899_v18 = vshll.u32 %v11839_v25, 16  ;;  %5803 = vst.msk [vmem:[#allocation2 + $0x58] sm:$0xff] %vm511_vm0, %v5739_v2  ;;  %v4256_v63 = vadd.f32 %v12858_v47, %v4192_v41  ;;  %13097 = vmatmul.mubr.msk.bf16.gmra.mxu0 %vm511_vm0, %v13416_v6  ;;  %v11994_v47 = vld [vmem:[%s13512_s26 + $0x3c] sm:$0xe] }
 0x1da   : > { %v5737_v22 = vadd.f32 %v5673_v46, %v5444_v39  ;;  %4315 = vst.msk [vmem:[#allocation2 + $0x68] sm:$0xff] %vm511_vm0, %v4251_v7  ;;  %v12094_v17 = vcombine.low %v15839_v8, %v15846_v57  ;;  %v7903_v12 = vshrl.u32 %v11839_v25, 16  ;;  %v5678_v60 = vld [vmem:[#allocation2 + $0x70] sm:$0xff]  ;;  %v3983_v40 = vpop.f32.mrf.mxu1  ;;  %v5460_v28 = vpop.f32.mrf.mxu0  ;;  %v7895_v32 = vrot.slane %v7893_v61, 5  ;;  %v4193_v25 = vld [vmem:[#allocation2 + $0x98] sm:$0xff]  ;;  %13100 = vmatprep.mubr.msk.bf16.mxu0 %vm511_vm0, %v13417_v43  ;;  %v4191_v61 = vld [vmem:[#allocation2 + $0x88] sm:$0xff] }
 0x1db   : > { %v15853_v51 = vrot.slane %v7899_v18, 5  ;;  %v7909_v34 = vshll.u32 %v11840_v30, 16  ;;  %v7913_v1 = vshrl.u32 %v11840_v30, 16  ;;  %v5742_v39 = vadd.f32 %v12926_v62, %v5678_v60  ;;  %4320 = vst.msk [vmem:[#allocation2 + $0x90] sm:$0xff] %vm511_vm0, %v4256_v63  ;;  %v11842_v52 = vld [vmem:[%s13512_s26 + $0x4c] sm:$0x1] }
 0x1dc   : > { %5801 = vst.msk [vmem:[#allocation2 + $0x48] sm:$0xff] %vm511_vm0, %v5737_v22  ;;  %v4254_v4 = vadd.f32 %v4190_v15, %v3983_v40  ;;  %v7905_v11 = vrot.slane %v7903_v12, 4  ;;  %v7919_v54 = vshll.u32 %v11841_v13, 16  ;;  %v5676_v5 = vld [vmem:[#allocation2 + $0x60] sm:$0xff]  ;;  %v12859_v2 = vpop.f32.mrf.mxu1  ;;  %v12930_v7 = vpop.f32.mrf.mxu0  ;;  %v7896_v41 = vor.u32 %v7895_v32, %v7892_v55  ;;  %v13418_v60 = vld [vmem:[%s13512_s26 + $0x10c] sm:$0xff]  }
 0x1dd   : > { %v7911_v30 = vrot.slane %v7909_v34, 5  ;;  %v7915_v46 = vrot.slane %v7913_v1, 4  ;;  %v7923_v6 = vshrl.u32 %v11841_v13, 16  ;;  %13029 = vmatmul.mubr.msk.bf16.gmra.mxu1 %vm511_vm0, %v11648_v9  ;;  %5806 = vst.msk [vmem:[#allocation2 + $0x70] sm:$0xff] %vm511_vm0, %v5742_v39  ;;  %v5740_v62 = vadd.f32 %v5676_v5, %v5457_v42  ;;  %v11995_v12 = vld [vmem:[%s13512_s26 + $0x40] sm:$0xf] }
 0x1de   : > { %4318 = vst.msk [vmem:[#allocation2 + $0x80] sm:$0xff] %vm511_vm0, %v4254_v4  ;;  %v4257_v43 = vadd.f32 %v12859_v2, %v4193_v25  ;;  %v7906_v55 = vor.u32 %v7905_v11, %v15853_v51  ;;  %v15868_v18 = vrot.slane %v7919_v54, 5  ;;  %13032 = vmatprep.mubr.msk.bf16.mxu1 %vm511_vm0, %v11649_v23  ;;  %v3986_v50 = vpop.f32.mrf.mxu1  ;;  %v5473_v9 = vpop.f32.mrf.mxu0  ;;  %v7897_v13 = vrot.slane %v7896_v41, 4  ;;  %v13420_v34 = vld [vmem:[%s13512_s26 + $0x118] sm:$0xff]   ;;  %v4196_v39 = vld [vmem:[#allocation2 + $0xb0] sm:$0xff] }
 0x1df   : > { %v5679_v38 = vld [vmem:[#allocation2 + $0x78] sm:$0xff]  ;;  %v7916_v42 = vor.u32 %v7915_v46, %v7911_v30  ;;  %v7925_v22 = vrot.slane %v7923_v6, 4  ;;  %v7929_v63 = vshll.u32 %v11842_v52, 16  ;;  %5804 = vst.msk [vmem:[#allocation2 + $0x60] sm:$0xff] %vm511_vm0, %v5740_v62  ;;  %v4255_v15 = vadd.f32 %v4191_v61, %v3986_v50  ;;  %v11997_v46 = vld [vmem:[%s13512_s26 + $0x48] sm:$0xf] }
 0x1e0   : > { %v5743_v40 = vadd.f32 %v12927_v27, %v5679_v38  ;;  %4321 = vst.msk [vmem:[#allocation2 + $0x98] sm:$0xff] %vm511_vm0, %v4257_v43  ;;  %v7907_v35 = vrot.slane %v7906_v55, 4  ;;  %v12070_v32 = vrot.slane %v11994_v47, 9  ;;  %v12862_v1 = vpop.f32.mrf.mxu1  ;;  %v12931_v4 = vpop.f32.mrf.mxu0  ;;  %v7902_v25 = vsel %vm13588_vm5, %v7897_v13, %v15853_v51  ;;  %v11998_v6 = vld [vmem:[%s13512_s26 + $0x4c] sm:$0x1]  ;;  %v4194_v51 = vld [vmem:[#allocation2 + $0xa0] sm:$0xff] }
 0x1e1   : > { %v5677_v23 = vld [vmem:[#allocation2 + $0x68] sm:$0xff]  ;;  %v7917_v11 = vrot.slane %v7916_v42, 4  ;;  %v7926_v27 = vor.u32 %v7925_v22, %v15868_v18  ;;  %v7931_v52 = vrot.slane %v7929_v63, 5  ;;  %4319 = vst.msk [vmem:[#allocation2 + $0x88] sm:$0xff] %vm511_vm0, %v4255_v15  ;;  %v4260_v5 = vadd.f32 %v12862_v1, %v4196_v39  ;;  %13101 = vmatmul.mubr.msk.bf16.gmra.mxu0 %vm511_vm0, %v13418_v60  ;;  %v4197_v13 = vld [vmem:[#allocation2 + $0xb8] sm:$0xff] }
 0x1e2   : > { %5807 = vst.msk [vmem:[#allocation2 + $0x78] sm:$0xff] %vm511_vm0, %v5743_v40  ;;  %v5741_v54 = vadd.f32 %v5677_v23, %v5460_v28  ;;  %v7912_v2 = vsel %vm13588_vm5, %v7907_v35, %v7911_v30  ;;  %v9430_v41 = vrot.slane %v11995_v12, 5  ;;  %v5682_v47 = vld [vmem:[#allocation2 + $0x90] sm:$0xff]  ;;  %v3999_v62 = vpop.f32.mrf.mxu1  ;;  %v5476_v43 = vpop.f32.mrf.mxu0  ;;  %v9433_v38 = vrot.slane %v11996_v19, 5  ;;  %13104 = vmatprep.mubr.msk.bf16.mxu0 %vm511_vm0, %v13420_v34  ;;  %v11845_v39 = vld [vmem:[%s13512_s26 + $0x58] sm:$0xf] }
 0x1e3   : > { %v15890_v61 = vcombine.low %v7902_v25, %v7912_v2  ;;  %v7922_v28 = vsel %vm13588_vm5, %v7917_v11, %v15868_v18  ;;  %v7927_v55 = vrot.slane %v7926_v27, 4  ;;  %v5746_v30 = vadd.f32 %v12930_v7, %v5682_v47  ;;  %4324 = vst.msk [vmem:[#allocation2 + $0xb0] sm:$0xff] %vm511_vm0, %v4260_v5  ;;  %v11843_v63 = vld [vmem:[%s13512_s26 + $0x50] sm:$0xf]  ;;  %v11844_v19 = vld [vmem:[%s13512_s26 + $0x54] sm:$0xf] }
 0x1e4   : > { %5805 = vst.msk [vmem:[#allocation2 + $0x68] sm:$0xff] %vm511_vm0, %v5741_v54  ;;  %v4258_v50 = vadd.f32 %v4194_v51, %v3999_v62  ;;  %v15900_v42 = vsel %vm13606_vm6, %v12070_v32, %v9430_v41  ;;  %v9432_v22 = vrot.slane %v9430_v41, 4  ;;  %v12863_v12 = vpop.f32.mrf.mxu1  ;;  %v12934_v60 = vpop.f32.mrf.mxu0  ;;  %v9435_v7 = vrot.slane %v9433_v38, 4  ;;  %v4195_v25 = vld [vmem:[#allocation2 + $0xa8] sm:$0xff]  ;;  %v13421_v5 = vld [vmem:[%s13512_s26 + $0x120] sm:$0xff]   ;;  %v4200_v41 = vld [vmem:[#allocation2 + $0xd0] sm:$0xff] }
 0x1e5   : > { %v5680_v18 = vld [vmem:[#allocation2 + $0x80] sm:$0xff]  ;;  %v7932_v40 = vsel %vm13588_vm5, %v7927_v55, %v7931_v52  ;;  %v9436_v15 = vrot.slane %v11997_v46, 5  ;;  %v9439_v35 = vrot.slane %v11998_v6, 5  ;;  %13033 = vmatmul.mubr.msk.bf16.gmra.mxu1 %vm511_vm0, %v11650_v44  ;;  %5810 = vst.msk [vmem:[#allocation2 + $0x90] sm:$0xff] %vm511_vm0, %v5746_v30  ;;  %v4261_v23 = vadd.f32 %v12863_v12, %v4197_v13 }
 0x1e6   : > { %v5744_v32 = vadd.f32 %v5680_v18, %v5473_v9  ;;  %4322 = vst.msk [vmem:[#allocation2 + $0xa0] sm:$0xff] %vm511_vm0, %v4258_v50  ;;  %v15913_v34 = vcombine.low %v7922_v28, %v7932_v40  ;;  %v15917_v1 = vsel %vm13606_vm6, %v9432_v22, %v9433_v38  ;;  %13036 = vmatprep.mubr.msk.bf16.mxu1 %vm511_vm0, %v17394_v45  ;;  %v4002_v44 = vpop.f32.mrf.mxu1  ;;  %v5489_v9 = vpop.f32.mrf.mxu0  ;;  %v7934_v54 = vshrl.u32 %v11843_v63, 16  ;;  %v11846_v50 = vld [vmem:[%s13512_s26 + $0x5c] sm:$0xf]  ;;  %v11847_v18 = vld [vmem:[%s13512_s26 + $0x60] sm:$0x1] }
 0x1e7   : > { %v5683_v48 = vld [vmem:[#allocation2 + $0x98] sm:$0xff]  ;;  %v12095_v11 = vcombine.low %v15900_v42, %v15917_v1  ;;  %v15928_v27 = vsel %vm13606_vm6, %v9435_v7, %v9436_v15  ;;  %v9438_v52 = vrot.slane %v9436_v15, 4  ;;  %4325 = vst.msk [vmem:[#allocation2 + $0xb8] sm:$0xff] %vm511_vm0, %v4261_v23  ;;  %v4259_v2 = vadd.f32 %v4195_v25, %v4002_v44  ;;  %v4198_v7 = vld [vmem:[#allocation2 + $0xc0] sm:$0xff] }
 0x1e8   : > { %5808 = vst.msk [vmem:[#allocation2 + $0x80] sm:$0xff] %vm511_vm0, %v5744_v32  ;;  %v5747_v36 = vadd.f32 %v12931_v4, %v5683_v48  ;;  %v7937_v46 = vshll.u32 %v11843_v63, 16  ;;  %v7943_v6 = vshll.u32 %v11844_v19, 16  ;;  %v5681_v47 = vld [vmem:[#allocation2 + $0x88] sm:$0xff]  ;;  %v12866_v62 = vpop.f32.mrf.mxu1  ;;  %v12935_v51 = vpop.f32.mrf.mxu0  ;;  %v7936_v55 = vrot.slane %v7934_v54, 4  ;;  %v4201_v48 = vld [vmem:[#allocation2 + $0xd8] sm:$0xff] }
 0x1e9   : > { %v15936_v28 = vsel %vm13606_vm6, %v9438_v52, %v9439_v35  ;;  %v7947_v38 = vshrl.u32 %v11844_v19, 16  ;;  %v7953_v30 = vshll.u32 %v11845_v39, 16  ;;  %v5745_v4 = vadd.f32 %v5681_v47, %v5476_v43  ;;  %4323 = vst.msk [vmem:[#allocation2 + $0xa8] sm:$0xff] %vm511_vm0, %v4259_v2  ;;  %13105 = vmatmul.mubr.msk.bf16.gmra.mxu0 %vm511_vm0, %v13421_v5  ;;  %v4199_v47 = vld [vmem:[#allocation2 + $0xc8] sm:$0xff] }
 0x1ea   : > { %5811 = vst.msk [vmem:[#allocation2 + $0x98] sm:$0xff] %vm511_vm0, %v5747_v36  ;;  %v4264_v13 = vadd.f32 %v12866_v62, %v4200_v41  ;;  %v12096_v22 = vcombine.low %v15928_v27, %v15936_v28  ;;  %v7939_v63 = vrot.slane %v7937_v46, 5  ;;  %v5686_v12 = vld [vmem:[#allocation2 + $0xb0] sm:$0xff]  ;;  %v4015_v40 = vpop.f32.mrf.mxu1  ;;  %v5492_v15 = vpop.f32.mrf.mxu0  ;;  %v7945_v35 = vrot.slane %v7943_v6, 5  ;;  %13108 = vmatprep.mubr.msk.bf16.mxu0 %vm511_vm0, %v13423_v0 }
 0x1eb   : > { %v7949_v32 = vrot.slane %v7947_v38, 4  ;;  %v7955_v19 = vrot.slane %v7953_v30, 5  ;;  %v7957_v23 = vshrl.u32 %v11845_v39, 16  ;;  %5809 = vst.msk [vmem:[#allocation2 + $0x88] sm:$0xff] %vm511_vm0, %v5745_v4  ;;  %v5750_v43 = vadd.f32 %v12934_v60, %v5686_v12  ;;  %v11999_v46 = vld [vmem:[%s13512_s26 + $0x50] sm:$0xe] }
 0x1ec   : > { %4328 = vst.msk [vmem:[#allocation2 + $0xd0] sm:$0xff] %vm511_vm0, %v4264_v13  ;;  %v4262_v45 = vadd.f32 %v4198_v7, %v4015_v40  ;;  %v7940_v44 = vor.u32 %v7939_v63, %v7936_v55  ;;  %v7963_v25 = vshll.u32 %v11846_v50, 16  ;;  %v12867_v54 = vpop.f32.mrf.mxu1  ;;  %v12938_v36 = vpop.f32.mrf.mxu0  ;;  %v7967_v41 = vshrl.u32 %v11846_v50, 16  ;;  %v12000_v38 = vld [vmem:[%s13512_s26 + $0x54] sm:$0xf]  ;;  %v13425_v7 = vld [vmem:[%s13512_s26 + $0x140] sm:$0xff]  }
 0x1ed   : > { %v5684_v52 = vld [vmem:[#allocation2 + $0xa0] sm:$0xff]  ;;  %v7950_v2 = vor.u32 %v7949_v32, %v7945_v35  ;;  %v7959_v39 = vrot.slane %v7957_v23, 4  ;;  %v7973_v5 = vshll.u32 %v11847_v18, 16  ;;  %v17395_v60 = vcombine.low %v15671_v49, %v15684_v59  ;;  %5814 = vst.msk [vmem:[#allocation2 + $0xb0] sm:$0xff] %vm511_vm0, %v5750_v43  ;;  %v12001_v18 = vld [vmem:[%s13512_s26 + $0x58] sm:$0xf] }
 0x1ee   : > { %v5748_v6 = vadd.f32 %v5684_v52, %v5489_v9  ;;  %4326 = vst.msk [vmem:[#allocation2 + $0xc0] sm:$0xff] %vm511_vm0, %v4262_v45  ;;  %v4265_v0 = vadd.f32 %v12867_v54, %v4201_v48  ;;  %v7941_v62 = vrot.slane %v7940_v44, 4  ;;  %v15955_v55 = vrot.slane %v7963_v25, 5  ;;  %v5687_v49 = vld [vmem:[#allocation2 + $0xb8] sm:$0xff]  ;;  %v4018_v59 = vpop.f32.mrf.mxu1  ;;  %v5505_v50 = vpop.f32.mrf.mxu0  ;;  %v4204_v45 = vld [vmem:[#allocation2 + $0xf0] sm:$0xff] }
 0x1ef   : > { %13037 = vmatmul.mubr.msk.bf16.gmra.mxu1 %vm511_vm0, %v17395_v60  ;;  %v17396_v30 = vcombine.low %v15693_v26, %v15703_v29  ;;  %v7951_v4 = vrot.slane %v7950_v2, 4  ;;  %v7960_v9 = vor.u32 %v7959_v39, %v7955_v19  ;;  %v7969_v13 = vrot.slane %v7967_v41, 4  ;;  %v13424_v12 = vld [vmem:[%s13512_s26 + $0x134] sm:$0xff]   ;;  %v12002_v54 = vld [vmem:[%s13512_s26 + $0x5c] sm:$0xf] }
 0x1f0   : > { %v7975_v63 = vrot.slane %v7973_v5, 5  ;;  %5812 = vst.msk [vmem:[#allocation2 + $0xa0] sm:$0xff] %vm511_vm0, %v5748_v6  ;;  %v5751_v40 = vadd.f32 %v12935_v51, %v5687_v49  ;;  %4329 = vst.msk [vmem:[#allocation2 + $0xd8] sm:$0xff] %vm511_vm0, %v4265_v0  ;;  %v4263_v32 = vadd.f32 %v4199_v47, %v4018_v59  ;;  %v7946_v26 = vsel %vm13588_vm5, %v7941_v62, %v7945_v35  ;;  %v5685_v23 = vld [vmem:[#allocation2 + $0xa8] sm:$0xff]  ;;  %v12870_v43 = vpop.f32.mrf.mxu1  ;;  %v12939_v48 = vpop.f32.mrf.mxu0  ;;  %v12003_v5 = vld [vmem:[%s13512_s26 + $0x60] sm:$0x1] }
 0x1f1   : > { %13040 = vmatprep.mubr.msk.bf16.mxu1 %vm511_vm0, %v17396_v30  ;;  %v12071_v29 = vrot.slane %v11999_v46, 9  ;;  %v7956_v44 = vsel %vm13588_vm5, %v7951_v4, %v7955_v19  ;;  %v7961_v25 = vrot.slane %v7960_v9, 4  ;;  %v7970_v51 = vor.u32 %v7969_v13, %v15955_v55  ;;  %v11848_v46 = vld [vmem:[%s13512_s26 + $0x64] sm:$0xf]  ;;  %13109 = vmatmul.mubr.msk.bf16.gmra.mxu0 %vm511_vm0, %v13424_v12  ;;  %v4205_v13 = vld [vmem:[#allocation2 + $0xf8] sm:$0xff] }
 0x1f2   : > { %v9443_v52 = vrot.slane %v12000_v38, 5  ;;  %5815 = vst.msk [vmem:[#allocation2 + $0xb8] sm:$0xff] %vm511_vm0, %v5751_v40  ;;  %v5749_v2 = vadd.f32 %v5685_v23, %v5492_v15  ;;  %4327 = vst.msk [vmem:[#allocation2 + $0xc8] sm:$0xff] %vm511_vm0, %v4263_v32  ;;  %v4268_v35 = vadd.f32 %v12870_v43, %v4204_v45  ;;  %v15975_v39 = vcombine.low %v7946_v26, %v7956_v44  ;;  %v4031_v6 = vpop.f32.mrf.mxu1  ;;  %v4202_v0 = vld [vmem:[#allocation2 + $0xe0] sm:$0xff]  ;;  %v5508_v19 = vpop.f32.mrf.mxu0  ;;  %v11849_v32 = vld [vmem:[%s13512_s26 + $0x68] sm:$0xf] }
 0x1f3   : > { %v9446_v41 = vrot.slane %v12001_v18, 5  ;;  %v5690_v60 = vld [vmem:[#allocation2 + $0xd0] sm:$0xff]  ;;  %v7966_v47 = vsel %vm13588_vm5, %v7961_v25, %v15955_v55  ;;  %v7971_v62 = vrot.slane %v7970_v51, 4  ;;  %v4266_v49 = vadd.f32 %v4202_v0, %v4031_v6  ;;  %13112 = vmatprep.mubr.msk.bf16.mxu0 %vm511_vm0, %v13425_v7  ;;  %v11850_v45 = vld [vmem:[%s13512_s26 + $0x6c] sm:$0xf] }
 0x1f4   : > { %v15984_v15 = vsel %vm13606_vm6, %v12071_v29, %v9443_v52  ;;  %v9445_v38 = vrot.slane %v9443_v52, 4  ;;  %5813 = vst.msk [vmem:[#allocation2 + $0xa8] sm:$0xff] %vm511_vm0, %v5749_v2  ;;  %v5754_v30 = vadd.f32 %v12938_v36, %v5690_v60  ;;  %4332 = vst.msk [vmem:[#allocation2 + $0xf0] sm:$0xff] %vm511_vm0, %v4268_v35  ;;  %v9449_v4 = vrot.slane %v12002_v54, 5  ;;  %v12871_v9 = vpop.f32.mrf.mxu1  ;;  %v12942_v18 = vpop.f32.mrf.mxu0  ;;  %v4203_v25 = vld [vmem:[#allocation2 + $0xe8] sm:$0xff] }
 0x1f5   : > { %v9448_v59 = vrot.slane %v9446_v41, 4  ;;  %v5688_v55 = vld [vmem:[#allocation2 + $0xc0] sm:$0xff]  ;;  %v7976_v40 = vsel %vm13588_vm5, %v7971_v62, %v7975_v63  ;;  %v9452_v36 = vrot.slane %v12003_v5, 5  ;;  %v7978_v26 = vshrl.u32 %v11848_v46, 16  ;;  %4330 = vst.msk [vmem:[#allocation2 + $0xe0] sm:$0xff] %vm511_vm0, %v4266_v49  ;;  %v13426_v35 = vld [vmem:[%s13512_s26 + $0x148] sm:$0xff]  }
 0x1f6   : > { %v15994_v12 = vsel %vm13606_vm6, %v9445_v38, %v9446_v41  ;;  %v17397_v29 = vcombine.low %v15716_v10, %v15731_v24  ;;  %5818 = vst.msk [vmem:[#allocation2 + $0xd0] sm:$0xff] %vm511_vm0, %v5754_v30  ;;  %v5752_v7 = vadd.f32 %v5688_v55, %v5505_v50  ;;  %v4269_v23 = vadd.f32 %v12871_v9, %v4205_v13  ;;  %v4034_v24 = vpop.f32.mrf.mxu1  ;;  %v5521_v51 = vpop.f32.mrf.mxu0  ;;  %v4208_v5 = vld [vmem:[#allocation2 + $0x110] sm:$0xff] }
 0x1f7   : > { %v16003_v63 = vcombine.low %v7966_v47, %v7976_v40  ;;  %v12097_v43 = vcombine.low %v15984_v15, %v15994_v12  ;;  %v17398_v44 = vcombine.low %v15720_v31, %v15743_v37  ;;  %v5691_v10 = vld [vmem:[#allocation2 + $0xd8] sm:$0xff]  ;;  %v16014_v50 = vsel %vm13606_vm6, %v9448_v59, %v9449_v4  ;;  %v11851_v59 = vld [vmem:[%s13512_s26 + $0x70] sm:$0xf]  ;;  %v11852_v13 = vld [vmem:[%s13512_s26 + $0x74] sm:$0x1] }
 0x1f8   : > { %13041 = vmatmul.mubr.msk.bf16.gmra.mxu1 %vm511_vm0, %v17397_v29  ;;  %v9451_v52 = vrot.slane %v9449_v4, 4  ;;  %v7980_v54 = vrot.slane %v7978_v26, 4  ;;  %v7981_v2 = vshll.u32 %v11848_v46, 16  ;;  %5816 = vst.msk [vmem:[#allocation2 + $0xc0] sm:$0xff] %vm511_vm0, %v5752_v7  ;;  %v5755_v41 = vadd.f32 %v12939_v48, %v5691_v10  ;;  %4333 = vst.msk [vmem:[#allocation2 + $0xf8] sm:$0xff] %vm511_vm0, %v4269_v23  ;;  %v13427_v31 = vld [vmem:[%s13512_s26 + $0x154] sm:$0xff]   ;;  %v12874_v47 = vpop.f32.mrf.mxu1  ;;  %v12943_v62 = vpop.f32.mrf.mxu0 }
 0x1f9   : > { %13044 = vmatprep.mubr.msk.bf16.mxu1 %vm511_vm0, %v17398_v44  ;;  %v4267_v37 = vadd.f32 %v4203_v25, %v4034_v24  ;;  %v7987_v60 = vshll.u32 %v11849_v32, 16  ;;  %v7991_v6 = vshrl.u32 %v11849_v32, 16  ;;  %v5689_v0 = vld [vmem:[#allocation2 + $0xc8] sm:$0xff]  ;;  %v7997_v30 = vshll.u32 %v11850_v45, 16  ;;  %13113 = vmatmul.mubr.msk.bf16.gmra.mxu0 %vm511_vm0, %v13426_v35 }
 0x1fa   : > { %v16022_v38 = vsel %vm13606_vm6, %v9451_v52, %v9452_v36  ;;  %v7983_v46 = vrot.slane %v7981_v2, 5  ;;  %v8001_v49 = vshrl.u32 %v11850_v45, 16  ;;  %5819 = vst.msk [vmem:[#allocation2 + $0xd8] sm:$0xff] %vm511_vm0, %v5755_v41  ;;  %v5753_v48 = vadd.f32 %v5689_v0, %v5508_v19  ;;  %v4047_v32 = vpop.f32.mrf.mxu1  ;;  %v4206_v36 = vld [vmem:[#allocation2 + $0x100] sm:$0xff]  ;;  %v5524_v26 = vpop.f32.mrf.mxu0  ;;  %13116 = vmatprep.mubr.msk.bf16.mxu0 %vm511_vm0, %v13427_v31 }
 0x1fb   : > { %4331 = vst.msk [vmem:[#allocation2 + $0xe8] sm:$0xff] %vm511_vm0, %v4267_v37  ;;  %v4272_v4 = vadd.f32 %v12874_v47, %v4208_v5  ;;  %v12098_v55 = vcombine.low %v16014_v50, %v16022_v38  ;;  %v16029_v9 = vrot.slane %v7987_v60, 5  ;;  %v5694_v40 = vld [vmem:[#allocation2 + $0xf0] sm:$0xff]  ;;  %v7993_v7 = vrot.slane %v7991_v6, 4  ;;  %v12004_v5 = vld [vmem:[%s13512_s26 + $0x64] sm:$0xe] }
 0x1fc   : > { %v7984_v29 = vor.u32 %v7983_v46, %v7980_v54  ;;  %v7999_v23 = vrot.slane %v7997_v30, 5  ;;  %v8003_v45 = vrot.slane %v8001_v49, 4  ;;  %5817 = vst.msk [vmem:[#allocation2 + $0xc8] sm:$0xff] %vm511_vm0, %v5753_v48  ;;  %v5758_v19 = vadd.f32 %v12942_v18, %v5694_v40  ;;  %v5692_v25 = vld [vmem:[#allocation2 + $0xe0] sm:$0xff]  ;;  %v12875_v52 = vpop.f32.mrf.mxu1  ;;  %v4209_v54 = vld [vmem:[#allocation2 + $0x118] sm:$0xff]  ;;  %v12946_v6 = vpop.f32.mrf.mxu0 }
 0x1fd   : > { %4336 = vst.msk [vmem:[#allocation2 + $0x110] sm:$0xff] %vm511_vm0, %v4272_v4  ;;  %v4270_v44 = vadd.f32 %v4206_v36, %v4047_v32  ;;  %v8007_v10 = vshll.u32 %v11851_v59, 16  ;;  %v8011_v24 = vshrl.u32 %v11851_v59, 16  ;;  %v7994_v41 = vor.u32 %v7993_v7, %v16029_v9  ;;  %v12005_v46 = vld [vmem:[%s13512_s26 + $0x68] sm:$0xf] }
 0x1fe   : > { %v7985_v2 = vrot.slane %v7984_v29, 4  ;;  %v8004_v37 = vor.u32 %v8003_v45, %v7999_v23  ;;  %v8017_v35 = vshll.u32 %v11852_v13, 16  ;;  %v17399_v18 = vcombine.low %v15754_v14, %v15762_v33  ;;  %5822 = vst.msk [vmem:[#allocation2 + $0xf0] sm:$0xff] %vm511_vm0, %v5758_v19  ;;  %v12006_v30 = vld [vmem:[%s13512_s26 + $0x6c] sm:$0xf]  ;;  %v4050_v14 = vpop.f32.mrf.mxu1  ;;  %v13428_v13 = vld [vmem:[%s13512_s26 + $0x15c] sm:$0xff]  }
 0x1ff   : > { %v5756_v60 = vadd.f32 %v5692_v25, %v5521_v51  ;;  %4334 = vst.msk [vmem:[#allocation2 + $0x100] sm:$0xff] %vm511_vm0, %v4270_v44  ;;  %v4273_v31 = vadd.f32 %v12875_v52, %v4209_v54  ;;  %v8009_v0 = vrot.slane %v8007_v10, 5  ;;  %v8013_v47 = vrot.slane %v8011_v24, 4  ;;  %v5695_v49 = vld [vmem:[#allocation2 + $0xf8] sm:$0xff]  ;;  %v4207_v33 = vld [vmem:[#allocation2 + $0x108] sm:$0xff]  ;;  %v4212_v44 = vld [vmem:[#allocation2 + $0x130] sm:$0xff] }
 0x200   : > { %13045 = vmatmul.mubr.msk.bf16.gmra.mxu1 %vm511_vm0, %v17399_v18  ;;  %v7990_v51 = vsel %vm13588_vm5, %v7985_v2, %v16029_v9  ;;  %v7995_v59 = vrot.slane %v7994_v41, 4  ;;  %v8005_v48 = vrot.slane %v8004_v37, 4  ;;  %v8019_v4 = vrot.slane %v8017_v35, 5  ;;  %v12007_v7 = vld [vmem:[%s13512_s26 + $0x70] sm:$0xf]  ;;  %v12878_v19 = vpop.f32.mrf.mxu1  ;;  %v4210_v41 = vld [vmem:[#allocation2 + $0x120] sm:$0xff] }
 0x201   : > { %13128 = vmatprep.mubr.msk.bf16.mxu1 %vm511_vm0, %v15800_v58  ;;  %5820 = vst.msk [vmem:[#allocation2 + $0xe0] sm:$0xff] %vm511_vm0, %v5756_v60  ;;  %v5759_v40 = vadd.f32 %v12943_v62, %v5695_v49  ;;  %4337 = vst.msk [vmem:[#allocation2 + $0x118] sm:$0xff] %vm511_vm0, %v4273_v31  ;;  %v4271_v32 = vadd.f32 %v4207_v33, %v4050_v14  ;;  %v5537_v58 = vpop.f32.mrf.mxu0  ;;  %v8014_v36 = vor.u32 %v8013_v47, %v8009_v0  ;;  %v12008_v62 = vld [vmem:[%s13512_s26 + $0x74] sm:$0x1]  ;;  %v11853_v47 = vld [vmem:[%s13512_s26 + $0x78] sm:$0xf] }
 0x202   : > { %v12072_v29 = vrot.slane %v12004_v5, 9  ;;  %v5693_v45 = vld [vmem:[#allocation2 + $0xe8] sm:$0xff]  ;;  %v8000_v9 = vsel %vm13588_vm5, %v7995_v59, %v7999_v23  ;;  %v8010_v10 = vsel %vm13588_vm5, %v8005_v48, %v8009_v0  ;;  %v9456_v24 = vrot.slane %v12005_v46, 5  ;;  %v4063_v5 = vpop.f32.mrf.mxu1  ;;  %13117 = vmatmul.mubr.msk.bf16.gmra.mxu0 %vm511_vm0, %v13428_v13  ;;  %v11854_v33 = vld [vmem:[%s13512_s26 + $0x7c] sm:$0xf] }
 0x203   : > { %v9459_v25 = vrot.slane %v12006_v30, 5  ;;  %5823 = vst.msk [vmem:[#allocation2 + $0xf8] sm:$0xff] %vm511_vm0, %v5759_v40  ;;  %v5757_v52 = vadd.f32 %v5693_v45, %v5524_v26  ;;  %4335 = vst.msk [vmem:[#allocation2 + $0x108] sm:$0xff] %vm511_vm0, %v4271_v32  ;;  %v4276_v54 = vadd.f32 %v12878_v19, %v4212_v44  ;;  %v12947_v2 = vpop.f32.mrf.mxu0  ;;  %v16062_v37 = vcombine.low %v7990_v51, %v8000_v9  ;;  %v4213_v48 = vld [vmem:[#allocation2 + $0x138] sm:$0xff]  ;;  %v11856_v9 = vld [vmem:[%s13512_s26 + $0x84] sm:$0xf] }
 0x204   : > { %v8015_v35 = vrot.slane %v8014_v36, 4  ;;  %v5698_v23 = vld [vmem:[#allocation2 + $0x110] sm:$0xff]  ;;  %v16066_v18 = vsel %vm13606_vm6, %v12072_v29, %v9456_v24  ;;  %v9458_v60 = vrot.slane %v9456_v24, 4  ;;  %v9462_v0 = vrot.slane %v12007_v7, 5  ;;  %13200 = vmatprep.mubr.msk.bf16.mxu0 %vm511_vm0, %v12093_v56  ;;  %v12879_v59 = vpop.f32.mrf.mxu1  ;;  %v4211_v56 = vld [vmem:[#allocation2 + $0x128] sm:$0xff] }
 0x205   : > { %v9461_v31 = vrot.slane %v9459_v25, 4  ;;  %5821 = vst.msk [vmem:[#allocation2 + $0xe8] sm:$0xff] %vm511_vm0, %v5757_v52  ;;  %v5762_v26 = vadd.f32 %v12946_v6, %v5698_v23  ;;  %4340 = vst.msk [vmem:[#allocation2 + $0x130] sm:$0xff] %vm511_vm0, %v4276_v54  ;;  %v4274_v46 = vadd.f32 %v4210_v41, %v4063_v5  ;;  %v5540_v30 = vpop.f32.mrf.mxu0  ;;  %v9465_v14 = vrot.slane %v12008_v62, 5  ;;  %v11855_v36 = vld [vmem:[%s13512_s26 + $0x80] sm:$0xf] }
 0x206   : > { %v8020_v49 = vsel %vm13588_vm5, %v8015_v35, %v8019_v4  ;;  %v5696_v51 = vld [vmem:[#allocation2 + $0x100] sm:$0xff]  ;;  %v16083_v6 = vsel %vm13606_vm6, %v9458_v60, %v9459_v25  ;;  %v9464_v40 = vrot.slane %v9462_v0, 4  ;;  %v4277_v16 = vadd.f32 %v12879_v59, %v4213_v48  ;;  %v4066_v45 = vpop.f32.mrf.mxu1  ;;  %v4216_v41 = vld [vmem:[#allocation2 + $0x150] sm:$0xff] }
 0x207   : > { %v16079_v13 = vcombine.low %v8010_v10, %v8020_v49  ;;  %v16087_v4 = vsel %vm13606_vm6, %v9461_v31, %v9462_v0  ;;  %5826 = vst.msk [vmem:[#allocation2 + $0x110] sm:$0xff] %vm511_vm0, %v5762_v26  ;;  %v5760_v20 = vadd.f32 %v5696_v51, %v5537_v58  ;;  %4338 = vst.msk [vmem:[#allocation2 + $0x120] sm:$0xff] %vm511_vm0, %v4274_v46  ;;  %v8022_v29 = vshrl.u32 %v11853_v47, 16  ;;  %v12950_v24 = vpop.f32.mrf.mxu0  ;;  %v11857_v26 = vld [vmem:[%s13512_s26 + $0x88] sm:$0x1] }
 0x208   : > { %13129 = vmatmul.mubr.msk.bf16.vlgmr.msra.gmra.mxu1 %vm511_vm0, %v15822_v21  ;;  %v12099_v32 = vcombine.low %v16066_v18, %v16083_v6  ;;  %v5699_v7 = vld [vmem:[#allocation2 + $0x118] sm:$0xff]  ;;  %v16100_v21 = vsel %vm13606_vm6, %v9464_v40, %v9465_v14  ;;  %v8025_v19 = vshll.u32 %v11853_v47, 16  ;;  %v8031_v58 = vshll.u32 %v11854_v33, 16  ;;  %4341 = vst.msk [vmem:[#allocation2 + $0x138] sm:$0xff] %vm511_vm0, %v4277_v16  ;;  %v12882_v54 = vpop.f32.mrf.mxu1 }
 0x209   : > { %13132 = vmatprep.mubr.msk.bf16.mxu1 %vm511_vm0, %v15890_v61  ;;  %v8035_v44 = vshrl.u32 %v11854_v33, 16  ;;  %5824 = vst.msk [vmem:[#allocation2 + $0x100] sm:$0xff] %vm511_vm0, %v5760_v20  ;;  %v5763_v10 = vadd.f32 %v12947_v2, %v5699_v7  ;;  %v4275_v25 = vadd.f32 %v4211_v56, %v4066_v45  ;;  %v12100_v61 = vcombine.low %v16087_v4, %v16100_v21  ;;  %v5553_v31 = vpop.f32.mrf.mxu0  ;;  %v4214_v33 = vld [vmem:[#allocation2 + $0x140] sm:$0xff]  ;;  %v16111_v20 = vld [vmem:[%s13512_s26 + $0x78] sm:$0xe] }
 0x20a   : > { %v8024_v62 = vrot.slane %v8022_v29, 4  ;;  %v5697_v52 = vld [vmem:[#allocation2 + $0x108] sm:$0xff]  ;;  %v8027_v35 = vrot.slane %v8025_v19, 5  ;;  %v8033_v23 = vrot.slane %v8031_v58, 5  ;;  %v8041_v60 = vshll.u32 %v11855_v36, 16  ;;  %v4079_v14 = vpop.f32.mrf.mxu1  ;;  %13201 = vmatmul.mubr.msk.bf16.vlgmr.msra.gmra.mxu0 %vm511_vm0, %v12094_v17  ;;  %v4217_v17 = vld [vmem:[#allocation2 + $0x158] sm:$0xff] }
 0x20b   : > { %v8037_v5 = vrot.slane %v8035_v44, 4  ;;  %5827 = vst.msk [vmem:[#allocation2 + $0x118] sm:$0xff] %vm511_vm0, %v5763_v10  ;;  %v5761_v2 = vadd.f32 %v5697_v52, %v5540_v30  ;;  %4339 = vst.msk [vmem:[#allocation2 + $0x128] sm:$0xff] %vm511_vm0, %v4275_v25  ;;  %v4280_v0 = vadd.f32 %v12882_v54, %v4216_v41  ;;  %v8045_v47 = vshrl.u32 %v11855_v36, 16  ;;  %v12951_v16 = vpop.f32.mrf.mxu0  ;;  %v12010_v7 = vld [vmem:[%s13512_s26 + $0x7c] sm:$0xf]  ;;  %13204 = vmatprep.mubr.msk.bf16.mxu0 %vm511_vm0, %v12095_v11 }
 0x20c   : > { %v8051_v46 = vshll.u32 %v11856_v9, 16  ;;  %v5702_v49 = vld [vmem:[#allocation2 + $0x130] sm:$0xff]  ;;  %v8028_v51 = vor.u32 %v8027_v35, %v8024_v62  ;;  %v8043_v48 = vrot.slane %v8041_v60, 5  ;;  %v8055_v40 = vshrl.u32 %v11856_v9, 16  ;;  %v12883_v57 = vpop.f32.mrf.mxu1  ;;  %v12011_v10 = vld [vmem:[%s13512_s26 + $0x80] sm:$0xf] }
 0x20d   : > { %v8038_v59 = vor.u32 %v8037_v5, %v8033_v23  ;;  %5825 = vst.msk [vmem:[#allocation2 + $0x108] sm:$0xff] %vm511_vm0, %v5761_v2  ;;  %v5766_v30 = vadd.f32 %v12950_v24, %v5702_v49  ;;  %4344 = vst.msk [vmem:[#allocation2 + $0x150] sm:$0xff] %vm511_vm0, %v4280_v0  ;;  %v4278_v56 = vadd.f32 %v4214_v33, %v4079_v14  ;;  %v8047_v36 = vrot.slane %v8045_v47, 4  ;;  %v5556_v42 = vpop.f32.mrf.mxu0  ;;  %v12012_v25 = vld [vmem:[%s13512_s26 + $0x84] sm:$0xf]  ;;  %v4215_v54 = vld [vmem:[#allocation2 + $0x148] sm:$0xff] }
 0x20e   : > { %v16119_v29 = vrot.slane %v8051_v46, 5  ;;  %v5700_v8 = vld [vmem:[#allocation2 + $0x120] sm:$0xff]  ;;  %v8029_v45 = vrot.slane %v8028_v51, 4  ;;  %v8057_v58 = vrot.slane %v8055_v40, 4  ;;  %v8061_v44 = vshll.u32 %v11857_v26, 16  ;;  %v4082_v52 = vpop.f32.mrf.mxu1  ;;  %v4229_v21 = vld [vmem:[#allocation2 + $0x1b8] sm:$0xff] }
 0x20f   : > { %v8039_v19 = vrot.slane %v8038_v59, 4  ;;  %5830 = vst.msk [vmem:[#allocation2 + $0x130] sm:$0xff] %vm511_vm0, %v5766_v30  ;;  %v5764_v9 = vadd.f32 %v5700_v8, %v5553_v31  ;;  %4342 = vst.msk [vmem:[#allocation2 + $0x140] sm:$0xff] %vm511_vm0, %v4278_v56  ;;  %v4281_v1 = vadd.f32 %v12883_v57, %v4217_v17  ;;  %v8048_v11 = vor.u32 %v8047_v36, %v8043_v48  ;;  %v5703_v62 = vld [vmem:[#allocation2 + $0x138] sm:$0xff]  ;;  %v12013_v60 = vld [vmem:[%s13512_s26 + $0x88] sm:$0x1]  ;;  %v12954_v59 = vpop.f32.mrf.mxu0 }
 0x210   : > { %13133 = vmatmul.mubr.msk.bf16.gmra.mxu1 %vm511_vm0, %v15913_v34  ;;  %v12073_v24 = vrot.slane %v16111_v20, 9  ;;  %v8034_v34 = vsel %vm13588_vm5, %v8029_v45, %v8033_v23  ;;  %v8058_v35 = vor.u32 %v8057_v58, %v16119_v29  ;;  %v8063_v5 = vrot.slane %v8061_v44, 5  ;;  %v12886_v26 = vpop.f32.mrf.mxu1  ;;  %v4220_v23 = vld [vmem:[#allocation2 + $0x170] sm:$0xff]  ;;  %v11858_v30 = vld [vmem:[%s13512_s26 + $0x8c] sm:$0xf]  ;;  %v4218_v36 = vld [vmem:[#allocation2 + $0x160] sm:$0xff] }
 0x211   : > { %13136 = vmatprep.mubr.msk.bf16.mxu1 %vm511_vm0, %v15975_v39  ;;  %v8044_v41 = vsel %vm13588_vm5, %v8039_v19, %v8043_v48  ;;  %5828 = vst.msk [vmem:[#allocation2 + $0x120] sm:$0xff] %vm511_vm0, %v5764_v9  ;;  %v5767_v2 = vadd.f32 %v12951_v16, %v5703_v62  ;;  %4345 = vst.msk [vmem:[#allocation2 + $0x158] sm:$0xff] %vm511_vm0, %v4281_v1  ;;  %v4279_v31 = vadd.f32 %v4215_v54, %v4082_v52  ;;  %v5569_v45 = vpop.f32.mrf.mxu0  ;;  %v11859_v9 = vld [vmem:[%s13512_s26 + $0x90] sm:$0xf]  ;;  %v11861_v52 = vld [vmem:[%s13512_s26 + $0x98] sm:$0xf] }
 0x212   : > { %v8049_v39 = vrot.slane %v8048_v11, 4  ;;  %v16143_v0 = vcombine.low %v8034_v34, %v8044_v41  ;;  %v5701_v47 = vld [vmem:[#allocation2 + $0x128] sm:$0xff]  ;;  %v8059_v46 = vrot.slane %v8058_v35, 4  ;;  %v9469_v49 = vrot.slane %v12010_v7, 5  ;;  %v4095_v56 = vpop.f32.mrf.mxu1  ;;  %13205 = vmatmul.mubr.msk.bf16.gmra.mxu0 %vm511_vm0, %v12096_v22  ;;  %v4221_v22 = vld [vmem:[#allocation2 + $0x178] sm:$0xff] }
 0x213   : > { %v9472_v14 = vrot.slane %v12011_v10, 5  ;;  %v9475_v33 = vrot.slane %v12012_v25, 5  ;;  %5831 = vst.msk [vmem:[#allocation2 + $0x138] sm:$0xff] %vm511_vm0, %v5767_v2  ;;  %v5765_v51 = vadd.f32 %v5701_v47, %v5556_v42  ;;  %4343 = vst.msk [vmem:[#allocation2 + $0x148] sm:$0xff] %vm511_vm0, %v4279_v31  ;;  %v4284_v48 = vadd.f32 %v12886_v26, %v4220_v23  ;;  %13208 = vmatprep.mubr.msk.bf16.mxu0 %vm511_vm0, %v12097_v43  ;;  %v11860_v11 = vld [vmem:[%s13512_s26 + $0x94] sm:$0xf]  ;;  %v12955_v12 = vpop.f32.mrf.mxu0 }
 0x214   : > { %v8054_v40 = vsel %vm13588_vm5, %v8049_v39, %v16119_v29  ;;  %v9478_v20 = vrot.slane %v12013_v60, 5  ;;  %v5706_v16 = vld [vmem:[#allocation2 + $0x150] sm:$0xff]  ;;  %v8064_v7 = vsel %vm13588_vm5, %v8059_v46, %v8063_v5  ;;  %v16155_v8 = vsel %vm13606_vm6, %v12073_v24, %v9469_v49  ;;  %v12887_v28 = vpop.f32.mrf.mxu1  ;;  %v4219_v34 = vld [vmem:[#allocation2 + $0x168] sm:$0xff]  ;;  %v11862_v23 = vld [vmem:[%s13512_s26 + $0x9c] sm:$0x1] }
 0x215   : > { %v9471_v57 = vrot.slane %v9469_v49, 4  ;;  %v9474_v17 = vrot.slane %v9472_v14, 4  ;;  %5829 = vst.msk [vmem:[#allocation2 + $0x128] sm:$0xff] %vm511_vm0, %v5765_v51  ;;  %v5770_v29 = vadd.f32 %v12954_v59, %v5706_v16  ;;  %4348 = vst.msk [vmem:[#allocation2 + $0x170] sm:$0xff] %vm511_vm0, %v4284_v48  ;;  %v4282_v19 = vadd.f32 %v4218_v36, %v4095_v56  ;;  %v5572_v31 = vpop.f32.mrf.mxu0  ;;  %v4224_v47 = vld [vmem:[#allocation2 + $0x190] sm:$0xff] }
 0x216   : > { %v16163_v58 = vcombine.low %v8054_v40, %v8064_v7  ;;  %v9477_v44 = vrot.slane %v9475_v33, 4  ;;  %v5704_v27 = vld [vmem:[#allocation2 + $0x140] sm:$0xff]  ;;  %v8066_v10 = vshrl.u32 %v11858_v30, 16  ;;  %v8069_v24 = vshll.u32 %v11858_v30, 16  ;;  %v4098_v54 = vpop.f32.mrf.mxu1  ;;  %v12014_v48 = vld [vmem:[%s13512_s26 + $0x8c] sm:$0xe] }
 0x217   : > { %v16172_v42 = vsel %vm13606_vm6, %v9471_v57, %v9472_v14  ;;  %v16176_v1 = vsel %vm13606_vm6, %v9474_v17, %v9475_v33  ;;  %5834 = vst.msk [vmem:[#allocation2 + $0x150] sm:$0xff] %vm511_vm0, %v5770_v29  ;;  %v5768_v15 = vadd.f32 %v5704_v27, %v5569_v45  ;;  %4346 = vst.msk [vmem:[#allocation2 + $0x160] sm:$0xff] %vm511_vm0, %v4282_v19  ;;  %v8075_v60 = vshll.u32 %v11859_v9, 16  ;;  %v12015_v56 = vld [vmem:[%s13512_s26 + $0x90] sm:$0xf]  ;;  %v4222_v57 = vld [vmem:[#allocation2 + $0x180] sm:$0xff] }
 0x218   : > { %13137 = vmatmul.mubr.msk.bf16.gmra.mxu1 %vm511_vm0, %v16003_v63  ;;  %v4285_v43 = vadd.f32 %v12887_v28, %v4221_v22  ;;  %v12101_v25 = vcombine.low %v16155_v8, %v16172_v42  ;;  %v16187_v62 = vsel %vm13606_vm6, %v9477_v44, %v9478_v20  ;;  %v5707_v63 = vld [vmem:[#allocation2 + $0x158] sm:$0xff]  ;;  %v8068_v35 = vrot.slane %v8066_v10, 4  ;;  %v12890_v49 = vpop.f32.mrf.mxu1  ;;  %v12016_v22 = vld [vmem:[%s13512_s26 + $0x94] sm:$0xf] }
 0x219   : > { %13140 = vmatprep.mubr.msk.bf16.mxu1 %vm511_vm0, %v16062_v37  ;;  %v12102_v41 = vcombine.low %v16176_v1, %v16187_v62  ;;  %v8071_v5 = vrot.slane %v8069_v24, 5  ;;  %5832 = vst.msk [vmem:[#allocation2 + $0x140] sm:$0xff] %vm511_vm0, %v5768_v15  ;;  %v5771_v2 = vadd.f32 %v12955_v12, %v5707_v63  ;;  %v4283_v39 = vadd.f32 %v4219_v34, %v4098_v54  ;;  %v12958_v44 = vpop.f32.mrf.mxu0 }
 0x21a   : > { %4349 = vst.msk [vmem:[#allocation2 + $0x178] sm:$0xff] %vm511_vm0, %v4285_v43  ;;  %v8079_v37 = vshrl.u32 %v11859_v9, 16  ;;  %v8085_v26 = vshll.u32 %v11860_v11, 16  ;;  %v5705_v46 = vld [vmem:[#allocation2 + $0x148] sm:$0xff]  ;;  %v16197_v33 = vrot.slane %v8075_v60, 5  ;;  %v8089_v51 = vshrl.u32 %v11860_v11, 16  ;;  %v4111_v7 = vpop.f32.mrf.mxu1  ;;  %13209 = vmatmul.mubr.msk.bf16.gmra.mxu0 %vm511_vm0, %v12098_v55 }
 0x21b   : > { %v8072_v14 = vor.u32 %v8071_v5, %v8068_v35  ;;  %v8095_v59 = vshll.u32 %v11861_v52, 16  ;;  %5835 = vst.msk [vmem:[#allocation2 + $0x158] sm:$0xff] %vm511_vm0, %v5771_v2  ;;  %v5769_v40 = vadd.f32 %v5705_v46, %v5572_v31  ;;  %4347 = vst.msk [vmem:[#allocation2 + $0x168] sm:$0xff] %vm511_vm0, %v4283_v39  ;;  %v4288_v20 = vadd.f32 %v12890_v49, %v4224_v47  ;;  %v4225_v55 = vld [vmem:[#allocation2 + $0x198] sm:$0xff]  ;;  %v5585_v43 = vpop.f32.mrf.mxu0  ;;  %v4223_v35 = vld [vmem:[#allocation2 + $0x188] sm:$0xff] }
 0x21c   : > { %v8081_v30 = vrot.slane %v8079_v37, 4  ;;  %v8087_v16 = vrot.slane %v8085_v26, 5  ;;  %v5710_v36 = vld [vmem:[#allocation2 + $0x170] sm:$0xff]  ;;  %v8091_v29 = vrot.slane %v8089_v51, 4  ;;  %v8099_v19 = vshrl.u32 %v11861_v52, 16  ;;  %13212 = vmatprep.mubr.msk.bf16.mxu0 %vm511_vm0, %v12099_v32  ;;  %v12891_v38 = vpop.f32.mrf.mxu1 }
 0x21d   : > { %v8073_v17 = vrot.slane %v8072_v14, 4  ;;  %v16203_v45 = vrot.slane %v8095_v59, 5  ;;  %5833 = vst.msk [vmem:[#allocation2 + $0x148] sm:$0xff] %vm511_vm0, %v5769_v40  ;;  %4352 = vst.msk [vmem:[#allocation2 + $0x190] sm:$0xff] %vm511_vm0, %v4288_v20  ;;  %v4286_v9 = vadd.f32 %v4222_v57, %v4111_v7  ;;  %v8105_v28 = vshll.u32 %v11862_v23, 16  ;;  %v12959_v31 = vpop.f32.mrf.mxu0 }
 0x21e   : > { %v8082_v27 = vor.u32 %v8081_v30, %v16197_v33  ;;  %v12074_v11 = vrot.slane %v12014_v48, 9  ;;  %v5774_v10 = vadd.f32 %v12958_v44, %v5710_v36  ;;  %v5708_v50 = vld [vmem:[#allocation2 + $0x160] sm:$0xff]  ;;  %v8092_v15 = vor.u32 %v8091_v29, %v8087_v16  ;;  %v4114_v34 = vpop.f32.mrf.mxu1  ;;  %v12017_v2 = vld [vmem:[%s13512_s26 + $0x98] sm:$0xf]  ;;  %v12018_v26 = vld [vmem:[%s13512_s26 + $0x9c] sm:$0x1] }
 0x21f   : > { %v8078_v24 = vsel %vm13588_vm5, %v8073_v17, %v16197_v33  ;;  %v8101_v12 = vrot.slane %v8099_v19, 4  ;;  %4350 = vst.msk [vmem:[#allocation2 + $0x180] sm:$0xff] %vm511_vm0, %v4286_v9  ;;  %v4289_v18 = vadd.f32 %v12891_v38, %v4225_v55  ;;  %v8107_v32 = vrot.slane %v8105_v28, 5  ;;  %v4228_v33 = vld [vmem:[#allocation2 + $0x1b0] sm:$0xff]  ;;  %v5588_v48 = vpop.f32.mrf.mxu0  ;;  %v11864_v36 = vld [vmem:[%s13512_s26 + $0xa4] sm:$0xf] }
 0x220   : > { %13141 = vmatmul.mubr.msk.bf16.gmra.mxu1 %vm511_vm0, %v16079_v13  ;;  %v8083_v6 = vrot.slane %v8082_v27, 4  ;;  %v9482_v52 = vrot.slane %v12015_v56, 5  ;;  %5838 = vst.msk [vmem:[#allocation2 + $0x170] sm:$0xff] %vm511_vm0, %v5774_v10  ;;  %v5772_v63 = vadd.f32 %v5708_v50, %v5585_v43  ;;  %v8093_v5 = vrot.slane %v8092_v15, 4  ;;  %v12894_v14 = vpop.f32.mrf.mxu1  ;;  %v11863_v56 = vld [vmem:[%s13512_s26 + $0xa0] sm:$0xf] }
 0x221   : > { %13144 = vmatprep.mubr.msk.bf16.mxu1 %vm511_vm0, %v16143_v0  ;;  %v5711_v54 = vld [vmem:[#allocation2 + $0x178] sm:$0xff]  ;;  %v8102_v13 = vor.u32 %v8101_v12, %v16203_v45  ;;  %v9485_v60 = vrot.slane %v12016_v22, 5  ;;  %4353 = vst.msk [vmem:[#allocation2 + $0x198] sm:$0xff] %vm511_vm0, %v4289_v18  ;;  %v4287_v39 = vadd.f32 %v4223_v35, %v4114_v34  ;;  %v4292_v40 = vadd.f32 %v12894_v14, %v4228_v33  ;;  %v4226_v29 = vld [vmem:[#allocation2 + $0x1a0] sm:$0xff]  ;;  %v11865_v44 = vld [vmem:[%s13512_s26 + $0xa8] sm:$0xf] }
 0x222   : > { %v8088_v47 = vsel %vm13588_vm5, %v8083_v6, %v8087_v16  ;;  %v16233_v37 = vsel %vm13606_vm6, %v12074_v11, %v9482_v52  ;;  %v9484_v0 = vrot.slane %v9482_v52, 4  ;;  %5836 = vst.msk [vmem:[#allocation2 + $0x160] sm:$0xff] %vm511_vm0, %v5772_v63  ;;  %v5775_v23 = vadd.f32 %v12959_v31, %v5711_v54  ;;  %v5709_v46 = vld [vmem:[#allocation2 + $0x168] sm:$0xff]  ;;  %v4127_v17 = vpop.f32.mrf.mxu1  ;;  %13213 = vmatmul.mubr.msk.bf16.gmra.mxu0 %vm511_vm0, %v12100_v61  ;;  %v11867_v63 = vld [vmem:[%s13512_s26 + $0xb0] sm:$0x1] }
 0x223   : > { %v11931_v49 = vcombine.low %v8078_v24, %v8088_v47  ;;  %v8098_v51 = vsel %vm13588_vm5, %v8093_v5, %v16203_v45  ;;  %v8103_v59 = vrot.slane %v8102_v13, 4  ;;  %4351 = vst.msk [vmem:[#allocation2 + $0x188] sm:$0xff] %vm511_vm0, %v4287_v39  ;;  %v9487_v30 = vrot.slane %v9485_v60, 4  ;;  %4356 = vst.msk [vmem:[#allocation2 + $0x1b0] sm:$0xff] %vm511_vm0, %v4292_v40  ;;  %13216 = vmatprep.mubr.msk.bf16.mxu0 %vm511_vm0, %v12101_v25  ;;  %v12962_v55 = vpop.f32.mrf.mxu0  ;;  %v11866_v12 = vld [vmem:[%s13512_s26 + $0xac] sm:$0xf] }
 0x224   : > { %v16243_v20 = vsel %vm13606_vm6, %v9484_v0, %v9485_v60  ;;  %v9488_v16 = vrot.slane %v12017_v2, 5  ;;  %5839 = vst.msk [vmem:[#allocation2 + $0x178] sm:$0xff] %vm511_vm0, %v5775_v23  ;;  %v5773_v7 = vadd.f32 %v5709_v46, %v5588_v48  ;;  %v9491_v19 = vrot.slane %v12018_v26, 5  ;;  %v5714_v9 = vld [vmem:[#allocation2 + $0x190] sm:$0xff]  ;;  %v12895_v4 = vpop.f32.mrf.mxu1  ;;  %v4227_v6 = vld [vmem:[#allocation2 + $0x1a8] sm:$0xff] }
 0x225   : > { %v8108_v57 = vsel %vm13588_vm5, %v8103_v59, %v8107_v32  ;;  %v12103_v45 = vcombine.low %v16233_v37, %v16243_v20  ;;  %v4290_v28 = vadd.f32 %v4226_v29, %v4127_v17  ;;  %v8110_v61 = vshrl.u32 %v11863_v56, 16  ;;  %v5601_v54 = vpop.f32.mrf.mxu0  ;;  %v4232_v0 = vld [vmem:[#allocation2 + $0x1d0] sm:$0xff]  ;;  %v4230_v59 = vld [vmem:[#allocation2 + $0x1c0] sm:$0xff] }
 0x226   : > { %v16258_v27 = vcombine.low %v8098_v51, %v8108_v57  ;;  %v16262_v22 = vsel %vm13606_vm6, %v9487_v30, %v9488_v16  ;;  %v9490_v11 = vrot.slane %v9488_v16, 4  ;;  %5837 = vst.msk [vmem:[#allocation2 + $0x168] sm:$0xff] %vm511_vm0, %v5773_v7  ;;  %v8113_v10 = vshll.u32 %v11863_v56, 16  ;;  %v5712_v24 = vld [vmem:[#allocation2 + $0x180] sm:$0xff]  ;;  %v12021_v57 = vld [vmem:[%s13512_s26 + $0xa8] sm:$0xf] }
 0x227   : > { %v8119_v50 = vshll.u32 %v11864_v36, 16  ;;  %v8123_v38 = vshrl.u32 %v11864_v36, 16  ;;  %4354 = vst.msk [vmem:[#allocation2 + $0x1a0] sm:$0xff] %vm511_vm0, %v4290_v28  ;;  %v4293_v15 = vadd.f32 %v12895_v4, %v4229_v21  ;;  %v8129_v42 = vshll.u32 %v11865_v44, 16  ;;  %v12963_v23 = vpop.f32.mrf.mxu0  ;;  %v12019_v48 = vld [vmem:[%s13512_s26 + $0xa0] sm:$0xe] }
 0x228   : > { %13145 = vmatmul.mubr.msk.bf16.gmra.mxu1 %vm511_vm0, %v16163_v58  ;;  %v16274_v8 = vsel %vm13606_vm6, %v9490_v11, %v9491_v19  ;;  %v8133_v25 = vshrl.u32 %v11865_v44, 16  ;;  %v5778_v43 = vadd.f32 %v12962_v55, %v5714_v9  ;;  %v4130_v58 = vpop.f32.mrf.mxu1  ;;  %v8112_v32 = vrot.slane %v8110_v61, 4  ;;  %v5715_v34 = vld [vmem:[#allocation2 + $0x198] sm:$0xff]  ;;  %v12020_v7 = vld [vmem:[%s13512_s26 + $0xa4] sm:$0xf] }
 0x229   : > { %13148 = vmatprep.mubr.msk.bf16.mxu1 %vm511_vm0, %v11931_v49  ;;  %v12104_v18 = vcombine.low %v16262_v22, %v16274_v8  ;;  %v8115_v52 = vrot.slane %v8113_v10, 5  ;;  %4357 = vst.msk [vmem:[#allocation2 + $0x1b8] sm:$0xff] %vm511_vm0, %v4293_v15  ;;  %v4291_v35 = vadd.f32 %v4227_v6, %v4130_v58  ;;  %v8121_v5 = vrot.slane %v8119_v50, 5  ;;  %v5604_v17 = vpop.f32.mrf.mxu0  ;;  %v12022_v28 = vld [vmem:[%s13512_s26 + $0xac] sm:$0xf]  ;;  %v4233_v4 = vld [vmem:[#allocation2 + $0x1d8] sm:$0xff] }
 0x22a   : > { %v8125_v13 = vrot.slane %v8123_v38, 4  ;;  %v8131_v60 = vrot.slane %v8129_v42, 5  ;;  %5842 = vst.msk [vmem:[#allocation2 + $0x190] sm:$0xff] %vm511_vm0, %v5778_v43  ;;  %v5776_v2 = vadd.f32 %v5712_v24, %v5601_v54  ;;  %v8135_v39 = vrot.slane %v8133_v25, 4  ;;  %v12898_v47 = vpop.f32.mrf.mxu1  ;;  %v5713_v46 = vld [vmem:[#allocation2 + $0x188] sm:$0xff]  ;;  %13217 = vmatmul.mubr.msk.bf16.gmra.mxu0 %vm511_vm0, %v12102_v41  ;;  %v5718_v10 = vld [vmem:[#allocation2 + $0x1b0] sm:$0xff] }
 0x22b   : > { %v8116_v31 = vor.u32 %v8115_v52, %v8112_v32  ;;  %v8139_v26 = vshll.u32 %v11866_v12, 16  ;;  %4355 = vst.msk [vmem:[#allocation2 + $0x1a8] sm:$0xff] %vm511_vm0, %v4291_v35  ;;  %v4296_v14 = vadd.f32 %v12898_v47, %v4232_v0  ;;  %v8143_v33 = vshrl.u32 %v11866_v12, 16  ;;  %13220 = vmatprep.mubr.msk.bf16.mxu0 %vm511_vm0, %v12103_v45  ;;  %v12023_v61 = vld [vmem:[%s13512_s26 + $0xb0] sm:$0x1]  ;;  %v4231_v52 = vld [vmem:[#allocation2 + $0x1c8] sm:$0xff] }
 0x22c   : > { %v8126_v49 = vor.u32 %v8125_v13, %v8121_v5  ;;  %v8149_v51 = vshll.u32 %v11867_v63, 16  ;;  %5840 = vst.msk [vmem:[#allocation2 + $0x180] sm:$0xff] %vm511_vm0, %v5776_v2  ;;  %v5779_v40 = vadd.f32 %v12963_v23, %v5715_v34  ;;  %v8136_v16 = vor.u32 %v8135_v39, %v8131_v60  ;;  %v4143_v36 = vpop.f32.mrf.mxu1  ;;  %v12966_v25 = vpop.f32.mrf.mxu0  ;;  %v11870_v47 = vld [vmem:[%s13512_s26 + $0xbc] sm:$0xf] }
 0x22d   : > { %v8117_v30 = vrot.slane %v8116_v31, 4  ;;  %v8141_v56 = vrot.slane %v8139_v26, 5  ;;  %4360 = vst.msk [vmem:[#allocation2 + $0x1d0] sm:$0xff] %vm511_vm0, %v4296_v14  ;;  %v8145_v19 = vrot.slane %v8143_v33, 4  ;;  %v4294_v9 = vadd.f32 %v4230_v59, %v4143_v36 }
 0x22e   : > { %v8127_v29 = vrot.slane %v8126_v49, 4  ;;  %v8151_v44 = vrot.slane %v8149_v51, 5  ;;  %5843 = vst.msk [vmem:[#allocation2 + $0x198] sm:$0xff] %vm511_vm0, %v5779_v40  ;;  %v5777_v11 = vadd.f32 %v5713_v46, %v5604_v17  ;;  %v8137_v62 = vrot.slane %v8136_v16, 4  ;;  %v12899_v41 = vpop.f32.mrf.mxu1  ;;  %v5716_v12 = vld [vmem:[#allocation2 + $0x1a0] sm:$0xff] }
 0x22f   : > { %v8122_v1 = vsel %vm13588_vm5, %v8117_v30, %v8121_v5  ;;  %v12075_v21 = vrot.slane %v12019_v48, 9  ;;  %v8146_v38 = vor.u32 %v8145_v19, %v8141_v56  ;;  %4358 = vst.msk [vmem:[#allocation2 + $0x1c0] sm:$0xff] %vm511_vm0, %v4294_v9  ;;  %v4297_v37 = vadd.f32 %v12899_v41, %v4233_v4  ;;  %v11869_v5 = vld [vmem:[%s13512_s26 + $0xb8] sm:$0xf] }
 0x230   : > { %13149 = vmatmul.mubr.msk.bf16.gmra.mxu1 %vm511_vm0, %v16258_v27  ;;  %v8132_v50 = vsel %vm13588_vm5, %v8127_v29, %v8131_v60  ;;  %v9495_v20 = vrot.slane %v12020_v7, 5  ;;  %5841 = vst.msk [vmem:[#allocation2 + $0x188] sm:$0xff] %vm511_vm0, %v5777_v11  ;;  %v8142_v55 = vsel %vm13588_vm5, %v8137_v62, %v8141_v56  ;;  %v9498_v24 = vrot.slane %v12021_v57, 5  ;;  %v4146_v42 = vpop.f32.mrf.mxu1  ;;  %v11868_v27 = vld [vmem:[%s13512_s26 + $0xb4] sm:$0xf]  ;;  %v5617_v60 = vpop.f32.mrf.mxu0  ;;  %v5719_v31 = vld [vmem:[#allocation2 + $0x1b8] sm:$0xff] }
 0x231   : > { %v11933_v45 = vcombine.low %v8122_v1, %v8132_v50  ;;  %v9501_v15 = vrot.slane %v12022_v28, 5  ;;  %v8147_v43 = vrot.slane %v8146_v38, 4  ;;  %4361 = vst.msk [vmem:[#allocation2 + $0x1d8] sm:$0xff] %vm511_vm0, %v4297_v37  ;;  %v9504_v32 = vrot.slane %v12023_v61, 5  ;;  %v11871_v56 = vld [vmem:[%s13512_s26 + $0xc0] sm:$0xf] }
 0x232   : > { %v9496_v58 = vsel %vm13606_vm6, %v12075_v21, %v9495_v20  ;;  %v9497_v6 = vrot.slane %v9495_v20, 4  ;;  %v5782_v63 = vadd.f32 %v12966_v25, %v5718_v10  ;;  %v9500_v54 = vrot.slane %v9498_v24, 4  ;;  %v12902_v13 = vpop.f32.mrf.mxu1  ;;  %13221 = vmatmul.mubr.msk.bf16.gmra.mxu0 %vm511_vm0, %v12104_v18  ;;  %v12967_v51 = vpop.f32.mrf.mxu0  ;;  %v5717_v59 = vld [vmem:[#allocation2 + $0x1a8] sm:$0xff]  ;;  %v4236_v57 = vld [vmem:[#allocation2 + $0x1f0] sm:$0xff]  ;;  %v11872_v18 = vld [vmem:[%s13512_s26 + $0xc4] sm:$0x1] }
 0x233   : > { %13152 = vmatprep.mubr.msk.bf16.mxu1 %vm511_vm0, %v11933_v45  ;;  %v9503_v34 = vrot.slane %v9501_v15, 4  ;;  %v4295_v35 = vadd.f32 %v4231_v52, %v4146_v42  ;;  %v8152_v2 = vsel %vm13588_vm5, %v8147_v43, %v8151_v44  ;;  %v8154_v0 = vshrl.u32 %v11868_v27, 16  ;;  %v12024_v11 = vld [vmem:[%s13512_s26 + $0xb4] sm:$0xe]  ;;  %v4234_v21 = vld [vmem:[#allocation2 + $0x1e0] sm:$0xff]  ;;  %v4237_v45 = vld [vmem:[#allocation2 + $0x1f8] sm:$0xff] }
 0x234   : > { %v9499_v39 = vsel %vm13606_vm6, %v9497_v6, %v9498_v24  ;;  %v8157_v26 = vshll.u32 %v11868_v27, 16  ;;  %5846 = vst.msk [vmem:[#allocation2 + $0x1b0] sm:$0xff] %vm511_vm0, %v5782_v63  ;;  %v5780_v23 = vadd.f32 %v5716_v12, %v5617_v60  ;;  %v11934_v46 = vcombine.low %v8142_v55, %v8152_v2  ;;  %v4159_v33 = vpop.f32.mrf.mxu1  ;;  %v5620_v17 = vpop.f32.mrf.mxu0  ;;  %v12025_v61 = vld [vmem:[%s13512_s26 + $0xb8] sm:$0xf]  ;;  %v5722_v10 = vld [vmem:[#allocation2 + $0x1d0] sm:$0xff] }
 0x235   : > { %v12105_v49 = vcombine.low %v9496_v58, %v9499_v39  ;;  %v9502_v14 = vsel %vm13606_vm6, %v9500_v54, %v9501_v15  ;;  %4359 = vst.msk [vmem:[#allocation2 + $0x1c8] sm:$0xff] %vm511_vm0, %v4295_v35  ;;  %v9505_v48 = vsel %vm13606_vm6, %v9503_v34, %v9504_v32  ;;  %v8156_v40 = vrot.slane %v8154_v0, 4  ;;  %v12026_v27 = vld [vmem:[%s13512_s26 + $0xbc] sm:$0xf]  ;;  %v12027_v25 = vld [vmem:[%s13512_s26 + $0xc0] sm:$0xf] }
 0x236   : > { %v8159_v30 = vrot.slane %v8157_v26, 5  ;;  %v8163_v16 = vshll.u32 %v11869_v5, 16  ;;  %5844 = vst.msk [vmem:[#allocation2 + $0x1a0] sm:$0xff] %vm511_vm0, %v5780_v23  ;;  %v5783_v36 = vadd.f32 %v12967_v51, %v5719_v31  ;;  %v12106_v7 = vcombine.low %v9502_v14, %v9505_v48  ;;  %v12903_v28 = vpop.f32.mrf.mxu1  ;;  %v12970_v12 = vpop.f32.mrf.mxu0  ;;  %v5720_v43 = vld [vmem:[#allocation2 + $0x1c0] sm:$0xff] }
 0x237   : > { %13224 = vmatprep.mubr.msk.bf16.mxu0 %vm511_vm0, %v12105_v49  ;;  %v8167_v22 = vshrl.u32 %v11869_v5, 16  ;;  %v8173_v8 = vshll.u32 %v11870_v47, 16  ;;  %v8177_v44 = vshrl.u32 %v11870_v47, 16  ;;  %v4300_v9 = vadd.f32 %v12902_v13, %v4236_v57  ;;  %v12028_v39 = vld [vmem:[%s13512_s26 + $0xc4] sm:$0x1] }
 0x238   : > { %13153 = vmatmul.mubr.msk.bf16.gmra.mxu1 %vm511_vm0, %v11934_v46  ;;  %v8160_v29 = vor.u32 %v8159_v30, %v8156_v40  ;;  %v8165_v19 = vrot.slane %v8163_v16, 5  ;;  %5847 = vst.msk [vmem:[#allocation2 + $0x1b8] sm:$0xff] %vm511_vm0, %v5783_v36  ;;  %v5781_v1 = vadd.f32 %v5717_v59, %v5620_v17  ;;  %v8183_v4 = vshll.u32 %v11871_v56, 16  ;;  %v5633_v5 = vpop.f32.mrf.mxu0  ;;  %v5723_v2 = vld [vmem:[#allocation2 + $0x1d8] sm:$0xff]  ;;  %v4162_v49 = vpop.f32.mrf.mxu1  ;;  %v11873_v30 = vld [vmem:[%s13512_s26 + $0xc8] sm:$0xf] }
 0x239   : > { %v8169_v62 = vrot.slane %v8167_v22, 4  ;;  %v8175_v41 = vrot.slane %v8173_v8, 5  ;;  %v8179_v38 = vrot.slane %v8177_v44, 4  ;;  %4364 = vst.msk [vmem:[#allocation2 + $0x1f0] sm:$0xff] %vm511_vm0, %v4300_v9  ;;  %v8187_v37 = vshrl.u32 %v11871_v56, 16  ;;  %v4235_v22 = vld [vmem:[#allocation2 + $0x1e8] sm:$0xff] }
 0x23a   : > { %v8161_v50 = vrot.slane %v8160_v29, 4  ;;  %v8193_v20 = vshll.u32 %v11872_v18, 16  ;;  %5845 = vst.msk [vmem:[#allocation2 + $0x1a8] sm:$0xff] %vm511_vm0, %v5781_v1  ;;  %v8185_v24 = vrot.slane %v8183_v4, 5  ;;  %v4298_v15 = vadd.f32 %v4234_v21, %v4159_v33  ;;  %13225 = vmatmul.mubr.msk.bf16.gmra.mxu0 %vm511_vm0, %v12106_v7  ;;  %v12971_v59 = vpop.f32.mrf.mxu0  ;;  %v11874_v8 = vld [vmem:[%s13512_s26 + $0xcc] sm:$0xf] }
 0x23b   : > { %v8170_v55 = vor.u32 %v8169_v62, %v8165_v19  ;;  %v4301_v42 = vadd.f32 %v12903_v28, %v4237_v45  ;;  %v8180_v6 = vor.u32 %v8179_v38, %v8175_v41  ;;  %v8189_v32 = vrot.slane %v8187_v37, 4  ;;  %v11875_v44 = vld [vmem:[%s13512_s26 + $0xd0] sm:$0xf]  ;;  %v11876_v9 = vld [vmem:[%s13512_s26 + $0xd4] sm:$0xf] }
 0x23c   : > { %v8166_v58 = vsel %vm13588_vm5, %v8161_v50, %v8165_v19  ;;  %v8195_v52 = vrot.slane %v8193_v20, 5  ;;  %v5786_v63 = vadd.f32 %v12970_v12, %v5722_v10  ;;  %4362 = vst.msk [vmem:[#allocation2 + $0x1e0] sm:$0xff] %vm511_vm0, %v4298_v15  ;;  %v12076_v34 = vrot.slane %v12024_v11, 9  ;;  %v5721_v48 = vld [vmem:[#allocation2 + $0x1c8] sm:$0xff]  ;;  %v5636_v18 = vpop.f32.mrf.mxu0  ;;  %v11877_v50 = vld [vmem:[%s13512_s26 + $0xd8] sm:$0x1] }
 0x23d   : > { %v8171_v54 = vrot.slane %v8170_v55, 4  ;;  %4365 = vst.msk [vmem:[#allocation2 + $0x1f8] sm:$0xff] %vm511_vm0, %v4301_v42  ;;  %v9508_v35 = vrot.slane %v12025_v61, 5  ;;  %v8181_v13 = vrot.slane %v8180_v6, 4  ;;  %v8190_v60 = vor.u32 %v8189_v32, %v8185_v24  ;;  %v12029_v55 = vld [vmem:[%s13512_s26 + $0xc8] sm:$0xe] }
 0x23e   : > { %v9511_v31 = vrot.slane %v12026_v27, 5  ;;  %v9514_v47 = vrot.slane %v12027_v25, 5  ;;  %5850 = vst.msk [vmem:[#allocation2 + $0x1d0] sm:$0xff] %vm511_vm0, %v5786_v63  ;;  %v5784_v0 = vadd.f32 %v5720_v43, %v5633_v5  ;;  %v5787_v16 = vadd.f32 %v12971_v59, %v5723_v2  ;;  %v12030_v2 = vld [vmem:[%s13512_s26 + $0xcc] sm:$0xf]  ;;  %v6738_v59 = vld [vmem:[#allocation2] sm:$0xff] }
 0x23f   : > { %v8176_v26 = vsel %vm13588_vm5, %v8171_v54, %v8175_v41  ;;  %v9509_v23 = vsel %vm13606_vm6, %v12076_v34, %v9508_v35  ;;  %v9510_v46 = vrot.slane %v9508_v35, 4  ;;  %v8186_v33 = vsel %vm13588_vm5, %v8181_v13, %v8185_v24  ;;  %v6740_v35 = vld [vmem:[#allocation2 + $0x10] sm:$0xff] }
 0x240   : > { %v11935_v14 = vcombine.low %v8166_v58, %v8176_v26  ;;  %v8191_v51 = vrot.slane %v8190_v60, 4  ;;  %v9513_v40 = vrot.slane %v9511_v31, 4  ;;  %5848 = vst.msk [vmem:[#allocation2 + $0x1c0] sm:$0xff] %vm511_vm0, %v5784_v0  ;;  %v9516_v36 = vrot.slane %v9514_v47, 4  ;;  %5851 = vst.msk [vmem:[#allocation2 + $0x1d8] sm:$0xff] %vm511_vm0, %v5787_v16  ;;  %v5726_v41 = vld [vmem:[#allocation2 + $0x1f0] sm:$0xff] }
 0x241   : > { %v9512_v56 = vsel %vm13606_vm6, %v9510_v46, %v9511_v31  ;;  %v9517_v7 = vrot.slane %v12028_v39, 5  ;;  %v4299_v19 = vadd.f32 %v4235_v22, %v4162_v49  ;;  %v5785_v11 = vadd.f32 %v5721_v48, %v5636_v18  ;;  %v12974_v24 = vpop.f32.mrf.mxu0  ;;  %v12031_v0 = vld [vmem:[%s13512_s26 + $0xd0] sm:$0xf] }
 0x242   : > { %13156 = vmatprep.mubr.msk.bf16.mxu1 %vm511_vm0, %v11935_v14  ;;  %v8196_v57 = vsel %vm13588_vm5, %v8191_v51, %v8195_v52  ;;  %v12107_v17 = vcombine.low %v9509_v23, %v9512_v56  ;;  %v9515_v29 = vsel %vm13606_vm6, %v9513_v40, %v9514_v47  ;;  %v8198_v62 = vshrl.u32 %v11873_v30, 16  ;;  %v12986_v34 = vpop.f32.mrf.mxu1  ;;  %v6741_v56 = vld [vmem:[#allocation2 + $0x18] sm:$0xff] }
 0x243   : > { %v11936_v28 = vcombine.low %v8186_v33, %v8196_v57  ;;  %v9518_v1 = vsel %vm13606_vm6, %v9516_v36, %v9517_v7  ;;  %4363 = vst.msk [vmem:[#allocation2 + $0x1e8] sm:$0xff] %vm511_vm0, %v4299_v19  ;;  %v8201_v21 = vshll.u32 %v11873_v30, 16  ;;  %v8207_v61 = vshll.u32 %v11874_v8, 16  ;;  %5849 = vst.msk [vmem:[#allocation2 + $0x1c8] sm:$0xff] %vm511_vm0, %v5785_v11  ;;  %v5724_v15 = vld [vmem:[#allocation2 + $0x1e0] sm:$0xff]  ;;  %v5649_v52 = vpop.f32.mrf.mxu0 }
 0x244   : > { %13228 = vmatprep.mubr.msk.bf16.mxu0 %vm511_vm0, %v12107_v17  ;;  %v12108_v4 = vcombine.low %v9515_v29, %v9518_v1  ;;  %v8211_v10 = vshrl.u32 %v11874_v8, 16  ;;  %v8200_v38 = vrot.slane %v8198_v62, 4  ;;  %v8217_v37 = vshll.u32 %v11875_v44, 16  ;;  %v5727_v60 = vld [vmem:[#allocation2 + $0x1f8] sm:$0xff]  ;;  %v6483_v51 = vpop.f32.mrf.mxu1  ;;  %v12032_v29 = vld [vmem:[%s13512_s26 + $0xd4] sm:$0xf] }
 0x245   : > { %13157 = vmatmul.mubr.msk.bf16.gmra.mxu1 %vm511_vm0, %v11936_v28  ;;  %v8221_v20 = vshrl.u32 %v11875_v44, 16  ;;  %v8227_v45 = vshll.u32 %v11876_v9, 16  ;;  %v8203_v42 = vrot.slane %v8201_v21, 5  ;;  %v8209_v27 = vrot.slane %v8207_v61, 5  ;;  %v12975_v33 = vpop.f32.mrf.mxu0  ;;  %v12033_v19 = vld [vmem:[%s13512_s26 + $0xd8] sm:$0x1] }
 0x246   : > { %13229 = vmatmul.mubr.msk.bf16.gmra.mxu0 %vm511_vm0, %v12108_v4  ;;  %v8213_v25 = vrot.slane %v8211_v10, 4  ;;  %v8231_v12 = vshrl.u32 %v11876_v9, 16  ;;  %v5790_v43 = vadd.f32 %v12974_v24, %v5726_v41  ;;  %v8219_v58 = vrot.slane %v8217_v37, 5  ;;  %v12987_v18 = vpop.f32.mrf.mxu1  ;;  %v11878_v1 = vld [vmem:[%s13512_s26 + $0xdc] sm:$0xf] }
 0x247   : > { %v8223_v6 = vrot.slane %v8221_v20, 4  ;;  %v8229_v32 = vrot.slane %v8227_v45, 5  ;;  %v8204_v63 = vor.u32 %v8203_v42, %v8200_v38  ;;  %v8237_v13 = vshll.u32 %v11877_v50, 16  ;;  %v5652_v57 = vpop.f32.mrf.mxu0  ;;  %v11879_v62 = vld [vmem:[%s13512_s26 + $0xe0] sm:$0xf]  ;;  %v6739_v38 = vld [vmem:[#allocation2 + $0x8] sm:$0xff] }
 0x248   : > { %v8214_v54 = vor.u32 %v8213_v25, %v8209_v27  ;;  %v8233_v5 = vrot.slane %v8231_v12, 4  ;;  %5854 = vst.msk [vmem:[#allocation2 + $0x1f0] sm:$0xff] %vm511_vm0, %v5790_v43  ;;  %v5788_v31 = vadd.f32 %v5724_v15, %v5649_v52  ;;  %v6804_v47 = vadd.f32 %v12986_v34, %v6740_v35  ;;  %v6486_v50 = vpop.f32.mrf.mxu1  ;;  %v11880_v24 = vld [vmem:[%s13512_s26 + $0xe4] sm:$0xf] }
 0x249   : > { %v8224_v39 = vor.u32 %v8223_v6, %v8219_v58  ;;  %v12077_v26 = vrot.slane %v12029_v55, 9  ;;  %v8205_v23 = vrot.slane %v8204_v63, 4  ;;  %v8239_v14 = vrot.slane %v8237_v13, 5  ;;  %v13058_v10 = vpop.f32.mrf.mxu0  ;;  %v11881_v63 = vld [vmem:[%s13512_s26 + $0xe8] sm:$0xf] }
 0x24a   : > { %v8215_v46 = vrot.slane %v8214_v54, 4  ;;  %v8234_v49 = vor.u32 %v8233_v5, %v8229_v32  ;;  %5852 = vst.msk [vmem:[#allocation2 + $0x1e0] sm:$0xff] %vm511_vm0, %v5788_v31  ;;  %6868 = vst.msk [vmem:[#allocation2 + $0x10] sm:$0xff] %vm511_vm0, %v6804_v47  ;;  %v5791_v40 = vadd.f32 %v12975_v33, %v5727_v60  ;;  %v6802_v30 = vadd.f32 %v6738_v59, %v6483_v51  ;;  %v5725_v16 = vld [vmem:[#allocation2 + $0x1e8] sm:$0xff]  ;;  %v12990_v43 = vpop.f32.mrf.mxu1 }
 0x24b   : > { %v8225_v48 = vrot.slane %v8224_v39, 4  ;;  %v9521_v36 = vrot.slane %v12030_v2, 5  ;;  %v8210_v7 = vsel %vm13588_vm5, %v8205_v23, %v8209_v27  ;;  %v9524_v17 = vrot.slane %v12031_v0, 5  ;;  %v7318_v42 = vpop.f32.mrf.mxu0  ;;  %v11882_v23 = vld [vmem:[%s13512_s26 + $0xec] sm:$0x1] }
 0x24c   : > { %v8220_v22 = vsel %vm13588_vm5, %v8215_v46, %v8219_v58  ;;  %v8235_v8 = vrot.slane %v8234_v49, 4  ;;  %5855 = vst.msk [vmem:[#allocation2 + $0x1f8] sm:$0xff] %vm511_vm0, %v5791_v40  ;;  %6866 = vst.msk [vmem:[#allocation2] sm:$0xff] %vm511_vm0, %v6802_v30  ;;  %v5789_v28 = vadd.f32 %v5725_v16, %v5652_v57  ;;  %v6805_v11 = vadd.f32 %v12987_v18, %v6741_v56  ;;  %v6499_v2 = vpop.f32.mrf.mxu1 }
 0x24d   : > { %v11937_v44 = vcombine.low %v8210_v7, %v8220_v22  ;;  %v8230_v9 = vsel %vm13588_vm5, %v8225_v48, %v8229_v32  ;;  %v9522_v4 = vsel %vm13606_vm6, %v12077_v26, %v9521_v36  ;;  %v9523_v21 = vrot.slane %v9521_v36, 4  ;;  %v13059_v60 = vpop.f32.mrf.mxu0  ;;  %v6744_v26 = vld [vmem:[#allocation2 + $0x30] sm:$0xff]  ;;  %v6742_v36 = vld [vmem:[#allocation2 + $0x20] sm:$0xff]  ;;  %v6745_v7 = vld [vmem:[#allocation2 + $0x38] sm:$0xff] }
 0x24e   : > { %v8240_v41 = vsel %vm13588_vm5, %v8235_v8, %v8239_v14  ;;  %v9526_v61 = vrot.slane %v9524_v17, 4  ;;  %5853 = vst.msk [vmem:[#allocation2 + $0x1e8] sm:$0xff] %vm511_vm0, %v5789_v28  ;;  %6869 = vst.msk [vmem:[#allocation2 + $0x18] sm:$0xff] %vm511_vm0, %v6805_v11  ;;  %v9527_v20 = vrot.slane %v12032_v29, 5  ;;  %v9530_v45 = vrot.slane %v12033_v19, 5  ;;  %v12991_v48 = vpop.f32.mrf.mxu1 }
 0x24f   : > { %13160 = vmatprep.mubr.msk.bf16.mxu1 %vm511_vm0, %v11937_v44  ;;  %v11938_v37 = vcombine.low %v8230_v9, %v8240_v41  ;;  %v6803_v55 = vadd.f32 %v6739_v38, %v6486_v50  ;;  %v9525_v15 = vsel %vm13606_vm6, %v9523_v21, %v9524_v17  ;;  %v8242_v27 = vshrl.u32 %v11878_v1, 16  ;;  %v7321_v59 = vpop.f32.mrf.mxu0  ;;  %v12034_v22 = vld [vmem:[%s13512_s26 + $0xdc] sm:$0xe]  ;;  %v12035_v19 = vld [vmem:[%s13512_s26 + $0xe0] sm:$0xf] }
 0x250   : > { %v8245_v25 = vshll.u32 %v11878_v1, 16  ;;  %v8251_v12 = vshll.u32 %v11879_v62, 16  ;;  %v12109_v58 = vcombine.low %v9522_v4, %v9525_v15  ;;  %v9528_v6 = vsel %vm13606_vm6, %v9526_v61, %v9527_v20  ;;  %v6502_v9 = vpop.f32.mrf.mxu1  ;;  %v12036_v41 = vld [vmem:[%s13512_s26 + $0xe4] sm:$0xf]  ;;  %v12037_v4 = vld [vmem:[%s13512_s26 + $0xe8] sm:$0xf] }
 0x251   : > { %13161 = vmatmul.mubr.msk.bf16.gmra.mxu1 %vm511_vm0, %v11938_v37  ;;  %v9529_v32 = vrot.slane %v9527_v20, 4  ;;  %6867 = vst.msk [vmem:[#allocation2 + $0x8] sm:$0xff] %vm511_vm0, %v6803_v55  ;;  %v8255_v52 = vshrl.u32 %v11879_v62, 16  ;;  %v7575_v54 = vld [vmem:[#allocation2 + $0x10] sm:$0xff]  ;;  %v8244_v34 = vrot.slane %v8242_v27, 4  ;;  %v8261_v13 = vshll.u32 %v11880_v24, 16  ;;  %v13062_v44 = vpop.f32.mrf.mxu0 }
 0x252   : > { %v8247_v35 = vrot.slane %v8245_v25, 5  ;;  %v8253_v5 = vrot.slane %v8251_v12, 5  ;;  %13232 = vmatprep.mubr.msk.bf16.mxu0 %vm511_vm0, %v12109_v58  ;;  %v7639_v31 = vadd.f32 %v13058_v10, %v7575_v54  ;;  %v8265_v0 = vshrl.u32 %v11880_v24, 16  ;;  %v12038_v37 = vld [vmem:[%s13512_s26 + $0xec] sm:$0x1] }
 0x253   : > { %v9531_v39 = vsel %vm13606_vm6, %v9529_v32, %v9530_v45  ;;  %v8257_v47 = vrot.slane %v8255_v52, 4  ;;  %v7573_v49 = vld [vmem:[#allocation2] sm:$0xff]  ;;  %v8263_v33 = vrot.slane %v8261_v13, 5  ;;  %v6808_v51 = vadd.f32 %v12990_v43, %v6744_v26  ;;  %v7334_v20 = vpop.f32.mrf.mxu0  ;;  %v6743_v27 = vld [vmem:[#allocation2 + $0x28] sm:$0xff]  ;;  %v11884_v32 = vld [vmem:[%s13512_s26 + $0xf4] sm:$0xf] }
 0x254   : > { %v12110_v46 = vcombine.low %v9528_v6, %v9531_v39  ;;  %v8248_v14 = vor.u32 %v8247_v35, %v8244_v34  ;;  %7703 = vst.msk [vmem:[#allocation2 + $0x10] sm:$0xff] %vm511_vm0, %v7639_v31  ;;  %v7637_v40 = vadd.f32 %v7573_v49, %v7318_v42  ;;  %v8267_v16 = vrot.slane %v8265_v0, 4  ;;  %v12994_v45 = vpop.f32.mrf.mxu1  ;;  %v11883_v6 = vld [vmem:[%s13512_s26 + $0xf0] sm:$0xf] }
 0x255   : > { %v8258_v30 = vor.u32 %v8257_v47, %v8253_v5  ;;  %v8271_v56 = vshll.u32 %v11881_v63, 16  ;;  %6872 = vst.msk [vmem:[#allocation2 + $0x30] sm:$0xff] %vm511_vm0, %v6808_v51  ;;  %v8275_v57 = vshrl.u32 %v11881_v63, 16  ;;  %v8281_v18 = vshll.u32 %v11882_v23, 16  ;;  %v7576_v17 = vld [vmem:[#allocation2 + $0x18] sm:$0xff]  ;;  %v16432_v52 = vpop.f32.mrf.mxu0 }
 0x256   : > { %13233 = vmatmul.mubr.msk.bf16.gmra.mxu0 %vm511_vm0, %v12110_v46  ;;  %v8249_v8 = vrot.slane %v8248_v14, 4  ;;  %v6806_v29 = vadd.f32 %v6742_v36, %v6499_v2  ;;  %7701 = vst.msk [vmem:[#allocation2] sm:$0xff] %vm511_vm0, %v7637_v40  ;;  %v8268_v11 = vor.u32 %v8267_v16, %v8263_v33  ;;  %v7640_v62 = vadd.f32 %v13059_v60, %v7576_v17  ;;  %v16434_v63 = vpop.f32.mrf.mxu1 }
 0x257   : > { %v8259_v28 = vrot.slane %v8258_v30, 4  ;;  %v8273_v1 = vrot.slane %v8271_v56, 5  ;;  %v8277_v61 = vrot.slane %v8275_v57, 4  ;;  %v8283_v10 = vrot.slane %v8281_v18, 5  ;;  %v16442_v39 = vpop.f32.mrf.mxu0  ;;  %v11887_v57 = vld [vmem:[%s13512_s26 + $0x100] sm:$0x1] }
 0x258   : > { %v8254_v21 = vsel %vm13588_vm5, %v8249_v8, %v8253_v5  ;;  %6870 = vst.msk [vmem:[#allocation2 + $0x20] sm:$0xff] %vm511_vm0, %v6806_v29  ;;  %v7574_v50 = vld [vmem:[#allocation2 + $0x8] sm:$0xff]  ;;  %v6809_v38 = vadd.f32 %v12991_v48, %v6745_v7  ;;  %v8269_v24 = vrot.slane %v8268_v11, 4  ;;  %7704 = vst.msk [vmem:[#allocation2 + $0x18] sm:$0xff] %vm511_vm0, %v7640_v62  ;;  %v12078_v42 = vrot.slane %v12034_v22, 9  ;;  %v16444_v47 = vpop.f32.mrf.mxu1 }
 0x259   : > { %v8264_v55 = vsel %vm13588_vm5, %v8259_v28, %v8263_v33  ;;  %v7638_v15 = vadd.f32 %v7574_v50, %v7321_v59  ;;  %v8278_v12 = vor.u32 %v8277_v61, %v8273_v1  ;;  %v9534_v43 = vrot.slane %v12035_v19, 5  ;;  %v11885_v48 = vld [vmem:[%s13512_s26 + $0xf8] sm:$0xf]  ;;  %v16454_v40 = vpop.f32.mrf.mxu0  ;;  %v11886_v8 = vld [vmem:[%s13512_s26 + $0xfc] sm:$0xf] }
 0x25a   : > { %v11939_v25 = vcombine.low %v8254_v21, %v8264_v55  ;;  %6873 = vst.msk [vmem:[#allocation2 + $0x38] sm:$0xff] %vm511_vm0, %v6809_v38  ;;  %v9537_v58 = vrot.slane %v12036_v41, 5  ;;  %v8274_v54 = vsel %vm13588_vm5, %v8269_v24, %v8273_v1  ;;  %v9540_v34 = vrot.slane %v12037_v4, 5  ;;  %v16456_v30 = vpop.f32.mrf.mxu1  ;;  %v12039_v21 = vld [vmem:[%s13512_s26 + $0xf0] sm:$0xe] }
 0x25b   : > { %7702 = vst.msk [vmem:[#allocation2 + $0x8] sm:$0xff] %vm511_vm0, %v7638_v15  ;;  %v9543_v35 = vrot.slane %v12038_v37, 5  ;;  %v6807_v5 = vadd.f32 %v6743_v27, %v6502_v9  ;;  %v8279_v13 = vrot.slane %v8278_v12, 4  ;;  %v9535_v60 = vsel %vm13606_vm6, %v12078_v42, %v9534_v43  ;;  %v16465_v9 = vpop.f32.mrf.mxu0  ;;  %v12040_v37 = vld [vmem:[%s13512_s26 + $0xf4] sm:$0xf] }
 0x25c   : > { %13164 = vmatprep.mubr.msk.bf16.mxu1 %vm511_vm0, %v11939_v25  ;;  %v9536_v2 = vrot.slane %v9534_v43, 4  ;;  %v9539_v31 = vrot.slane %v9537_v58, 4  ;;  %v7579_v0 = vld [vmem:[#allocation2 + $0x30] sm:$0xff]  ;;  %v9542_v26 = vrot.slane %v9540_v34, 4  ;;  %v8286_v23 = vshrl.u32 %v11883_v6, 16  ;;  %v16467_v28 = vpop.f32.mrf.mxu1 }
 0x25d   : > { %6871 = vst.msk [vmem:[#allocation2 + $0x28] sm:$0xff] %vm511_vm0, %v6807_v5  ;;  %v8289_v46 = vshll.u32 %v11883_v6, 16  ;;  %v8295_v49 = vshll.u32 %v11884_v32, 16  ;;  %v8284_v14 = vsel %vm13588_vm5, %v8279_v13, %v8283_v10  ;;  %v7643_v51 = vadd.f32 %v13062_v44, %v7579_v0  ;;  %v6748_v44 = vld [vmem:[#allocation2 + $0x50] sm:$0xff]  ;;  %v12041_v27 = vld [vmem:[%s13512_s26 + $0xf8] sm:$0xf] }
 0x25e   : > { %v9538_v33 = vsel %vm13606_vm6, %v9536_v2, %v9537_v58  ;;  %v9541_v59 = vsel %vm13606_vm6, %v9539_v31, %v9540_v34  ;;  %v11940_v16 = vcombine.low %v8274_v54, %v8284_v14  ;;  %v9544_v36 = vsel %vm13606_vm6, %v9542_v26, %v9543_v35  ;;  %v16477_v55 = vpop.f32.mrf.mxu1  ;;  %v6746_v6 = vld [vmem:[#allocation2 + $0x40] sm:$0xff]  ;;  %v12042_v2 = vld [vmem:[%s13512_s26 + $0xfc] sm:$0xf] }
 0x25f   : > { %v12111_v56 = vcombine.low %v9535_v60, %v9538_v33  ;;  %v7577_v7 = vld [vmem:[#allocation2 + $0x20] sm:$0xff]  ;;  %v8288_v22 = vrot.slane %v8286_v23, 4  ;;  %7707 = vst.msk [vmem:[#allocation2 + $0x30] sm:$0xff] %vm511_vm0, %v7643_v51  ;;  %v12112_v18 = vcombine.low %v9541_v59, %v9544_v36  ;;  %v8291_v29 = vrot.slane %v8289_v46, 5  ;;  %v6749_v60 = vld [vmem:[#allocation2 + $0x58] sm:$0xff]  ;;  %v6747_v59 = vld [vmem:[#allocation2 + $0x48] sm:$0xff] }
 0x260   : > { %v7641_v17 = vadd.f32 %v7577_v7, %v7334_v20  ;;  %v16463_v19 = vrot.slane %v8295_v49, 5  ;;  %13165 = vmatmul.mubr.msk.bf16.gmra.mxu1 %vm511_vm0, %v11940_v16  ;;  %v8299_v11 = vshrl.u32 %v11884_v32, 16  ;;  %v8305_v1 = vshll.u32 %v11885_v48, 16  ;;  %v16475_v20 = vpop.f32.mrf.mxu0  ;;  %v16484_v34 = vpop.f32.mrf.mxu1  ;;  %v12043_v31 = vld [vmem:[%s13512_s26 + $0x100] sm:$0x1] }
 0x261   : > { %13236 = vmatprep.mubr.msk.bf16.mxu0 %vm511_vm0, %v12111_v56  ;;  %v8309_v62 = vshrl.u32 %v11885_v48, 16  ;;  %v6812_v41 = vadd.f32 %v12994_v45, %v6748_v44  ;;  %v7580_v4 = vld [vmem:[#allocation2 + $0x38] sm:$0xff]  ;;  %v8292_v61 = vor.u32 %v8291_v29, %v8288_v22  ;;  %v8315_v10 = vshll.u32 %v11886_v8, 16  ;;  %v11888_v36 = vld [vmem:[%s13512_s26 + $0x104] sm:$0xf] }
 0x262   : > { %13237 = vmatmul.mubr.msk.bf16.gmra.mxu0 %vm511_vm0, %v12112_v18  ;;  %7705 = vst.msk [vmem:[#allocation2 + $0x20] sm:$0xff] %vm511_vm0, %v7641_v17  ;;  %v8319_v50 = vshrl.u32 %v11886_v8, 16  ;;  %v8325_v38 = vshll.u32 %v11887_v57, 16  ;;  %v8301_v24 = vrot.slane %v8299_v11, 4  ;;  %v8307_v15 = vrot.slane %v8305_v1, 5  ;;  %v16482_v54 = vpop.f32.mrf.mxu0  ;;  %v16498_v14 = vpop.f32.mrf.mxu1 }
 0x263   : > { %v8311_v42 = vrot.slane %v8309_v62, 4  ;;  %6876 = vst.msk [vmem:[#allocation2 + $0x50] sm:$0xff] %vm511_vm0, %v6812_v41  ;;  %v7644_v45 = vadd.f32 %v16432_v52, %v7580_v4  ;;  %v8293_v25 = vrot.slane %v8292_v61, 4  ;;  %v8317_v12 = vrot.slane %v8315_v10, 5  ;;  %v11889_v1 = vld [vmem:[%s13512_s26 + $0x108] sm:$0xf] }
 0x264   : > { %v8321_v43 = vrot.slane %v8319_v50, 4  ;;  %v8327_v58 = vrot.slane %v8325_v38, 5  ;;  %v7578_v32 = vld [vmem:[#allocation2 + $0x28] sm:$0xff]  ;;  %v8302_v35 = vor.u32 %v8301_v24, %v16463_v19  ;;  %v6810_v52 = vadd.f32 %v6746_v6, %v16434_v63  ;;  %v16496_v49 = vpop.f32.mrf.mxu0  ;;  %v16507_v22 = vpop.f32.mrf.mxu1 }
 0x265   : > { %v8312_v5 = vor.u32 %v8311_v42, %v8307_v15  ;;  %7708 = vst.msk [vmem:[#allocation2 + $0x38] sm:$0xff] %vm511_vm0, %v7644_v45  ;;  %v7642_v13 = vadd.f32 %v7578_v32, %v16442_v39  ;;  %v8298_v0 = vsel %vm13588_vm5, %v8293_v25, %v16463_v19  ;;  %v6813_v23 = vadd.f32 %v16444_v47, %v6749_v60  ;;  %v11890_v10 = vld [vmem:[%s13512_s26 + $0x10c] sm:$0xf]  ;;  %v11891_v42 = vld [vmem:[%s13512_s26 + $0x110] sm:$0xf] }
 0x266   : > { %v8322_v26 = vor.u32 %v8321_v43, %v8317_v12  ;;  %v12079_v46 = vrot.slane %v12039_v21, 9  ;;  %v8303_v33 = vrot.slane %v8302_v35, 4  ;;  %6874 = vst.msk [vmem:[#allocation2 + $0x40] sm:$0xff] %vm511_vm0, %v6810_v52  ;;  %v9547_v39 = vrot.slane %v12040_v37, 5  ;;  %v16505_v7 = vpop.f32.mrf.mxu0  ;;  %v16521_v41 = vpop.f32.mrf.mxu1 }
 0x267   : > { %v8313_v63 = vrot.slane %v8312_v5, 4  ;;  %7706 = vst.msk [vmem:[#allocation2 + $0x28] sm:$0xff] %vm511_vm0, %v7642_v13  ;;  %v9550_v51 = vrot.slane %v12041_v27, 5  ;;  %6877 = vst.msk [vmem:[#allocation2 + $0x58] sm:$0xff] %vm511_vm0, %v6813_v23  ;;  %v9553_v16 = vrot.slane %v12042_v2, 5  ;;  %v9556_v47 = vrot.slane %v12043_v31, 5 }
 0x268   : > { %v8323_v48 = vrot.slane %v8322_v26, 4  ;;  %v6811_v56 = vadd.f32 %v6747_v59, %v16456_v30  ;;  %v8308_v8 = vsel %vm13588_vm5, %v8303_v33, %v8307_v15  ;;  %v9548_v18 = vsel %vm13606_vm6, %v12079_v46, %v9547_v39  ;;  %v16519_v62 = vpop.f32.mrf.mxu0  ;;  %v16535_v27 = vpop.f32.mrf.mxu1  ;;  %v11892_v13 = vld [vmem:[%s13512_s26 + $0x114] sm:$0x1]  ;;  %v12045_v59 = vld [vmem:[%s13512_s26 + $0x108] sm:$0xf] }
 0x269   : > { %v8318_v57 = vsel %vm13588_vm5, %v8313_v63, %v8317_v12  ;;  %v9549_v17 = vrot.slane %v9547_v39, 4  ;;  %v11941_v29 = vcombine.low %v8298_v0, %v8308_v8  ;;  %v9552_v19 = vrot.slane %v9550_v51, 4 }
 0x26a   : > { %v8328_v30 = vsel %vm13588_vm5, %v8323_v48, %v8327_v58  ;;  %v7583_v44 = vld [vmem:[#allocation2 + $0x50] sm:$0xff]  ;;  %v9555_v11 = vrot.slane %v9553_v16, 4  ;;  %6875 = vst.msk [vmem:[#allocation2 + $0x48] sm:$0xff] %vm511_vm0, %v6811_v56  ;;  %v8330_v50 = vshrl.u32 %v11888_v36, 16  ;;  %v8333_v15 = vshll.u32 %v11888_v36, 16  ;;  %v16533_v45 = vpop.f32.mrf.mxu0  ;;  %v16544_v2 = vpop.f32.mrf.mxu1 }
 0x26b   : > { %v11942_v4 = vcombine.low %v8318_v57, %v8328_v30  ;;  %v9551_v21 = vsel %vm13606_vm6, %v9549_v17, %v9550_v51  ;;  %v7647_v61 = vadd.f32 %v16454_v40, %v7583_v44  ;;  %13168 = vmatprep.mubr.msk.bf16.mxu1 %vm511_vm0, %v11941_v29  ;;  %v9554_v37 = vsel %vm13606_vm6, %v9552_v19, %v9553_v16  ;;  %v6752_v58 = vld [vmem:[#allocation2 + $0x70] sm:$0xff]  ;;  %v6750_v51 = vld [vmem:[#allocation2 + $0x60] sm:$0xff]  ;;  %v6753_v57 = vld [vmem:[#allocation2 + $0x78] sm:$0xff] }
 0x26c   : > { %v12113_v38 = vcombine.low %v9548_v18, %v9551_v21  ;;  %v9557_v24 = vsel %vm13606_vm6, %v9555_v11, %v9556_v47  ;;  %v8332_v25 = vrot.slane %v8330_v50, 4  ;;  %v8339_v12 = vshll.u32 %v11889_v1, 16  ;;  %v16542_v60 = vpop.f32.mrf.mxu0  ;;  %v16552_v16 = vpop.f32.mrf.mxu1  ;;  %v12044_v18 = vld [vmem:[%s13512_s26 + $0x104] sm:$0xe]  ;;  %v12046_v44 = vld [vmem:[%s13512_s26 + $0x10c] sm:$0xf] }
 0x26d   : > { %13169 = vmatmul.mubr.msk.bf16.gmra.mxu1 %vm511_vm0, %v11942_v4  ;;  %7711 = vst.msk [vmem:[#allocation2 + $0x50] sm:$0xff] %vm511_vm0, %v7647_v61  ;;  %v12114_v40 = vcombine.low %v9554_v37, %v9557_v24  ;;  %v8343_v43 = vshrl.u32 %v11889_v1, 16  ;;  %v7581_v6 = vld [vmem:[#allocation2 + $0x40] sm:$0xff]  ;;  %v8335_v32 = vrot.slane %v8333_v15, 5  ;;  %v8349_v35 = vshll.u32 %v11890_v10, 16 }
 0x26e   : > { %13240 = vmatprep.mubr.msk.bf16.mxu0 %vm511_vm0, %v12113_v38  ;;  %v8353_v5 = vshrl.u32 %v11890_v10, 16  ;;  %v6816_v52 = vadd.f32 %v16467_v28, %v6752_v58  ;;  %v7645_v31 = vadd.f32 %v7581_v6, %v16465_v9  ;;  %v8341_v0 = vrot.slane %v8339_v12, 5  ;;  %v7584_v46 = vld [vmem:[#allocation2 + $0x58] sm:$0xff]  ;;  %v16550_v48 = vpop.f32.mrf.mxu0  ;;  %v12047_v11 = vld [vmem:[%s13512_s26 + $0x110] sm:$0xf]  ;;  %v16562_v4 = vpop.f32.mrf.mxu1 }
 0x26f   : > { %13241 = vmatmul.mubr.msk.bf16.gmra.mxu0 %vm511_vm0, %v12114_v40  ;;  %v8345_v26 = vrot.slane %v8343_v43, 4  ;;  %v8359_v23 = vshll.u32 %v11891_v42, 16  ;;  %v8336_v33 = vor.u32 %v8335_v32, %v8332_v25  ;;  %v8351_v63 = vrot.slane %v8349_v35, 5  ;;  %v12048_v50 = vld [vmem:[%s13512_s26 + $0x114] sm:$0x1] }
 0x270   : > { %v8355_v39 = vrot.slane %v8353_v5, 4  ;;  %6880 = vst.msk [vmem:[#allocation2 + $0x70] sm:$0xff] %vm511_vm0, %v6816_v52  ;;  %v8363_v28 = vshrl.u32 %v11891_v42, 16  ;;  %7709 = vst.msk [vmem:[#allocation2 + $0x40] sm:$0xff] %vm511_vm0, %v7645_v31  ;;  %v8369_v56 = vshll.u32 %v11892_v13, 16  ;;  %v7648_v36 = vadd.f32 %v16475_v20, %v7584_v46  ;;  %v16560_v1 = vpop.f32.mrf.mxu0  ;;  %v16573_v42 = vpop.f32.mrf.mxu1 }
 0x271   : > { %v8346_v9 = vor.u32 %v8345_v26, %v8341_v0  ;;  %v8361_v47 = vrot.slane %v8359_v23, 5  ;;  %v7582_v8 = vld [vmem:[#allocation2 + $0x48] sm:$0xff]  ;;  %v8337_v17 = vrot.slane %v8336_v33, 4  ;;  %v6814_v19 = vadd.f32 %v6750_v51, %v16477_v55  ;;  %v11893_v12 = vld [vmem:[%s13512_s26 + $0x118] sm:$0xf] }
 0x272   : > { %v8356_v29 = vor.u32 %v8355_v39, %v8351_v63  ;;  %v8365_v30 = vrot.slane %v8363_v28, 4  ;;  %v8371_v61 = vrot.slane %v8369_v56, 5  ;;  %7712 = vst.msk [vmem:[#allocation2 + $0x58] sm:$0xff] %vm511_vm0, %v7648_v36  ;;  %v7646_v20 = vadd.f32 %v7582_v8, %v16482_v54  ;;  %v16571_v15 = vpop.f32.mrf.mxu0  ;;  %v16584_v5 = vpop.f32.mrf.mxu1  ;;  %v6751_v23 = vld [vmem:[#allocation2 + $0x68] sm:$0xff]  ;;  %v11894_v39 = vld [vmem:[%s13512_s26 + $0x11c] sm:$0xf] }
 0x273   : > { %v8347_v21 = vrot.slane %v8346_v9, 4  ;;  %v6817_v10 = vadd.f32 %v16484_v34, %v6753_v57  ;;  %v8342_v38 = vsel %vm13588_vm5, %v8337_v17, %v8341_v0  ;;  %6878 = vst.msk [vmem:[#allocation2 + $0x60] sm:$0xff] %vm511_vm0, %v6814_v19  ;;  %v12080_v24 = vrot.slane %v12044_v18, 9  ;;  %v11895_v28 = vld [vmem:[%s13512_s26 + $0x120] sm:$0xf] }
 0x274   : > { %v8357_v55 = vrot.slane %v8356_v29, 4  ;;  %v8366_v37 = vor.u32 %v8365_v30, %v8361_v47  ;;  %7710 = vst.msk [vmem:[#allocation2 + $0x48] sm:$0xff] %vm511_vm0, %v7646_v20  ;;  %v9560_v54 = vrot.slane %v12045_v59, 5  ;;  %v9563_v34 = vrot.slane %v12046_v44, 5  ;;  %v16582_v35 = vpop.f32.mrf.mxu0  ;;  %v11896_v8 = vld [vmem:[%s13512_s26 + $0x124] sm:$0xf] }
 0x275   : > { %v8352_v40 = vsel %vm13588_vm5, %v8347_v21, %v8351_v63  ;;  %6881 = vst.msk [vmem:[#allocation2 + $0x78] sm:$0xff] %vm511_vm0, %v6817_v10  ;;  %v9566_v25 = vrot.slane %v12047_v11, 5  ;;  %v9569_v32 = vrot.slane %v12048_v50, 5  ;;  %v6815_v63 = vadd.f32 %v6751_v23, %v16498_v14  ;;  %v16597_v9 = vpop.f32.mrf.mxu1  ;;  %v11897_v29 = vld [vmem:[%s13512_s26 + $0x128] sm:$0x1]  ;;  %v6756_v10 = vld [vmem:[#allocation2 + $0x90] sm:$0xff] }
 0x276   : > { %v11943_v43 = vcombine.low %v8342_v38, %v8352_v40  ;;  %v8362_v58 = vsel %vm13588_vm5, %v8357_v55, %v8361_v47  ;;  %v8367_v6 = vrot.slane %v8366_v37, 4  ;;  %v9561_v52 = vsel %vm13606_vm6, %v12080_v24, %v9560_v54  ;;  %v16595_v59 = vpop.f32.mrf.mxu0 }
 0x277   : > { %v9562_v13 = vrot.slane %v9560_v54, 4  ;;  %v9565_v31 = vrot.slane %v9563_v34, 4  ;;  %v7587_v0 = vld [vmem:[#allocation2 + $0x70] sm:$0xff]  ;;  %v9568_v26 = vrot.slane %v9566_v25, 4  ;;  %v8374_v51 = vshrl.u32 %v11893_v12, 16  ;;  %6879 = vst.msk [vmem:[#allocation2 + $0x68] sm:$0xff] %vm511_vm0, %v6815_v63  ;;  %v16611_v19 = vpop.f32.mrf.mxu1 }
 0x278   : > { %13172 = vmatprep.mubr.msk.bf16.mxu1 %vm511_vm0, %v11943_v43  ;;  %v8372_v46 = vsel %vm13588_vm5, %v8367_v6, %v8371_v61  ;;  %v7651_v33 = vadd.f32 %v16496_v49, %v7587_v0  ;;  %v8377_v17 = vshll.u32 %v11893_v12, 16  ;;  %v16609_v30 = vpop.f32.mrf.mxu0  ;;  %v8383_v11 = vshll.u32 %v11894_v39, 16  ;;  %v6757_v63 = vld [vmem:[#allocation2 + $0x98] sm:$0xff] }
 0x279   : > { %v11944_v47 = vcombine.low %v8362_v58, %v8372_v46  ;;  %v9564_v56 = vsel %vm13606_vm6, %v9562_v13, %v9563_v34  ;;  %v9567_v36 = vsel %vm13606_vm6, %v9565_v31, %v9566_v25  ;;  %v9570_v49 = vsel %vm13606_vm6, %v9568_v26, %v9569_v32  ;;  %v16619_v54 = vpop.f32.mrf.mxu1  ;;  %v12050_v58 = vld [vmem:[%s13512_s26 + $0x11c] sm:$0xf]  ;;  %v12049_v13 = vld [vmem:[%s13512_s26 + $0x118] sm:$0xe] }
 0x27a   : > { %v12115_v14 = vcombine.low %v9561_v52, %v9564_v56  ;;  %7715 = vst.msk [vmem:[#allocation2 + $0x70] sm:$0xff] %vm511_vm0, %v7651_v33  ;;  %v12116_v57 = vcombine.low %v9567_v36, %v9570_v49  ;;  %v8376_v18 = vrot.slane %v8374_v51, 4  ;;  %v7585_v44 = vld [vmem:[#allocation2 + $0x60] sm:$0xff]  ;;  %v8387_v21 = vshrl.u32 %v11894_v39, 16  ;;  %v16617_v40 = vpop.f32.mrf.mxu0 }
 0x27b   : > { %13173 = vmatmul.mubr.msk.bf16.gmra.mxu1 %vm511_vm0, %v11944_v47  ;;  %v8393_v61 = vshll.u32 %v11895_v28, 16  ;;  %v8397_v20 = vshrl.u32 %v11895_v28, 16  ;;  %v7649_v50 = vadd.f32 %v7585_v44, %v16505_v7  ;;  %v8379_v38 = vrot.slane %v8377_v17, 5  ;;  %v6754_v52 = vld [vmem:[#allocation2 + $0x80] sm:$0xff]  ;;  %v16630_v0 = vpop.f32.mrf.mxu1 }
 0x27c   : > { %13244 = vmatprep.mubr.msk.bf16.mxu0 %vm511_vm0, %v12115_v14  ;;  %v6820_v55 = vadd.f32 %v16507_v22, %v6756_v10  ;;  %v8403_v37 = vshll.u32 %v11896_v8, 16  ;;  %v7588_v24 = vld [vmem:[#allocation2 + $0x78] sm:$0xff]  ;;  %v8385_v34 = vrot.slane %v8383_v11, 5  ;;  %v8389_v25 = vrot.slane %v8387_v21, 4  ;;  %v16628_v31 = vpop.f32.mrf.mxu0  ;;  %v12051_v39 = vld [vmem:[%s13512_s26 + $0x120] sm:$0xf] }
 0x27d   : > { %13245 = vmatmul.mubr.msk.bf16.gmra.mxu0 %vm511_vm0, %v12116_v57  ;;  %v8395_v12 = vrot.slane %v8393_v61, 5  ;;  %v8399_v43 = vrot.slane %v8397_v20, 4  ;;  %7713 = vst.msk [vmem:[#allocation2 + $0x60] sm:$0xff] %vm511_vm0, %v7649_v50  ;;  %v8380_v7 = vor.u32 %v8379_v38, %v8376_v18  ;;  %v8407_v6 = vshrl.u32 %v11896_v8, 16  ;;  %v12052_v36 = vld [vmem:[%s13512_s26 + $0x124] sm:$0xf]  ;;  %v16639_v8 = vpop.f32.mrf.mxu1 }
 0x27e   : > { %6884 = vst.msk [vmem:[#allocation2 + $0x90] sm:$0xff] %vm511_vm0, %v6820_v55  ;;  %v16625_v22 = vrot.slane %v8403_v37, 5  ;;  %v8413_v32 = vshll.u32 %v11897_v29, 16  ;;  %v8390_v26 = vor.u32 %v8389_v25, %v8385_v34  ;;  %v7652_v46 = vadd.f32 %v16519_v62, %v7588_v24  ;;  %v16637_v49 = vpop.f32.mrf.mxu0  ;;  %v7586_v62 = vld [vmem:[#allocation2 + $0x68] sm:$0xff] }
 0x27f   : > { %v8400_v23 = vor.u32 %v8399_v43, %v8395_v12  ;;  %v6818_v33 = vadd.f32 %v6754_v52, %v16521_v41  ;;  %v8381_v28 = vrot.slane %v8380_v7, 4  ;;  %v8409_v51 = vrot.slane %v8407_v6, 4  ;;  %v12053_v11 = vld [vmem:[%s13512_s26 + $0x128] sm:$0x1]  ;;  %v11898_v21 = vld [vmem:[%s13512_s26 + $0x12c] sm:$0xf]  ;;  %v16652_v20 = vpop.f32.mrf.mxu1 }
 0x280   : > { %v8415_v47 = vrot.slane %v8413_v32, 5  ;;  %v6821_v56 = vadd.f32 %v16535_v27, %v6757_v63  ;;  %v8391_v14 = vrot.slane %v8390_v26, 4  ;;  %7716 = vst.msk [vmem:[#allocation2 + $0x78] sm:$0xff] %vm511_vm0, %v7652_v46  ;;  %v12081_v41 = vrot.slane %v12049_v13, 9  ;;  %v16650_v61 = vpop.f32.mrf.mxu0  ;;  %v6755_v25 = vld [vmem:[#allocation2 + $0x88] sm:$0xff] }
 0x281   : > { %v8401_v57 = vrot.slane %v8400_v23, 4  ;;  %6882 = vst.msk [vmem:[#allocation2 + $0x80] sm:$0xff] %vm511_vm0, %v6818_v33  ;;  %v9573_v18 = vrot.slane %v12050_v58, 5  ;;  %v8386_v17 = vsel %vm13588_vm5, %v8381_v28, %v8385_v34  ;;  %v8410_v27 = vor.u32 %v8409_v51, %v16625_v22  ;;  %v11899_v43 = vld [vmem:[%s13512_s26 + $0x130] sm:$0xf] }
 0x282   : > { %v7650_v29 = vadd.f32 %v7586_v62, %v16533_v45  ;;  %6885 = vst.msk [vmem:[#allocation2 + $0x98] sm:$0xff] %vm511_vm0, %v6821_v56  ;;  %v9576_v44 = vrot.slane %v12051_v39, 5  ;;  %v8396_v10 = vsel %vm13588_vm5, %v8391_v14, %v8395_v12  ;;  %v9579_v34 = vrot.slane %v12052_v36, 5  ;;  %v16663_v58 = vpop.f32.mrf.mxu0  ;;  %v16665_v12 = vpop.f32.mrf.mxu1  ;;  %v11900_v52 = vld [vmem:[%s13512_s26 + $0x134] sm:$0xf] }
 0x283   : > { %v8406_v50 = vsel %vm13588_vm5, %v8401_v57, %v16625_v22  ;;  %v9574_v45 = vsel %vm13606_vm6, %v12081_v41, %v9573_v18  ;;  %v9575_v38 = vrot.slane %v9573_v18, 4  ;;  %v11945_v55 = vcombine.low %v8386_v17, %v8396_v10  ;;  %v11901_v36 = vld [vmem:[%s13512_s26 + $0x138] sm:$0xf]  ;;  %v6760_v41 = vld [vmem:[#allocation2 + $0xb0] sm:$0xff] }
 0x284   : > { %v8411_v37 = vrot.slane %v8410_v27, 4  ;;  %7714 = vst.msk [vmem:[#allocation2 + $0x68] sm:$0xff] %vm511_vm0, %v7650_v29  ;;  %v9578_v24 = vrot.slane %v9576_v44, 4  ;;  %v9582_v6 = vrot.slane %v12053_v11, 5  ;;  %v6819_v32 = vadd.f32 %v6755_v25, %v16544_v2  ;;  %v16677_v63 = vpop.f32.mrf.mxu0  ;;  %v16679_v39 = vpop.f32.mrf.mxu1 }
 0x285   : > { %v9577_v7 = vsel %vm13606_vm6, %v9575_v38, %v9576_v44  ;;  %v7591_v22 = vld [vmem:[#allocation2 + $0x90] sm:$0xff]  ;;  %v8418_v13 = vshrl.u32 %v11898_v21, 16  ;;  %13176 = vmatprep.mubr.msk.bf16.mxu1 %vm511_vm0, %v11945_v55  ;;  %v9581_v51 = vrot.slane %v9579_v34, 4  ;;  %v8421_v56 = vshll.u32 %v11898_v21, 16  ;;  %v11902_v21 = vld [vmem:[%s13512_s26 + $0x13c] sm:$0x1] }
 0x286   : > { %v8416_v26 = vsel %vm13588_vm5, %v8411_v37, %v8415_v47  ;;  %v12117_v23 = vcombine.low %v9574_v45, %v9577_v7  ;;  %v7655_v46 = vadd.f32 %v16542_v60, %v7591_v22  ;;  %v9580_v33 = vsel %vm13606_vm6, %v9578_v24, %v9579_v34  ;;  %6883 = vst.msk [vmem:[#allocation2 + $0x88] sm:$0xff] %vm511_vm0, %v6819_v32  ;;  %v16685_v18 = vpop.f32.mrf.mxu0  ;;  %v16687_v17 = vpop.f32.mrf.mxu1  ;;  %v12054_v7 = vld [vmem:[%s13512_s26 + $0x12c] sm:$0xe] }
 0x287   : > { %v11946_v28 = vcombine.low %v8406_v50, %v8416_v26  ;;  %v8420_v2 = vrot.slane %v8418_v13, 4  ;;  %v8427_v47 = vshll.u32 %v11899_v43, 16  ;;  %v8431_v14 = vshrl.u32 %v11899_v43, 16  ;;  %v6758_v43 = vld [vmem:[#allocation2 + $0xa0] sm:$0xff]  ;;  %v12055_v13 = vld [vmem:[%s13512_s26 + $0x130] sm:$0xf] }
 0x288   : > { %13248 = vmatprep.mubr.msk.bf16.mxu0 %vm511_vm0, %v12117_v23  ;;  %7719 = vst.msk [vmem:[#allocation2 + $0x90] sm:$0xff] %vm511_vm0, %v7655_v46  ;;  %v7589_v60 = vld [vmem:[#allocation2 + $0x80] sm:$0xff]  ;;  %v8437_v57 = vshll.u32 %v11900_v52, 16  ;;  %v8441_v62 = vshrl.u32 %v11900_v52, 16  ;;  %v9583_v27 = vsel %vm13606_vm6, %v9581_v51, %v9582_v6  ;;  %v8423_v44 = vrot.slane %v8421_v56, 5  ;;  %v16695_v37 = vpop.f32.mrf.mxu0  ;;  %v16697_v24 = vpop.f32.mrf.mxu1  ;;  %v6761_v56 = vld [vmem:[#allocation2 + $0xb8] sm:$0xff] }
 0x289   : > { %13177 = vmatmul.mubr.msk.bf16.gmra.mxu1 %vm511_vm0, %v11946_v28  ;;  %v7653_v29 = vadd.f32 %v7589_v60, %v16550_v48  ;;  %v6824_v11 = vadd.f32 %v16552_v16, %v6760_v41  ;;  %v7592_v10 = vld [vmem:[#allocation2 + $0x98] sm:$0xff]  ;;  %v12118_v50 = vcombine.low %v9580_v33, %v9583_v27  ;;  %v8429_v45 = vrot.slane %v8427_v47, 5  ;;  %v12056_v26 = vld [vmem:[%s13512_s26 + $0x134] sm:$0xf] }
 0x28a   : > { %v8433_v38 = vrot.slane %v8431_v14, 4  ;;  %v8439_v55 = vrot.slane %v8437_v57, 5  ;;  %v8424_v34 = vor.u32 %v8423_v44, %v8420_v2  ;;  %v8443_v48 = vrot.slane %v8441_v62, 4  ;;  %v16707_v23 = vpop.f32.mrf.mxu0  ;;  %v16709_v46 = vpop.f32.mrf.mxu1  ;;  %v12058_v57 = vld [vmem:[%s13512_s26 + $0x13c] sm:$0x1] }
 0x28b   : > { %7717 = vst.msk [vmem:[#allocation2 + $0x80] sm:$0xff] %vm511_vm0, %v7653_v29  ;;  %6888 = vst.msk [vmem:[#allocation2 + $0xb0] sm:$0xff] %vm511_vm0, %v6824_v11  ;;  %v8447_v16 = vshll.u32 %v11901_v36, 16  ;;  %v8451_v25 = vshrl.u32 %v11901_v36, 16  ;;  %13249 = vmatmul.mubr.msk.bf16.gmra.mxu0 %vm511_vm0, %v12118_v50  ;;  %v8457_v6 = vshll.u32 %v11902_v21, 16  ;;  %v7656_v32 = vadd.f32 %v16560_v1, %v7592_v10 }
 0x28c   : > { %v8434_v22 = vor.u32 %v8433_v38, %v8429_v45  ;;  %v6822_v52 = vadd.f32 %v6758_v43, %v16562_v4  ;;  %v8425_v33 = vrot.slane %v8424_v34, 4  ;;  %v8444_v28 = vor.u32 %v8443_v48, %v8439_v55  ;;  %v12057_v36 = vld [vmem:[%s13512_s26 + $0x138] sm:$0xf]  ;;  %v16716_v62 = vpop.f32.mrf.mxu0  ;;  %v16718_v41 = vpop.f32.mrf.mxu1  ;;  %v11903_v38 = vld [vmem:[%s13512_s26 + $0x140] sm:$0xf] }
 0x28d   : > { %v8449_v51 = vrot.slane %v8447_v16, 5  ;;  %v8453_v2 = vrot.slane %v8451_v25, 4  ;;  %v8459_v47 = vrot.slane %v8457_v6, 5  ;;  %7720 = vst.msk [vmem:[#allocation2 + $0x98] sm:$0xff] %vm511_vm0, %v7656_v32  ;;  %v7590_v1 = vld [vmem:[#allocation2 + $0x88] sm:$0xff]  ;;  %v6825_v4 = vadd.f32 %v16573_v42, %v6761_v56 }
 0x28e   : > { %v8435_v60 = vrot.slane %v8434_v22, 4  ;;  %6886 = vst.msk [vmem:[#allocation2 + $0xa0] sm:$0xff] %vm511_vm0, %v6822_v52  ;;  %v12082_v14 = vrot.slane %v12054_v7, 9  ;;  %v8430_v27 = vsel %vm13588_vm5, %v8425_v33, %v8429_v45  ;;  %v8445_v29 = vrot.slane %v8444_v28, 4  ;;  %v16727_v34 = vpop.f32.mrf.mxu0  ;;  %v16729_v48 = vpop.f32.mrf.mxu1  ;;  %v6759_v32 = vld [vmem:[#allocation2 + $0xa8] sm:$0xff] }
 0x28f   : > { %v8454_v44 = vor.u32 %v8453_v2, %v8449_v51  ;;  %v7654_v11 = vadd.f32 %v7590_v1, %v16571_v15  ;;  %6889 = vst.msk [vmem:[#allocation2 + $0xb8] sm:$0xff] %vm511_vm0, %v6825_v4  ;;  %v9586_v10 = vrot.slane %v12055_v13, 5  ;;  %v9589_v42 = vrot.slane %v12056_v26, 5  ;;  %v11905_v2 = vld [vmem:[%s13512_s26 + $0x148] sm:$0xf] }
 0x290   : > { %v8440_v21 = vsel %vm13588_vm5, %v8435_v60, %v8439_v55  ;;  %v9592_v50 = vrot.slane %v12057_v36, 5  ;;  %v8450_v45 = vsel %vm13588_vm5, %v8445_v29, %v8449_v51  ;;  %v9595_v15 = vrot.slane %v12058_v57, 5  ;;  %v16736_v52 = vpop.f32.mrf.mxu0  ;;  %v16738_v13 = vpop.f32.mrf.mxu1  ;;  %v11904_v51 = vld [vmem:[%s13512_s26 + $0x144] sm:$0xf] }
 0x291   : > { %v11947_v16 = vcombine.low %v8430_v27, %v8440_v21  ;;  %v8455_v25 = vrot.slane %v8454_v44, 4  ;;  %7718 = vst.msk [vmem:[#allocation2 + $0x88] sm:$0xff] %vm511_vm0, %v7654_v11  ;;  %v9587_v55 = vsel %vm13606_vm6, %v12082_v14, %v9586_v10  ;;  %v9588_v43 = vrot.slane %v9586_v10, 4  ;;  %v11906_v14 = vld [vmem:[%s13512_s26 + $0x14c] sm:$0xf] }
 0x292   : > { %v9591_v7 = vrot.slane %v9589_v42, 4  ;;  %v7595_v22 = vld [vmem:[#allocation2 + $0xb0] sm:$0xff]  ;;  %v9594_v6 = vrot.slane %v9592_v50, 4  ;;  %v6823_v28 = vadd.f32 %v6759_v32, %v16584_v5  ;;  %v8462_v56 = vshrl.u32 %v11903_v38, 16 }
 0x293   : > { %13180 = vmatprep.mubr.msk.bf16.mxu1 %vm511_vm0, %v11947_v16  ;;  %v8460_v26 = vsel %vm13588_vm5, %v8455_v25, %v8459_v47  ;;  %v7659_v33 = vadd.f32 %v16582_v35, %v7595_v22  ;;  %v9590_v60 = vsel %vm13606_vm6, %v9588_v43, %v9589_v42  ;;  %v16754_v47 = vpop.f32.mrf.mxu0  ;;  %v16756_v35 = vpop.f32.mrf.mxu1  ;;  %v8465_v44 = vshll.u32 %v11903_v38, 16  ;;  %v11907_v16 = vld [vmem:[%s13512_s26 + $0x150] sm:$0x1] }
 0x294   : > { %v11948_v36 = vcombine.low %v8450_v45, %v8460_v26  ;;  %v9593_v1 = vsel %vm13606_vm6, %v9591_v7, %v9592_v50  ;;  %v9596_v4 = vsel %vm13606_vm6, %v9594_v6, %v9595_v15  ;;  %v12119_v5 = vcombine.low %v9587_v55, %v9590_v60  ;;  %6887 = vst.msk [vmem:[#allocation2 + $0xa8] sm:$0xff] %vm511_vm0, %v6823_v28  ;;  %v6764_v50 = vld [vmem:[#allocation2 + $0xd0] sm:$0xff]  ;;  %v12060_v26 = vld [vmem:[%s13512_s26 + $0x144] sm:$0xf]  ;;  %v12059_v60 = vld [vmem:[%s13512_s26 + $0x140] sm:$0xe] }
 0x295   : > { %7723 = vst.msk [vmem:[#allocation2 + $0xb0] sm:$0xff] %vm511_vm0, %v7659_v33  ;;  %v12120_v57 = vcombine.low %v9593_v1, %v9596_v4  ;;  %v7593_v27 = vld [vmem:[#allocation2 + $0xa0] sm:$0xff]  ;;  %v8464_v29 = vrot.slane %v8462_v56, 4  ;;  %v8471_v21 = vshll.u32 %v11904_v51, 16  ;;  %v8475_v10 = vshrl.u32 %v11904_v51, 16  ;;  %v16763_v45 = vpop.f32.mrf.mxu0  ;;  %v16765_v25 = vpop.f32.mrf.mxu1 }
 0x296   : > { %13181 = vmatmul.mubr.msk.bf16.gmra.mxu1 %vm511_vm0, %v11948_v36  ;;  %v7657_v11 = vadd.f32 %v7593_v27, %v16595_v59  ;;  %v8481_v42 = vshll.u32 %v11905_v2, 16  ;;  %13252 = vmatprep.mubr.msk.bf16.mxu0 %vm511_vm0, %v12119_v5  ;;  %v8467_v15 = vrot.slane %v8465_v44, 5  ;;  %v8485_v55 = vshrl.u32 %v11905_v2, 16  ;;  %v7596_v7 = vld [vmem:[#allocation2 + $0xb8] sm:$0xff]  ;;  %v6762_v36 = vld [vmem:[#allocation2 + $0xc0] sm:$0xff] }
 0x297   : > { %v6828_v38 = vadd.f32 %v16597_v9, %v6764_v50  ;;  %v8491_v43 = vshll.u32 %v11906_v14, 16  ;;  %13253 = vmatmul.mubr.msk.bf16.gmra.mxu0 %vm511_vm0, %v12120_v57  ;;  %v8473_v59 = vrot.slane %v8471_v21, 5  ;;  %v8477_v22 = vrot.slane %v8475_v10, 4  ;;  %v16772_v33 = vpop.f32.mrf.mxu0  ;;  %v16774_v28 = vpop.f32.mrf.mxu1  ;;  %v6765_v57 = vld [vmem:[#allocation2 + $0xd8] sm:$0xff]  ;;  %v12061_v27 = vld [vmem:[%s13512_s26 + $0x148] sm:$0xf] }
 0x298   : > { %7721 = vst.msk [vmem:[#allocation2 + $0xa0] sm:$0xff] %vm511_vm0, %v7657_v11  ;;  %v8483_v6 = vrot.slane %v8481_v42, 5  ;;  %v8495_v32 = vshrl.u32 %v11906_v14, 16  ;;  %v8468_v51 = vor.u32 %v8467_v15, %v8464_v29  ;;  %v8487_v2 = vrot.slane %v8485_v55, 4  ;;  %v12062_v55 = vld [vmem:[%s13512_s26 + $0x14c] sm:$0xf] }
 0x299   : > { %6892 = vst.msk [vmem:[#allocation2 + $0xd0] sm:$0xff] %vm511_vm0, %v6828_v38  ;;  %v8493_v9 = vrot.slane %v8491_v43, 5  ;;  %v8501_v56 = vshll.u32 %v11907_v16, 16  ;;  %v8478_v1 = vor.u32 %v8477_v22, %v8473_v59  ;;  %v7660_v5 = vadd.f32 %v16609_v30, %v7596_v7  ;;  %v16781_v44 = vpop.f32.mrf.mxu0  ;;  %v16783_v11 = vpop.f32.mrf.mxu1 }
 0x29a   : > { %v8497_v4 = vrot.slane %v8495_v32, 4  ;;  %v6826_v14 = vadd.f32 %v6762_v36, %v16611_v19  ;;  %v8469_v29 = vrot.slane %v8468_v51, 4  ;;  %v8488_v21 = vor.u32 %v8487_v2, %v8483_v6  ;;  %v12063_v51 = vld [vmem:[%s13512_s26 + $0x150] sm:$0x1] }
 0x29b   : > { %v8503_v10 = vrot.slane %v8501_v56, 5  ;;  %v6829_v42 = vadd.f32 %v16619_v54, %v6765_v57  ;;  %v8479_v50 = vrot.slane %v8478_v1, 4  ;;  %7724 = vst.msk [vmem:[#allocation2 + $0xb8] sm:$0xff] %vm511_vm0, %v7660_v5  ;;  %v7594_v30 = vld [vmem:[#allocation2 + $0xa8] sm:$0xff]  ;;  %v12083_v19 = vrot.slane %v12059_v60, 9  ;;  %v16789_v38 = vpop.f32.mrf.mxu0  ;;  %v16791_v43 = vpop.f32.mrf.mxu1 }
 0x29c   : > { %v8498_v16 = vor.u32 %v8497_v4, %v8493_v9  ;;  %6890 = vst.msk [vmem:[#allocation2 + $0xc0] sm:$0xff] %vm511_vm0, %v6826_v14  ;;  %v9599_v15 = vrot.slane %v12060_v26, 5  ;;  %v8474_v7 = vsel %vm13588_vm5, %v8469_v29, %v8473_v59  ;;  %v8489_v22 = vrot.slane %v8488_v21, 4  ;;  %v6763_v60 = vld [vmem:[#allocation2 + $0xc8] sm:$0xff]  ;;  %v11909_v57 = vld [vmem:[%s13512_s26 + $0x158] sm:$0xf] }
 0x29d   : > { %v7658_v54 = vadd.f32 %v7594_v30, %v16617_v40  ;;  %6893 = vst.msk [vmem:[#allocation2 + $0xd8] sm:$0xff] %vm511_vm0, %v6829_v42  ;;  %v9602_v32 = vrot.slane %v12061_v27, 5  ;;  %v8484_v26 = vsel %vm13588_vm5, %v8479_v50, %v8483_v6  ;;  %v16802_v59 = vpop.f32.mrf.mxu0  ;;  %v16804_v1 = vpop.f32.mrf.mxu1  ;;  %v9605_v14 = vrot.slane %v12062_v55, 5  ;;  %v11908_v6 = vld [vmem:[%s13512_s26 + $0x154] sm:$0xf] }
 0x29e   : > { %v8499_v2 = vrot.slane %v8498_v16, 4  ;;  %v9600_v56 = vsel %vm13606_vm6, %v12083_v19, %v9599_v15  ;;  %v9601_v36 = vrot.slane %v9599_v15, 4  ;;  %v11949_v40 = vcombine.low %v8474_v7, %v8484_v26  ;;  %v11910_v16 = vld [vmem:[%s13512_s26 + $0x15c] sm:$0xf] }
 0x29f   : > { %v8494_v4 = vsel %vm13588_vm5, %v8489_v22, %v8493_v9  ;;  %7722 = vst.msk [vmem:[#allocation2 + $0xa8] sm:$0xff] %vm511_vm0, %v7658_v54  ;;  %v9604_v5 = vrot.slane %v9602_v32, 4  ;;  %v9608_v42 = vrot.slane %v12063_v51, 5  ;;  %v6827_v50 = vadd.f32 %v6763_v60, %v16630_v0  ;;  %v16817_v30 = vpop.f32.mrf.mxu0  ;;  %v16819_v9 = vpop.f32.mrf.mxu1 }
 0x2a0   : > { %v8504_v27 = vsel %vm13588_vm5, %v8499_v2, %v8503_v10  ;;  %v9603_v29 = vsel %vm13606_vm6, %v9601_v36, %v9602_v32  ;;  %v7599_v21 = vld [vmem:[#allocation2 + $0xd0] sm:$0xff]  ;;  %13184 = vmatprep.mubr.msk.bf16.mxu1 %vm511_vm0, %v11949_v40  ;;  %v9607_v7 = vrot.slane %v9605_v14, 4  ;;  %v8506_v22 = vshrl.u32 %v11908_v6, 16  ;;  %v11911_v40 = vld [vmem:[%s13512_s26 + $0x160] sm:$0xf] }
 0x2a1   : > { %v11950_v19 = vcombine.low %v8494_v4, %v8504_v27  ;;  %v12121_v15 = vcombine.low %v9600_v56, %v9603_v29  ;;  %v7663_v55 = vadd.f32 %v16628_v31, %v7599_v21  ;;  %v9606_v10 = vsel %vm13606_vm6, %v9604_v5, %v9605_v14  ;;  %6891 = vst.msk [vmem:[#allocation2 + $0xc8] sm:$0xff] %vm511_vm0, %v6827_v50  ;;  %v6768_v32 = vld [vmem:[#allocation2 + $0xf0] sm:$0xff]  ;;  %v16826_v51 = vpop.f32.mrf.mxu0  ;;  %v16828_v26 = vpop.f32.mrf.mxu1  ;;  %v11912_v27 = vld [vmem:[%s13512_s26 + $0x164] sm:$0x1] }
 0x2a2   : > { %v8509_v0 = vshll.u32 %v11908_v6, 16  ;;  %v8515_v54 = vshll.u32 %v11909_v57, 16  ;;  %v8519_v2 = vshrl.u32 %v11909_v57, 16  ;;  %v8525_v56 = vshll.u32 %v11910_v16, 16 }
 0x2a3   : > { %13185 = vmatmul.mubr.msk.bf16.gmra.mxu1 %vm511_vm0, %v11950_v19  ;;  %13256 = vmatprep.mubr.msk.bf16.mxu0 %vm511_vm0, %v12121_v15  ;;  %7727 = vst.msk [vmem:[#allocation2 + $0xd0] sm:$0xff] %vm511_vm0, %v7663_v55  ;;  %v7597_v31 = vld [vmem:[#allocation2 + $0xc0] sm:$0xff]  ;;  %v8529_v36 = vshrl.u32 %v11910_v16, 16  ;;  %v6832_v60 = vadd.f32 %v16639_v8, %v6768_v32  ;;  %v9609_v4 = vsel %vm13606_vm6, %v9607_v7, %v9608_v42  ;;  %v8508_v14 = vrot.slane %v8506_v22, 4  ;;  %v16839_v21 = vpop.f32.mrf.mxu0  ;;  %v16841_v50 = vpop.f32.mrf.mxu1  ;;  %v12064_v22 = vld [vmem:[%s13512_s26 + $0x154] sm:$0xe] }
 0x2a4   : > { %v7661_v5 = vadd.f32 %v7597_v31, %v16637_v49  ;;  %v8511_v6 = vrot.slane %v8509_v0, 5  ;;  %v7600_v29 = vld [vmem:[#allocation2 + $0xd8] sm:$0xff]  ;;  %17400 = vst [vmem:[#allocation3_spill] sm:$0xff] %v16839_v21  ;;  %v12122_v57 = vcombine.low %v9606_v10, %v9609_v4  ;;  %v8517_v19 = vrot.slane %v8515_v54, 5  ;;  %v6766_v7 = vld [vmem:[#allocation2 + $0xe0] sm:$0xff] }
 0x2a5   : > { %v8521_v16 = vrot.slane %v8519_v2, 4  ;;  %v8527_v15 = vrot.slane %v8525_v56, 5  ;;  %6896 = vst.msk [vmem:[#allocation2 + $0xf0] sm:$0xff] %vm511_vm0, %v6832_v60  ;;  %v8531_v8 = vrot.slane %v8529_v36, 4  ;;  %v8535_v42 = vshll.u32 %v11911_v40, 16  ;;  %v16846_v0 = vpop.f32.mrf.mxu0  ;;  %v16848_v32 = vpop.f32.mrf.mxu1 }
 0x2a6   : > { %7725 = vst.msk [vmem:[#allocation2 + $0xc0] sm:$0xff] %vm511_vm0, %v7661_v5  ;;  %v8512_v49 = vor.u32 %v8511_v6, %v8508_v14  ;;  %v8539_v55 = vshrl.u32 %v11911_v40, 16  ;;  %17401 = vst [vmem:[#allocation4_spill] sm:$0xff] %v16846_v0  ;;  %13257 = vmatmul.mubr.msk.bf16.gmra.mxu0 %vm511_vm0, %v12122_v57  ;;  %v8545_v54 = vshll.u32 %v11912_v27, 16  ;;  %v7664_v31 = vadd.f32 %v16650_v61, %v7600_v29  ;;  %v12065_v56 = vld [vmem:[%s13512_s26 + $0x158] sm:$0xf] }
 0x2a7   : > { %v8522_v10 = vor.u32 %v8521_v16, %v8517_v19  ;;  %v6830_v2 = vadd.f32 %v6766_v7, %v16652_v20  ;;  %v12066_v60 = vld [vmem:[%s13512_s26 + $0x15c] sm:$0xf]  ;;  %v8532_v40 = vor.u32 %v8531_v8, %v8527_v15  ;;  %v8537_v4 = vrot.slane %v8535_v42, 5  ;;  %v12067_v6 = vld [vmem:[%s13512_s26 + $0x160] sm:$0xf]  ;;  %v16856_v0 = vpop.f32.mrf.mxu0  ;;  %v16858_v21 = vpop.f32.mrf.mxu1 }
 0x2a8   : > { %v8513_v36 = vrot.slane %v8512_v49, 4  ;;  %v8541_v5 = vrot.slane %v8539_v55, 4  ;;  %v6769_v14 = vld [vmem:[#allocation2 + $0xf8] sm:$0xff]  ;;  %v8547_v16 = vrot.slane %v8545_v54, 5  ;;  %7728 = vst.msk [vmem:[#allocation2 + $0xd8] sm:$0xff] %vm511_vm0, %v7664_v31  ;;  %v7598_v61 = vld [vmem:[#allocation2 + $0xc8] sm:$0xff] }
 0x2a9   : > { %v8523_v57 = vrot.slane %v8522_v10, 4  ;;  %6894 = vst.msk [vmem:[#allocation2 + $0xe0] sm:$0xff] %vm511_vm0, %v6830_v2  ;;  %v6833_v20 = vadd.f32 %v16665_v12, %v6769_v14  ;;  %v12084_v27 = vrot.slane %v12064_v22, 9  ;;  %v12068_v29 = vld [vmem:[%s13512_s26 + $0x164] sm:$0x1]  ;;  %v8533_v8 = vrot.slane %v8532_v40, 4  ;;  %v16867_v7 = vpop.f32.mrf.mxu0  ;;  %v16869_v10 = vpop.f32.mrf.mxu1 }
 0x2aa   : > { %v8518_v49 = vsel %vm13588_vm5, %v8513_v36, %v8517_v19  ;;  %v8542_v42 = vor.u32 %v8541_v5, %v8537_v4  ;;  %v7662_v55 = vadd.f32 %v7598_v61, %v16663_v58  ;;  %v9612_v31 = vrot.slane %v12065_v56, 5  ;;  %v6772_v61 = vld [vmem:[#allocation2 + $0x110] sm:$0xff]  ;;  %s10987_s26 = sshll.u32 %s13448_s12, 6 }
 0x2ab   : > { %v8528_v54 = vsel %vm13588_vm5, %v8523_v57, %v8527_v15  ;;  %6897 = vst.msk [vmem:[#allocation2 + $0xf8] sm:$0xff] %vm511_vm0, %v6833_v20  ;;  %v9615_v12 = vrot.slane %v12066_v60, 5  ;;  %v9618_v22 = vrot.slane %v12067_v6, 5  ;;  %v8538_v19 = vsel %vm13588_vm5, %v8533_v8, %v8537_v4  ;;  %v16877_v5 = vpop.f32.mrf.mxu0  ;;  %v16879_v14 = vpop.f32.mrf.mxu1  ;;  %v6767_v6 = vld [vmem:[#allocation2 + $0xe8] sm:$0xff]  ;;  %v6770_v20 = vld [vmem:[#allocation2 + $0x100] sm:$0xff]  ;;  %p17036_p5 = scmp.lt.s32.totalorder %s10987_s26, 127 }
 0x2ac   : > { %v11951_v2 = vcombine.low %v8518_v49, %v8528_v54  ;;  %v8543_v36 = vrot.slane %v8542_v42, 4  ;;  %7726 = vst.msk [vmem:[#allocation2 + $0xc8] sm:$0xff] %vm511_vm0, %v7662_v55  ;;  %v7603_v58 = vld [vmem:[#allocation2 + $0xf0] sm:$0xff]  ;;  %v9621_v40 = vrot.slane %v12068_v29, 5  ;;  %v9613_v15 = vsel %vm13606_vm6, %v12084_v27, %v9612_v31  ;;  %v6773_v42 = vld [vmem:[#allocation2 + $0x118] sm:$0xff]  ;;  %v6771_v55 = vld [vmem:[#allocation2 + $0x108] sm:$0xff] }
 0x2ad   : > { %v9614_v57 = vrot.slane %v9612_v31, 4  ;;  %v9617_v56 = vrot.slane %v9615_v12, 4  ;;  %v7667_v60 = vadd.f32 %v16677_v63, %v7603_v58  ;;  %v9620_v29 = vrot.slane %v9618_v22, 4  ;;  %v6776_v27 = vld [vmem:[#allocation2 + $0x130] sm:$0xff]  ;;  %v16889_v54 = vpop.f32.mrf.mxu0  ;;  %v16891_v31 = vpop.f32.mrf.mxu1  ;;  %s17410_s26 = smov (!%p17036_p5, %s10987_s26), 127 }
 0x2ae   : > { %13188 = vmatprep.mubr.msk.bf16.mxu1 %vm511_vm0, %v11951_v2  ;;  %v8548_v4 = vsel %vm13588_vm5, %v8543_v36, %v8547_v16  ;;  %v6831_v49 = vadd.f32 %v6767_v6, %v16679_v39  ;;  %v6836_v8 = vadd.f32 %v16687_v17, %v6772_v61  ;;  %v6834_v39 = vadd.f32 %v6770_v20, %v16697_v24  ;;  %v6774_v16 = vld [vmem:[#allocation2 + $0x120] sm:$0xff]  ;;  %v6777_v17 = vld [vmem:[#allocation2 + $0x138] sm:$0xff]  ;;  %v6775_v2 = vld [vmem:[#allocation2 + $0x128] sm:$0xff]  ;;  %s10988_s12 = sshll.u32 %s17410_s26, 2 }
 0x2af   : > { %v11952_v63 = vcombine.low %v8538_v19, %v8548_v4  ;;  %v9616_v58 = vsel %vm13606_vm6, %v9614_v57, %v9615_v12  ;;  %7731 = vst.msk [vmem:[#allocation2 + $0xf0] sm:$0xff] %vm511_vm0, %v7667_v60  ;;  %v9619_v53 = vsel %vm13606_vm6, %v9617_v56, %v9618_v22  ;;  %v9622_v6 = vsel %vm13606_vm6, %v9620_v29, %v9621_v40  ;;  %v6780_v60 = vld [vmem:[#allocation2 + $0x150] sm:$0xff]  ;;  %v6778_v22 = vld [vmem:[#allocation2 + $0x140] sm:$0xff]  ;;  %v16905_v56 = vpop.f32.mrf.mxu0  ;;  %v13038_v24 = vpop.f32.mrf.mxu1  ;;  %v6781_v20 = vld [vmem:[#allocation2 + $0x158] sm:$0xff]  ;;  %s17069_s17 = scalar_lea.vmem %s17389_s3, %s10988_s12 }
 0x2b0   : > { %v12123_v36 = vcombine.low %v9613_v15, %v9616_v58  ;;  %6895 = vst.msk [vmem:[#allocation2 + $0xe8] sm:$0xff] %vm511_vm0, %v6831_v49  ;;  %v7601_v19 = vld [vmem:[#allocation2 + $0xe0] sm:$0xff]  ;;  %6900 = vst.msk [vmem:[#allocation2 + $0x110] sm:$0xff] %vm511_vm0, %v6836_v8  ;;  %v6837_v12 = vadd.f32 %v16709_v46, %v6773_v42  ;;  %v6835_v57 = vadd.f32 %v6771_v55, %v16718_v41  ;;  %v6779_v46 = vld [vmem:[#allocation2 + $0x148] sm:$0xff] }
 0x2b1   : > { %13189 = vmatmul.mubr.msk.bf16.gmra.mxu1 %vm511_vm0, %v11952_v63  ;;  %v12124_v15 = vcombine.low %v9619_v53, %v9622_v6  ;;  %v7665_v3 = vadd.f32 %v7601_v19, %v16685_v18  ;;  %6898 = vst.msk [vmem:[#allocation2 + $0x100] sm:$0xff] %vm511_vm0, %v6834_v39  ;;  %v6840_v40 = vadd.f32 %v16729_v48, %v6776_v27  ;;  %v6784_v4 = vld [vmem:[#allocation2 + $0x170] sm:$0xff]  ;;  %v6782_v8 = vld [vmem:[#allocation2 + $0x160] sm:$0xff]  ;;  %v16919_v42 = vpop.f32.mrf.mxu0  ;;  %v6691_v55 = vpop.f32.mrf.mxu1  ;;  %v6787_v39 = vld [vmem:[#allocation2 + $0x188] sm:$0xff] }
 0x2b2   : > { %v6838_v61 = vadd.f32 %v6774_v16, %v16738_v13  ;;  %13260 = vmatprep.mubr.msk.bf16.mxu0 %vm511_vm0, %v12123_v36  ;;  %v7604_v41 = vld [vmem:[#allocation2 + $0xf8] sm:$0xff]  ;;  %6901 = vst.msk [vmem:[#allocation2 + $0x118] sm:$0xff] %vm511_vm0, %v6837_v12  ;;  %6899 = vst.msk [vmem:[#allocation2 + $0x108] sm:$0xff] %vm511_vm0, %v6835_v57  ;;  %v6841_v29 = vadd.f32 %v16756_v35, %v6777_v17  ;;  %v6839_v18 = vadd.f32 %v6775_v2, %v16765_v25  ;;  %v6788_v63 = vld [vmem:[#allocation2 + $0x190] sm:$0xff] }
 0x2b3   : > { %v6844_v49 = vadd.f32 %v16774_v28, %v6780_v60  ;;  %v6842_v48 = vadd.f32 %v6778_v22, %v16783_v11  ;;  %v6785_v13 = vld [vmem:[#allocation2 + $0x178] sm:$0xff]  ;;  %13261 = vmatmul.mubr.msk.bf16.gmra.mxu0 %vm511_vm0, %v12124_v15  ;;  %7729 = vst.msk [vmem:[#allocation2 + $0xe0] sm:$0xff] %vm511_vm0, %v7665_v3  ;;  %v7668_v27 = vadd.f32 %v16695_v37, %v7604_v41  ;;  %6904 = vst.msk [vmem:[#allocation2 + $0x130] sm:$0xff] %vm511_vm0, %v6840_v40  ;;  %v6783_v11 = vld [vmem:[#allocation2 + $0x168] sm:$0xff]  ;;  %v16937_v17 = vpop.f32.mrf.mxu0  ;;  %v13039_v2 = vpop.f32.mrf.mxu1 }
 0x2b4   : > { %6902 = vst.msk [vmem:[#allocation2 + $0x120] sm:$0xff] %vm511_vm0, %v6838_v61  ;;  %v6845_v35 = vadd.f32 %v16791_v43, %v6781_v20  ;;  %v6843_v25 = vadd.f32 %v6779_v46, %v16804_v1  ;;  %v6848_v28 = vadd.f32 %v16819_v9, %v6784_v4  ;;  %v6786_v58 = vld [vmem:[#allocation2 + $0x180] sm:$0xff]  ;;  %6905 = vst.msk [vmem:[#allocation2 + $0x138] sm:$0xff] %vm511_vm0, %v6841_v29  ;;  %v6789_v9 = vld [vmem:[#allocation2 + $0x198] sm:$0xff] }
 0x2b5   : > { %6903 = vst.msk [vmem:[#allocation2 + $0x128] sm:$0xff] %vm511_vm0, %v6839_v18  ;;  %6908 = vst.msk [vmem:[#allocation2 + $0x150] sm:$0xff] %vm511_vm0, %v6844_v49  ;;  %v6846_v37 = vadd.f32 %v6782_v8, %v16828_v26  ;;  %v6849_v53 = vadd.f32 %v16841_v50, %v6785_v13  ;;  %v6847_v43 = vadd.f32 %v6783_v11, %v16848_v32  ;;  %v6792_v16 = vld [vmem:[#allocation2 + $0x1b0] sm:$0xff]  ;;  %v6790_v36 = vld [vmem:[#allocation2 + $0x1a0] sm:$0xff]  ;;  %v16950_v57 = vpop.f32.mrf.mxu0 }
 0x2b6   : > { %6906 = vst.msk [vmem:[#allocation2 + $0x140] sm:$0xff] %vm511_vm0, %v6842_v48  ;;  %v6852_v1 = vadd.f32 %v16858_v21, %v6788_v63  ;;  %7732 = vst.msk [vmem:[#allocation2 + $0xf8] sm:$0xff] %vm511_vm0, %v7668_v27  ;;  %v6850_v26 = vadd.f32 %v6786_v58, %v16869_v10  ;;  %v6853_v50 = vadd.f32 %v16879_v14, %v6789_v9  ;;  %v6793_v6 = vld [vmem:[#allocation2 + $0x1b8] sm:$0xff]  ;;  %v6694_v10 = vpop.f32.mrf.mxu1  ;;  %v6791_v60 = vld [vmem:[#allocation2 + $0x1a8] sm:$0xff] }
 0x2b7   : > { %6909 = vst.msk [vmem:[#allocation2 + $0x158] sm:$0xff] %vm511_vm0, %v6845_v35  ;;  %6907 = vst.msk [vmem:[#allocation2 + $0x148] sm:$0xff] %vm511_vm0, %v6843_v25  ;;  %v6851_v21 = vadd.f32 %v6787_v39, %v16891_v31  ;;  %v6856_v32 = vadd.f32 %v13038_v24, %v6792_v16  ;;  %v6854_v19 = vadd.f32 %v6790_v36, %v6691_v55  ;;  %v7602_v14 = vld [vmem:[#allocation2 + $0xe8] sm:$0xff]  ;;  %v7607_v22 = vld [vmem:[#allocation2 + $0x110] sm:$0xff]  ;;  %v16960_v40 = vpop.f32.mrf.mxu0 }
 0x2b8   : > { %6912 = vst.msk [vmem:[#allocation2 + $0x170] sm:$0xff] %vm511_vm0, %v6848_v28  ;;  %6910 = vst.msk [vmem:[#allocation2 + $0x160] sm:$0xff] %vm511_vm0, %v6846_v37  ;;  %v6857_v12 = vadd.f32 %v13039_v2, %v6793_v6  ;;  %v6855_v31 = vadd.f32 %v6791_v60, %v6694_v10  ;;  %v7666_v24 = vadd.f32 %v7602_v14, %v16707_v23  ;;  %v7605_v3 = vld [vmem:[#allocation2 + $0x100] sm:$0xff]  ;;  %v13042_v61 = vpop.f32.mrf.mxu1  ;;  %v6796_v20 = vld [vmem:[#allocation2 + $0x1d0] sm:$0xff] }
 0x2b9   : > { %6913 = vst.msk [vmem:[#allocation2 + $0x178] sm:$0xff] %vm511_vm0, %v6849_v53  ;;  %6911 = vst.msk [vmem:[#allocation2 + $0x168] sm:$0xff] %vm511_vm0, %v6847_v43  ;;  %v7671_v15 = vadd.f32 %v16716_v62, %v7607_v22  ;;  %v7669_v46 = vadd.f32 %v7605_v3, %v16727_v34  ;;  %v7608_v4 = vld [vmem:[#allocation2 + $0x118] sm:$0xff]  ;;  %v7606_v41 = vld [vmem:[#allocation2 + $0x108] sm:$0xff]  ;;  %v6860_v29 = vadd.f32 %v13042_v61, %v6796_v20  ;;  %v16968_v8 = vpop.f32.mrf.mxu0 }
 0x2ba   : > { %6916 = vst.msk [vmem:[#allocation2 + $0x190] sm:$0xff] %vm511_vm0, %v6852_v1  ;;  %6914 = vst.msk [vmem:[#allocation2 + $0x180] sm:$0xff] %vm511_vm0, %v6850_v26  ;;  %v6794_v18 = vld [vmem:[#allocation2 + $0x1c0] sm:$0xff]  ;;  %v7672_v23 = vadd.f32 %v16736_v52, %v7608_v4  ;;  %v7670_v62 = vadd.f32 %v7606_v41, %v16754_v47  ;;  %v7611_v49 = vld [vmem:[#allocation2 + $0x130] sm:$0xff]  ;;  %v6707_v13 = vpop.f32.mrf.mxu1 }
 0x2bb   : > { %6917 = vst.msk [vmem:[#allocation2 + $0x198] sm:$0xff] %vm511_vm0, %v6853_v50  ;;  %6915 = vst.msk [vmem:[#allocation2 + $0x188] sm:$0xff] %vm511_vm0, %v6851_v21  ;;  %v7609_v48 = vld [vmem:[#allocation2 + $0x120] sm:$0xff]  ;;  %v6797_v34 = vld [vmem:[#allocation2 + $0x1d8] sm:$0xff]  ;;  %v7675_v55 = vadd.f32 %v16763_v45, %v7611_v49  ;;  %v6858_v52 = vadd.f32 %v6794_v18, %v6707_v13 }
 0x2bc   : > { %6920 = vst.msk [vmem:[#allocation2 + $0x1b0] sm:$0xff] %vm511_vm0, %v6856_v32  ;;  %6918 = vst.msk [vmem:[#allocation2 + $0x1a0] sm:$0xff] %vm511_vm0, %v6854_v19  ;;  %v7673_v27 = vadd.f32 %v7609_v48, %v16772_v33  ;;  %v7612_v35 = vld [vmem:[#allocation2 + $0x138] sm:$0xff]  ;;  %v7610_v25 = vld [vmem:[#allocation2 + $0x128] sm:$0xff]  ;;  %v7529_v33 = vpop.f32.mrf.mxu0  ;;  %v13043_v53 = vpop.f32.mrf.mxu1 }
 0x2bd   : > { %6921 = vst.msk [vmem:[#allocation2 + $0x1b8] sm:$0xff] %vm511_vm0, %v6857_v12  ;;  %6919 = vst.msk [vmem:[#allocation2 + $0x1a8] sm:$0xff] %vm511_vm0, %v6855_v31  ;;  %v7615_v28 = vld [vmem:[#allocation2 + $0x150] sm:$0xff]  ;;  %v7676_v47 = vadd.f32 %v16781_v44, %v7612_v35  ;;  %v7674_v11 = vadd.f32 %v7610_v25, %v16789_v38  ;;  %v7613_v58 = vld [vmem:[#allocation2 + $0x140] sm:$0xff] }
 0x2be   : > { %7730 = vst.msk [vmem:[#allocation2 + $0xe8] sm:$0xff] %vm511_vm0, %v7666_v24  ;;  %7735 = vst.msk [vmem:[#allocation2 + $0x110] sm:$0xff] %vm511_vm0, %v7671_v15  ;;  %v7679_v63 = vadd.f32 %v16802_v59, %v7615_v28  ;;  %v7616_v45 = vld [vmem:[#allocation2 + $0x158] sm:$0xff]  ;;  %v7614_v37 = vld [vmem:[#allocation2 + $0x148] sm:$0xff]  ;;  %v7677_v1 = vadd.f32 %v7613_v58, %v16817_v30  ;;  %v6861_v59 = vadd.f32 %v13043_v53, %v6797_v34  ;;  %v13114_v6 = vpop.f32.mrf.mxu0  ;;  %v6710_v19 = vpop.f32.mrf.mxu1 }
 0x2bf   : > { %7733 = vst.msk [vmem:[#allocation2 + $0x100] sm:$0xff] %vm511_vm0, %v7669_v46  ;;  %6924 = vst.msk [vmem:[#allocation2 + $0x1d0] sm:$0xff] %vm511_vm0, %v6860_v29  ;;  %v6795_v43 = vld [vmem:[#allocation2 + $0x1c8] sm:$0xff]  ;;  %v7680_v9 = vadd.f32 %v16826_v51, %v7616_v45  ;;  %v17402_v39 = vld [vmem:[#allocation3_spill] sm:$0xff] }
 0x2c0   : > { %7736 = vst.msk [vmem:[#allocation2 + $0x118] sm:$0xff] %vm511_vm0, %v7672_v23  ;;  %7734 = vst.msk [vmem:[#allocation2 + $0x108] sm:$0xff] %vm511_vm0, %v7670_v62  ;;  %v7678_v44 = vadd.f32 %v7614_v37, %v17402_v39  ;;  %v7619_v16 = vld [vmem:[#allocation2 + $0x170] sm:$0xff]  ;;  %v7617_v38 = vld [vmem:[#allocation2 + $0x160] sm:$0xff]  ;;  %v6859_v31 = vadd.f32 %v6795_v43, %v6710_v19  ;;  %v7542_v61 = vpop.f32.mrf.mxu0  ;;  %v13046_v20 = vpop.f32.mrf.mxu1 }
 0x2c1   : > { %7739 = vst.msk [vmem:[#allocation2 + $0x130] sm:$0xff] %vm511_vm0, %v7675_v55  ;;  %7737 = vst.msk [vmem:[#allocation2 + $0x120] sm:$0xff] %vm511_vm0, %v7673_v27  ;;  %v7620_v2 = vld [vmem:[#allocation2 + $0x178] sm:$0xff]  ;;  %v17403_v26 = vld [vmem:[#allocation4_spill] sm:$0xff]  ;;  %v7681_v30 = vadd.f32 %v7617_v38, %v16856_v0 }
 0x2c2   : > { %6922 = vst.msk [vmem:[#allocation2 + $0x1c0] sm:$0xff] %vm511_vm0, %v6858_v52  ;;  %7740 = vst.msk [vmem:[#allocation2 + $0x138] sm:$0xff] %vm511_vm0, %v7676_v47  ;;  %v7683_v50 = vadd.f32 %v17403_v26, %v7619_v16  ;;  %v7684_v51 = vadd.f32 %v16867_v7, %v7620_v2  ;;  %v7618_v21 = vld [vmem:[#allocation2 + $0x168] sm:$0xff]  ;;  %v7623_v32 = vld [vmem:[#allocation2 + $0x190] sm:$0xff]  ;;  %v13115_v41 = vpop.f32.mrf.mxu0  ;;  %v6723_v29 = vpop.f32.mrf.mxu1 }
 0x2c3   : > { %7738 = vst.msk [vmem:[#allocation2 + $0x128] sm:$0xff] %vm511_vm0, %v7674_v11  ;;  %7743 = vst.msk [vmem:[#allocation2 + $0x150] sm:$0xff] %vm511_vm0, %v7679_v63  ;;  %v7621_v36 = vld [vmem:[#allocation2 + $0x180] sm:$0xff]  ;;  %v6800_v12 = vld [vmem:[#allocation2 + $0x1f0] sm:$0xff]  ;;  %v7682_v10 = vadd.f32 %v7618_v21, %v16877_v5  ;;  %v7687_v60 = vadd.f32 %v16889_v54, %v7623_v32 }
 0x2c4   : > { %7741 = vst.msk [vmem:[#allocation2 + $0x140] sm:$0xff] %vm511_vm0, %v7677_v1  ;;  %7744 = vst.msk [vmem:[#allocation2 + $0x158] sm:$0xff] %vm511_vm0, %v7680_v9  ;;  %v7685_v0 = vadd.f32 %v7621_v36, %v16905_v56  ;;  %v7624_v14 = vld [vmem:[#allocation2 + $0x198] sm:$0xff]  ;;  %v7622_v7 = vld [vmem:[#allocation2 + $0x188] sm:$0xff]  ;;  %v7545_v49 = vpop.f32.mrf.mxu0  ;;  %v13047_v48 = vpop.f32.mrf.mxu1 }
 0x2c5   : > { %7742 = vst.msk [vmem:[#allocation2 + $0x148] sm:$0xff] %vm511_vm0, %v7678_v44  ;;  %v7627_v22 = vld [vmem:[#allocation2 + $0x1b0] sm:$0xff]  ;;  %6925 = vst.msk [vmem:[#allocation2 + $0x1d8] sm:$0xff] %vm511_vm0, %v6861_v59  ;;  %v7688_v24 = vadd.f32 %v16919_v42, %v7624_v14  ;;  %v7686_v5 = vadd.f32 %v7622_v7, %v16937_v17  ;;  %v7625_v15 = vld [vmem:[#allocation2 + $0x1a0] sm:$0xff]  ;;  %v6864_v17 = vadd.f32 %v13046_v20, %v6800_v12 }
 0x2c6   : > { %7747 = vst.msk [vmem:[#allocation2 + $0x170] sm:$0xff] %vm511_vm0, %v7683_v50  ;;  %7745 = vst.msk [vmem:[#allocation2 + $0x160] sm:$0xff] %vm511_vm0, %v7681_v30  ;;  %v7691_v54 = vadd.f32 %v16950_v57, %v7627_v22  ;;  %v7628_v56 = vld [vmem:[#allocation2 + $0x1b8] sm:$0xff]  ;;  %v7626_v3 = vld [vmem:[#allocation2 + $0x1a8] sm:$0xff]  ;;  %v7689_v46 = vadd.f32 %v7625_v15, %v16960_v40  ;;  %v13118_v27 = vpop.f32.mrf.mxu0  ;;  %v6726_v35 = vpop.f32.mrf.mxu1 }
 0x2c7   : > { %7748 = vst.msk [vmem:[#allocation2 + $0x178] sm:$0xff] %vm511_vm0, %v7684_v51  ;;  %7746 = vst.msk [vmem:[#allocation2 + $0x168] sm:$0xff] %vm511_vm0, %v7682_v10  ;;  %v7692_v4 = vadd.f32 %v16968_v8, %v7628_v56  ;;  %v7690_v42 = vadd.f32 %v7626_v3, %v7529_v33  ;;  %v7631_v57 = vld [vmem:[#allocation2 + $0x1d0] sm:$0xff]  ;;  %v6798_v18 = vld [vmem:[#allocation2 + $0x1e0] sm:$0xff] }
 0x2c8   : > { %7751 = vst.msk [vmem:[#allocation2 + $0x190] sm:$0xff] %vm511_vm0, %v7687_v60  ;;  %7749 = vst.msk [vmem:[#allocation2 + $0x180] sm:$0xff] %vm511_vm0, %v7685_v0  ;;  %v7695_v40 = vadd.f32 %v13114_v6, %v7631_v57  ;;  %v6862_v23 = vadd.f32 %v6798_v18, %v6723_v29  ;;  %v6801_v8 = vld [vmem:[#allocation2 + $0x1f8] sm:$0xff]  ;;  %v6799_v25 = vld [vmem:[#allocation2 + $0x1e8] sm:$0xff]  ;;  %v7558_v11 = vpop.f32.mrf.mxu0  ;;  %v13130_v63 = vpop.f32.mrf.mxu1 }
 0x2c9   : > { %6923 = vst.msk [vmem:[#allocation2 + $0x1c8] sm:$0xff] %vm511_vm0, %v6859_v31  ;;  %7752 = vst.msk [vmem:[#allocation2 + $0x198] sm:$0xff] %vm511_vm0, %v7688_v24  ;;  %v7629_v62 = vld [vmem:[#allocation2 + $0x1c0] sm:$0xff]  ;;  %v6865_v34 = vadd.f32 %v13047_v48, %v6801_v8  ;;  %v6863_v52 = vadd.f32 %v6799_v25, %v6726_v35  ;;  %v9065_v58 = vld [vmem:[#allocation2 + $0x10] sm:$0xff] }
 0x2ca   : > { %7750 = vst.msk [vmem:[#allocation2 + $0x188] sm:$0xff] %vm511_vm0, %v7686_v5  ;;  %7755 = vst.msk [vmem:[#allocation2 + $0x1b0] sm:$0xff] %vm511_vm0, %v7691_v54  ;;  %v7693_v13 = vadd.f32 %v7629_v62, %v7542_v61  ;;  %v9129_v37 = vadd.f32 %v13130_v63, %v9065_v58  ;;  %v13119_v53 = vpop.f32.mrf.mxu0  ;;  %v8808_v43 = vpop.f32.mrf.mxu1  ;;  %v9063_v1 = vld [vmem:[#allocation2] sm:$0xff]  ;;  %v9066_v2 = vld [vmem:[#allocation2 + $0x18] sm:$0xff] }
 0x2cb   : > { %7753 = vst.msk [vmem:[#allocation2 + $0x1a0] sm:$0xff] %vm511_vm0, %v7689_v46  ;;  %7756 = vst.msk [vmem:[#allocation2 + $0x1b8] sm:$0xff] %vm511_vm0, %v7692_v4  ;;  %v9127_v39 = vadd.f32 %v9063_v1, %v8808_v43  ;;  %v9064_v21 = vld [vmem:[#allocation2 + $0x8] sm:$0xff]  ;;  %v9069_v10 = vld [vmem:[#allocation2 + $0x30] sm:$0xff] }
 0x2cc   : > { %7754 = vst.msk [vmem:[#allocation2 + $0x1a8] sm:$0xff] %vm511_vm0, %v7690_v42  ;;  %6928 = vst.msk [vmem:[#allocation2 + $0x1f0] sm:$0xff] %vm511_vm0, %v6864_v17  ;;  %v7632_v55 = vld [vmem:[#allocation2 + $0x1d8] sm:$0xff]  ;;  %v7561_v16 = vpop.f32.mrf.mxu0  ;;  %v13131_v38 = vpop.f32.mrf.mxu1  ;;  %v9067_v31 = vld [vmem:[#allocation2 + $0x20] sm:$0xff] }
 0x2cd   : > { %7759 = vst.msk [vmem:[#allocation2 + $0x1d0] sm:$0xff] %vm511_vm0, %v7695_v40  ;;  %6926 = vst.msk [vmem:[#allocation2 + $0x1e0] sm:$0xff] %vm511_vm0, %v6862_v23  ;;  %v7696_v28 = vadd.f32 %v13115_v41, %v7632_v55  ;;  %v9130_v26 = vadd.f32 %v13131_v38, %v9066_v2  ;;  %v9070_v3 = vld [vmem:[#allocation2 + $0x38] sm:$0xff]  ;;  %v9068_v17 = vld [vmem:[#allocation2 + $0x28] sm:$0xff] }
 0x2ce   : > { %7757 = vst.msk [vmem:[#allocation2 + $0x1c0] sm:$0xff] %vm511_vm0, %v7693_v13  ;;  %6929 = vst.msk [vmem:[#allocation2 + $0x1f8] sm:$0xff] %vm511_vm0, %v6865_v34  ;;  %v13202_v30 = vpop.f32.mrf.mxu0  ;;  %v8811_v51 = vpop.f32.mrf.mxu1  ;;  %v9073_v23 = vld [vmem:[#allocation2 + $0x50] sm:$0xff]  ;;  %v17055_v48 = vld [vmem:[%s17388_s2] ss:$0 sm:$0xff] }
 0x2cf   : > { %7760 = vst.msk [vmem:[#allocation2 + $0x1d8] sm:$0xff] %vm511_vm0, %v7696_v28  ;;  %6927 = vst.msk [vmem:[#allocation2 + $0x1e8] sm:$0xff] %vm511_vm0, %v6863_v52  ;;  %v9128_v36 = vadd.f32 %v9064_v21, %v8811_v51  ;;  %v9071_v55 = vld [vmem:[#allocation2 + $0x40] sm:$0xff]  ;;  %v9072_v1 = vld [vmem:[#allocation2 + $0x48] sm:$0xff] }
 0x2d0   : > { %v7630_v47 = vld [vmem:[#allocation2 + $0x1c8] sm:$0xff]  ;;  %9193 = vst.msk [vmem:[#allocation2 + $0x10] sm:$0xff] %vm511_vm0, %v9129_v37  ;;  %9191 = vst.msk [vmem:[#allocation2] sm:$0xff] %vm511_vm0, %v9127_v39  ;;  %v9882_v19 = vpop.f32.mrf.mxu0  ;;  %v13134_v12 = vpop.f32.mrf.mxu1 }
 0x2d1   : > { %v7694_v45 = vadd.f32 %v7630_v47, %v7545_v49  ;;  %9194 = vst.msk [vmem:[#allocation2 + $0x18] sm:$0xff] %vm511_vm0, %v9130_v26  ;;  %9192 = vst.msk [vmem:[#allocation2 + $0x8] sm:$0xff] %vm511_vm0, %v9128_v36  ;;  %v9133_v0 = vadd.f32 %v13134_v12, %v9069_v10 }
 0x2d2   : > { %v13203_v7 = vpop.f32.mrf.mxu0  ;;  %v8824_v22 = vpop.f32.mrf.mxu1 }
 0x2d3   : > { %v7635_v33 = vld [vmem:[#allocation2 + $0x1f0] sm:$0xff]  ;;  %7758 = vst.msk [vmem:[#allocation2 + $0x1c8] sm:$0xff] %vm511_vm0, %v7694_v45  ;;  %9197 = vst.msk [vmem:[#allocation2 + $0x30] sm:$0xff] %vm511_vm0, %v9133_v0  ;;  %v9131_v5 = vadd.f32 %v9067_v31, %v8824_v22  ;;  %v9075_v22 = vld [vmem:[#allocation2 + $0x60] sm:$0xff] }
 0x2d4   : > { %v7699_v9 = vadd.f32 %v13118_v27, %v7635_v33  ;;  %v7633_v44 = vld [vmem:[#allocation2 + $0x1e0] sm:$0xff]  ;;  %v9885_v15 = vpop.f32.mrf.mxu0  ;;  %v13135_v56 = vpop.f32.mrf.mxu1 }
 0x2d5   : > { %v7697_v59 = vadd.f32 %v7633_v44, %v7558_v11  ;;  %v7636_v50 = vld [vmem:[#allocation2 + $0x1f8] sm:$0xff]  ;;  %9195 = vst.msk [vmem:[#allocation2 + $0x20] sm:$0xff] %vm511_vm0, %v9131_v5  ;;  %v9134_v20 = vadd.f32 %v13135_v56, %v9070_v3 }
 0x2d6   : > { %7763 = vst.msk [vmem:[#allocation2 + $0x1f0] sm:$0xff] %vm511_vm0, %v7699_v9  ;;  %v7700_v32 = vadd.f32 %v13119_v53, %v7636_v50  ;;  %v7634_v6 = vld [vmem:[#allocation2 + $0x1e8] sm:$0xff]  ;;  %v13206_v4 = vpop.f32.mrf.mxu0  ;;  %v8827_v42 = vpop.f32.mrf.mxu1  ;;  %v9074_v11 = vld [vmem:[#allocation2 + $0x58] sm:$0xff] }
 0x2d7   : > { %7761 = vst.msk [vmem:[#allocation2 + $0x1e0] sm:$0xff] %vm511_vm0, %v7697_v59  ;;  %v7698_v60 = vadd.f32 %v7634_v6, %v7561_v16  ;;  %v10139_v14 = vld [vmem:[#allocation2 + $0x10] sm:$0xff]  ;;  %v10137_v54 = vld [vmem:[#allocation2] sm:$0xff]  ;;  %9198 = vst.msk [vmem:[#allocation2 + $0x38] sm:$0xff] %vm511_vm0, %v9134_v20  ;;  %v9132_v41 = vadd.f32 %v9068_v17, %v8827_v42 }
 0x2d8   : > { %7764 = vst.msk [vmem:[#allocation2 + $0x1f8] sm:$0xff] %vm511_vm0, %v7700_v32  ;;  %v10203_v24 = vadd.f32 %v13202_v30, %v10139_v14  ;;  %v10201_v61 = vadd.f32 %v10137_v54, %v9882_v19  ;;  %v10140_v46 = vld [vmem:[#allocation2 + $0x18] sm:$0xff]  ;;  %v10138_v29 = vld [vmem:[#allocation2 + $0x8] sm:$0xff]  ;;  %v9898_v18 = vpop.f32.mrf.mxu0  ;;  %v13138_v40 = vpop.f32.mrf.mxu1  ;;  %v9077_v32 = vld [vmem:[#allocation2 + $0x70] sm:$0xff] }
 0x2d9   : > { %7762 = vst.msk [vmem:[#allocation2 + $0x1e8] sm:$0xff] %vm511_vm0, %v7698_v60  ;;  %v10204_v57 = vadd.f32 %v13203_v7, %v10140_v46  ;;  %v10202_v62 = vadd.f32 %v10138_v29, %v9885_v15  ;;  %9196 = vst.msk [vmem:[#allocation2 + $0x28] sm:$0xff] %vm511_vm0, %v9132_v41  ;;  %v9137_v49 = vadd.f32 %v13138_v40, %v9073_v23  ;;  %v9078_v46 = vld [vmem:[#allocation2 + $0x78] sm:$0xff] }
 0x2da   : > { %10267 = vst.msk [vmem:[#allocation2 + $0x10] sm:$0xff] %vm511_vm0, %v10203_v24  ;;  %10265 = vst.msk [vmem:[#allocation2] sm:$0xff] %vm511_vm0, %v10201_v61  ;;  %v10143_v8 = vld [vmem:[#allocation2 + $0x30] sm:$0xff]  ;;  %v13207_v13 = vpop.f32.mrf.mxu0  ;;  %v8840_v34 = vpop.f32.mrf.mxu1 }
 0x2db   : > { %10268 = vst.msk [vmem:[#allocation2 + $0x18] sm:$0xff] %vm511_vm0, %v10204_v57  ;;  %10266 = vst.msk [vmem:[#allocation2 + $0x8] sm:$0xff] %vm511_vm0, %v10202_v62  ;;  %v10207_v27 = vadd.f32 %v13206_v4, %v10143_v8  ;;  %v9135_v35 = vadd.f32 %v9071_v55, %v8840_v34  ;;  %v9076_v62 = vld [vmem:[#allocation2 + $0x68] sm:$0xff] }
 0x2dc   : > { %9201 = vst.msk [vmem:[#allocation2 + $0x50] sm:$0xff] %vm511_vm0, %v9137_v49  ;;  %v10141_v28 = vld [vmem:[#allocation2 + $0x20] sm:$0xff]  ;;  %v9901_v52 = vpop.f32.mrf.mxu0  ;;  %v13139_v47 = vpop.f32.mrf.mxu1 }
 0x2dd   : > { %10271 = vst.msk [vmem:[#allocation2 + $0x30] sm:$0xff] %vm511_vm0, %v10207_v27  ;;  %v10205_v58 = vadd.f32 %v10141_v28, %v9898_v18  ;;  %9199 = vst.msk [vmem:[#allocation2 + $0x40] sm:$0xff] %vm511_vm0, %v9135_v35  ;;  %v9138_v45 = vadd.f32 %v13139_v47, %v9074_v11 }
 0x2de   : > { %v10144_v33 = vld [vmem:[#allocation2 + $0x38] sm:$0xff]  ;;  %v13210_v53 = vpop.f32.mrf.mxu0  ;;  %v8843_v43 = vpop.f32.mrf.mxu1 }
 0x2df   : > { %10269 = vst.msk [vmem:[#allocation2 + $0x20] sm:$0xff] %vm511_vm0, %v10205_v58  ;;  %v10208_v44 = vadd.f32 %v13207_v13, %v10144_v33  ;;  %9202 = vst.msk [vmem:[#allocation2 + $0x58] sm:$0xff] %vm511_vm0, %v9138_v45  ;;  %v9136_v16 = vadd.f32 %v9072_v1, %v8843_v43  ;;  %v9079_v45 = vld [vmem:[#allocation2 + $0x80] sm:$0xff] }
 0x2e0   : > { %v10142_v2 = vld [vmem:[#allocation2 + $0x28] sm:$0xff]  ;;  %v9914_v59 = vpop.f32.mrf.mxu0  ;;  %v13142_v26 = vpop.f32.mrf.mxu1 }
 0x2e1   : > { %v10331_v25 = vld [vmem:[#allocation2 + $0x10] sm:$0xff]  ;;  %v10329_v37 = vld [vmem:[#allocation2] sm:$0xff]  ;;  %10272 = vst.msk [vmem:[#allocation2 + $0x38] sm:$0xff] %vm511_vm0, %v10208_v44  ;;  %v10206_v21 = vadd.f32 %v10142_v2, %v9901_v52  ;;  %9200 = vst.msk [vmem:[#allocation2 + $0x48] sm:$0xff] %vm511_vm0, %v9136_v16  ;;  %v9141_v19 = vadd.f32 %v13142_v26, %v9077_v32 }
 0x2e2   : > { %v10402_v63 = vadd.f32 %v17055_v48, %v10331_v25  ;;  %v10400_v39 = vadd.f32 %v17055_v48, %v10329_v37  ;;  %v10332_v38 = vld [vmem:[#allocation2 + $0x18] sm:$0xff]  ;;  %v10330_v36 = vld [vmem:[#allocation2 + $0x8] sm:$0xff]  ;;  %v13211_v12 = vpop.f32.mrf.mxu0  ;;  %v8856_v10 = vpop.f32.mrf.mxu1  ;;  %v9081_v52 = vld [vmem:[#allocation2 + $0x90] sm:$0xff] }
 0x2e3   : > { %v10403_v51 = vadd.f32 %v17055_v48, %v10332_v38  ;;  %v10147_v6 = vld [vmem:[#allocation2 + $0x50] sm:$0xff]  ;;  %v10401_v14 = vadd.f32 %v17055_v48, %v10330_v36  ;;  %10270 = vst.msk [vmem:[#allocation2 + $0x28] sm:$0xff] %vm511_vm0, %v10206_v21  ;;  %9205 = vst.msk [vmem:[#allocation2 + $0x70] sm:$0xff] %vm511_vm0, %v9141_v19  ;;  %v9139_v5 = vadd.f32 %v9075_v22, %v8856_v10  ;;  %v9082_v38 = vld [vmem:[#allocation2 + $0x98] sm:$0xff] }
 0x2e4   : > { %v10466_v9 = vmax.f32 %v10402_v63, 0.0  ;;  %v10464_v30 = vmax.f32 %v10400_v39, 0.0  ;;  %v10211_v7 = vadd.f32 %v13210_v53, %v10147_v6  ;;  %v10335_v31 = vld [vmem:[#allocation2 + $0x30] sm:$0xff]  ;;  %v10145_v24 = vld [vmem:[#allocation2 + $0x40] sm:$0xff]  ;;  %v9917_v54 = vpop.f32.mrf.mxu0  ;;  %v13143_v15 = vpop.f32.mrf.mxu1  ;;  %v9080_v6 = vld [vmem:[#allocation2 + $0x88] sm:$0xff] }
 0x2e5   : > { %v10467_v0 = vmax.f32 %v10403_v51, 0.0  ;;  %v10465_v3 = vmax.f32 %v10401_v14, 0.0  ;;  %v10406_v61 = vadd.f32 %v17055_v48, %v10335_v31  ;;  %v10209_v20 = vadd.f32 %v10145_v24, %v9914_v59  ;;  %9203 = vst.msk [vmem:[#allocation2 + $0x60] sm:$0xff] %vm511_vm0, %v9139_v5  ;;  %v9085_v24 = vld [vmem:[#allocation2 + $0xb0] sm:$0xff] }
 0x2e6   : > { %v12230_v50 = vpack.c.bf16 %v10466_v9, %v10466_v9  ;;  %v12228_v60 = vpack.c.bf16 %v10464_v30, %v10464_v30  ;;  %10275 = vst.msk [vmem:[#allocation2 + $0x50] sm:$0xff] %vm511_vm0, %v10211_v7  ;;  %v10333_v4 = vld [vmem:[#allocation2 + $0x20] sm:$0xff]  ;;  %v10148_v42 = vld [vmem:[#allocation2 + $0x58] sm:$0xff]  ;;  %v9142_v17 = vadd.f32 %v13143_v15, %v9078_v46  ;;  %v13214_v57 = vpop.f32.mrf.mxu0  ;;  %v8859_v41 = vpop.f32.mrf.mxu1 }
 0x2e7   : > { %v12231_v56 = vpack.c.bf16 %v10467_v0, %v10467_v0  ;;  %v12229_v29 = vpack.c.bf16 %v10465_v3, %v10465_v3  ;;  %v10470_v18 = vmax.f32 %v10406_v61, 0.0  ;;  %v10404_v40 = vadd.f32 %v17055_v48, %v10333_v4  ;;  %10273 = vst.msk [vmem:[#allocation2 + $0x40] sm:$0xff] %vm511_vm0, %v10209_v20 }
 0x2e8   : > { %10787 = vst.msk [vmem:[%s17069_s17 + $0x8] sm:$0xf] %vm10784_vm7, %v12230_v50  ;;  %10785 = vst.msk [vmem:[%s17069_s17] sm:$0xf] %vm10784_vm7, %v12228_v60  ;;  %v10212_v23 = vadd.f32 %v13211_v12, %v10148_v42  ;;  %v10336_v49 = vld [vmem:[#allocation2 + $0x38] sm:$0xff]  ;;  %v10146_v8 = vld [vmem:[#allocation2 + $0x48] sm:$0xff]  ;;  %v9140_v13 = vadd.f32 %v9076_v62, %v8859_v41  ;;  %v9930_v34 = vpop.f32.mrf.mxu0  ;;  %v13146_v55 = vpop.f32.mrf.mxu1 }
 0x2e9   : > { %10788 = vst.msk [vmem:[%s17069_s17 + $0xc] sm:$0xf] %vm10784_vm7, %v12231_v56  ;;  %10786 = vst.msk [vmem:[%s17069_s17 + $0x4] sm:$0xf] %vm10784_vm7, %v12229_v29  ;;  %v12234_v27 = vpack.c.bf16 %v10470_v18, %v10470_v18  ;;  %v10468_v35 = vmax.f32 %v10404_v40, 0.0  ;;  %v10407_v25 = vadd.f32 %v17055_v48, %v10336_v49  ;;  %v10210_v28 = vadd.f32 %v10146_v8, %v9917_v54  ;;  %v9083_v42 = vld [vmem:[#allocation2 + $0xa0] sm:$0xff] }
 0x2ea   : > { %9206 = vst.msk [vmem:[#allocation2 + $0x78] sm:$0xff] %vm511_vm0, %v9142_v17  ;;  %10276 = vst.msk [vmem:[#allocation2 + $0x58] sm:$0xff] %vm511_vm0, %v10212_v23  ;;  %v10334_v47 = vld [vmem:[#allocation2 + $0x28] sm:$0xff]  ;;  %v9145_v11 = vadd.f32 %v13146_v55, %v9081_v52  ;;  %v13215_v63 = vpop.f32.mrf.mxu0  ;;  %v8872_v58 = vpop.f32.mrf.mxu1  ;;  %v10151_v43 = vld [vmem:[#allocation2 + $0x70] sm:$0xff] }
 0x2eb   : > { %9204 = vst.msk [vmem:[#allocation2 + $0x68] sm:$0xff] %vm511_vm0, %v9140_v13  ;;  %v12232_v37 = vpack.c.bf16 %v10468_v35, %v10468_v35  ;;  %v10471_v33 = vmax.f32 %v10407_v25, 0.0  ;;  %v10405_v53 = vadd.f32 %v17055_v48, %v10334_v47  ;;  %10274 = vst.msk [vmem:[#allocation2 + $0x48] sm:$0xff] %vm511_vm0, %v10210_v28  ;;  %v9143_v1 = vadd.f32 %v9079_v45, %v8872_v58  ;;  %v9086_v8 = vld [vmem:[#allocation2 + $0xb8] sm:$0xff] }
 0x2ec   : > { %10791 = vst.msk [vmem:[%s17069_s17 + $0x18] sm:$0xf] %vm10784_vm7, %v12234_v27  ;;  %v10215_v39 = vadd.f32 %v13214_v57, %v10151_v43  ;;  %v9933_v44 = vpop.f32.mrf.mxu0  ;;  %v13147_v16 = vpop.f32.mrf.mxu1  ;;  %v10149_v50 = vld [vmem:[#allocation2 + $0x60] sm:$0xff] }
 0x2ed   : > { %v10339_v9 = vld [vmem:[#allocation2 + $0x50] sm:$0xff]  ;;  %9209 = vst.msk [vmem:[#allocation2 + $0x90] sm:$0xff] %vm511_vm0, %v9145_v11  ;;  %v12235_v2 = vpack.c.bf16 %v10471_v33, %v10471_v33  ;;  %v10469_v59 = vmax.f32 %v10405_v53, 0.0  ;;  %9207 = vst.msk [vmem:[#allocation2 + $0x80] sm:$0xff] %vm511_vm0, %v9143_v1  ;;  %v9146_v30 = vadd.f32 %v13147_v16, %v9082_v38  ;;  %v10213_v21 = vadd.f32 %v10149_v50, %v9930_v34  ;;  %v9084_v11 = vld [vmem:[#allocation2 + $0xa8] sm:$0xff] }
 0x2ee   : > { %10789 = vst.msk [vmem:[%s17069_s17 + $0x10] sm:$0xf] %vm10784_vm7, %v12232_v37  ;;  %v10410_v26 = vadd.f32 %v17055_v48, %v10339_v9  ;;  %v10337_v51 = vld [vmem:[#allocation2 + $0x40] sm:$0xff]  ;;  %v13218_v32 = vpop.f32.mrf.mxu0  ;;  %v8875_v36 = vpop.f32.mrf.mxu1 }
 0x2ef   : > { %10279 = vst.msk [vmem:[#allocation2 + $0x70] sm:$0xff] %vm511_vm0, %v10215_v39  ;;  %v12233_v19 = vpack.c.bf16 %v10469_v59, %v10469_v59  ;;  %v10408_v10 = vadd.f32 %v17055_v48, %v10337_v51  ;;  %9210 = vst.msk [vmem:[#allocation2 + $0x98] sm:$0xff] %vm511_vm0, %v9146_v30  ;;  %v9144_v0 = vadd.f32 %v9080_v6, %v8875_v36  ;;  %v9089_v39 = vld [vmem:[#allocation2 + $0xd0] sm:$0xff] }
 0x2f0   : > { %10792 = vst.msk [vmem:[%s17069_s17 + $0x1c] sm:$0xf] %vm10784_vm7, %v12235_v2  ;;  %v10474_v12 = vmax.f32 %v10410_v26, 0.0  ;;  %v9946_v22 = vpop.f32.mrf.mxu0  ;;  %v13150_v31 = vpop.f32.mrf.mxu1 }
 0x2f1   : > { %v10152_v60 = vld [vmem:[#allocation2 + $0x78] sm:$0xff]  ;;  %10277 = vst.msk [vmem:[#allocation2 + $0x60] sm:$0xff] %vm511_vm0, %v10213_v21  ;;  %v10472_v54 = vmax.f32 %v10408_v10, 0.0  ;;  %9208 = vst.msk [vmem:[#allocation2 + $0x88] sm:$0xff] %vm511_vm0, %v9144_v0  ;;  %v9149_v3 = vadd.f32 %v13150_v31, %v9085_v24  ;;  %v9087_v21 = vld [vmem:[#allocation2 + $0xc0] sm:$0xff] }
 0x2f2   : > { %v10340_v14 = vld [vmem:[#allocation2 + $0x58] sm:$0xff]  ;;  %v10216_v7 = vadd.f32 %v13215_v63, %v10152_v60  ;;  %10790 = vst.msk [vmem:[%s17069_s17 + $0x14] sm:$0xf] %vm10784_vm7, %v12233_v19  ;;  %v12238_v5 = vpack.c.bf16 %v10474_v12, %v10474_v12  ;;  %v10150_v56 = vld [vmem:[#allocation2 + $0x68] sm:$0xff]  ;;  %v13219_v46 = vpop.f32.mrf.mxu0  ;;  %v8888_v4 = vpop.f32.mrf.mxu1 }
 0x2f3   : > { %v10411_v15 = vadd.f32 %v17055_v48, %v10340_v14  ;;  %v10338_v61 = vld [vmem:[#allocation2 + $0x48] sm:$0xff]  ;;  %v10214_v20 = vadd.f32 %v10150_v56, %v9933_v44  ;;  %v12236_v17 = vpack.c.bf16 %v10472_v54, %v10472_v54  ;;  %9213 = vst.msk [vmem:[#allocation2 + $0xb0] sm:$0xff] %vm511_vm0, %v9149_v3  ;;  %v9147_v18 = vadd.f32 %v9083_v42, %v8888_v4 }
 0x2f4   : > { %10280 = vst.msk [vmem:[#allocation2 + $0x78] sm:$0xff] %vm511_vm0, %v10216_v7  ;;  %v10409_v41 = vadd.f32 %v17055_v48, %v10338_v61  ;;  %v10155_v29 = vld [vmem:[#allocation2 + $0x90] sm:$0xff]  ;;  %v10153_v23 = vld [vmem:[#allocation2 + $0x80] sm:$0xff]  ;;  %v9949_v62 = vpop.f32.mrf.mxu0  ;;  %v13151_v49 = vpop.f32.mrf.mxu1  ;;  %v9090_v7 = vld [vmem:[#allocation2 + $0xd8] sm:$0xff] }
 0x2f5   : > { %10795 = vst.msk [vmem:[%s17069_s17 + $0x28] sm:$0xf] %vm10784_vm7, %v12238_v5  ;;  %v10475_v57 = vmax.f32 %v10411_v15, 0.0  ;;  %v10219_v40 = vadd.f32 %v13218_v32, %v10155_v29  ;;  %10793 = vst.msk [vmem:[%s17069_s17 + $0x20] sm:$0xf] %vm10784_vm7, %v12236_v17  ;;  %v10217_v27 = vadd.f32 %v10153_v23, %v9946_v22  ;;  %v9150_v35 = vadd.f32 %v13151_v49, %v9086_v8 }
 0x2f6   : > { %10278 = vst.msk [vmem:[#allocation2 + $0x68] sm:$0xff] %vm511_vm0, %v10214_v20  ;;  %v10473_v34 = vmax.f32 %v10409_v41, 0.0  ;;  %v10343_v55 = vld [vmem:[#allocation2 + $0x70] sm:$0xff]  ;;  %9211 = vst.msk [vmem:[#allocation2 + $0xa0] sm:$0xff] %vm511_vm0, %v9147_v18  ;;  %v10156_v28 = vld [vmem:[#allocation2 + $0x98] sm:$0xff]  ;;  %v13222_v52 = vpop.f32.mrf.mxu0  ;;  %v8891_v47 = vpop.f32.mrf.mxu1 }
 0x2f7   : > { %v12239_v13 = vpack.c.bf16 %v10475_v57, %v10475_v57  ;;  %v10414_v25 = vadd.f32 %v17055_v48, %v10343_v55  ;;  %10283 = vst.msk [vmem:[#allocation2 + $0x90] sm:$0xff] %vm511_vm0, %v10219_v40  ;;  %10281 = vst.msk [vmem:[#allocation2 + $0x80] sm:$0xff] %vm511_vm0, %v10217_v27  ;;  %v10220_v45 = vadd.f32 %v13219_v46, %v10156_v28  ;;  %v9088_v46 = vld [vmem:[#allocation2 + $0xc8] sm:$0xff] }
 0x2f8   : > { %v12237_v63 = vpack.c.bf16 %v10473_v34, %v10473_v34  ;;  %v10341_v58 = vld [vmem:[#allocation2 + $0x60] sm:$0xff]  ;;  %9214 = vst.msk [vmem:[#allocation2 + $0xb8] sm:$0xff] %vm511_vm0, %v9150_v35  ;;  %v9148_v37 = vadd.f32 %v9084_v11, %v8891_v47  ;;  %v10154_v43 = vld [vmem:[#allocation2 + $0x88] sm:$0xff]  ;;  %v9962_v1 = vpop.f32.mrf.mxu0  ;;  %v13154_v9 = vpop.f32.mrf.mxu1 }
 0x2f9   : > { %10796 = vst.msk [vmem:[%s17069_s17 + $0x2c] sm:$0xf] %vm10784_vm7, %v12239_v13  ;;  %v10478_v33 = vmax.f32 %v10414_v25, 0.0  ;;  %v10412_v53 = vadd.f32 %v17055_v48, %v10341_v58  ;;  %v10218_v16 = vadd.f32 %v10154_v43, %v9949_v62  ;;  %v9153_v38 = vadd.f32 %v13154_v9, %v9089_v39 }
 0x2fa   : > { %10794 = vst.msk [vmem:[%s17069_s17 + $0x24] sm:$0xf] %vm10784_vm7, %v12237_v63  ;;  %v10159_v50 = vld [vmem:[#allocation2 + $0xb0] sm:$0xff]  ;;  %v13223_v30 = vpop.f32.mrf.mxu0  ;;  %v8904_v51 = vpop.f32.mrf.mxu1 }
 0x2fb   : > { %v10344_v44 = vld [vmem:[#allocation2 + $0x78] sm:$0xff]  ;;  %10284 = vst.msk [vmem:[#allocation2 + $0x98] sm:$0xff] %vm511_vm0, %v10220_v45  ;;  %9212 = vst.msk [vmem:[#allocation2 + $0xa8] sm:$0xff] %vm511_vm0, %v9148_v37  ;;  %v12242_v2 = vpack.c.bf16 %v10478_v33, %v10478_v33  ;;  %v10476_v59 = vmax.f32 %v10412_v53, 0.0  ;;  %v10223_v36 = vadd.f32 %v13222_v52, %v10159_v50  ;;  %v9151_v6 = vadd.f32 %v9087_v21, %v8904_v51  ;;  %v9093_v53 = vld [vmem:[#allocation2 + $0xf0] sm:$0xff] }
 0x2fc   : > { %v10415_v26 = vadd.f32 %v17055_v48, %v10344_v44  ;;  %10282 = vst.msk [vmem:[#allocation2 + $0x88] sm:$0xff] %vm511_vm0, %v10218_v16  ;;  %9217 = vst.msk [vmem:[#allocation2 + $0xd0] sm:$0xff] %vm511_vm0, %v9153_v38  ;;  %v9965_v0 = vpop.f32.mrf.mxu0  ;;  %v13155_v14 = vpop.f32.mrf.mxu1 }
 0x2fd   : > { %v10342_v32 = vld [vmem:[#allocation2 + $0x68] sm:$0xff]  ;;  %10799 = vst.msk [vmem:[%s17069_s17 + $0x38] sm:$0xf] %vm10784_vm7, %v12242_v2  ;;  %v12240_v19 = vpack.c.bf16 %v10476_v59, %v10476_v59  ;;  %v10157_v60 = vld [vmem:[#allocation2 + $0xa0] sm:$0xff]  ;;  %v9154_v24 = vadd.f32 %v13155_v14, %v9090_v7 }
 0x2fe   : > { %v10479_v12 = vmax.f32 %v10415_v26, 0.0  ;;  %v10413_v10 = vadd.f32 %v17055_v48, %v10342_v32  ;;  %v10347_v22 = vld [vmem:[#allocation2 + $0x90] sm:$0xff]  ;;  %10287 = vst.msk [vmem:[#allocation2 + $0xb0] sm:$0xff] %vm511_vm0, %v10223_v36  ;;  %v10221_v31 = vadd.f32 %v10157_v60, %v9962_v1  ;;  %9215 = vst.msk [vmem:[#allocation2 + $0xc0] sm:$0xff] %vm511_vm0, %v9151_v6  ;;  %v10345_v56 = vld [vmem:[#allocation2 + $0x80] sm:$0xff]  ;;  %v13226_v61 = vpop.f32.mrf.mxu0  ;;  %v8907_v20 = vpop.f32.mrf.mxu1 }
 0x2ff   : > { %10797 = vst.msk [vmem:[%s17069_s17 + $0x30] sm:$0xf] %vm10784_vm7, %v12240_v19  ;;  %v10418_v15 = vadd.f32 %v17055_v48, %v10347_v22  ;;  %v10160_v3 = vld [vmem:[#allocation2 + $0xb8] sm:$0xff]  ;;  %v10416_v4 = vadd.f32 %v17055_v48, %v10345_v56  ;;  %v9152_v17 = vadd.f32 %v9088_v46, %v8907_v20  ;;  %v9091_v26 = vld [vmem:[#allocation2 + $0xe0] sm:$0xff] }
 0x300   : > { %v12243_v5 = vpack.c.bf16 %v10479_v12, %v10479_v12  ;;  %v10477_v54 = vmax.f32 %v10413_v10, 0.0  ;;  %10285 = vst.msk [vmem:[#allocation2 + $0xa0] sm:$0xff] %vm511_vm0, %v10221_v31  ;;  %v10224_v42 = vadd.f32 %v13223_v30, %v10160_v3  ;;  %9218 = vst.msk [vmem:[#allocation2 + $0xd8] sm:$0xff] %vm511_vm0, %v9154_v24  ;;  %v9978_v40 = vpop.f32.mrf.mxu0  ;;  %v9094_v12 = vld [vmem:[#allocation2 + $0xf8] sm:$0xff]  ;;  %v9092_v24 = vld [vmem:[#allocation2 + $0xe8] sm:$0xff] }
 0x301   : > { %v10482_v41 = vmax.f32 %v10418_v15, 0.0  ;;  %v10480_v23 = vmax.f32 %v10416_v4, 0.0  ;;  %9216 = vst.msk [vmem:[#allocation2 + $0xc8] sm:$0xff] %vm511_vm0, %v9152_v17 }
 0x302   : > { %10800 = vst.msk [vmem:[%s17069_s17 + $0x3c] sm:$0xf] %vm10784_vm7, %v12243_v5  ;;  %v12241_v57 = vpack.c.bf16 %v10477_v54, %v10477_v54  ;;  %v10348_v29 = vld [vmem:[#allocation2 + $0x98] sm:$0xff]  ;;  %v10158_v18 = vld [vmem:[#allocation2 + $0xa8] sm:$0xff]  ;;  %v13227_v55 = vpop.f32.mrf.mxu0 }
 0x303   : > { %v10419_v62 = vadd.f32 %v17055_v48, %v10348_v29  ;;  %10288 = vst.msk [vmem:[#allocation2 + $0xb8] sm:$0xff] %vm511_vm0, %v10224_v42  ;;  %v10222_v49 = vadd.f32 %v10158_v18, %v9965_v0  ;;  %v12246_v8 = vpack.c.bf16 %v10482_v41, %v10482_v41  ;;  %v10346_v13 = vld [vmem:[#allocation2 + $0x88] sm:$0xff]  ;;  %v10163_v34 = vld [vmem:[#allocation2 + $0xd0] sm:$0xff]  ;;  %v12244_v27 = vpack.c.bf16 %v10480_v23, %v10480_v23 }
 0x304   : > { %10798 = vst.msk [vmem:[%s17069_s17 + $0x34] sm:$0xf] %vm10784_vm7, %v12241_v57  ;;  %v10417_v25 = vadd.f32 %v17055_v48, %v10346_v13  ;;  %v10227_v28 = vadd.f32 %v13226_v61, %v10163_v34  ;;  %v9981_v11 = vpop.f32.mrf.mxu0 }
 0x305   : > { %v10483_v35 = vmax.f32 %v10419_v62, 0.0  ;;  %10286 = vst.msk [vmem:[#allocation2 + $0xa8] sm:$0xff] %vm511_vm0, %v10222_v49  ;;  %v10351_v52 = vld [vmem:[#allocation2 + $0xb0] sm:$0xff]  ;;  %v10161_v47 = vld [vmem:[#allocation2 + $0xc0] sm:$0xff]  ;;  %v13158_v33 = vpop.f32.mrf.mxu1 }
 0x306   : > { %10803 = vst.msk [vmem:[%s17069_s17 + $0x48] sm:$0xf] %vm10784_vm7, %v12246_v8  ;;  %10801 = vst.msk [vmem:[%s17069_s17 + $0x40] sm:$0xf] %vm10784_vm7, %v12244_v27  ;;  %v10481_v58 = vmax.f32 %v10417_v25, 0.0  ;;  %v10422_v45 = vadd.f32 %v17055_v48, %v10351_v52  ;;  %v10225_v37 = vadd.f32 %v10161_v47, %v9978_v40  ;;  %v9157_v1 = vadd.f32 %v13158_v33, %v9093_v53  ;;  %v13230_v39 = vpop.f32.mrf.mxu0  ;;  %v9097_v49 = vld [vmem:[#allocation2 + $0x110] sm:$0xff] }
 0x307   : > { %v12247_v63 = vpack.c.bf16 %v10483_v35, %v10483_v35  ;;  %10291 = vst.msk [vmem:[#allocation2 + $0xd0] sm:$0xff] %vm511_vm0, %v10227_v28  ;;  %v10349_v43 = vld [vmem:[#allocation2 + $0xa0] sm:$0xff]  ;;  %v10164_v9 = vld [vmem:[#allocation2 + $0xd8] sm:$0xff]  ;;  %v8920_v59 = vpop.f32.mrf.mxu1 }
 0x308   : > { %v12245_v44 = vpack.c.bf16 %v10481_v58, %v10481_v58  ;;  %v10486_v16 = vmax.f32 %v10422_v45, 0.0  ;;  %v10420_v38 = vadd.f32 %v17055_v48, %v10349_v43  ;;  %10289 = vst.msk [vmem:[#allocation2 + $0xc0] sm:$0xff] %vm511_vm0, %v10225_v37  ;;  %v10228_v2 = vadd.f32 %v13227_v55, %v10164_v9  ;;  %9221 = vst.msk [vmem:[#allocation2 + $0xf0] sm:$0xff] %vm511_vm0, %v9157_v1  ;;  %v10162_v51 = vld [vmem:[#allocation2 + $0xc8] sm:$0xff]  ;;  %v9994_v0 = vpop.f32.mrf.mxu0  ;;  %v9095_v47 = vld [vmem:[#allocation2 + $0x100] sm:$0xff] }
 0x309   : > { %10804 = vst.msk [vmem:[%s17069_s17 + $0x4c] sm:$0xf] %vm10784_vm7, %v12247_v63  ;;  %v9155_v30 = vadd.f32 %v9091_v26, %v8920_v59  ;;  %v10226_v6 = vadd.f32 %v10162_v51, %v9981_v11  ;;  %v13159_v19 = vpop.f32.mrf.mxu1  ;;  %v9098_v53 = vld [vmem:[#allocation2 + $0x118] sm:$0xff] }
 0x30a   : > { %v10352_v50 = vld [vmem:[#allocation2 + $0xb8] sm:$0xff]  ;;  %10802 = vst.msk [vmem:[%s17069_s17 + $0x44] sm:$0xf] %vm10784_vm7, %v12245_v44  ;;  %v12250_v21 = vpack.c.bf16 %v10486_v16, %v10486_v16  ;;  %v10484_v32 = vmax.f32 %v10420_v38, 0.0  ;;  %v9158_v60 = vadd.f32 %v13159_v19, %v9094_v12  ;;  %v13231_v20 = vpop.f32.mrf.mxu0  ;;  %v9096_v16 = vld [vmem:[#allocation2 + $0x108] sm:$0xff] }
 0x30b   : > { %v10423_v36 = vadd.f32 %v17055_v48, %v10352_v50  ;;  %10292 = vst.msk [vmem:[#allocation2 + $0xd8] sm:$0xff] %vm511_vm0, %v10228_v2  ;;  %9219 = vst.msk [vmem:[#allocation2 + $0xe0] sm:$0xff] %vm511_vm0, %v9155_v30  ;;  %v8923_v31 = vpop.f32.mrf.mxu1 }
 0x30c   : > { %v10350_v10 = vld [vmem:[#allocation2 + $0xa8] sm:$0xff]  ;;  %10807 = vst.msk [vmem:[%s17069_s17 + $0x58] sm:$0xf] %vm10784_vm7, %v12250_v21  ;;  %v12248_v14 = vpack.c.bf16 %v10484_v32, %v10484_v32  ;;  %v9156_v54 = vadd.f32 %v9092_v24, %v8923_v31  ;;  %v9997_v55 = vpop.f32.mrf.mxu0 }
 0x30d   : > { %v10487_v7 = vmax.f32 %v10423_v36, 0.0  ;;  %v10421_v22 = vadd.f32 %v17055_v48, %v10350_v10  ;;  %10290 = vst.msk [vmem:[#allocation2 + $0xc8] sm:$0xff] %vm511_vm0, %v10226_v6  ;;  %9222 = vst.msk [vmem:[#allocation2 + $0xf8] sm:$0xff] %vm511_vm0, %v9158_v60 }
 0x30e   : > { %v10355_v5 = vld [vmem:[#allocation2 + $0xd0] sm:$0xff]  ;;  %10805 = vst.msk [vmem:[%s17069_s17 + $0x50] sm:$0xf] %vm10784_vm7, %v12248_v14 }
 0x30f   : > { %v12251_v15 = vpack.c.bf16 %v10487_v7, %v10487_v7  ;;  %v10485_v56 = vmax.f32 %v10421_v22, 0.0  ;;  %v10426_v3 = vadd.f32 %v17055_v48, %v10355_v5  ;;  %v10353_v61 = vld [vmem:[#allocation2 + $0xc0] sm:$0xff]  ;;  %9220 = vst.msk [vmem:[#allocation2 + $0xe8] sm:$0xff] %vm511_vm0, %v9156_v54  ;;  %v10167_v17 = vld [vmem:[#allocation2 + $0xf0] sm:$0xff] }
 0x310   : > { %v10424_v42 = vadd.f32 %v17055_v48, %v10353_v61  ;;  %v10231_v41 = vadd.f32 %v13230_v39, %v10167_v17 }
 0x311   : > { %10808 = vst.msk [vmem:[%s17069_s17 + $0x5c] sm:$0xf] %vm10784_vm7, %v12251_v15  ;;  %v12249_v46 = vpack.c.bf16 %v10485_v56, %v10485_v56  ;;  %v10490_v4 = vmax.f32 %v10426_v3, 0.0  ;;  %v13162_v62 = vpop.f32.mrf.mxu1  ;;  %v9101_v56 = vld [vmem:[#allocation2 + $0x130] sm:$0xff] }
 0x312   : > { %v10356_v57 = vld [vmem:[#allocation2 + $0xd8] sm:$0xff]  ;;  %v10488_v18 = vmax.f32 %v10424_v42, 0.0  ;;  %v10165_v23 = vld [vmem:[#allocation2 + $0xe0] sm:$0xff]  ;;  %10295 = vst.msk [vmem:[#allocation2 + $0xf0] sm:$0xff] %vm511_vm0, %v10231_v41  ;;  %v9161_v34 = vadd.f32 %v13162_v62, %v9097_v49 }
 0x313   : > { %10806 = vst.msk [vmem:[%s17069_s17 + $0x54] sm:$0xf] %vm10784_vm7, %v12249_v46  ;;  %v12254_v29 = vpack.c.bf16 %v10490_v4, %v10490_v4  ;;  %v10427_v40 = vadd.f32 %v17055_v48, %v10356_v57  ;;  %v10229_v13 = vadd.f32 %v10165_v23, %v9994_v0  ;;  %v8936_v52 = vpop.f32.mrf.mxu1  ;;  %v9099_v57 = vld [vmem:[#allocation2 + $0x120] sm:$0xff]  ;;  %v9102_v62 = vld [vmem:[#allocation2 + $0x138] sm:$0xff] }
 0x314   : > { %v10354_v8 = vld [vmem:[#allocation2 + $0xc8] sm:$0xff]  ;;  %v12252_v27 = vpack.c.bf16 %v10488_v18, %v10488_v18  ;;  %v10168_v28 = vld [vmem:[#allocation2 + $0xf8] sm:$0xff]  ;;  %9225 = vst.msk [vmem:[#allocation2 + $0x110] sm:$0xff] %vm511_vm0, %v9161_v34  ;;  %v9159_v63 = vadd.f32 %v9095_v47, %v8936_v52 }
 0x315   : > { %10811 = vst.msk [vmem:[%s17069_s17 + $0x68] sm:$0xf] %vm10784_vm7, %v12254_v29  ;;  %v10491_v35 = vmax.f32 %v10427_v40, 0.0  ;;  %v10425_v25 = vadd.f32 %v17055_v48, %v10354_v8  ;;  %v10232_v11 = vadd.f32 %v13231_v20, %v10168_v28  ;;  %v13163_v33 = vpop.f32.mrf.mxu1 }
 0x316   : > { %10293 = vst.msk [vmem:[#allocation2 + $0xe0] sm:$0xff] %vm511_vm0, %v10229_v13  ;;  %v10166_v37 = vld [vmem:[#allocation2 + $0xe8] sm:$0xff]  ;;  %9223 = vst.msk [vmem:[#allocation2 + $0x100] sm:$0xff] %vm511_vm0, %v9159_v63  ;;  %v9162_v1 = vadd.f32 %v13163_v33, %v9098_v53  ;;  %v13234_v9 = vpop.f32.mrf.mxu0 }
 0x317   : > { %10809 = vst.msk [vmem:[%s17069_s17 + $0x60] sm:$0xf] %vm10784_vm7, %v12252_v27  ;;  %v12255_v58 = vpack.c.bf16 %v10491_v35, %v10491_v35  ;;  %v10489_v45 = vmax.f32 %v10425_v25, 0.0  ;;  %v10230_v43 = vadd.f32 %v10166_v37, %v9997_v55  ;;  %v8939_v44 = vpop.f32.mrf.mxu1  ;;  %v9100_v55 = vld [vmem:[#allocation2 + $0x128] sm:$0xff] }
 0x318   : > { %10296 = vst.msk [vmem:[#allocation2 + $0xf8] sm:$0xff] %vm511_vm0, %v10232_v11  ;;  %9226 = vst.msk [vmem:[#allocation2 + $0x118] sm:$0xff] %vm511_vm0, %v9162_v1  ;;  %v9160_v38 = vadd.f32 %v9096_v16, %v8939_v44  ;;  %v10010_v2 = vpop.f32.mrf.mxu0  ;;  %v9105_v44 = vld [vmem:[#allocation2 + $0x150] sm:$0xff] }
 0x319   : > { %10812 = vst.msk [vmem:[%s17069_s17 + $0x6c] sm:$0xf] %vm10784_vm7, %v12255_v58  ;;  %v12253_v39 = vpack.c.bf16 %v10489_v45, %v10489_v45  ;;  %v10359_v59 = vld [vmem:[#allocation2 + $0xf0] sm:$0xff] }
 0x31a   : > { %10294 = vst.msk [vmem:[#allocation2 + $0xe8] sm:$0xff] %vm511_vm0, %v10230_v43  ;;  %v10430_v26 = vadd.f32 %v17055_v48, %v10359_v59  ;;  %9224 = vst.msk [vmem:[#allocation2 + $0x108] sm:$0xff] %vm511_vm0, %v9160_v38  ;;  %v13235_v50 = vpop.f32.mrf.mxu0 }
 0x31b   : > { %10810 = vst.msk [vmem:[%s17069_s17 + $0x64] sm:$0xf] %vm10784_vm7, %v12253_v39  ;;  %v10171_v51 = vld [vmem:[#allocation2 + $0x110] sm:$0xff] }
 0x31c   : > { %v10494_v21 = vmax.f32 %v10430_v26, 0.0  ;;  %v10235_v36 = vadd.f32 %v13234_v9, %v10171_v51  ;;  %v10013_v14 = vpop.f32.mrf.mxu0 }
 0x31d   : > { %v10357_v30 = vld [vmem:[#allocation2 + $0xe0] sm:$0xff] }
 0x31e   : > { %v10428_v32 = vadd.f32 %v17055_v48, %v10357_v30  ;;  %v10169_v19 = vld [vmem:[#allocation2 + $0x100] sm:$0xff]  ;;  %v12258_v12 = vpack.c.bf16 %v10494_v21, %v10494_v21  ;;  %10299 = vst.msk [vmem:[#allocation2 + $0x110] sm:$0xff] %vm511_vm0, %v10235_v36 }
 0x31f   : > { %v10360_v6 = vld [vmem:[#allocation2 + $0xf8] sm:$0xff]  ;;  %v10233_v0 = vadd.f32 %v10169_v19, %v10010_v2  ;;  %v9103_v30 = vld [vmem:[#allocation2 + $0x140] sm:$0xff] }
 0x320   : > { %v10492_v10 = vmax.f32 %v10428_v32, 0.0  ;;  %v10431_v60 = vadd.f32 %v17055_v48, %v10360_v6  ;;  %v10172_v22 = vld [vmem:[#allocation2 + $0x118] sm:$0xff]  ;;  %10815 = vst.msk [vmem:[%s17069_s17 + $0x78] sm:$0xf] %vm10784_vm7, %v12258_v12  ;;  %v13166_v15 = vpop.f32.mrf.mxu1 }
 0x321   : > { %v10358_v7 = vld [vmem:[#allocation2 + $0xe8] sm:$0xff]  ;;  %10297 = vst.msk [vmem:[#allocation2 + $0x100] sm:$0xff] %vm511_vm0, %v10233_v0  ;;  %v10236_v54 = vadd.f32 %v13235_v50, %v10172_v22  ;;  %v9165_v46 = vadd.f32 %v13166_v15, %v9101_v56  ;;  %v9106_v12 = vld [vmem:[#allocation2 + $0x158] sm:$0xff] }
 0x322   : > { %v12256_v31 = vpack.c.bf16 %v10492_v10, %v10492_v10  ;;  %v10495_v24 = vmax.f32 %v10431_v60, 0.0  ;;  %v10429_v5 = vadd.f32 %v17055_v48, %v10358_v7  ;;  %v10170_v3 = vld [vmem:[#allocation2 + $0x108] sm:$0xff]  ;;  %v13238_v42 = vpop.f32.mrf.mxu0  ;;  %v8952_v17 = vpop.f32.mrf.mxu1 }
 0x323   : > { %10300 = vst.msk [vmem:[#allocation2 + $0x118] sm:$0xff] %vm511_vm0, %v10236_v54  ;;  %v10234_v4 = vadd.f32 %v10170_v3, %v10013_v14  ;;  %9229 = vst.msk [vmem:[#allocation2 + $0x130] sm:$0xff] %vm511_vm0, %v9165_v46  ;;  %v9163_v29 = vadd.f32 %v9099_v57, %v8952_v17  ;;  %v9104_v7 = vld [vmem:[#allocation2 + $0x148] sm:$0xff] }
 0x324   : > { %10813 = vst.msk [vmem:[%s17069_s17 + $0x70] sm:$0xf] %vm10784_vm7, %v12256_v31  ;;  %v12259_v61 = vpack.c.bf16 %v10495_v24, %v10495_v24  ;;  %v10493_v20 = vmax.f32 %v10429_v5, 0.0  ;;  %v10026_v18 = vpop.f32.mrf.mxu0  ;;  %v13167_v23 = vpop.f32.mrf.mxu1 }
 0x325   : > { %10298 = vst.msk [vmem:[#allocation2 + $0x108] sm:$0xff] %vm511_vm0, %v10234_v4  ;;  %v10363_v40 = vld [vmem:[#allocation2 + $0x110] sm:$0xff]  ;;  %9227 = vst.msk [vmem:[#allocation2 + $0x120] sm:$0xff] %vm511_vm0, %v9163_v29  ;;  %v9166_v8 = vadd.f32 %v13167_v23, %v9102_v62 }
 0x326   : > { %10816 = vst.msk [vmem:[%s17069_s17 + $0x7c] sm:$0xf] %vm10784_vm7, %v12259_v61  ;;  %v12257_v41 = vpack.c.bf16 %v10493_v20, %v10493_v20  ;;  %v10434_v49 = vadd.f32 %v17055_v48, %v10363_v40  ;;  %v8955_v34 = vpop.f32.mrf.mxu1  ;;  %v13239_v27 = vpop.f32.mrf.mxu0  ;;  %v9109_v40 = vld [vmem:[#allocation2 + $0x170] sm:$0xff] }
 0x327   : > { %9230 = vst.msk [vmem:[#allocation2 + $0x138] sm:$0xff] %vm511_vm0, %v9166_v8  ;;  %v9164_v28 = vadd.f32 %v9100_v55, %v8955_v34 }
 0x328   : > { %10814 = vst.msk [vmem:[%s17069_s17 + $0x74] sm:$0xf] %vm10784_vm7, %v12257_v41  ;;  %v10361_v13 = vld [vmem:[#allocation2 + $0x100] sm:$0xff]  ;;  %v10498_v35 = vmax.f32 %v10434_v49, 0.0  ;;  %v10029_v37 = vpop.f32.mrf.mxu0 }
 0x329   : > { %v10432_v25 = vadd.f32 %v17055_v48, %v10361_v13  ;;  %9228 = vst.msk [vmem:[#allocation2 + $0x128] sm:$0xff] %vm511_vm0, %v9164_v28 }
 0x32a   : > { %v10364_v52 = vld [vmem:[#allocation2 + $0x118] sm:$0xff]  ;;  %v12262_v47 = vpack.c.bf16 %v10498_v35, %v10498_v35  ;;  %v10175_v45 = vld [vmem:[#allocation2 + $0x130] sm:$0xff] }
 0x32b   : > { %v10496_v11 = vmax.f32 %v10432_v25, 0.0  ;;  %v10435_v63 = vadd.f32 %v17055_v48, %v10364_v52  ;;  %v10239_v1 = vadd.f32 %v13238_v42, %v10175_v45 }
 0x32c   : > { %v10362_v58 = vld [vmem:[#allocation2 + $0x108] sm:$0xff]  ;;  %10819 = vst.msk [vmem:[%s17069_s17 + $0x88] sm:$0xf] %vm10784_vm7, %v12262_v47  ;;  %v10173_v9 = vld [vmem:[#allocation2 + $0x120] sm:$0xff] }
 0x32d   : > { %v12260_v33 = vpack.c.bf16 %v10496_v11, %v10496_v11  ;;  %v10499_v53 = vmax.f32 %v10435_v63, 0.0  ;;  %v10433_v43 = vadd.f32 %v17055_v48, %v10362_v58  ;;  %v13170_v39 = vpop.f32.mrf.mxu1  ;;  %10303 = vst.msk [vmem:[#allocation2 + $0x130] sm:$0xff] %vm511_vm0, %v10239_v1  ;;  %v10237_v2 = vadd.f32 %v10173_v9, %v10026_v18  ;;  %v9110_v63 = vld [vmem:[#allocation2 + $0x178] sm:$0xff]  ;;  %v17265_v1 = vld [vmem:[%s17388_s2] ss:$0 sm:$0xff] }
 0x32e   : > { %v9169_v59 = vadd.f32 %v13170_v39, %v9105_v44  ;;  %v10176_v26 = vld [vmem:[#allocation2 + $0x138] sm:$0xff] }
 0x32f   : > { %10817 = vst.msk [vmem:[%s17069_s17 + $0x80] sm:$0xf] %vm10784_vm7, %v12260_v33  ;;  %v12263_v16 = vpack.c.bf16 %v10499_v53, %v10499_v53  ;;  %v10497_v38 = vmax.f32 %v10433_v43, 0.0  ;;  %v8968_v50 = vpop.f32.mrf.mxu1  ;;  %v13242_v51 = vpop.f32.mrf.mxu0  ;;  %v10240_v32 = vadd.f32 %v13239_v27, %v10176_v26  ;;  %v9107_v27 = vld [vmem:[#allocation2 + $0x160] sm:$0xff]  ;;  %v9108_v43 = vld [vmem:[#allocation2 + $0x168] sm:$0xff] }
 0x330   : > { %10301 = vst.msk [vmem:[#allocation2 + $0x120] sm:$0xff] %vm511_vm0, %v10237_v2  ;;  %9233 = vst.msk [vmem:[#allocation2 + $0x150] sm:$0xff] %vm511_vm0, %v9169_v59  ;;  %v9167_v36 = vadd.f32 %v9103_v30, %v8968_v50  ;;  %v10174_v6 = vld [vmem:[#allocation2 + $0x128] sm:$0xff] }
 0x331   : > { %10820 = vst.msk [vmem:[%s17069_s17 + $0x8c] sm:$0xf] %vm10784_vm7, %v12263_v16  ;;  %v12261_v21 = vpack.c.bf16 %v10497_v38, %v10497_v38  ;;  %v13171_v19 = vpop.f32.mrf.mxu1  ;;  %v10042_v10 = vpop.f32.mrf.mxu0  ;;  %v10238_v60 = vadd.f32 %v10174_v6, %v10029_v37 }
 0x332   : > { %10304 = vst.msk [vmem:[#allocation2 + $0x138] sm:$0xff] %vm511_vm0, %v10240_v32  ;;  %9231 = vst.msk [vmem:[#allocation2 + $0x140] sm:$0xff] %vm511_vm0, %v9167_v36  ;;  %v9170_v0 = vadd.f32 %v13171_v19, %v9106_v12 }
 0x333   : > { %10818 = vst.msk [vmem:[%s17069_s17 + $0x84] sm:$0xf] %vm10784_vm7, %v12261_v21  ;;  %v8971_v14 = vpop.f32.mrf.mxu1  ;;  %v13243_v24 = vpop.f32.mrf.mxu0 }
 0x334   : > { %10302 = vst.msk [vmem:[#allocation2 + $0x128] sm:$0xff] %vm511_vm0, %v10238_v60  ;;  %9234 = vst.msk [vmem:[#allocation2 + $0x158] sm:$0xff] %vm511_vm0, %v9170_v0  ;;  %v9168_v22 = vadd.f32 %v9104_v7, %v8971_v14  ;;  %v10367_v31 = vld [vmem:[#allocation2 + $0x130] sm:$0xff] }
 0x335   : > { %v10438_v5 = vadd.f32 %v17055_v48, %v10367_v31  ;;  %v10045_v4 = vpop.f32.mrf.mxu0  ;;  %v9113_v14 = vld [vmem:[#allocation2 + $0x190] sm:$0xff] }
 0x336   : > { %9232 = vst.msk [vmem:[#allocation2 + $0x148] sm:$0xff] %vm511_vm0, %v9168_v22 }
 0x337   : > { %v10365_v54 = vld [vmem:[#allocation2 + $0x120] sm:$0xff]  ;;  %v10179_v15 = vld [vmem:[#allocation2 + $0x150] sm:$0xff]  ;;  %v10502_v56 = vmax.f32 %v10438_v5, 0.0 }
 0x338   : > { %v10436_v3 = vadd.f32 %v17055_v48, %v10365_v54  ;;  %v10243_v61 = vadd.f32 %v13242_v51, %v10179_v15  ;;  %v9111_v15 = vld [vmem:[#allocation2 + $0x180] sm:$0xff] }
 0x339   : > { %v10368_v20 = vld [vmem:[#allocation2 + $0x138] sm:$0xff]  ;;  %v10177_v46 = vld [vmem:[#allocation2 + $0x140] sm:$0xff]  ;;  %v12266_v42 = vpack.c.bf16 %v10502_v56, %v10502_v56 }
 0x33a   : > { %v10500_v17 = vmax.f32 %v10436_v3, 0.0  ;;  %v10439_v57 = vadd.f32 %v17055_v48, %v10368_v20  ;;  %10307 = vst.msk [vmem:[#allocation2 + $0x150] sm:$0xff] %vm511_vm0, %v10243_v61  ;;  %v10241_v41 = vadd.f32 %v10177_v46, %v10042_v10 }
 0x33b   : > { %v10366_v29 = vld [vmem:[#allocation2 + $0x128] sm:$0xff]  ;;  %v13174_v18 = vpop.f32.mrf.mxu1  ;;  %v10180_v23 = vld [vmem:[#allocation2 + $0x158] sm:$0xff]  ;;  %10823 = vst.msk [vmem:[%s17069_s17 + $0x98] sm:$0xf] %vm10784_vm7, %v12266_v42 }
 0x33c   : > { %v12264_v62 = vpack.c.bf16 %v10500_v17, %v10500_v17  ;;  %v10503_v49 = vmax.f32 %v10439_v57, 0.0  ;;  %v10437_v8 = vadd.f32 %v17055_v48, %v10366_v29  ;;  %10305 = vst.msk [vmem:[#allocation2 + $0x140] sm:$0xff] %vm511_vm0, %v10241_v41  ;;  %v9173_v13 = vadd.f32 %v13174_v18, %v9109_v40  ;;  %v9114_v42 = vld [vmem:[#allocation2 + $0x198] sm:$0xff]  ;;  %v9112_v18 = vld [vmem:[#allocation2 + $0x188] sm:$0xff] }
 0x33d   : > { %v10244_v34 = vadd.f32 %v13243_v24, %v10180_v23  ;;  %v8984_v55 = vpop.f32.mrf.mxu1  ;;  %v10178_v35 = vld [vmem:[#allocation2 + $0x148] sm:$0xff]  ;;  %v13246_v25 = vpop.f32.mrf.mxu0 }
 0x33e   : > { %10821 = vst.msk [vmem:[%s17069_s17 + $0x90] sm:$0xf] %vm10784_vm7, %v12264_v62  ;;  %v12267_v28 = vpack.c.bf16 %v10503_v49, %v10503_v49  ;;  %v10501_v52 = vmax.f32 %v10437_v8, 0.0  ;;  %v9171_v47 = vadd.f32 %v9107_v27, %v8984_v55  ;;  %v10242_v11 = vadd.f32 %v10178_v35, %v10045_v4 }
 0x33f   : > { %9237 = vst.msk [vmem:[#allocation2 + $0x170] sm:$0xff] %vm511_vm0, %v9173_v13  ;;  %10308 = vst.msk [vmem:[#allocation2 + $0x158] sm:$0xff] %vm511_vm0, %v10244_v34  ;;  %v13175_v48 = vpop.f32.mrf.mxu1  ;;  %v10058_v37 = vpop.f32.mrf.mxu0 }
 0x340   : > { %10824 = vst.msk [vmem:[%s17069_s17 + $0x9c] sm:$0xf] %vm10784_vm7, %v12267_v28  ;;  %v12265_v58 = vpack.c.bf16 %v10501_v52, %v10501_v52  ;;  %v9174_v45 = vadd.f32 %v13175_v48, %v9110_v63 }
 0x341   : > { %9235 = vst.msk [vmem:[#allocation2 + $0x160] sm:$0xff] %vm511_vm0, %v9171_v47  ;;  %10306 = vst.msk [vmem:[#allocation2 + $0x148] sm:$0xff] %vm511_vm0, %v10242_v11  ;;  %v10371_v33 = vld [vmem:[#allocation2 + $0x150] sm:$0xff]  ;;  %v8987_v53 = vpop.f32.mrf.mxu1  ;;  %v13247_v2 = vpop.f32.mrf.mxu0 }
 0x342   : > { %10822 = vst.msk [vmem:[%s17069_s17 + $0x94] sm:$0xf] %vm10784_vm7, %v12265_v58  ;;  %v10442_v9 = vadd.f32 %v17265_v1, %v10371_v33  ;;  %v9172_v39 = vadd.f32 %v9108_v43, %v8987_v53  ;;  %v9117_v33 = vld [vmem:[#allocation2 + $0x1b0] sm:$0xff] }
 0x343   : > { %9238 = vst.msk [vmem:[#allocation2 + $0x178] sm:$0xff] %vm511_vm0, %v9174_v45  ;;  %v10369_v44 = vld [vmem:[#allocation2 + $0x140] sm:$0xff]  ;;  %v10061_v10 = vpop.f32.mrf.mxu0 }
 0x344   : > { %v10506_v16 = vmax.f32 %v10442_v9, 0.0  ;;  %v10440_v38 = vadd.f32 %v17265_v1, %v10369_v44  ;;  %9236 = vst.msk [vmem:[#allocation2 + $0x168] sm:$0xff] %vm511_vm0, %v9172_v39 }
 0x346   : > { %v10183_v59 = vld [vmem:[#allocation2 + $0x170] sm:$0xff]  ;;  %v12270_v26 = vpack.c.bf16 %v10506_v16, %v10506_v16  ;;  %v10504_v50 = vmax.f32 %v10440_v38, 0.0  ;;  %v10372_v30 = vld [vmem:[#allocation2 + $0x158] sm:$0xff]  ;;  %v9115_v38 = vld [vmem:[#allocation2 + $0x1a0] sm:$0xff] }
 0x347   : > { %v10247_v51 = vadd.f32 %v13246_v25, %v10183_v59  ;;  %v10443_v21 = vadd.f32 %v17265_v1, %v10372_v30 }
 0x348   : > { %v10370_v32 = vld [vmem:[#allocation2 + $0x148] sm:$0xff]  ;;  %v10181_v36 = vld [vmem:[#allocation2 + $0x160] sm:$0xff]  ;;  %10827 = vst.msk [vmem:[%s17069_s17 + $0xa8] sm:$0xf] %vm10784_vm7, %v12270_v26  ;;  %v12268_v6 = vpack.c.bf16 %v10504_v50, %v10504_v50 }
 0x349   : > { %v10441_v19 = vadd.f32 %v17265_v1, %v10370_v32  ;;  %10311 = vst.msk [vmem:[#allocation2 + $0x170] sm:$0xff] %vm511_vm0, %v10247_v51  ;;  %v10245_v12 = vadd.f32 %v10181_v36, %v10058_v37  ;;  %v10507_v60 = vmax.f32 %v10443_v21, 0.0  ;;  %v13178_v0 = vpop.f32.mrf.mxu1  ;;  %v9118_v21 = vld [vmem:[#allocation2 + $0x1b8] sm:$0xff] }
 0x34a   : > { %v10184_v7 = vld [vmem:[#allocation2 + $0x178] sm:$0xff]  ;;  %10825 = vst.msk [vmem:[%s17069_s17 + $0xa0] sm:$0xf] %vm10784_vm7, %v12268_v6  ;;  %v9177_v31 = vadd.f32 %v13178_v0, %v9113_v14 }
 0x34b   : > { %v10505_v22 = vmax.f32 %v10441_v19, 0.0  ;;  %10309 = vst.msk [vmem:[#allocation2 + $0x160] sm:$0xff] %vm511_vm0, %v10245_v12  ;;  %v10248_v24 = vadd.f32 %v13247_v2, %v10184_v7  ;;  %v12271_v5 = vpack.c.bf16 %v10507_v60, %v10507_v60  ;;  %v9000_v54 = vpop.f32.mrf.mxu1  ;;  %v10182_v56 = vld [vmem:[#allocation2 + $0x168] sm:$0xff]  ;;  %v13250_v46 = vpop.f32.mrf.mxu0 }
 0x34c   : > { %9241 = vst.msk [vmem:[#allocation2 + $0x190] sm:$0xff] %vm511_vm0, %v9177_v31  ;;  %v9175_v61 = vadd.f32 %v9111_v15, %v9000_v54  ;;  %v10246_v20 = vadd.f32 %v10182_v56, %v10061_v10  ;;  %v9116_v19 = vld [vmem:[#allocation2 + $0x1a8] sm:$0xff] }
 0x34d   : > { %v12269_v3 = vpack.c.bf16 %v10505_v22, %v10505_v22  ;;  %10312 = vst.msk [vmem:[#allocation2 + $0x178] sm:$0xff] %vm511_vm0, %v10248_v24  ;;  %v13179_v4 = vpop.f32.mrf.mxu1  ;;  %v10074_v57 = vpop.f32.mrf.mxu0 }
 0x34e   : > { %10828 = vst.msk [vmem:[%s17069_s17 + $0xac] sm:$0xf] %vm10784_vm7, %v12271_v5  ;;  %v9178_v17 = vadd.f32 %v13179_v4, %v9114_v42  ;;  %v9121_v4 = vld [vmem:[#allocation2 + $0x1d0] sm:$0xff] }
 0x34f   : > { %10826 = vst.msk [vmem:[%s17069_s17 + $0xa4] sm:$0xf] %vm10784_vm7, %v12269_v3  ;;  %v9003_v29 = vpop.f32.mrf.mxu1  ;;  %v13251_v62 = vpop.f32.mrf.mxu0 }
 0x350   : > { %9239 = vst.msk [vmem:[#allocation2 + $0x180] sm:$0xff] %vm511_vm0, %v9175_v61  ;;  %10310 = vst.msk [vmem:[#allocation2 + $0x168] sm:$0xff] %vm511_vm0, %v10246_v20  ;;  %v10375_v41 = vld [vmem:[#allocation2 + $0x170] sm:$0xff]  ;;  %v9176_v23 = vadd.f32 %v9112_v18, %v9003_v29 }
 0x351   : > { %v10446_v40 = vadd.f32 %v17265_v1, %v10375_v41  ;;  %9242 = vst.msk [vmem:[#allocation2 + $0x198] sm:$0xff] %vm511_vm0, %v9178_v17  ;;  %v10077_v52 = vpop.f32.mrf.mxu0 }
 0x352   : > { %v10373_v49 = vld [vmem:[#allocation2 + $0x160] sm:$0xff]  ;;  %9240 = vst.msk [vmem:[#allocation2 + $0x188] sm:$0xff] %vm511_vm0, %v9176_v23 }
 0x353   : > { %v10510_v8 = vmax.f32 %v10446_v40, 0.0  ;;  %v10444_v13 = vadd.f32 %v17265_v1, %v10373_v49  ;;  %v10187_v55 = vld [vmem:[#allocation2 + $0x190] sm:$0xff] }
 0x354   : > { %v10376_v34 = vld [vmem:[#allocation2 + $0x178] sm:$0xff]  ;;  %v10251_v28 = vadd.f32 %v13250_v46, %v10187_v55 }
 0x355   : > { %v12274_v27 = vpack.c.bf16 %v10510_v8, %v10510_v8  ;;  %v10508_v35 = vmax.f32 %v10444_v13, 0.0  ;;  %v10447_v25 = vadd.f32 %v17265_v1, %v10376_v34 }
 0x356   : > { %10315 = vst.msk [vmem:[#allocation2 + $0x190] sm:$0xff] %vm511_vm0, %v10251_v28  ;;  %v13182_v37 = vpop.f32.mrf.mxu1 }
 0x357   : > { %v10374_v47 = vld [vmem:[#allocation2 + $0x168] sm:$0xff]  ;;  %v10185_v11 = vld [vmem:[#allocation2 + $0x180] sm:$0xff]  ;;  %10831 = vst.msk [vmem:[%s17069_s17 + $0xb8] sm:$0xf] %vm10784_vm7, %v12274_v27  ;;  %v12272_v48 = vpack.c.bf16 %v10508_v35, %v10508_v35  ;;  %v10511_v63 = vmax.f32 %v10447_v25, 0.0  ;;  %v9181_v53 = vadd.f32 %v13182_v37, %v9117_v33  ;;  %v13254_v2 = vpop.f32.mrf.mxu0  ;;  %v9122_v35 = vld [vmem:[#allocation2 + $0x1d8] sm:$0xff] }
 0x358   : > { %v10445_v58 = vadd.f32 %v17265_v1, %v10374_v47  ;;  %v10249_v45 = vadd.f32 %v10185_v11, %v10074_v57  ;;  %v10188_v43 = vld [vmem:[#allocation2 + $0x198] sm:$0xff]  ;;  %v9016_v16 = vpop.f32.mrf.mxu1  ;;  %v9120_v11 = vld [vmem:[#allocation2 + $0x1c8] sm:$0xff] }
 0x359   : > { %10829 = vst.msk [vmem:[%s17069_s17 + $0xb0] sm:$0xf] %vm10784_vm7, %v12272_v48  ;;  %v12275_v9 = vpack.c.bf16 %v10511_v63, %v10511_v63  ;;  %v10252_v44 = vadd.f32 %v13251_v62, %v10188_v43  ;;  %v9179_v59 = vadd.f32 %v9115_v38, %v9016_v16  ;;  %v10186_v26 = vld [vmem:[#allocation2 + $0x188] sm:$0xff]  ;;  %v10090_v36 = vpop.f32.mrf.mxu0  ;;  %v9119_v62 = vld [vmem:[#allocation2 + $0x1c0] sm:$0xff] }
 0x35a   : > { %v10509_v39 = vmax.f32 %v10445_v58, 0.0  ;;  %10313 = vst.msk [vmem:[#allocation2 + $0x180] sm:$0xff] %vm511_vm0, %v10249_v45  ;;  %9245 = vst.msk [vmem:[#allocation2 + $0x1b0] sm:$0xff] %vm511_vm0, %v9181_v53  ;;  %v10250_v30 = vadd.f32 %v10186_v26, %v10077_v52  ;;  %v13183_v51 = vpop.f32.mrf.mxu1 }
 0x35b   : > { %10832 = vst.msk [vmem:[%s17069_s17 + $0xbc] sm:$0xf] %vm10784_vm7, %v12275_v9  ;;  %v9182_v32 = vadd.f32 %v13183_v51, %v9118_v21  ;;  %v13255_v14 = vpop.f32.mrf.mxu0 }
 0x35c   : > { %v12273_v50 = vpack.c.bf16 %v10509_v39, %v10509_v39  ;;  %10316 = vst.msk [vmem:[#allocation2 + $0x198] sm:$0xff] %vm511_vm0, %v10252_v44  ;;  %9243 = vst.msk [vmem:[#allocation2 + $0x1a0] sm:$0xff] %vm511_vm0, %v9179_v59  ;;  %v9019_v6 = vpop.f32.mrf.mxu1 }
 0x35d   : > { %10314 = vst.msk [vmem:[#allocation2 + $0x188] sm:$0xff] %vm511_vm0, %v10250_v30  ;;  %v10379_v12 = vld [vmem:[#allocation2 + $0x190] sm:$0xff]  ;;  %9246 = vst.msk [vmem:[#allocation2 + $0x1b8] sm:$0xff] %vm511_vm0, %v9182_v32  ;;  %v9180_v10 = vadd.f32 %v9116_v19, %v9019_v6  ;;  %v10093_v42 = vpop.f32.mrf.mxu0 }
 0x35e   : > { %10830 = vst.msk [vmem:[%s17069_s17 + $0xb4] sm:$0xf] %vm10784_vm7, %v12273_v50  ;;  %v10450_v60 = vadd.f32 %v17265_v1, %v10379_v12 }
 0x35f   : > { %9244 = vst.msk [vmem:[#allocation2 + $0x1a8] sm:$0xff] %vm511_vm0, %v9180_v10 }
 0x360   : > { %v10514_v7 = vmax.f32 %v10450_v60, 0.0 }
 0x361   : > { %v10377_v0 = vld [vmem:[#allocation2 + $0x180] sm:$0xff]  ;;  %v10191_v31 = vld [vmem:[#allocation2 + $0x1b0] sm:$0xff] }
 0x362   : > { %v10448_v22 = vadd.f32 %v17265_v1, %v10377_v0  ;;  %v10255_v5 = vadd.f32 %v13254_v2, %v10191_v31  ;;  %v12278_v54 = vpack.c.bf16 %v10514_v7, %v10514_v7  ;;  %v9123_v7 = vld [vmem:[#allocation2 + $0x1e0] sm:$0xff] }
 0x363   : > { %v10380_v24 = vld [vmem:[#allocation2 + $0x198] sm:$0xff]  ;;  %v10189_v3 = vld [vmem:[#allocation2 + $0x1a0] sm:$0xff]  ;;  %v13186_v46 = vpop.f32.mrf.mxu1 }
 0x364   : > { %v10512_v15 = vmax.f32 %v10448_v22, 0.0  ;;  %v10451_v56 = vadd.f32 %v17265_v1, %v10380_v24  ;;  %v10378_v61 = vld [vmem:[#allocation2 + $0x188] sm:$0xff]  ;;  %10319 = vst.msk [vmem:[#allocation2 + $0x1b0] sm:$0xff] %vm511_vm0, %v10255_v5  ;;  %v10253_v20 = vadd.f32 %v10189_v3, %v10090_v36  ;;  %v9185_v29 = vadd.f32 %v13186_v46, %v9121_v4  ;;  %v10192_v18 = vld [vmem:[#allocation2 + $0x1b8] sm:$0xff]  ;;  %v9125_v36 = vld [vmem:[#allocation2 + $0x1f0] sm:$0xff] }
 0x365   : > { %10835 = vst.msk [vmem:[%s17069_s17 + $0xc8] sm:$0xf] %vm10784_vm7, %v12278_v54  ;;  %v10449_v41 = vadd.f32 %v17265_v1, %v10378_v61  ;;  %v10256_v40 = vadd.f32 %v13255_v14, %v10192_v18  ;;  %v9032_v23 = vpop.f32.mrf.mxu1  ;;  %v9124_v46 = vld [vmem:[#allocation2 + $0x1e8] sm:$0xff] }
 0x366   : > { %v12276_v17 = vpack.c.bf16 %v10512_v15, %v10512_v15  ;;  %v10515_v57 = vmax.f32 %v10451_v56, 0.0  ;;  %10317 = vst.msk [vmem:[#allocation2 + $0x1a0] sm:$0xff] %vm511_vm0, %v10253_v20  ;;  %9249 = vst.msk [vmem:[#allocation2 + $0x1d0] sm:$0xff] %vm511_vm0, %v9185_v29  ;;  %v9183_v13 = vadd.f32 %v9119_v62, %v9032_v23  ;;  %v10190_v34 = vld [vmem:[#allocation2 + $0x1a8] sm:$0xff]  ;;  %v13258_v25 = vpop.f32.mrf.mxu0  ;;  %v9126_v15 = vld [vmem:[#allocation2 + $0x1f8] sm:$0xff] }
 0x367   : > { %v10513_v8 = vmax.f32 %v10449_v41, 0.0  ;;  %10320 = vst.msk [vmem:[#allocation2 + $0x1b8] sm:$0xff] %vm511_vm0, %v10256_v40  ;;  %v10254_v55 = vadd.f32 %v10190_v34, %v10093_v42  ;;  %v13187_v27 = vpop.f32.mrf.mxu1 }
 0x368   : > { %10833 = vst.msk [vmem:[%s17069_s17 + $0xc0] sm:$0xf] %vm10784_vm7, %v12276_v17  ;;  %v12279_v49 = vpack.c.bf16 %v10515_v57, %v10515_v57  ;;  %v9186_v52 = vadd.f32 %v13187_v27, %v9122_v35  ;;  %v10106_v48 = vpop.f32.mrf.mxu0 }
 0x369   : > { %v12277_v28 = vpack.c.bf16 %v10513_v8, %v10513_v8  ;;  %9247 = vst.msk [vmem:[#allocation2 + $0x1c0] sm:$0xff] %vm511_vm0, %v9183_v13  ;;  %10318 = vst.msk [vmem:[#allocation2 + $0x1a8] sm:$0xff] %vm511_vm0, %v10254_v55  ;;  %v9035_v47 = vpop.f32.mrf.mxu1 }
 0x36a   : > { %10836 = vst.msk [vmem:[%s17069_s17 + $0xcc] sm:$0xf] %vm10784_vm7, %v12279_v49  ;;  %v9184_v58 = vadd.f32 %v9120_v11, %v9035_v47  ;;  %v13259_v9 = vpop.f32.mrf.mxu0 }
 0x36b   : > { %10834 = vst.msk [vmem:[%s17069_s17 + $0xc4] sm:$0xf] %vm10784_vm7, %v12277_v28  ;;  %v10383_v63 = vld [vmem:[#allocation2 + $0x1b0] sm:$0xff] }
 0x36c   : > { %9250 = vst.msk [vmem:[#allocation2 + $0x1d8] sm:$0xff] %vm511_vm0, %v9186_v52  ;;  %v10454_v45 = vadd.f32 %v17265_v1, %v10383_v63  ;;  %9248 = vst.msk [vmem:[#allocation2 + $0x1c8] sm:$0xff] %vm511_vm0, %v9184_v58  ;;  %v10109_v19 = vpop.f32.mrf.mxu0 }
 0x36d   : > { %v10381_v37 = vld [vmem:[#allocation2 + $0x1a0] sm:$0xff]  ;;  %v10195_v43 = vld [vmem:[#allocation2 + $0x1d0] sm:$0xff] }
 0x36e   : > { %v10518_v33 = vmax.f32 %v10454_v45, 0.0  ;;  %v10452_v53 = vadd.f32 %v17265_v1, %v10381_v37  ;;  %v10384_v39 = vld [vmem:[#allocation2 + $0x1b8] sm:$0xff]  ;;  %v10259_v44 = vadd.f32 %v13258_v25, %v10195_v43 }
 0x36f   : > { %v10455_v2 = vadd.f32 %v17265_v1, %v10384_v39 }
 0x370   : > { %v12282_v16 = vpack.c.bf16 %v10518_v33, %v10518_v33  ;;  %v10516_v38 = vmax.f32 %v10452_v53, 0.0  ;;  %v10193_v59 = vld [vmem:[#allocation2 + $0x1c0] sm:$0xff]  ;;  %v10382_v26 = vld [vmem:[#allocation2 + $0x1a8] sm:$0xff]  ;;  %10323 = vst.msk [vmem:[#allocation2 + $0x1d0] sm:$0xff] %vm511_vm0, %v10259_v44 }
 0x371   : > { %v10257_v50 = vadd.f32 %v10193_v59, %v10106_v48  ;;  %v10519_v51 = vmax.f32 %v10455_v2, 0.0  ;;  %v10453_v21 = vadd.f32 %v17265_v1, %v10382_v26  ;;  %v13190_v32 = vpop.f32.mrf.mxu1 }
 0x372   : > { %10839 = vst.msk [vmem:[%s17069_s17 + $0xd8] sm:$0xf] %vm10784_vm7, %v12282_v16  ;;  %v12280_v30 = vpack.c.bf16 %v10516_v38, %v10516_v38  ;;  %v9189_v12 = vadd.f32 %v13190_v32, %v9125_v36 }
 0x373   : > { %v10196_v6 = vld [vmem:[#allocation2 + $0x1d8] sm:$0xff]  ;;  %10321 = vst.msk [vmem:[#allocation2 + $0x1c0] sm:$0xff] %vm511_vm0, %v10257_v50  ;;  %v12283_v60 = vpack.c.bf16 %v10519_v51, %v10519_v51  ;;  %v10517_v0 = vmax.f32 %v10453_v21, 0.0  ;;  %v9048_v14 = vpop.f32.mrf.mxu1  ;;  %v10194_v22 = vld [vmem:[#allocation2 + $0x1c8] sm:$0xff]  ;;  %v13262_v56 = vpop.f32.mrf.mxu0 }
 0x374   : > { %v10260_v10 = vadd.f32 %v13259_v9, %v10196_v6  ;;  %10837 = vst.msk [vmem:[%s17069_s17 + $0xd0] sm:$0xf] %vm10784_vm7, %v12280_v30  ;;  %v9187_v31 = vadd.f32 %v9123_v7, %v9048_v14  ;;  %v10258_v24 = vadd.f32 %v10194_v22, %v10109_v19 }
 0x375   : > { %9253 = vst.msk [vmem:[#allocation2 + $0x1f0] sm:$0xff] %vm511_vm0, %v9189_v12  ;;  %v12281_v5 = vpack.c.bf16 %v10517_v0, %v10517_v0  ;;  %v13191_v54 = vpop.f32.mrf.mxu1  ;;  %v10122_v57 = vpop.f32.mrf.mxu0 }
 0x376   : > { %10324 = vst.msk [vmem:[#allocation2 + $0x1d8] sm:$0xff] %vm511_vm0, %v10260_v10  ;;  %9251 = vst.msk [vmem:[#allocation2 + $0x1e0] sm:$0xff] %vm511_vm0, %v9187_v31  ;;  %v9190_v3 = vadd.f32 %v13191_v54, %v9126_v15 }
 0x377   : > { %10840 = vst.msk [vmem:[%s17069_s17 + $0xdc] sm:$0xf] %vm10784_vm7, %v12283_v60  ;;  %10838 = vst.msk [vmem:[%s17069_s17 + $0xd4] sm:$0xf] %vm10784_vm7, %v12281_v5  ;;  %v10387_v61 = vld [vmem:[#allocation2 + $0x1d0] sm:$0xff]  ;;  %v9051_v20 = vpop.f32.mrf.mxu1  ;;  %v13263_v55 = vpop.f32.mrf.mxu0 }
 0x378   : > { %10322 = vst.msk [vmem:[#allocation2 + $0x1c8] sm:$0xff] %vm511_vm0, %v10258_v24  ;;  %v10458_v4 = vadd.f32 %v17265_v1, %v10387_v61  ;;  %9254 = vst.msk [vmem:[#allocation2 + $0x1f8] sm:$0xff] %vm511_vm0, %v9190_v3  ;;  %v9188_v42 = vadd.f32 %v9124_v46, %v9051_v20 }
 0x379   : > { %v10125_v63 = vpop.f32.mrf.mxu0 }
 0x37a   : > { %v10385_v17 = vld [vmem:[#allocation2 + $0x1c0] sm:$0xff]  ;;  %v10522_v41 = vmax.f32 %v10458_v4, 0.0  ;;  %9252 = vst.msk [vmem:[#allocation2 + $0x1e8] sm:$0xff] %vm511_vm0, %v9188_v42 }
 0x37b   : > { %v10456_v29 = vadd.f32 %v17265_v1, %v10385_v17 }
 0x37c   : > { %v10199_v40 = vld [vmem:[#allocation2 + $0x1f0] sm:$0xff]  ;;  %v12286_v23 = vpack.c.bf16 %v10522_v41, %v10522_v41 }
 0x37d   : > { %v10388_v18 = vld [vmem:[#allocation2 + $0x1d8] sm:$0xff]  ;;  %v10520_v62 = vmax.f32 %v10456_v29, 0.0  ;;  %v10263_v8 = vadd.f32 %v13262_v56, %v10199_v40  ;;  %v10197_v34 = vld [vmem:[#allocation2 + $0x1e0] sm:$0xff] }
 0x37e   : > { %v10459_v49 = vadd.f32 %v17265_v1, %v10388_v18  ;;  %10843 = vst.msk [vmem:[%s17069_s17 + $0xe8] sm:$0xf] %vm10784_vm7, %v12286_v23  ;;  %v10261_v28 = vadd.f32 %v10197_v34, %v10122_v57 }
 0x37f   : > { %v10386_v13 = vld [vmem:[#allocation2 + $0x1c8] sm:$0xff]  ;;  %v12284_v27 = vpack.c.bf16 %v10520_v62, %v10520_v62  ;;  %10327 = vst.msk [vmem:[#allocation2 + $0x1f0] sm:$0xff] %vm511_vm0, %v10263_v8  ;;  %v10200_v52 = vld [vmem:[#allocation2 + $0x1f8] sm:$0xff] }
 0x380   : > { %v10523_v35 = vmax.f32 %v10459_v49, 0.0  ;;  %v10457_v25 = vadd.f32 %v17265_v1, %v10386_v13  ;;  %10325 = vst.msk [vmem:[#allocation2 + $0x1e0] sm:$0xff] %vm511_vm0, %v10261_v28  ;;  %v10264_v48 = vadd.f32 %v13263_v55, %v10200_v52 }
 0x381   : > { %10841 = vst.msk [vmem:[%s17069_s17 + $0xe0] sm:$0xf] %vm10784_vm7, %v12284_v27  ;;  %v10198_v58 = vld [vmem:[#allocation2 + $0x1e8] sm:$0xff] }
 0x382   : > { %v12287_v47 = vpack.c.bf16 %v10523_v35, %v10523_v35  ;;  %v10521_v11 = vmax.f32 %v10457_v25, 0.0  ;;  %10328 = vst.msk [vmem:[#allocation2 + $0x1f8] sm:$0xff] %vm511_vm0, %v10264_v48  ;;  %v10262_v37 = vadd.f32 %v10198_v58, %v10125_v63 }
 0x384   : > { %10844 = vst.msk [vmem:[%s17069_s17 + $0xec] sm:$0xf] %vm10784_vm7, %v12287_v47  ;;  %v12285_v45 = vpack.c.bf16 %v10521_v11, %v10521_v11 }
 0x385   : > { %10326 = vst.msk [vmem:[#allocation2 + $0x1e8] sm:$0xff] %vm511_vm0, %v10262_v37 }
 0x386   : > { %10842 = vst.msk [vmem:[%s17069_s17 + $0xe4] sm:$0xf] %vm10784_vm7, %v12285_v45  ;;  %v10391_v33 = vld [vmem:[#allocation2 + $0x1f0] sm:$0xff] }
 0x387   : > { %v10462_v53 = vadd.f32 %v17265_v1, %v10391_v33  ;;  %v10389_v43 = vld [vmem:[#allocation2 + $0x1e0] sm:$0xff] }
 0x388   : > { %v10460_v39 = vadd.f32 %v17265_v1, %v10389_v43 }
 0x389   : > { %v10526_v9 = vmax.f32 %v10462_v53, 0.0  ;;  %v10392_v44 = vld [vmem:[#allocation2 + $0x1f8] sm:$0xff] }
 0x38a   : > { %v10524_v38 = vmax.f32 %v10460_v39, 0.0  ;;  %v10463_v2 = vadd.f32 %v17265_v1, %v10392_v44 }
 0x38b   : > { %v12290_v16 = vpack.c.bf16 %v10526_v9, %v10526_v9 }
 0x38c   : > { %v10390_v59 = vld [vmem:[#allocation2 + $0x1e8] sm:$0xff]  ;;  %v12288_v26 = vpack.c.bf16 %v10524_v38, %v10524_v38  ;;  %v10527_v50 = vmax.f32 %v10463_v2, 0.0 }
 0x38d   : > { %10847 = vst.msk [vmem:[%s17069_s17 + $0xf8] sm:$0xf] %vm10784_vm7, %v12290_v16  ;;  %v10461_v30 = vadd.f32 %v17265_v1, %v10390_v59 }
 0x38e   : > { %10845 = vst.msk [vmem:[%s17069_s17 + $0xf0] sm:$0xf] %vm10784_vm7, %v12288_v26  ;;  %v12291_v51 = vpack.c.bf16 %v10527_v50, %v10527_v50 }
 0x38f   : > { %v10525_v21 = vmax.f32 %v10461_v30, 0.0 }
 0x390   : > { %10848 = vst.msk [vmem:[%s17069_s17 + $0xfc] sm:$0xf] %vm10784_vm7, %v12291_v51 }
 0x391   : > { %v12289_v32 = vpack.c.bf16 %v10525_v21, %v10525_v21 }
 0x393   : > { %10846 = vst.msk [vmem:[%s17069_s17 + $0xf4] sm:$0xf] %vm10784_vm7, %v12289_v32 }
 0x394 PF: > { %s13_s14 = sadd.s32 1, %s13456_s14   ;;  %s17405_s12 = smov %s13452_s13 }
 0x395   : > { %p10_p6 = scmp.ge.s32.totalorder %s13_s14, 4   ;;  %s17406_s13 = smov %s17408_s15 }
 0x397   :  { %12 = sbr.rel (!%p10_p6) target bundleno = 2 (0x2), region = 78 }

</bundles_post_ra>
